<compile_context>
chip_gen: v5e
topology: v5e:2x2
jax: 0.10.0
libtpu: 0.0.40
codegen_flags: <defaults>
</compile_context>

<pallas_src>
import numpy as np
import jax
import jax.numpy as jnp
from jax.experimental import pallas as pl
from jax.experimental.pallas import tpu as pltpu


# ---------------------------------------------------------------------------
# static model configuration (mirrors the PyTorch module)
# ---------------------------------------------------------------------------
CH = 32            # pretrain conv channels
KSZ = 5            # conv kernel size (stride 2, padding 2)
FC1_DIM = 32       # pretrain fc1 width
LABEL_NUM = 18     # pretrain output width (used as the cnn feature size, see TODO)
GNN_HIDDEN = 16    # gnn_feature_size
GNN_LAYERS = 2
LEAKY_ADJ = 0.01   # nn.LeakyReLU() default inside Adj_layer
LEAKY_GCONV = 0.1  # F.leaky_relu(x_next, 0.1)


def _round_up(n, m):
    return ((n + m - 1) // m) * m


def _conv_out_len(l):
    return (l + 2 * 2 - KSZ) // 2 + 1


def _cnn_lens(l):
    l1 = _conv_out_len(l)
    l2 = _conv_out_len(l1)
    l3 = _conv_out_len(l2)
    return l1, l2, l3


def _cnn_s_offsets(l):
    """8-aligned sublane offsets of the three selection matrices in the slab."""
    l1, l2, _ = _cnn_lens(l)
    o1 = 0
    o2 = _round_up(o1 + KSZ * l1, 8)
    o3 = _round_up(o2 + KSZ * l2, 8)
    return o1, o2, o3


_CNN_W_OFFS = (0, 8, 8 + CH)   # 8-aligned sublane offsets of W1/W2/W3 in the slab


def _selection_matrix(l_in):
    """S[t*lout + o, idx] = 1 with idx = 2*o + t - 2 (zero rows == zero padding).

    Expresses the k=5 / stride=2 / pad=2 Conv1d patch gather ("im2col") as one
    small matmul that runs inside the kernel, so no patch tensor hits HBM.
    """
    lout = _conv_out_len(l_in)
    s = np.zeros((KSZ * lout, l_in), np.float32)
    for t in range(KSZ):
        for o in range(lout):
            idx = 2 * o + t - 2
            if 0 <= idx < l_in:
                s[t * lout + o, idx] = 1.0
    return s


# ---------------------------------------------------------------------------
# kernel 1: whole pretrain CNN (conv1..3 + fc1 + fc2, BN folded), grid=(B,)
# ---------------------------------------------------------------------------
def _cnn_kernel(x_ref, s_ref, cw_ref, cb_ref, wf1_ref, wf2_ref, o_ref):
    """x_ref   : (1, V, L, 1)    length-major samples of one batch element
       s_ref   : (S_rows, L)     packed selection ("im2col") matrices (3 convs)
       cw_ref  : (5, 72, CH)     packed conv weights [tap, cin-slab, cout]
       cb_ref  : (5, CH)         packed biases: conv1..3, fc1, fc2
       wf1_ref : (L3, CH, FC1)   fc1 weight, pre-permuted so PyTorch's
                                 channel-major Flatten needs no in-kernel transpose
       wf2_ref : (FC1, FEAT)
       o_ref   : (1, V, FEAT)    pretrain features (only HBM write of this kernel)
    """
    v_count = x_ref.shape[1]
    l_in = x_ref.shape[2]
    l1, l2, l3 = _cnn_lens(l_in)
    o1, o2, o3 = _cnn_s_offsets(l_in)
    feat = o_ref.shape[2]

    # weights are shared by the V samples of this grid step -> hoist out of the loop
    w1 = cw_ref[:, _CNN_W_OFFS[0]:_CNN_W_OFFS[0] + 1, :]     # (5, 1, CH)
    w2 = cw_ref[:, _CNN_W_OFFS[1]:_CNN_W_OFFS[1] + CH, :]    # (5, CH, CH)
    w3 = cw_ref[:, _CNN_W_OFFS[2]:_CNN_W_OFFS[2] + CH, :]    # (5, CH, CH)
    b1 = cb_ref[0:1, :]
    b2 = cb_ref[1:2, :]
    b3 = cb_ref[2:3, :]
    bf1 = cb_ref[3:4, :]
    bf2 = cb_ref[4:5, 0:feat]
    wf2 = wf2_ref[...]

    def conv(sx, w, b, lout):
        """Conv1d(+folded BN +ReLU) from pre-gathered taps sx = (5*lout, cin)."""
        y = jnp.zeros((lout, w.shape[2]), jnp.float32) + b
        for t in range(KSZ):
            sx_t = sx[t * lout:(t + 1) * lout, :]
            if w.shape[1] == 1:          # conv1: cin == 1 -> outer product on the VPU
                y = y + sx_t * w[t]
            else:
                y = y + jnp.dot(sx_t, w[t], preferred_element_type=jnp.float32)
        return jnp.maximum(y, 0.0)

    for v in range(v_count):
        x0 = x_ref[0, v]                                                    # (L, 1)
        h = conv(jnp.dot(s_ref[o1:o1 + KSZ * l1, 0:l_in], x0,
                         preferred_element_type=jnp.float32), w1, b1, l1)   # (60, CH)
        h = conv(jnp.dot(s_ref[o2:o2 + KSZ * l2, 0:l1], h,
                         preferred_element_type=jnp.float32), w2, b2, l2)   # (30, CH)
        h = conv(jnp.dot(s_ref[o3:o3 + KSZ * l3, 0:l2], h,
                         preferred_element_type=jnp.float32), w3, b3, l3)   # (15, CH)
        # fc1 (+folded BN +ReLU): the channel-major Flatten is absorbed into the
        # pre-permuted WF1 slab, so no in-kernel transpose/reshape is needed.
        acc = bf1
        for l in range(l3):
            acc = acc + jnp.dot(h[l:l + 1, :], wf1_ref[l],
                                preferred_element_type=jnp.float32)
        acc = jnp.maximum(acc, 0.0)
        feats = jnp.dot(acc, wf2, preferred_element_type=jnp.float32) + bf2  # (1, 18)
        o_ref[0, v:v + 1, :] = feats


def cnn_forward(p, x):
    """x: (B, V, L, 1) -> pretrain features (B, V, LABEL_NUM) in one fused kernel."""
    b, v, l_in, _ = x.shape
    feat = p["WF2"].shape[1]
    return pl.pallas_call(
        _cnn_kernel,
        out_shape=jax.ShapeDtypeStruct((b, v, feat), jnp.float32),
        grid=(b,),
        in_specs=[
            pl.BlockSpec((1, v, l_in, 1), lambda i: (i, 0, 0, 0)),
            pl.BlockSpec(p["S"].shape, lambda i: (0, 0)),
            pl.BlockSpec(p["CW"].shape, lambda i: (0, 0, 0)),
            pl.BlockSpec(p["CB"].shape, lambda i: (0, 0)),
            pl.BlockSpec(p["WF1"].shape, lambda i: (0, 0, 0)),
            pl.BlockSpec(p["WF2"].shape, lambda i: (0, 0)),
        ],
        out_specs=pl.BlockSpec((1, v, feat), lambda i: (i, 0, 0)),
        compiler_params=pltpu.CompilerParams(dimension_semantics=("parallel",)),
    )(x, p["S"], p["CW"], p["CB"], p["WF1"], p["WF2"])


# ---------------------------------------------------------------------------
# kernel 2: whole GNN stack (2 dense layers + last layer + log-softmax), grid=(B,)
# ---------------------------------------------------------------------------
def _gnn_kernel(nodes_ref, gjj_ref, gt_ref, w1g_ref, c2w_ref, c3w_ref, b_ref,
                logp_ref, a_ref, x_sc):
    """nodes_ref: (1, V, D0)          CNN features ++ label one-hots
       gjj_ref  : (V*V, 2V)           [:, :V] = G - J pair-difference map, [:, V:] = J
       gt_ref   : (V, V*V)            flat->matrix scatter for the row softmax
       w1g_ref  : (NL+1, Dmax, 40)    Adj c1 weight ++ Gconv weight (zero padded rows)
       c2w_ref  : (NL+1, 32, 16)      Adj c2 weights
       c3w_ref  : (NL+1, 16, 1)       Adj c3 weights
       b_ref    : (NL+1, 64)          packed biases [c1 | c2 | gconv | c3]
       logp_ref : (1, 1, nway)        log_softmax(out[:, 0, :])
       a_ref    : (1, V, V)           last adjacency
       x_sc     : (V, Dmax) VMEM      growing node features (torch.cat done in VMEM)
    """
    V = nodes_ref.shape[1]
    din0 = nodes_ref.shape[2]
    num_layers = c2w_ref.shape[0] - 1
    nway = logp_ref.shape[2]
    c1out = c2w_ref.shape[1]
    c2out = c2w_ref.shape[2]
    gout = w1g_ref.shape[2] - c1out
    gb_off = c1out + c2out
    c3b_off = gb_off + gout

    gj = gjj_ref[:, 0:V]        # (V*V, V)  rows  e_{r//V} - e_{r%V}
    jm = gjj_ref[:, V:2 * V]    # (V*V, V)  one-hot key index
    gt = gt_ref[...]            # (V, V*V)

    # per-step (re)initialisation of the growing node-feature scratch
    x_sc[...] = jnp.zeros(x_sc.shape, jnp.float32)
    x_sc[:, 0:din0] = nodes_ref[0]

    def adjacency(x, l):
        """Adj_layer: phi=|x_i-x_j| -> 1x1-conv MLP (BN folded) -> per-row softmax."""
        phi = jnp.abs(jnp.dot(gj, x, preferred_element_type=jnp.float32))     # (V*V, D)
        h = jnp.dot(phi, w1g_ref[l, :, 0:c1out],
                    preferred_element_type=jnp.float32) + b_ref[l:l + 1, 0:c1out]
        h = jnp.where(h >= 0, h, h * LEAKY_ADJ)
        h = jnp.dot(h, c2w_ref[l],
                    preferred_element_type=jnp.float32) + b_ref[l:l + 1, c1out:gb_off]
        h = jnp.where(h >= 0, h, h * LEAKY_ADJ)
        s = jnp.dot(h, c3w_ref[l],
                    preferred_element_type=jnp.float32) + b_ref[l:l + 1, c3b_off:c3b_off + 1]
        # scatter flat (V*V, 1) scores into a (V, V) matrix, softmax each row
        smat = jnp.dot(gt, s * jm, preferred_element_type=jnp.float32)        # (V, V)
        m = jnp.max(smat, axis=-1, keepdims=True)
        e = jnp.exp(smat - m)
        return e / jnp.sum(e, axis=-1, keepdims=True)

    for l in range(num_layers):
        x = x_sc[...]                                                         # (V, Dmax)
        adj = adjacency(x, l)
        xa = jnp.dot(adj, x, preferred_element_type=jnp.float32)
        y = jnp.dot(xa, w1g_ref[l, :, c1out:c1out + gout],
                    preferred_element_type=jnp.float32) + b_ref[l:l + 1, gb_off:gb_off + gout]
        y = jnp.where(y >= 0, y, y * LEAKY_GCONV)
        x_sc[:, din0 + l * gout:din0 + (l + 1) * gout] = y        # torch.cat in VMEM

    # last layer: only out[:, 0, :] is consumed downstream -> compute just that
    # row, and fold the final log_softmax of the logits in here as well.
    x = x_sc[...]
    adj = adjacency(x, num_layers)
    a_ref[0] = adj
    xa0 = jnp.dot(adj[0:1, :], x, preferred_element_type=jnp.float32)         # (1, Dmax)
    y0 = jnp.dot(xa0, w1g_ref[num_layers, :, c1out:c1out + gout],
                 preferred_element_type=jnp.float32)
    y0 = y0 + b_ref[num_layers:num_layers + 1, gb_off:gb_off + gout]
    logits = y0[:, 0:nway]
    m = jnp.max(logits, axis=-1, keepdims=True)
    lse = jnp.log(jnp.sum(jnp.exp(logits - m), axis=-1, keepdims=True))
    logp_ref[0] = logits - m - lse


def gnn_forward(p, nodes, nway):
    """nodes: (B, V, D0) -> (log-probs (B, nway), adjacency (B, V, V)), one kernel."""
    b, v, din0 = nodes.shape
    dmax = p["W1G"].shape[1]
    logp, a = pl.pallas_call(
        _gnn_kernel,
        out_shape=(jax.ShapeDtypeStruct((b, 1, nway), jnp.float32),
                   jax.ShapeDtypeStruct((b, v, v), jnp.float32)),
        grid=(b,),
        in_specs=[
            pl.BlockSpec((1, v, din0), lambda i: (i, 0, 0)),
            pl.BlockSpec(p["GJJ"].shape, lambda i: (0, 0)),
            pl.BlockSpec(p["GT"].shape, lambda i: (0, 0)),
            pl.BlockSpec(p["W1G"].shape, lambda i: (0, 0, 0)),
            pl.BlockSpec(p["C2W"].shape, lambda i: (0, 0, 0)),
            pl.BlockSpec(p["C3W"].shape, lambda i: (0, 0, 0)),
            pl.BlockSpec(p["BIAS"].shape, lambda i: (0, 0)),
        ],
        out_specs=(pl.BlockSpec((1, 1, nway), lambda i: (i, 0, 0)),
                   pl.BlockSpec((1, v, v), lambda i: (i, 0, 0))),
        scratch_shapes=[pltpu.VMEM((v, dmax), jnp.float32)],
        compiler_params=pltpu.CompilerParams(dimension_semantics=("parallel",)),
    )(nodes, p["GJJ"], p["GT"], p["W1G"], p["C2W"], p["C3W"], p["BIAS"])
    return logp[:, 0, :], a


# ---------------------------------------------------------------------------
# deterministic parameter construction (BatchNorm folded at init, eval mode)
# ---------------------------------------------------------------------------
def _init_linear(key, din, dout):
    k1, k2 = jax.random.split(key)
    std = 1.0 / np.sqrt(din)
    w = jax.random.uniform(k1, (din, dout), jnp.float32, -std, std)
    b = jax.random.uniform(k2, (dout,), jnp.float32, -std, std)
    return w, b


def _init_bn_affine(key, c, eps=1e-5):
    k1, k2, k3, k4 = jax.random.split(key, 4)
    gamma = 1.0 + 0.1 * jax.random.normal(k1, (c,), jnp.float32)
    beta = 0.1 * jax.random.normal(k2, (c,), jnp.float32)
    running_mean = 0.1 * jax.random.normal(k3, (c,), jnp.float32)
    running_var = jax.random.uniform(k4, (c,), jnp.float32, 0.5, 1.5)
    scale = gamma / jnp.sqrt(running_var + eps)
    shift = beta - running_mean * scale
    return scale, shift


def _linear_bn(key, din, dout):
    k1, k2 = jax.random.split(key)
    w, b = _init_linear(k1, din, dout)
    scale, shift = _init_bn_affine(k2, dout)
    return w * scale[None, :], b * scale + shift


def init_params(key, nway, v_nodes, seq_len=120, label_num=LABEL_NUM,
                gnn_feat=GNN_HIDDEN, num_layers=GNN_LAYERS):
    keys = iter(jax.random.split(key, 64))
    l1, l2, l3 = _cnn_lens(seq_len)
    o1, o2, o3 = _cnn_s_offsets(seq_len)

    # --- pretrain CNN: selection-matrix slab + packed conv/fc weights (BN folded) ---
    s_rows = _round_up(o3 + KSZ * l3, 8)
    s_np = np.zeros((s_rows, seq_len), np.float32)
    s_np[o1:o1 + KSZ * l1, 0:seq_len] = _selection_matrix(seq_len)
    s_np[o2:o2 + KSZ * l2, 0:l1] = _selection_matrix(l1)
    s_np[o3:o3 + KSZ * l3, 0:l2] = _selection_matrix(l2)

    def conv_bn(k, cin):
        w, b = _linear_bn(k, KSZ * cin, CH)
        return w.reshape(KSZ, cin, CH), b

    w1, b1 = conv_bn(next(keys), 1)
    w2, b2 = conv_bn(next(keys), CH)
    w3, b3 = conv_bn(next(keys), CH)
    wf1, bf1 = _linear_bn(next(keys), CH * l3, FC1_DIM)
    wf2, bf2 = _init_linear(next(keys), FC1_DIM, label_num)

    cw = jnp.zeros((KSZ, _CNN_W_OFFS[2] + CH, CH), jnp.float32)
    cw = cw.at[:, _CNN_W_OFFS[0]:_CNN_W_OFFS[0] + 1, :].set(w1)
    cw = cw.at[:, _CNN_W_OFFS[1]:_CNN_W_OFFS[1] + CH, :].set(w2)
    cw = cw.at[:, _CNN_W_OFFS[2]:_CNN_W_OFFS[2] + CH, :].set(w3)

    cb = jnp.zeros((5, CH), jnp.float32)
    cb = cb.at[0].set(b1).at[1].set(b2).at[2].set(b3).at[3].set(bf1)
    cb = cb.at[4, 0:label_num].set(bf2)

    # fc1 weight permuted to (length, channel, out): PyTorch's channel-major
    # Flatten is absorbed here instead of transposing activations in the kernel.
    wf1_r = wf1.reshape(CH, l3, FC1_DIM).transpose(1, 0, 2)

    cnn = {"S": jnp.asarray(s_np), "CW": cw, "CB": cb, "WF1": wf1_r, "WF2": wf2}

    # --- GNN: per-layer weights packed into (num_layers+1, ...) slabs --------------
    # TODO(synk): the original code builds GNN with cnn_feature_size=32 while
    # `pretrain` emits label_num=18 features (would not compose as written); we
    # use the real pretrain output width (18) so the forward is runnable.
    num_inputs = label_num + nway
    hidden = gnn_feat
    hid2 = hidden // 2
    dins = [num_inputs + hid2 * i for i in range(num_layers + 1)]
    dmax = dins[-1]
    c1out, c2out = hidden * 2, hidden
    gb_off, c3b_off = c1out + c2out, c1out + c2out + hid2

    w1g = jnp.zeros((num_layers + 1, dmax, c1out + hid2), jnp.float32)
    c2w = jnp.zeros((num_layers + 1, c1out, c2out), jnp.float32)
    c3w = jnp.zeros((num_layers + 1, c2out, 1), jnp.float32)
    bias = jnp.zeros((num_layers + 1, 64), jnp.float32)
    for l in range(num_layers + 1):
        din = dins[l]
        cw1, cb1 = _linear_bn(next(keys), din, c1out)
        cw2, cb2 = _linear_bn(next(keys), c1out, c2out)
        cw3, cb3 = _init_linear(next(keys), c2out, 1)
        if l < num_layers:
            gw, gb = _linear_bn(next(keys), din, hid2)      # Gconv + BN
            gwid = hid2
        else:
            gw, gb = _init_linear(next(keys), din, nway)    # last Gconv, no BN
            gwid = nway
        w1g = w1g.at[l, :din, 0:c1out].set(cw1)
        w1g = w1g.at[l, :din, c1out:c1out + gwid].set(gw)
        c2w = c2w.at[l].set(cw2)
        c3w = c3w.at[l].set(cw3)
        bias = bias.at[l, 0:c1out].set(cb1)
        bias = bias.at[l, c1out:gb_off].set(cb2)
        bias = bias.at[l, gb_off:gb_off + gwid].set(gb)
        bias = bias.at[l, c3b_off].set(cb3[0])

    # pair-structure constants: G[r,i] = [r//V==i], J[r,j] = [r%V==j]
    r = np.arange(v_nodes * v_nodes)
    idx = np.arange(v_nodes)
    g_np = (r[:, None] // v_nodes == idx[None, :]).astype(np.float32)
    j_np = (r[:, None] % v_nodes == idx[None, :]).astype(np.float32)
    gnn = {"GJJ": jnp.asarray(np.concatenate([g_np - j_np, j_np], axis=1)),
           "GT": jnp.asarray(np.ascontiguousarray(g_np.T)),
           "W1G": w1g, "C2W": c2w, "C3W": c3w, "BIAS": bias}

    return {"cnn": cnn, "gnn": gnn}


# ---------------------------------------------------------------------------
# forward pass (thin JAX glue around the two fused Pallas kernels)
# ---------------------------------------------------------------------------
def gnn_model_forward(params, x, xi, one_hot_yi):
    """Reference `gnnModel.forward`: CNN features -> GNN -> (log-probs, adjacency)."""
    b, seq_len = x.shape[0], x.shape[-1]
    m = xi.shape[1]
    nway = one_hot_yi.shape[2]
    # stack query + support samples; C == 1 so NCW -> length-major is a pure relabel
    all_inp = jnp.concatenate([x[:, None], xi], axis=1).reshape(b, m + 1, seq_len, 1)
    feats = cnn_forward(params["cnn"], all_inp)                        # (B, V, 18)
    uniform_pad = jnp.full((b, 1, nway), 1.0 / nway, jnp.float32)
    labels = jnp.concatenate([uniform_pad, one_hot_yi.astype(jnp.float32)], axis=1)
    nodes = jnp.concatenate([feats, labels], axis=2)                   # (B, V, 18+nway)
    # log_softmax(out_logits) is folded into the fused GNN kernel.
    return gnn_forward(params["gnn"], nodes, nway)


# ---------------------------------------------------------------------------
# main
# ---------------------------------------------------------------------------
if __name__ == "__main__":
    key = jax.random.PRNGKey(0)
    nway, shot, B, L = 3, 1, 2, 120
    M = nway * shot                                  # support samples; V = M + 1
    V = M + 1
    k1, k2, k3, k4 = jax.random.split(key, 4)

    params = init_params(k1, nway, V, seq_len=L)
    x = jax.random.normal(k2, (B, 1, L), jnp.float32)
    xi = jax.random.normal(k3, (B, M, 1, L), jnp.float32)
    yi = jax.random.randint(k4, (B, M), 0, nway)
    one_hot_yi = jax.nn.one_hot(yi, nway, dtype=jnp.float32)

    fwd = jax.jit(gnn_model_forward)
    logp, A = fwd(params, x, xi, one_hot_yi)
    logp, A = jax.block_until_ready((logp, A))

    assert logp.shape == (B, nway), logp.shape
    assert A.shape == (B, V, V), A.shape
    assert bool(jnp.all(jnp.isfinite(logp))) and bool(jnp.all(jnp.isfinite(A)))
    # adjacency rows sum to 1 (softmax over dim 2); log-probs exponentiate to 1
    assert bool(jnp.allclose(jnp.sum(A, axis=2), 1.0, atol=1e-5))
    assert bool(jnp.allclose(jnp.sum(jnp.exp(logp), axis=1), 1.0, atol=1e-4))
    print("KERNEL_OK")
</pallas_src>

<mosaic_0001>
module attributes {stable_mosaic.version = 11 : i64} {
  func.func @_cnn_kernel(%arg0: i32, %arg1: memref<1x4x120x1xf32, #tpu.memory_space<vmem>>, %arg2: memref<536x120xf32, #tpu.memory_space<vmem>>, %arg3: memref<5x72x32xf32, #tpu.memory_space<vmem>>, %arg4: memref<5x32xf32, #tpu.memory_space<vmem>>, %arg5: memref<15x32x32xf32, #tpu.memory_space<vmem>>, %arg6: memref<32x18xf32, #tpu.memory_space<vmem>>, %arg7: memref<1x4x18xf32, #tpu.memory_space<vmem>>) attributes {dimension_semantics = [#tpu.dimension_semantics<parallel>], iteration_bounds = array<i64: 2>, scalar_prefetch = 0 : i64, scratch_operands = 0 : i64, tpu.core_type = #tpu.core_type<tc>, window_params = [{transform_indices = @transform_0, window_bounds = array<i64: 1, 4, 120, 1>}, {pipeline_mode = #tpu.pipeline_mode<synchronous>, transform_indices = @transform_1, window_bounds = array<i64: 536, 120>}, {pipeline_mode = #tpu.pipeline_mode<synchronous>, transform_indices = @transform_2, window_bounds = array<i64: 5, 72, 32>}, {pipeline_mode = #tpu.pipeline_mode<synchronous>, transform_indices = @transform_3, window_bounds = array<i64: 5, 32>}, {pipeline_mode = #tpu.pipeline_mode<synchronous>, transform_indices = @transform_4, window_bounds = array<i64: 15, 32, 32>}, {pipeline_mode = #tpu.pipeline_mode<synchronous>, transform_indices = @transform_5, window_bounds = array<i64: 32, 18>}, {transform_indices = @transform_6, window_bounds = array<i64: 1, 4, 18>}]} {
    %c0 = arith.constant 0 : index
    %c0_0 = arith.constant 0 : index
    %c0_1 = arith.constant 0 : index
    %0 = vector.load %arg3[%c0, %c0_0, %c0_1] : memref<5x72x32xf32, #tpu.memory_space<vmem>>, vector<5x1x32xf32>
    %c0_2 = arith.constant 0 : index
    %c8 = arith.constant 8 : index
    %c0_3 = arith.constant 0 : index
    %1 = vector.load %arg3[%c0_2, %c8, %c0_3] : memref<5x72x32xf32, #tpu.memory_space<vmem>>, vector<5x32x32xf32>
    %c0_4 = arith.constant 0 : index
    %c40 = arith.constant 40 : index
    %c0_5 = arith.constant 0 : index
    %2 = vector.load %arg3[%c0_4, %c40, %c0_5] : memref<5x72x32xf32, #tpu.memory_space<vmem>>, vector<5x32x32xf32>
    %c0_6 = arith.constant 0 : index
    %c0_7 = arith.constant 0 : index
    %3 = vector.load %arg4[%c0_6, %c0_7] : memref<5x32xf32, #tpu.memory_space<vmem>>, vector<1x32xf32>
    %c1 = arith.constant 1 : index
    %c0_8 = arith.constant 0 : index
    %4 = vector.load %arg4[%c1, %c0_8] : memref<5x32xf32, #tpu.memory_space<vmem>>, vector<1x32xf32>
    %c2 = arith.constant 2 : index
    %c0_9 = arith.constant 0 : index
    %5 = vector.load %arg4[%c2, %c0_9] : memref<5x32xf32, #tpu.memory_space<vmem>>, vector<1x32xf32>
    %c3 = arith.constant 3 : index
    %c0_10 = arith.constant 0 : index
    %6 = vector.load %arg4[%c3, %c0_10] : memref<5x32xf32, #tpu.memory_space<vmem>>, vector<1x32xf32>
    %c4 = arith.constant 4 : index
    %c0_11 = arith.constant 0 : index
    %7 = vector.load %arg4[%c4, %c0_11] : memref<5x32xf32, #tpu.memory_space<vmem>>, vector<1x18xf32>
    %c0_12 = arith.constant 0 : index
    %c0_13 = arith.constant 0 : index
    %8 = vector.load %arg6[%c0_12, %c0_13] : memref<32x18xf32, #tpu.memory_space<vmem>>, vector<32x18xf32>
    %c0_14 = arith.constant 0 : index
    %c0_15 = arith.constant 0 : index
    %c0_16 = arith.constant 0 : index
    %c0_17 = arith.constant 0 : index
    %9 = vector.load %arg1[%c0_14, %c0_15, %c0_16, %c0_17] : memref<1x4x120x1xf32, #tpu.memory_space<vmem>>, vector<1x1x120x1xf32>
    %10 = vector.shape_cast %9 : vector<1x1x120x1xf32> to vector<120x1xf32>
    %c0_18 = arith.constant 0 : index
    %c0_19 = arith.constant 0 : index
    %11 = vector.load %arg2[%c0_18, %c0_19] : memref<536x120xf32, #tpu.memory_space<vmem>>, vector<300x120xf32>
    %cst = arith.constant dense<0.000000e+00> : vector<300x1xf32>
    %12 = tpu.matmul %11, %10, %cst {dimension_numbers = #tpu.dot_dimension_numbers<[1], [0], [0], [1], [0, 0, 1, 1], [], []>} : vector<300x120xf32>, vector<120x1xf32>, vector<300x1xf32> -> vector<300x1xf32>
    %cst_20 = arith.constant 0.000000e+00 : f32
    %13 = vector.broadcast %cst_20 : f32 to vector<60x32xf32>
    %14 = vector.broadcast %3 : vector<1x32xf32> to vector<60x32xf32>
    %15 = arith.addf %13, %14 : vector<60x32xf32>
    %16 = vector.extract_strided_slice %12 {offsets = [0, 0], sizes = [60, 1], strides = [1, 1]} : vector<300x1xf32> to vector<60x1xf32>
    %17 = vector.extract_strided_slice %0 {offsets = [0, 0, 0], sizes = [1, 1, 32], strides = [1, 1, 1]} : vector<5x1x32xf32> to vector<1x1x32xf32>
    %18 = vector.shape_cast %17 : vector<1x1x32xf32> to vector<1x32xf32>
    %19 = vector.broadcast %16 : vector<60x1xf32> to vector<60x32xf32>
    %20 = vector.broadcast %18 : vector<1x32xf32> to vector<60x32xf32>
    %21 = arith.mulf %19, %20 : vector<60x32xf32>
    %22 = arith.addf %15, %21 : vector<60x32xf32>
    %23 = vector.extract_strided_slice %12 {offsets = [60, 0], sizes = [60, 1], strides = [1, 1]} : vector<300x1xf32> to vector<60x1xf32>
    %24 = vector.extract_strided_slice %0 {offsets = [1, 0, 0], sizes = [1, 1, 32], strides = [1, 1, 1]} : vector<5x1x32xf32> to vector<1x1x32xf32>
    %25 = vector.shape_cast %24 : vector<1x1x32xf32> to vector<1x32xf32>
    %26 = vector.broadcast %23 : vector<60x1xf32> to vector<60x32xf32>
    %27 = vector.broadcast %25 : vector<1x32xf32> to vector<60x32xf32>
    %28 = arith.mulf %26, %27 : vector<60x32xf32>
    %29 = arith.addf %22, %28 : vector<60x32xf32>
    %30 = vector.extract_strided_slice %12 {offsets = [120, 0], sizes = [60, 1], strides = [1, 1]} : vector<300x1xf32> to vector<60x1xf32>
    %31 = vector.extract_strided_slice %0 {offsets = [2, 0, 0], sizes = [1, 1, 32], strides = [1, 1, 1]} : vector<5x1x32xf32> to vector<1x1x32xf32>
    %32 = vector.shape_cast %31 : vector<1x1x32xf32> to vector<1x32xf32>
    %33 = vector.broadcast %30 : vector<60x1xf32> to vector<60x32xf32>
    %34 = vector.broadcast %32 : vector<1x32xf32> to vector<60x32xf32>
    %35 = arith.mulf %33, %34 : vector<60x32xf32>
    %36 = arith.addf %29, %35 : vector<60x32xf32>
    %37 = vector.extract_strided_slice %12 {offsets = [180, 0], sizes = [60, 1], strides = [1, 1]} : vector<300x1xf32> to vector<60x1xf32>
    %38 = vector.extract_strided_slice %0 {offsets = [3, 0, 0], sizes = [1, 1, 32], strides = [1, 1, 1]} : vector<5x1x32xf32> to vector<1x1x32xf32>
    %39 = vector.shape_cast %38 : vector<1x1x32xf32> to vector<1x32xf32>
    %40 = vector.broadcast %37 : vector<60x1xf32> to vector<60x32xf32>
    %41 = vector.broadcast %39 : vector<1x32xf32> to vector<60x32xf32>
    %42 = arith.mulf %40, %41 : vector<60x32xf32>
    %43 = arith.addf %36, %42 : vector<60x32xf32>
    %44 = vector.extract_strided_slice %12 {offsets = [240, 0], sizes = [60, 1], strides = [1, 1]} : vector<300x1xf32> to vector<60x1xf32>
    %45 = vector.extract_strided_slice %0 {offsets = [4, 0, 0], sizes = [1, 1, 32], strides = [1, 1, 1]} : vector<5x1x32xf32> to vector<1x1x32xf32>
    %46 = vector.shape_cast %45 : vector<1x1x32xf32> to vector<1x32xf32>
    %47 = vector.broadcast %44 : vector<60x1xf32> to vector<60x32xf32>
    %48 = vector.broadcast %46 : vector<1x32xf32> to vector<60x32xf32>
    %49 = arith.mulf %47, %48 : vector<60x32xf32>
    %50 = arith.addf %43, %49 : vector<60x32xf32>
    %cst_21 = arith.constant 0.000000e+00 : f32
    %51 = vector.broadcast %cst_21 : f32 to vector<60x32xf32>
    %52 = arith.maximumf %50, %51 : vector<60x32xf32>
    %c304 = arith.constant 304 : index
    %c0_22 = arith.constant 0 : index
    %53 = vector.load %arg2[%c304, %c0_22] : memref<536x120xf32, #tpu.memory_space<vmem>>, vector<150x60xf32>
    %cst_23 = arith.constant dense<0.000000e+00> : vector<150x32xf32>
    %54 = tpu.matmul %53, %52, %cst_23 {dimension_numbers = #tpu.dot_dimension_numbers<[1], [0], [0], [1], [0, 0, 1, 1], [], []>} : vector<150x60xf32>, vector<60x32xf32>, vector<150x32xf32> -> vector<150x32xf32>
    %cst_24 = arith.constant 0.000000e+00 : f32
    %55 = vector.broadcast %cst_24 : f32 to vector<30x32xf32>
    %56 = vector.broadcast %4 : vector<1x32xf32> to vector<30x32xf32>
    %57 = arith.addf %55, %56 : vector<30x32xf32>
    %58 = vector.extract_strided_slice %54 {offsets = [0, 0], sizes = [30, 32], strides = [1, 1]} : vector<150x32xf32> to vector<30x32xf32>
    %59 = vector.extract_strided_slice %1 {offsets = [0, 0, 0], sizes = [1, 32, 32], strides = [1, 1, 1]} : vector<5x32x32xf32> to vector<1x32x32xf32>
    %60 = vector.shape_cast %59 : vector<1x32x32xf32> to vector<32x32xf32>
    %cst_25 = arith.constant dense<0.000000e+00> : vector<30x32xf32>
    %61 = tpu.matmul %58, %60, %cst_25 {dimension_numbers = #tpu.dot_dimension_numbers<[1], [0], [0], [1], [0, 0, 1, 1], [], []>} : vector<30x32xf32>, vector<32x32xf32>, vector<30x32xf32> -> vector<30x32xf32>
    %62 = arith.addf %57, %61 : vector<30x32xf32>
    %63 = vector.extract_strided_slice %54 {offsets = [30, 0], sizes = [30, 32], strides = [1, 1]} : vector<150x32xf32> to vector<30x32xf32>
    %64 = vector.extract_strided_slice %1 {offsets = [1, 0, 0], sizes = [1, 32, 32], strides = [1, 1, 1]} : vector<5x32x32xf32> to vector<1x32x32xf32>
    %65 = vector.shape_cast %64 : vector<1x32x32xf32> to vector<32x32xf32>
    %cst_26 = arith.constant dense<0.000000e+00> : vector<30x32xf32>
    %66 = tpu.matmul %63, %65, %cst_26 {dimension_numbers = #tpu.dot_dimension_numbers<[1], [0], [0], [1], [0, 0, 1, 1], [], []>} : vector<30x32xf32>, vector<32x32xf32>, vector<30x32xf32> -> vector<30x32xf32>
    %67 = arith.addf %62, %66 : vector<30x32xf32>
    %68 = vector.extract_strided_slice %54 {offsets = [60, 0], sizes = [30, 32], strides = [1, 1]} : vector<150x32xf32> to vector<30x32xf32>
    %69 = vector.extract_strided_slice %1 {offsets = [2, 0, 0], sizes = [1, 32, 32], strides = [1, 1, 1]} : vector<5x32x32xf32> to vector<1x32x32xf32>
    %70 = vector.shape_cast %69 : vector<1x32x32xf32> to vector<32x32xf32>
    %cst_27 = arith.constant dense<0.000000e+00> : vector<30x32xf32>
    %71 = tpu.matmul %68, %70, %cst_27 {dimension_numbers = #tpu.dot_dimension_numbers<[1], [0], [0], [1], [0, 0, 1, 1], [], []>} : vector<30x32xf32>, vector<32x32xf32>, vector<30x32xf32> -> vector<30x32xf32>
    %72 = arith.addf %67, %71 : vector<30x32xf32>
    %73 = vector.extract_strided_slice %54 {offsets = [90, 0], sizes = [30, 32], strides = [1, 1]} : vector<150x32xf32> to vector<30x32xf32>
    %74 = vector.extract_strided_slice %1 {offsets = [3, 0, 0], sizes = [1, 32, 32], strides = [1, 1, 1]} : vector<5x32x32xf32> to vector<1x32x32xf32>
    %75 = vector.shape_cast %74 : vector<1x32x32xf32> to vector<32x32xf32>
    %cst_28 = arith.constant dense<0.000000e+00> : vector<30x32xf32>
    %76 = tpu.matmul %73, %75, %cst_28 {dimension_numbers = #tpu.dot_dimension_numbers<[1], [0], [0], [1], [0, 0, 1, 1], [], []>} : vector<30x32xf32>, vector<32x32xf32>, vector<30x32xf32> -> vector<30x32xf32>
    %77 = arith.addf %72, %76 : vector<30x32xf32>
    %78 = vector.extract_strided_slice %54 {offsets = [120, 0], sizes = [30, 32], strides = [1, 1]} : vector<150x32xf32> to vector<30x32xf32>
    %79 = vector.extract_strided_slice %1 {offsets = [4, 0, 0], sizes = [1, 32, 32], strides = [1, 1, 1]} : vector<5x32x32xf32> to vector<1x32x32xf32>
    %80 = vector.shape_cast %79 : vector<1x32x32xf32> to vector<32x32xf32>
    %cst_29 = arith.constant dense<0.000000e+00> : vector<30x32xf32>
    %81 = tpu.matmul %78, %80, %cst_29 {dimension_numbers = #tpu.dot_dimension_numbers<[1], [0], [0], [1], [0, 0, 1, 1], [], []>} : vector<30x32xf32>, vector<32x32xf32>, vector<30x32xf32> -> vector<30x32xf32>
    %82 = arith.addf %77, %81 : vector<30x32xf32>
    %cst_30 = arith.constant 0.000000e+00 : f32
    %83 = vector.broadcast %cst_30 : f32 to vector<30x32xf32>
    %84 = arith.maximumf %82, %83 : vector<30x32xf32>
    %c456 = arith.constant 456 : index
    %c0_31 = arith.constant 0 : index
    %85 = vector.load %arg2[%c456, %c0_31] : memref<536x120xf32, #tpu.memory_space<vmem>>, vector<75x30xf32>
    %cst_32 = arith.constant dense<0.000000e+00> : vector<75x32xf32>
    %86 = tpu.matmul %85, %84, %cst_32 {dimension_numbers = #tpu.dot_dimension_numbers<[1], [0], [0], [1], [0, 0, 1, 1], [], []>} : vector<75x30xf32>, vector<30x32xf32>, vector<75x32xf32> -> vector<75x32xf32>
    %cst_33 = arith.constant 0.000000e+00 : f32
    %87 = vector.broadcast %cst_33 : f32 to vector<15x32xf32>
    %88 = vector.broadcast %5 : vector<1x32xf32> to vector<15x32xf32>
    %89 = arith.addf %87, %88 : vector<15x32xf32>
    %90 = vector.extract_strided_slice %86 {offsets = [0, 0], sizes = [15, 32], strides = [1, 1]} : vector<75x32xf32> to vector<15x32xf32>
    %91 = vector.extract_strided_slice %2 {offsets = [0, 0, 0], sizes = [1, 32, 32], strides = [1, 1, 1]} : vector<5x32x32xf32> to vector<1x32x32xf32>
    %92 = vector.shape_cast %91 : vector<1x32x32xf32> to vector<32x32xf32>
    %cst_34 = arith.constant dense<0.000000e+00> : vector<15x32xf32>
    %93 = tpu.matmul %90, %92, %cst_34 {dimension_numbers = #tpu.dot_dimension_numbers<[1], [0], [0], [1], [0, 0, 1, 1], [], []>} : vector<15x32xf32>, vector<32x32xf32>, vector<15x32xf32> -> vector<15x32xf32>
    %94 = arith.addf %89, %93 : vector<15x32xf32>
    %95 = vector.extract_strided_slice %86 {offsets = [15, 0], sizes = [15, 32], strides = [1, 1]} : vector<75x32xf32> to vector<15x32xf32>
    %96 = vector.extract_strided_slice %2 {offsets = [1, 0, 0], sizes = [1, 32, 32], strides = [1, 1, 1]} : vector<5x32x32xf32> to vector<1x32x32xf32>
    %97 = vector.shape_cast %96 : vector<1x32x32xf32> to vector<32x32xf32>
    %cst_35 = arith.constant dense<0.000000e+00> : vector<15x32xf32>
    %98 = tpu.matmul %95, %97, %cst_35 {dimension_numbers = #tpu.dot_dimension_numbers<[1], [0], [0], [1], [0, 0, 1, 1], [], []>} : vector<15x32xf32>, vector<32x32xf32>, vector<15x32xf32> -> vector<15x32xf32>
    %99 = arith.addf %94, %98 : vector<15x32xf32>
    %100 = vector.extract_strided_slice %86 {offsets = [30, 0], sizes = [15, 32], strides = [1, 1]} : vector<75x32xf32> to vector<15x32xf32>
    %101 = vector.extract_strided_slice %2 {offsets = [2, 0, 0], sizes = [1, 32, 32], strides = [1, 1, 1]} : vector<5x32x32xf32> to vector<1x32x32xf32>
    %102 = vector.shape_cast %101 : vector<1x32x32xf32> to vector<32x32xf32>
    %cst_36 = arith.constant dense<0.000000e+00> : vector<15x32xf32>
    %103 = tpu.matmul %100, %102, %cst_36 {dimension_numbers = #tpu.dot_dimension_numbers<[1], [0], [0], [1], [0, 0, 1, 1], [], []>} : vector<15x32xf32>, vector<32x32xf32>, vector<15x32xf32> -> vector<15x32xf32>
    %104 = arith.addf %99, %103 : vector<15x32xf32>
    %105 = vector.extract_strided_slice %86 {offsets = [45, 0], sizes = [15, 32], strides = [1, 1]} : vector<75x32xf32> to vector<15x32xf32>
    %106 = vector.extract_strided_slice %2 {offsets = [3, 0, 0], sizes = [1, 32, 32], strides = [1, 1, 1]} : vector<5x32x32xf32> to vector<1x32x32xf32>
    %107 = vector.shape_cast %106 : vector<1x32x32xf32> to vector<32x32xf32>
    %cst_37 = arith.constant dense<0.000000e+00> : vector<15x32xf32>
    %108 = tpu.matmul %105, %107, %cst_37 {dimension_numbers = #tpu.dot_dimension_numbers<[1], [0], [0], [1], [0, 0, 1, 1], [], []>} : vector<15x32xf32>, vector<32x32xf32>, vector<15x32xf32> -> vector<15x32xf32>
    %109 = arith.addf %104, %108 : vector<15x32xf32>
    %110 = vector.extract_strided_slice %86 {offsets = [60, 0], sizes = [15, 32], strides = [1, 1]} : vector<75x32xf32> to vector<15x32xf32>
    %111 = vector.extract_strided_slice %2 {offsets = [4, 0, 0], sizes = [1, 32, 32], strides = [1, 1, 1]} : vector<5x32x32xf32> to vector<1x32x32xf32>
    %112 = vector.shape_cast %111 : vector<1x32x32xf32> to vector<32x32xf32>
    %cst_38 = arith.constant dense<0.000000e+00> : vector<15x32xf32>
    %113 = tpu.matmul %110, %112, %cst_38 {dimension_numbers = #tpu.dot_dimension_numbers<[1], [0], [0], [1], [0, 0, 1, 1], [], []>} : vector<15x32xf32>, vector<32x32xf32>, vector<15x32xf32> -> vector<15x32xf32>
    %114 = arith.addf %109, %113 : vector<15x32xf32>
    %cst_39 = arith.constant 0.000000e+00 : f32
    %115 = vector.broadcast %cst_39 : f32 to vector<15x32xf32>
    %116 = arith.maximumf %114, %115 : vector<15x32xf32>
    %117 = vector.extract_strided_slice %116 {offsets = [0, 0], sizes = [1, 32], strides = [1, 1]} : vector<15x32xf32> to vector<1x32xf32>
    %c0_40 = arith.constant 0 : index
    %c0_41 = arith.constant 0 : index
    %c0_42 = arith.constant 0 : index
    %118 = vector.load %arg5[%c0_40, %c0_41, %c0_42] : memref<15x32x32xf32, #tpu.memory_space<vmem>>, vector<1x32x32xf32>
    %119 = vector.shape_cast %118 : vector<1x32x32xf32> to vector<32x32xf32>
    %cst_43 = arith.constant dense<0.000000e+00> : vector<1x32xf32>
    %120 = tpu.matmul %117, %119, %cst_43 {dimension_numbers = #tpu.dot_dimension_numbers<[1], [0], [0], [1], [0, 0, 1, 1], [], []>} : vector<1x32xf32>, vector<32x32xf32>, vector<1x32xf32> -> vector<1x32xf32>
    %121 = arith.addf %6, %120 : vector<1x32xf32>
    %122 = vector.extract_strided_slice %116 {offsets = [1, 0], sizes = [1, 32], strides = [1, 1]} : vector<15x32xf32> to vector<1x32xf32>
    %c1_44 = arith.constant 1 : index
    %c0_45 = arith.constant 0 : index
    %c0_46 = arith.constant 0 : index
    %123 = vector.load %arg5[%c1_44, %c0_45, %c0_46] : memref<15x32x32xf32, #tpu.memory_space<vmem>>, vector<1x32x32xf32>
    %124 = vector.shape_cast %123 : vector<1x32x32xf32> to vector<32x32xf32>
    %cst_47 = arith.constant dense<0.000000e+00> : vector<1x32xf32>
    %125 = tpu.matmul %122, %124, %cst_47 {dimension_numbers = #tpu.dot_dimension_numbers<[1], [0], [0], [1], [0, 0, 1, 1], [], []>} : vector<1x32xf32>, vector<32x32xf32>, vector<1x32xf32> -> vector<1x32xf32>
    %126 = arith.addf %121, %125 : vector<1x32xf32>
    %127 = vector.extract_strided_slice %116 {offsets = [2, 0], sizes = [1, 32], strides = [1, 1]} : vector<15x32xf32> to vector<1x32xf32>
    %c2_48 = arith.constant 2 : index
    %c0_49 = arith.constant 0 : index
    %c0_50 = arith.constant 0 : index
    %128 = vector.load %arg5[%c2_48, %c0_49, %c0_50] : memref<15x32x32xf32, #tpu.memory_space<vmem>>, vector<1x32x32xf32>
    %129 = vector.shape_cast %128 : vector<1x32x32xf32> to vector<32x32xf32>
    %cst_51 = arith.constant dense<0.000000e+00> : vector<1x32xf32>
    %130 = tpu.matmul %127, %129, %cst_51 {dimension_numbers = #tpu.dot_dimension_numbers<[1], [0], [0], [1], [0, 0, 1, 1], [], []>} : vector<1x32xf32>, vector<32x32xf32>, vector<1x32xf32> -> vector<1x32xf32>
    %131 = arith.addf %126, %130 : vector<1x32xf32>
    %132 = vector.extract_strided_slice %116 {offsets = [3, 0], sizes = [1, 32], strides = [1, 1]} : vector<15x32xf32> to vector<1x32xf32>
    %c3_52 = arith.constant 3 : index
    %c0_53 = arith.constant 0 : index
    %c0_54 = arith.constant 0 : index
    %133 = vector.load %arg5[%c3_52, %c0_53, %c0_54] : memref<15x32x32xf32, #tpu.memory_space<vmem>>, vector<1x32x32xf32>
    %134 = vector.shape_cast %133 : vector<1x32x32xf32> to vector<32x32xf32>
    %cst_55 = arith.constant dense<0.000000e+00> : vector<1x32xf32>
    %135 = tpu.matmul %132, %134, %cst_55 {dimension_numbers = #tpu.dot_dimension_numbers<[1], [0], [0], [1], [0, 0, 1, 1], [], []>} : vector<1x32xf32>, vector<32x32xf32>, vector<1x32xf32> -> vector<1x32xf32>
    %136 = arith.addf %131, %135 : vector<1x32xf32>
    %137 = vector.extract_strided_slice %116 {offsets = [4, 0], sizes = [1, 32], strides = [1, 1]} : vector<15x32xf32> to vector<1x32xf32>
    %c4_56 = arith.constant 4 : index
    %c0_57 = arith.constant 0 : index
    %c0_58 = arith.constant 0 : index
    %138 = vector.load %arg5[%c4_56, %c0_57, %c0_58] : memref<15x32x32xf32, #tpu.memory_space<vmem>>, vector<1x32x32xf32>
    %139 = vector.shape_cast %138 : vector<1x32x32xf32> to vector<32x32xf32>
    %cst_59 = arith.constant dense<0.000000e+00> : vector<1x32xf32>
    %140 = tpu.matmul %137, %139, %cst_59 {dimension_numbers = #tpu.dot_dimension_numbers<[1], [0], [0], [1], [0, 0, 1, 1], [], []>} : vector<1x32xf32>, vector<32x32xf32>, vector<1x32xf32> -> vector<1x32xf32>
    %141 = arith.addf %136, %140 : vector<1x32xf32>
    %142 = vector.extract_strided_slice %116 {offsets = [5, 0], sizes = [1, 32], strides = [1, 1]} : vector<15x32xf32> to vector<1x32xf32>
    %c5 = arith.constant 5 : index
    %c0_60 = arith.constant 0 : index
    %c0_61 = arith.constant 0 : index
    %143 = vector.load %arg5[%c5, %c0_60, %c0_61] : memref<15x32x32xf32, #tpu.memory_space<vmem>>, vector<1x32x32xf32>
    %144 = vector.shape_cast %143 : vector<1x32x32xf32> to vector<32x32xf32>
    %cst_62 = arith.constant dense<0.000000e+00> : vector<1x32xf32>
    %145 = tpu.matmul %142, %144, %cst_62 {dimension_numbers = #tpu.dot_dimension_numbers<[1], [0], [0], [1], [0, 0, 1, 1], [], []>} : vector<1x32xf32>, vector<32x32xf32>, vector<1x32xf32> -> vector<1x32xf32>
    %146 = arith.addf %141, %145 : vector<1x32xf32>
    %147 = vector.extract_strided_slice %116 {offsets = [6, 0], sizes = [1, 32], strides = [1, 1]} : vector<15x32xf32> to vector<1x32xf32>
    %c6 = arith.constant 6 : index
    %c0_63 = arith.constant 0 : index
    %c0_64 = arith.constant 0 : index
    %148 = vector.load %arg5[%c6, %c0_63, %c0_64] : memref<15x32x32xf32, #tpu.memory_space<vmem>>, vector<1x32x32xf32>
    %149 = vector.shape_cast %148 : vector<1x32x32xf32> to vector<32x32xf32>
    %cst_65 = arith.constant dense<0.000000e+00> : vector<1x32xf32>
    %150 = tpu.matmul %147, %149, %cst_65 {dimension_numbers = #tpu.dot_dimension_numbers<[1], [0], [0], [1], [0, 0, 1, 1], [], []>} : vector<1x32xf32>, vector<32x32xf32>, vector<1x32xf32> -> vector<1x32xf32>
    %151 = arith.addf %146, %150 : vector<1x32xf32>
    %152 = vector.extract_strided_slice %116 {offsets = [7, 0], sizes = [1, 32], strides = [1, 1]} : vector<15x32xf32> to vector<1x32xf32>
    %c7 = arith.constant 7 : index
    %c0_66 = arith.constant 0 : index
    %c0_67 = arith.constant 0 : index
    %153 = vector.load %arg5[%c7, %c0_66, %c0_67] : memref<15x32x32xf32, #tpu.memory_space<vmem>>, vector<1x32x32xf32>
    %154 = vector.shape_cast %153 : vector<1x32x32xf32> to vector<32x32xf32>
    %cst_68 = arith.constant dense<0.000000e+00> : vector<1x32xf32>
    %155 = tpu.matmul %152, %154, %cst_68 {dimension_numbers = #tpu.dot_dimension_numbers<[1], [0], [0], [1], [0, 0, 1, 1], [], []>} : vector<1x32xf32>, vector<32x32xf32>, vector<1x32xf32> -> vector<1x32xf32>
    %156 = arith.addf %151, %155 : vector<1x32xf32>
    %157 = vector.extract_strided_slice %116 {offsets = [8, 0], sizes = [1, 32], strides = [1, 1]} : vector<15x32xf32> to vector<1x32xf32>
    %c8_69 = arith.constant 8 : index
    %c0_70 = arith.constant 0 : index
    %c0_71 = arith.constant 0 : index
    %158 = vector.load %arg5[%c8_69, %c0_70, %c0_71] : memref<15x32x32xf32, #tpu.memory_space<vmem>>, vector<1x32x32xf32>
    %159 = vector.shape_cast %158 : vector<1x32x32xf32> to vector<32x32xf32>
    %cst_72 = arith.constant dense<0.000000e+00> : vector<1x32xf32>
    %160 = tpu.matmul %157, %159, %cst_72 {dimension_numbers = #tpu.dot_dimension_numbers<[1], [0], [0], [1], [0, 0, 1, 1], [], []>} : vector<1x32xf32>, vector<32x32xf32>, vector<1x32xf32> -> vector<1x32xf32>
    %161 = arith.addf %156, %160 : vector<1x32xf32>
    %162 = vector.extract_strided_slice %116 {offsets = [9, 0], sizes = [1, 32], strides = [1, 1]} : vector<15x32xf32> to vector<1x32xf32>
    %c9 = arith.constant 9 : index
    %c0_73 = arith.constant 0 : index
    %c0_74 = arith.constant 0 : index
    %163 = vector.load %arg5[%c9, %c0_73, %c0_74] : memref<15x32x32xf32, #tpu.memory_space<vmem>>, vector<1x32x32xf32>
    %164 = vector.shape_cast %163 : vector<1x32x32xf32> to vector<32x32xf32>
    %cst_75 = arith.constant dense<0.000000e+00> : vector<1x32xf32>
    %165 = tpu.matmul %162, %164, %cst_75 {dimension_numbers = #tpu.dot_dimension_numbers<[1], [0], [0], [1], [0, 0, 1, 1], [], []>} : vector<1x32xf32>, vector<32x32xf32>, vector<1x32xf32> -> vector<1x32xf32>
    %166 = arith.addf %161, %165 : vector<1x32xf32>
    %167 = vector.extract_strided_slice %116 {offsets = [10, 0], sizes = [1, 32], strides = [1, 1]} : vector<15x32xf32> to vector<1x32xf32>
    %c10 = arith.constant 10 : index
    %c0_76 = arith.constant 0 : index
    %c0_77 = arith.constant 0 : index
    %168 = vector.load %arg5[%c10, %c0_76, %c0_77] : memref<15x32x32xf32, #tpu.memory_space<vmem>>, vector<1x32x32xf32>
    %169 = vector.shape_cast %168 : vector<1x32x32xf32> to vector<32x32xf32>
    %cst_78 = arith.constant dense<0.000000e+00> : vector<1x32xf32>
    %170 = tpu.matmul %167, %169, %cst_78 {dimension_numbers = #tpu.dot_dimension_numbers<[1], [0], [0], [1], [0, 0, 1, 1], [], []>} : vector<1x32xf32>, vector<32x32xf32>, vector<1x32xf32> -> vector<1x32xf32>
    %171 = arith.addf %166, %170 : vector<1x32xf32>
    %172 = vector.extract_strided_slice %116 {offsets = [11, 0], sizes = [1, 32], strides = [1, 1]} : vector<15x32xf32> to vector<1x32xf32>
    %c11 = arith.constant 11 : index
    %c0_79 = arith.constant 0 : index
    %c0_80 = arith.constant 0 : index
    %173 = vector.load %arg5[%c11, %c0_79, %c0_80] : memref<15x32x32xf32, #tpu.memory_space<vmem>>, vector<1x32x32xf32>
    %174 = vector.shape_cast %173 : vector<1x32x32xf32> to vector<32x32xf32>
    %cst_81 = arith.constant dense<0.000000e+00> : vector<1x32xf32>
    %175 = tpu.matmul %172, %174, %cst_81 {dimension_numbers = #tpu.dot_dimension_numbers<[1], [0], [0], [1], [0, 0, 1, 1], [], []>} : vector<1x32xf32>, vector<32x32xf32>, vector<1x32xf32> -> vector<1x32xf32>
    %176 = arith.addf %171, %175 : vector<1x32xf32>
    %177 = vector.extract_strided_slice %116 {offsets = [12, 0], sizes = [1, 32], strides = [1, 1]} : vector<15x32xf32> to vector<1x32xf32>
    %c12 = arith.constant 12 : index
    %c0_82 = arith.constant 0 : index
    %c0_83 = arith.constant 0 : index
    %178 = vector.load %arg5[%c12, %c0_82, %c0_83] : memref<15x32x32xf32, #tpu.memory_space<vmem>>, vector<1x32x32xf32>
    %179 = vector.shape_cast %178 : vector<1x32x32xf32> to vector<32x32xf32>
    %cst_84 = arith.constant dense<0.000000e+00> : vector<1x32xf32>
    %180 = tpu.matmul %177, %179, %cst_84 {dimension_numbers = #tpu.dot_dimension_numbers<[1], [0], [0], [1], [0, 0, 1, 1], [], []>} : vector<1x32xf32>, vector<32x32xf32>, vector<1x32xf32> -> vector<1x32xf32>
    %181 = arith.addf %176, %180 : vector<1x32xf32>
    %182 = vector.extract_strided_slice %116 {offsets = [13, 0], sizes = [1, 32], strides = [1, 1]} : vector<15x32xf32> to vector<1x32xf32>
    %c13 = arith.constant 13 : index
    %c0_85 = arith.constant 0 : index
    %c0_86 = arith.constant 0 : index
    %183 = vector.load %arg5[%c13, %c0_85, %c0_86] : memref<15x32x32xf32, #tpu.memory_space<vmem>>, vector<1x32x32xf32>
    %184 = vector.shape_cast %183 : vector<1x32x32xf32> to vector<32x32xf32>
    %cst_87 = arith.constant dense<0.000000e+00> : vector<1x32xf32>
    %185 = tpu.matmul %182, %184, %cst_87 {dimension_numbers = #tpu.dot_dimension_numbers<[1], [0], [0], [1], [0, 0, 1, 1], [], []>} : vector<1x32xf32>, vector<32x32xf32>, vector<1x32xf32> -> vector<1x32xf32>
    %186 = arith.addf %181, %185 : vector<1x32xf32>
    %187 = vector.extract_strided_slice %116 {offsets = [14, 0], sizes = [1, 32], strides = [1, 1]} : vector<15x32xf32> to vector<1x32xf32>
    %c14 = arith.constant 14 : index
    %c0_88 = arith.constant 0 : index
    %c0_89 = arith.constant 0 : index
    %188 = vector.load %arg5[%c14, %c0_88, %c0_89] : memref<15x32x32xf32, #tpu.memory_space<vmem>>, vector<1x32x32xf32>
    %189 = vector.shape_cast %188 : vector<1x32x32xf32> to vector<32x32xf32>
    %cst_90 = arith.constant dense<0.000000e+00> : vector<1x32xf32>
    %190 = tpu.matmul %187, %189, %cst_90 {dimension_numbers = #tpu.dot_dimension_numbers<[1], [0], [0], [1], [0, 0, 1, 1], [], []>} : vector<1x32xf32>, vector<32x32xf32>, vector<1x32xf32> -> vector<1x32xf32>
    %191 = arith.addf %186, %190 : vector<1x32xf32>
    %cst_91 = arith.constant 0.000000e+00 : f32
    %192 = vector.broadcast %cst_91 : f32 to vector<1x32xf32>
    %193 = arith.maximumf %191, %192 : vector<1x32xf32>
    %cst_92 = arith.constant dense<0.000000e+00> : vector<1x18xf32>
    %194 = tpu.matmul %193, %8, %cst_92 {dimension_numbers = #tpu.dot_dimension_numbers<[1], [0], [0], [1], [0, 0, 1, 1], [], []>} : vector<1x32xf32>, vector<32x18xf32>, vector<1x18xf32> -> vector<1x18xf32>
    %195 = arith.addf %194, %7 : vector<1x18xf32>
    %c0_93 = arith.constant 0 : index
    %c0_94 = arith.constant 0 : index
    %c0_95 = arith.constant 0 : index
    %196 = vector.load %arg7[%c0_93, %c0_94, %c0_95] : memref<1x4x18xf32, #tpu.memory_space<vmem>>, vector<1x1x18xf32>
    %197 = vector.shape_cast %196 : vector<1x1x18xf32> to vector<1x18xf32>
    %198 = vector.shape_cast %195 : vector<1x18xf32> to vector<1x1x18xf32>
    tpu.vector_store %arg7[%c0_93, %c0_94, %c0_95], %198 {strides = array<i32>} : memref<1x4x18xf32, #tpu.memory_space<vmem>>, vector<1x1x18xf32>,
    %c0_96 = arith.constant 0 : index
    %c1_97 = arith.constant 1 : index
    %c0_98 = arith.constant 0 : index
    %c0_99 = arith.constant 0 : index
    %199 = vector.load %arg1[%c0_96, %c1_97, %c0_98, %c0_99] : memref<1x4x120x1xf32, #tpu.memory_space<vmem>>, vector<1x1x120x1xf32>
    %200 = vector.shape_cast %199 : vector<1x1x120x1xf32> to vector<120x1xf32>
    %c0_100 = arith.constant 0 : index
    %c0_101 = arith.constant 0 : index
    %201 = vector.load %arg2[%c0_100, %c0_101] : memref<536x120xf32, #tpu.memory_space<vmem>>, vector<300x120xf32>
    %cst_102 = arith.constant dense<0.000000e+00> : vector<300x1xf32>
    %202 = tpu.matmul %201, %200, %cst_102 {dimension_numbers = #tpu.dot_dimension_numbers<[1], [0], [0], [1], [0, 0, 1, 1], [], []>} : vector<300x120xf32>, vector<120x1xf32>, vector<300x1xf32> -> vector<300x1xf32>
    %cst_103 = arith.constant 0.000000e+00 : f32
    %203 = vector.broadcast %cst_103 : f32 to vector<60x32xf32>
    %204 = vector.broadcast %3 : vector<1x32xf32> to vector<60x32xf32>
    %205 = arith.addf %203, %204 : vector<60x32xf32>
    %206 = vector.extract_strided_slice %202 {offsets = [0, 0], sizes = [60, 1], strides = [1, 1]} : vector<300x1xf32> to vector<60x1xf32>
    %207 = vector.extract_strided_slice %0 {offsets = [0, 0, 0], sizes = [1, 1, 32], strides = [1, 1, 1]} : vector<5x1x32xf32> to vector<1x1x32xf32>
    %208 = vector.shape_cast %207 : vector<1x1x32xf32> to vector<1x32xf32>
    %209 = vector.broadcast %206 : vector<60x1xf32> to vector<60x32xf32>
    %210 = vector.broadcast %208 : vector<1x32xf32> to vector<60x32xf32>
    %211 = arith.mulf %209, %210 : vector<60x32xf32>
    %212 = arith.addf %205, %211 : vector<60x32xf32>
    %213 = vector.extract_strided_slice %202 {offsets = [60, 0], sizes = [60, 1], strides = [1, 1]} : vector<300x1xf32> to vector<60x1xf32>
    %214 = vector.extract_strided_slice %0 {offsets = [1, 0, 0], sizes = [1, 1, 32], strides = [1, 1, 1]} : vector<5x1x32xf32> to vector<1x1x32xf32>
    %215 = vector.shape_cast %214 : vector<1x1x32xf32> to vector<1x32xf32>
    %216 = vector.broadcast %213 : vector<60x1xf32> to vector<60x32xf32>
    %217 = vector.broadcast %215 : vector<1x32xf32> to vector<60x32xf32>
    %218 = arith.mulf %216, %217 : vector<60x32xf32>
    %219 = arith.addf %212, %218 : vector<60x32xf32>
    %220 = vector.extract_strided_slice %202 {offsets = [120, 0], sizes = [60, 1], strides = [1, 1]} : vector<300x1xf32> to vector<60x1xf32>
    %221 = vector.extract_strided_slice %0 {offsets = [2, 0, 0], sizes = [1, 1, 32], strides = [1, 1, 1]} : vector<5x1x32xf32> to vector<1x1x32xf32>
    %222 = vector.shape_cast %221 : vector<1x1x32xf32> to vector<1x32xf32>
    %223 = vector.broadcast %220 : vector<60x1xf32> to vector<60x32xf32>
    %224 = vector.broadcast %222 : vector<1x32xf32> to vector<60x32xf32>
    %225 = arith.mulf %223, %224 : vector<60x32xf32>
    %226 = arith.addf %219, %225 : vector<60x32xf32>
    %227 = vector.extract_strided_slice %202 {offsets = [180, 0], sizes = [60, 1], strides = [1, 1]} : vector<300x1xf32> to vector<60x1xf32>
    %228 = vector.extract_strided_slice %0 {offsets = [3, 0, 0], sizes = [1, 1, 32], strides = [1, 1, 1]} : vector<5x1x32xf32> to vector<1x1x32xf32>
    %229 = vector.shape_cast %228 : vector<1x1x32xf32> to vector<1x32xf32>
    %230 = vector.broadcast %227 : vector<60x1xf32> to vector<60x32xf32>
    %231 = vector.broadcast %229 : vector<1x32xf32> to vector<60x32xf32>
    %232 = arith.mulf %230, %231 : vector<60x32xf32>
    %233 = arith.addf %226, %232 : vector<60x32xf32>
    %234 = vector.extract_strided_slice %202 {offsets = [240, 0], sizes = [60, 1], strides = [1, 1]} : vector<300x1xf32> to vector<60x1xf32>
    %235 = vector.extract_strided_slice %0 {offsets = [4, 0, 0], sizes = [1, 1, 32], strides = [1, 1, 1]} : vector<5x1x32xf32> to vector<1x1x32xf32>
    %236 = vector.shape_cast %235 : vector<1x1x32xf32> to vector<1x32xf32>
    %237 = vector.broadcast %234 : vector<60x1xf32> to vector<60x32xf32>
    %238 = vector.broadcast %236 : vector<1x32xf32> to vector<60x32xf32>
    %239 = arith.mulf %237, %238 : vector<60x32xf32>
    %240 = arith.addf %233, %239 : vector<60x32xf32>
    %cst_104 = arith.constant 0.000000e+00 : f32
    %241 = vector.broadcast %cst_104 : f32 to vector<60x32xf32>
    %242 = arith.maximumf %240, %241 : vector<60x32xf32>
    %c304_105 = arith.constant 304 : index
    %c0_106 = arith.constant 0 : index
    %243 = vector.load %arg2[%c304_105, %c0_106] : memref<536x120xf32, #tpu.memory_space<vmem>>, vector<150x60xf32>
    %cst_107 = arith.constant dense<0.000000e+00> : vector<150x32xf32>
    %244 = tpu.matmul %243, %242, %cst_107 {dimension_numbers = #tpu.dot_dimension_numbers<[1], [0], [0], [1], [0, 0, 1, 1], [], []>} : vector<150x60xf32>, vector<60x32xf32>, vector<150x32xf32> -> vector<150x32xf32>
    %cst_108 = arith.constant 0.000000e+00 : f32
    %245 = vector.broadcast %cst_108 : f32 to vector<30x32xf32>
    %246 = vector.broadcast %4 : vector<1x32xf32> to vector<30x32xf32>
    %247 = arith.addf %245, %246 : vector<30x32xf32>
    %248 = vector.extract_strided_slice %244 {offsets = [0, 0], sizes = [30, 32], strides = [1, 1]} : vector<150x32xf32> to vector<30x32xf32>
    %249 = vector.extract_strided_slice %1 {offsets = [0, 0, 0], sizes = [1, 32, 32], strides = [1, 1, 1]} : vector<5x32x32xf32> to vector<1x32x32xf32>
    %250 = vector.shape_cast %249 : vector<1x32x32xf32> to vector<32x32xf32>
    %cst_109 = arith.constant dense<0.000000e+00> : vector<30x32xf32>
    %251 = tpu.matmul %248, %250, %cst_109 {dimension_numbers = #tpu.dot_dimension_numbers<[1], [0], [0], [1], [0, 0, 1, 1], [], []>} : vector<30x32xf32>, vector<32x32xf32>, vector<30x32xf32> -> vector<30x32xf32>
    %252 = arith.addf %247, %251 : vector<30x32xf32>
    %253 = vector.extract_strided_slice %244 {offsets = [30, 0], sizes = [30, 32], strides = [1, 1]} : vector<150x32xf32> to vector<30x32xf32>
    %254 = vector.extract_strided_slice %1 {offsets = [1, 0, 0], sizes = [1, 32, 32], strides = [1, 1, 1]} : vector<5x32x32xf32> to vector<1x32x32xf32>
    %255 = vector.shape_cast %254 : vector<1x32x32xf32> to vector<32x32xf32>
    %cst_110 = arith.constant dense<0.000000e+00> : vector<30x32xf32>
    %256 = tpu.matmul %253, %255, %cst_110 {dimension_numbers = #tpu.dot_dimension_numbers<[1], [0], [0], [1], [0, 0, 1, 1], [], []>} : vector<30x32xf32>, vector<32x32xf32>, vector<30x32xf32> -> vector<30x32xf32>
    %257 = arith.addf %252, %256 : vector<30x32xf32>
    %258 = vector.extract_strided_slice %244 {offsets = [60, 0], sizes = [30, 32], strides = [1, 1]} : vector<150x32xf32> to vector<30x32xf32>
    %259 = vector.extract_strided_slice %1 {offsets = [2, 0, 0], sizes = [1, 32, 32], strides = [1, 1, 1]} : vector<5x32x32xf32> to vector<1x32x32xf32>
    %260 = vector.shape_cast %259 : vector<1x32x32xf32> to vector<32x32xf32>
    %cst_111 = arith.constant dense<0.000000e+00> : vector<30x32xf32>
    %261 = tpu.matmul %258, %260, %cst_111 {dimension_numbers = #tpu.dot_dimension_numbers<[1], [0], [0], [1], [0, 0, 1, 1], [], []>} : vector<30x32xf32>, vector<32x32xf32>, vector<30x32xf32> -> vector<30x32xf32>
    %262 = arith.addf %257, %261 : vector<30x32xf32>
    %263 = vector.extract_strided_slice %244 {offsets = [90, 0], sizes = [30, 32], strides = [1, 1]} : vector<150x32xf32> to vector<30x32xf32>
    %264 = vector.extract_strided_slice %1 {offsets = [3, 0, 0], sizes = [1, 32, 32], strides = [1, 1, 1]} : vector<5x32x32xf32> to vector<1x32x32xf32>
    %265 = vector.shape_cast %264 : vector<1x32x32xf32> to vector<32x32xf32>
    %cst_112 = arith.constant dense<0.000000e+00> : vector<30x32xf32>
    %266 = tpu.matmul %263, %265, %cst_112 {dimension_numbers = #tpu.dot_dimension_numbers<[1], [0], [0], [1], [0, 0, 1, 1], [], []>} : vector<30x32xf32>, vector<32x32xf32>, vector<30x32xf32> -> vector<30x32xf32>
    %267 = arith.addf %262, %266 : vector<30x32xf32>
    %268 = vector.extract_strided_slice %244 {offsets = [120, 0], sizes = [30, 32], strides = [1, 1]} : vector<150x32xf32> to vector<30x32xf32>
    %269 = vector.extract_strided_slice %1 {offsets = [4, 0, 0], sizes = [1, 32, 32], strides = [1, 1, 1]} : vector<5x32x32xf32> to vector<1x32x32xf32>
    %270 = vector.shape_cast %269 : vector<1x32x32xf32> to vector<32x32xf32>
    %cst_113 = arith.constant dense<0.000000e+00> : vector<30x32xf32>
    %271 = tpu.matmul %268, %270, %cst_113 {dimension_numbers = #tpu.dot_dimension_numbers<[1], [0], [0], [1], [0, 0, 1, 1], [], []>} : vector<30x32xf32>, vector<32x32xf32>, vector<30x32xf32> -> vector<30x32xf32>
    %272 = arith.addf %267, %271 : vector<30x32xf32>
    %cst_114 = arith.constant 0.000000e+00 : f32
    %273 = vector.broadcast %cst_114 : f32 to vector<30x32xf32>
    %274 = arith.maximumf %272, %273 : vector<30x32xf32>
    %c456_115 = arith.constant 456 : index
    %c0_116 = arith.constant 0 : index
    %275 = vector.load %arg2[%c456_115, %c0_116] : memref<536x120xf32, #tpu.memory_space<vmem>>, vector<75x30xf32>
    %cst_117 = arith.constant dense<0.000000e+00> : vector<75x32xf32>
    %276 = tpu.matmul %275, %274, %cst_117 {dimension_numbers = #tpu.dot_dimension_numbers<[1], [0], [0], [1], [0, 0, 1, 1], [], []>} : vector<75x30xf32>, vector<30x32xf32>, vector<75x32xf32> -> vector<75x32xf32>
    %cst_118 = arith.constant 0.000000e+00 : f32
    %277 = vector.broadcast %cst_118 : f32 to vector<15x32xf32>
    %278 = vector.broadcast %5 : vector<1x32xf32> to vector<15x32xf32>
    %279 = arith.addf %277, %278 : vector<15x32xf32>
    %280 = vector.extract_strided_slice %276 {offsets = [0, 0], sizes = [15, 32], strides = [1, 1]} : vector<75x32xf32> to vector<15x32xf32>
    %281 = vector.extract_strided_slice %2 {offsets = [0, 0, 0], sizes = [1, 32, 32], strides = [1, 1, 1]} : vector<5x32x32xf32> to vector<1x32x32xf32>
    %282 = vector.shape_cast %281 : vector<1x32x32xf32> to vector<32x32xf32>
    %cst_119 = arith.constant dense<0.000000e+00> : vector<15x32xf32>
    %283 = tpu.matmul %280, %282, %cst_119 {dimension_numbers = #tpu.dot_dimension_numbers<[1], [0], [0], [1], [0, 0, 1, 1], [], []>} : vector<15x32xf32>, vector<32x32xf32>, vector<15x32xf32> -> vector<15x32xf32>
    %284 = arith.addf %279, %283 : vector<15x32xf32>
    %285 = vector.extract_strided_slice %276 {offsets = [15, 0], sizes = [15, 32], strides = [1, 1]} : vector<75x32xf32> to vector<15x32xf32>
    %286 = vector.extract_strided_slice %2 {offsets = [1, 0, 0], sizes = [1, 32, 32], strides = [1, 1, 1]} : vector<5x32x32xf32> to vector<1x32x32xf32>
    %287 = vector.shape_cast %286 : vector<1x32x32xf32> to vector<32x32xf32>
    %cst_120 = arith.constant dense<0.000000e+00> : vector<15x32xf32>
    %288 = tpu.matmul %285, %287, %cst_120 {dimension_numbers = #tpu.dot_dimension_numbers<[1], [0], [0], [1], [0, 0, 1, 1], [], []>} : vector<15x32xf32>, vector<32x32xf32>, vector<15x32xf32> -> vector<15x32xf32>
    %289 = arith.addf %284, %288 : vector<15x32xf32>
    %290 = vector.extract_strided_slice %276 {offsets = [30, 0], sizes = [15, 32], strides = [1, 1]} : vector<75x32xf32> to vector<15x32xf32>
    %291 = vector.extract_strided_slice %2 {offsets = [2, 0, 0], sizes = [1, 32, 32], strides = [1, 1, 1]} : vector<5x32x32xf32> to vector<1x32x32xf32>
    %292 = vector.shape_cast %291 : vector<1x32x32xf32> to vector<32x32xf32>
    %cst_121 = arith.constant dense<0.000000e+00> : vector<15x32xf32>
    %293 = tpu.matmul %290, %292, %cst_121 {dimension_numbers = #tpu.dot_dimension_numbers<[1], [0], [0], [1], [0, 0, 1, 1], [], []>} : vector<15x32xf32>, vector<32x32xf32>, vector<15x32xf32> -> vector<15x32xf32>
    %294 = arith.addf %289, %293 : vector<15x32xf32>
    %295 = vector.extract_strided_slice %276 {offsets = [45, 0], sizes = [15, 32], strides = [1, 1]} : vector<75x32xf32> to vector<15x32xf32>
    %296 = vector.extract_strided_slice %2 {offsets = [3, 0, 0], sizes = [1, 32, 32], strides = [1, 1, 1]} : vector<5x32x32xf32> to vector<1x32x32xf32>
    %297 = vector.shape_cast %296 : vector<1x32x32xf32> to vector<32x32xf32>
    %cst_122 = arith.constant dense<0.000000e+00> : vector<15x32xf32>
    %298 = tpu.matmul %295, %297, %cst_122 {dimension_numbers = #tpu.dot_dimension_numbers<[1], [0], [0], [1], [0, 0, 1, 1], [], []>} : vector<15x32xf32>, vector<32x32xf32>, vector<15x32xf32> -> vector<15x32xf32>
    %299 = arith.addf %294, %298 : vector<15x32xf32>
    %300 = vector.extract_strided_slice %276 {offsets = [60, 0], sizes = [15, 32], strides = [1, 1]} : vector<75x32xf32> to vector<15x32xf32>
    %301 = vector.extract_strided_slice %2 {offsets = [4, 0, 0], sizes = [1, 32, 32], strides = [1, 1, 1]} : vector<5x32x32xf32> to vector<1x32x32xf32>
    %302 = vector.shape_cast %301 : vector<1x32x32xf32> to vector<32x32xf32>
    %cst_123 = arith.constant dense<0.000000e+00> : vector<15x32xf32>
    %303 = tpu.matmul %300, %302, %cst_123 {dimension_numbers = #tpu.dot_dimension_numbers<[1], [0], [0], [1], [0, 0, 1, 1], [], []>} : vector<15x32xf32>, vector<32x32xf32>, vector<15x32xf32> -> vector<15x32xf32>
    %304 = arith.addf %299, %303 : vector<15x32xf32>
    %cst_124 = arith.constant 0.000000e+00 : f32
    %305 = vector.broadcast %cst_124 : f32 to vector<15x32xf32>
    %306 = arith.maximumf %304, %305 : vector<15x32xf32>
    %307 = vector.extract_strided_slice %306 {offsets = [0, 0], sizes = [1, 32], strides = [1, 1]} : vector<15x32xf32> to vector<1x32xf32>
    %c0_125 = arith.constant 0 : index
    %c0_126 = arith.constant 0 : index
    %c0_127 = arith.constant 0 : index
    %308 = vector.load %arg5[%c0_125, %c0_126, %c0_127] : memref<15x32x32xf32, #tpu.memory_space<vmem>>, vector<1x32x32xf32>
    %309 = vector.shape_cast %308 : vector<1x32x32xf32> to vector<32x32xf32>
    %cst_128 = arith.constant dense<0.000000e+00> : vector<1x32xf32>
    %310 = tpu.matmul %307, %309, %cst_128 {dimension_numbers = #tpu.dot_dimension_numbers<[1], [0], [0], [1], [0, 0, 1, 1], [], []>} : vector<1x32xf32>, vector<32x32xf32>, vector<1x32xf32> -> vector<1x32xf32>
    %311 = arith.addf %6, %310 : vector<1x32xf32>
    %312 = vector.extract_strided_slice %306 {offsets = [1, 0], sizes = [1, 32], strides = [1, 1]} : vector<15x32xf32> to vector<1x32xf32>
    %c1_129 = arith.constant 1 : index
    %c0_130 = arith.constant 0 : index
    %c0_131 = arith.constant 0 : index
    %313 = vector.load %arg5[%c1_129, %c0_130, %c0_131] : memref<15x32x32xf32, #tpu.memory_space<vmem>>, vector<1x32x32xf32>
    %314 = vector.shape_cast %313 : vector<1x32x32xf32> to vector<32x32xf32>
    %cst_132 = arith.constant dense<0.000000e+00> : vector<1x32xf32>
    %315 = tpu.matmul %312, %314, %cst_132 {dimension_numbers = #tpu.dot_dimension_numbers<[1], [0], [0], [1], [0, 0, 1, 1], [], []>} : vector<1x32xf32>, vector<32x32xf32>, vector<1x32xf32> -> vector<1x32xf32>
    %316 = arith.addf %311, %315 : vector<1x32xf32>
    %317 = vector.extract_strided_slice %306 {offsets = [2, 0], sizes = [1, 32], strides = [1, 1]} : vector<15x32xf32> to vector<1x32xf32>
    %c2_133 = arith.constant 2 : index
    %c0_134 = arith.constant 0 : index
    %c0_135 = arith.constant 0 : index
    %318 = vector.load %arg5[%c2_133, %c0_134, %c0_135] : memref<15x32x32xf32, #tpu.memory_space<vmem>>, vector<1x32x32xf32>
    %319 = vector.shape_cast %318 : vector<1x32x32xf32> to vector<32x32xf32>
    %cst_136 = arith.constant dense<0.000000e+00> : vector<1x32xf32>
    %320 = tpu.matmul %317, %319, %cst_136 {dimension_numbers = #tpu.dot_dimension_numbers<[1], [0], [0], [1], [0, 0, 1, 1], [], []>} : vector<1x32xf32>, vector<32x32xf32>, vector<1x32xf32> -> vector<1x32xf32>
    %321 = arith.addf %316, %320 : vector<1x32xf32>
    %322 = vector.extract_strided_slice %306 {offsets = [3, 0], sizes = [1, 32], strides = [1, 1]} : vector<15x32xf32> to vector<1x32xf32>
    %c3_137 = arith.constant 3 : index
    %c0_138 = arith.constant 0 : index
    %c0_139 = arith.constant 0 : index
    %323 = vector.load %arg5[%c3_137, %c0_138, %c0_139] : memref<15x32x32xf32, #tpu.memory_space<vmem>>, vector<1x32x32xf32>
    %324 = vector.shape_cast %323 : vector<1x32x32xf32> to vector<32x32xf32>
    %cst_140 = arith.constant dense<0.000000e+00> : vector<1x32xf32>
    %325 = tpu.matmul %322, %324, %cst_140 {dimension_numbers = #tpu.dot_dimension_numbers<[1], [0], [0], [1], [0, 0, 1, 1], [], []>} : vector<1x32xf32>, vector<32x32xf32>, vector<1x32xf32> -> vector<1x32xf32>
    %326 = arith.addf %321, %325 : vector<1x32xf32>
    %327 = vector.extract_strided_slice %306 {offsets = [4, 0], sizes = [1, 32], strides = [1, 1]} : vector<15x32xf32> to vector<1x32xf32>
    %c4_141 = arith.constant 4 : index
    %c0_142 = arith.constant 0 : index
    %c0_143 = arith.constant 0 : index
    %328 = vector.load %arg5[%c4_141, %c0_142, %c0_143] : memref<15x32x32xf32, #tpu.memory_space<vmem>>, vector<1x32x32xf32>
    %329 = vector.shape_cast %328 : vector<1x32x32xf32> to vector<32x32xf32>
    %cst_144 = arith.constant dense<0.000000e+00> : vector<1x32xf32>
    %330 = tpu.matmul %327, %329, %cst_144 {dimension_numbers = #tpu.dot_dimension_numbers<[1], [0], [0], [1], [0, 0, 1, 1], [], []>} : vector<1x32xf32>, vector<32x32xf32>, vector<1x32xf32> -> vector<1x32xf32>
    %331 = arith.addf %326, %330 : vector<1x32xf32>
    %332 = vector.extract_strided_slice %306 {offsets = [5, 0], sizes = [1, 32], strides = [1, 1]} : vector<15x32xf32> to vector<1x32xf32>
    %c5_145 = arith.constant 5 : index
    %c0_146 = arith.constant 0 : index
    %c0_147 = arith.constant 0 : index
    %333 = vector.load %arg5[%c5_145, %c0_146, %c0_147] : memref<15x32x32xf32, #tpu.memory_space<vmem>>, vector<1x32x32xf32>
    %334 = vector.shape_cast %333 : vector<1x32x32xf32> to vector<32x32xf32>
    %cst_148 = arith.constant dense<0.000000e+00> : vector<1x32xf32>
    %335 = tpu.matmul %332, %334, %cst_148 {dimension_numbers = #tpu.dot_dimension_numbers<[1], [0], [0], [1], [0, 0, 1, 1], [], []>} : vector<1x32xf32>, vector<32x32xf32>, vector<1x32xf32> -> vector<1x32xf32>
    %336 = arith.addf %331, %335 : vector<1x32xf32>
    %337 = vector.extract_strided_slice %306 {offsets = [6, 0], sizes = [1, 32], strides = [1, 1]} : vector<15x32xf32> to vector<1x32xf32>
    %c6_149 = arith.constant 6 : index
    %c0_150 = arith.constant 0 : index
    %c0_151 = arith.constant 0 : index
    %338 = vector.load %arg5[%c6_149, %c0_150, %c0_151] : memref<15x32x32xf32, #tpu.memory_space<vmem>>, vector<1x32x32xf32>
    %339 = vector.shape_cast %338 : vector<1x32x32xf32> to vector<32x32xf32>
    %cst_152 = arith.constant dense<0.000000e+00> : vector<1x32xf32>
    %340 = tpu.matmul %337, %339, %cst_152 {dimension_numbers = #tpu.dot_dimension_numbers<[1], [0], [0], [1], [0, 0, 1, 1], [], []>} : vector<1x32xf32>, vector<32x32xf32>, vector<1x32xf32> -> vector<1x32xf32>
    %341 = arith.addf %336, %340 : vector<1x32xf32>
    %342 = vector.extract_strided_slice %306 {offsets = [7, 0], sizes = [1, 32], strides = [1, 1]} : vector<15x32xf32> to vector<1x32xf32>
    %c7_153 = arith.constant 7 : index
    %c0_154 = arith.constant 0 : index
    %c0_155 = arith.constant 0 : index
    %343 = vector.load %arg5[%c7_153, %c0_154, %c0_155] : memref<15x32x32xf32, #tpu.memory_space<vmem>>, vector<1x32x32xf32>
    %344 = vector.shape_cast %343 : vector<1x32x32xf32> to vector<32x32xf32>
    %cst_156 = arith.constant dense<0.000000e+00> : vector<1x32xf32>
    %345 = tpu.matmul %342, %344, %cst_156 {dimension_numbers = #tpu.dot_dimension_numbers<[1], [0], [0], [1], [0, 0, 1, 1], [], []>} : vector<1x32xf32>, vector<32x32xf32>, vector<1x32xf32> -> vector<1x32xf32>
    %346 = arith.addf %341, %345 : vector<1x32xf32>
    %347 = vector.extract_strided_slice %306 {offsets = [8, 0], sizes = [1, 32], strides = [1, 1]} : vector<15x32xf32> to vector<1x32xf32>
    %c8_157 = arith.constant 8 : index
    %c0_158 = arith.constant 0 : index
    %c0_159 = arith.constant 0 : index
    %348 = vector.load %arg5[%c8_157, %c0_158, %c0_159] : memref<15x32x32xf32, #tpu.memory_space<vmem>>, vector<1x32x32xf32>
    %349 = vector.shape_cast %348 : vector<1x32x32xf32> to vector<32x32xf32>
    %cst_160 = arith.constant dense<0.000000e+00> : vector<1x32xf32>
    %350 = tpu.matmul %347, %349, %cst_160 {dimension_numbers = #tpu.dot_dimension_numbers<[1], [0], [0], [1], [0, 0, 1, 1], [], []>} : vector<1x32xf32>, vector<32x32xf32>, vector<1x32xf32> -> vector<1x32xf32>
    %351 = arith.addf %346, %350 : vector<1x32xf32>
    %352 = vector.extract_strided_slice %306 {offsets = [9, 0], sizes = [1, 32], strides = [1, 1]} : vector<15x32xf32> to vector<1x32xf32>
    %c9_161 = arith.constant 9 : index
    %c0_162 = arith.constant 0 : index
    %c0_163 = arith.constant 0 : index
    %353 = vector.load %arg5[%c9_161, %c0_162, %c0_163] : memref<15x32x32xf32, #tpu.memory_space<vmem>>, vector<1x32x32xf32>
    %354 = vector.shape_cast %353 : vector<1x32x32xf32> to vector<32x32xf32>
    %cst_164 = arith.constant dense<0.000000e+00> : vector<1x32xf32>
    %355 = tpu.matmul %352, %354, %cst_164 {dimension_numbers = #tpu.dot_dimension_numbers<[1], [0], [0], [1], [0, 0, 1, 1], [], []>} : vector<1x32xf32>, vector<32x32xf32>, vector<1x32xf32> -> vector<1x32xf32>
    %356 = arith.addf %351, %355 : vector<1x32xf32>
    %357 = vector.extract_strided_slice %306 {offsets = [10, 0], sizes = [1, 32], strides = [1, 1]} : vector<15x32xf32> to vector<1x32xf32>
    %c10_165 = arith.constant 10 : index
    %c0_166 = arith.constant 0 : index
    %c0_167 = arith.constant 0 : index
    %358 = vector.load %arg5[%c10_165, %c0_166, %c0_167] : memref<15x32x32xf32, #tpu.memory_space<vmem>>, vector<1x32x32xf32>
    %359 = vector.shape_cast %358 : vector<1x32x32xf32> to vector<32x32xf32>
    %cst_168 = arith.constant dense<0.000000e+00> : vector<1x32xf32>
    %360 = tpu.matmul %357, %359, %cst_168 {dimension_numbers = #tpu.dot_dimension_numbers<[1], [0], [0], [1], [0, 0, 1, 1], [], []>} : vector<1x32xf32>, vector<32x32xf32>, vector<1x32xf32> -> vector<1x32xf32>
    %361 = arith.addf %356, %360 : vector<1x32xf32>
    %362 = vector.extract_strided_slice %306 {offsets = [11, 0], sizes = [1, 32], strides = [1, 1]} : vector<15x32xf32> to vector<1x32xf32>
    %c11_169 = arith.constant 11 : index
    %c0_170 = arith.constant 0 : index
    %c0_171 = arith.constant 0 : index
    %363 = vector.load %arg5[%c11_169, %c0_170, %c0_171] : memref<15x32x32xf32, #tpu.memory_space<vmem>>, vector<1x32x32xf32>
    %364 = vector.shape_cast %363 : vector<1x32x32xf32> to vector<32x32xf32>
    %cst_172 = arith.constant dense<0.000000e+00> : vector<1x32xf32>
    %365 = tpu.matmul %362, %364, %cst_172 {dimension_numbers = #tpu.dot_dimension_numbers<[1], [0], [0], [1], [0, 0, 1, 1], [], []>} : vector<1x32xf32>, vector<32x32xf32>, vector<1x32xf32> -> vector<1x32xf32>
    %366 = arith.addf %361, %365 : vector<1x32xf32>
    %367 = vector.extract_strided_slice %306 {offsets = [12, 0], sizes = [1, 32], strides = [1, 1]} : vector<15x32xf32> to vector<1x32xf32>
    %c12_173 = arith.constant 12 : index
    %c0_174 = arith.constant 0 : index
    %c0_175 = arith.constant 0 : index
    %368 = vector.load %arg5[%c12_173, %c0_174, %c0_175] : memref<15x32x32xf32, #tpu.memory_space<vmem>>, vector<1x32x32xf32>
    %369 = vector.shape_cast %368 : vector<1x32x32xf32> to vector<32x32xf32>
    %cst_176 = arith.constant dense<0.000000e+00> : vector<1x32xf32>
    %370 = tpu.matmul %367, %369, %cst_176 {dimension_numbers = #tpu.dot_dimension_numbers<[1], [0], [0], [1], [0, 0, 1, 1], [], []>} : vector<1x32xf32>, vector<32x32xf32>, vector<1x32xf32> -> vector<1x32xf32>
    %371 = arith.addf %366, %370 : vector<1x32xf32>
    %372 = vector.extract_strided_slice %306 {offsets = [13, 0], sizes = [1, 32], strides = [1, 1]} : vector<15x32xf32> to vector<1x32xf32>
    %c13_177 = arith.constant 13 : index
    %c0_178 = arith.constant 0 : index
    %c0_179 = arith.constant 0 : index
    %373 = vector.load %arg5[%c13_177, %c0_178, %c0_179] : memref<15x32x32xf32, #tpu.memory_space<vmem>>, vector<1x32x32xf32>
    %374 = vector.shape_cast %373 : vector<1x32x32xf32> to vector<32x32xf32>
    %cst_180 = arith.constant dense<0.000000e+00> : vector<1x32xf32>
    %375 = tpu.matmul %372, %374, %cst_180 {dimension_numbers = #tpu.dot_dimension_numbers<[1], [0], [0], [1], [0, 0, 1, 1], [], []>} : vector<1x32xf32>, vector<32x32xf32>, vector<1x32xf32> -> vector<1x32xf32>
    %376 = arith.addf %371, %375 : vector<1x32xf32>
    %377 = vector.extract_strided_slice %306 {offsets = [14, 0], sizes = [1, 32], strides = [1, 1]} : vector<15x32xf32> to vector<1x32xf32>
    %c14_181 = arith.constant 14 : index
    %c0_182 = arith.constant 0 : index
    %c0_183 = arith.constant 0 : index
    %378 = vector.load %arg5[%c14_181, %c0_182, %c0_183] : memref<15x32x32xf32, #tpu.memory_space<vmem>>, vector<1x32x32xf32>
    %379 = vector.shape_cast %378 : vector<1x32x32xf32> to vector<32x32xf32>
    %cst_184 = arith.constant dense<0.000000e+00> : vector<1x32xf32>
    %380 = tpu.matmul %377, %379, %cst_184 {dimension_numbers = #tpu.dot_dimension_numbers<[1], [0], [0], [1], [0, 0, 1, 1], [], []>} : vector<1x32xf32>, vector<32x32xf32>, vector<1x32xf32> -> vector<1x32xf32>
    %381 = arith.addf %376, %380 : vector<1x32xf32>
    %cst_185 = arith.constant 0.000000e+00 : f32
    %382 = vector.broadcast %cst_185 : f32 to vector<1x32xf32>
    %383 = arith.maximumf %381, %382 : vector<1x32xf32>
    %cst_186 = arith.constant dense<0.000000e+00> : vector<1x18xf32>
    %384 = tpu.matmul %383, %8, %cst_186 {dimension_numbers = #tpu.dot_dimension_numbers<[1], [0], [0], [1], [0, 0, 1, 1], [], []>} : vector<1x32xf32>, vector<32x18xf32>, vector<1x18xf32> -> vector<1x18xf32>
    %385 = arith.addf %384, %7 : vector<1x18xf32>
    %c0_187 = arith.constant 0 : index
    %c1_188 = arith.constant 1 : index
    %c0_189 = arith.constant 0 : index
    %386 = vector.load %arg7[%c0_187, %c1_188, %c0_189] : memref<1x4x18xf32, #tpu.memory_space<vmem>>, vector<1x1x18xf32>
    %387 = vector.shape_cast %386 : vector<1x1x18xf32> to vector<1x18xf32>
    %388 = vector.shape_cast %385 : vector<1x18xf32> to vector<1x1x18xf32>
    tpu.vector_store %arg7[%c0_187, %c1_188, %c0_189], %388 {strides = array<i32>} : memref<1x4x18xf32, #tpu.memory_space<vmem>>, vector<1x1x18xf32>,
    %c0_190 = arith.constant 0 : index
    %c2_191 = arith.constant 2 : index
    %c0_192 = arith.constant 0 : index
    %c0_193 = arith.constant 0 : index
    %389 = vector.load %arg1[%c0_190, %c2_191, %c0_192, %c0_193] : memref<1x4x120x1xf32, #tpu.memory_space<vmem>>, vector<1x1x120x1xf32>
    %390 = vector.shape_cast %389 : vector<1x1x120x1xf32> to vector<120x1xf32>
    %c0_194 = arith.constant 0 : index
    %c0_195 = arith.constant 0 : index
    %391 = vector.load %arg2[%c0_194, %c0_195] : memref<536x120xf32, #tpu.memory_space<vmem>>, vector<300x120xf32>
    %cst_196 = arith.constant dense<0.000000e+00> : vector<300x1xf32>
    %392 = tpu.matmul %391, %390, %cst_196 {dimension_numbers = #tpu.dot_dimension_numbers<[1], [0], [0], [1], [0, 0, 1, 1], [], []>} : vector<300x120xf32>, vector<120x1xf32>, vector<300x1xf32> -> vector<300x1xf32>
    %cst_197 = arith.constant 0.000000e+00 : f32
    %393 = vector.broadcast %cst_197 : f32 to vector<60x32xf32>
    %394 = vector.broadcast %3 : vector<1x32xf32> to vector<60x32xf32>
    %395 = arith.addf %393, %394 : vector<60x32xf32>
    %396 = vector.extract_strided_slice %392 {offsets = [0, 0], sizes = [60, 1], strides = [1, 1]} : vector<300x1xf32> to vector<60x1xf32>
    %397 = vector.extract_strided_slice %0 {offsets = [0, 0, 0], sizes = [1, 1, 32], strides = [1, 1, 1]} : vector<5x1x32xf32> to vector<1x1x32xf32>
    %398 = vector.shape_cast %397 : vector<1x1x32xf32> to vector<1x32xf32>
    %399 = vector.broadcast %396 : vector<60x1xf32> to vector<60x32xf32>
    %400 = vector.broadcast %398 : vector<1x32xf32> to vector<60x32xf32>
    %401 = arith.mulf %399, %400 : vector<60x32xf32>
    %402 = arith.addf %395, %401 : vector<60x32xf32>
    %403 = vector.extract_strided_slice %392 {offsets = [60, 0], sizes = [60, 1], strides = [1, 1]} : vector<300x1xf32> to vector<60x1xf32>
    %404 = vector.extract_strided_slice %0 {offsets = [1, 0, 0], sizes = [1, 1, 32], strides = [1, 1, 1]} : vector<5x1x32xf32> to vector<1x1x32xf32>
    %405 = vector.shape_cast %404 : vector<1x1x32xf32> to vector<1x32xf32>
    %406 = vector.broadcast %403 : vector<60x1xf32> to vector<60x32xf32>
    %407 = vector.broadcast %405 : vector<1x32xf32> to vector<60x32xf32>
    %408 = arith.mulf %406, %407 : vector<60x32xf32>
    %409 = arith.addf %402, %408 : vector<60x32xf32>
    %410 = vector.extract_strided_slice %392 {offsets = [120, 0], sizes = [60, 1], strides = [1, 1]} : vector<300x1xf32> to vector<60x1xf32>
    %411 = vector.extract_strided_slice %0 {offsets = [2, 0, 0], sizes = [1, 1, 32], strides = [1, 1, 1]} : vector<5x1x32xf32> to vector<1x1x32xf32>
    %412 = vector.shape_cast %411 : vector<1x1x32xf32> to vector<1x32xf32>
    %413 = vector.broadcast %410 : vector<60x1xf32> to vector<60x32xf32>
    %414 = vector.broadcast %412 : vector<1x32xf32> to vector<60x32xf32>
    %415 = arith.mulf %413, %414 : vector<60x32xf32>
    %416 = arith.addf %409, %415 : vector<60x32xf32>
    %417 = vector.extract_strided_slice %392 {offsets = [180, 0], sizes = [60, 1], strides = [1, 1]} : vector<300x1xf32> to vector<60x1xf32>
    %418 = vector.extract_strided_slice %0 {offsets = [3, 0, 0], sizes = [1, 1, 32], strides = [1, 1, 1]} : vector<5x1x32xf32> to vector<1x1x32xf32>
    %419 = vector.shape_cast %418 : vector<1x1x32xf32> to vector<1x32xf32>
    %420 = vector.broadcast %417 : vector<60x1xf32> to vector<60x32xf32>
    %421 = vector.broadcast %419 : vector<1x32xf32> to vector<60x32xf32>
    %422 = arith.mulf %420, %421 : vector<60x32xf32>
    %423 = arith.addf %416, %422 : vector<60x32xf32>
    %424 = vector.extract_strided_slice %392 {offsets = [240, 0], sizes = [60, 1], strides = [1, 1]} : vector<300x1xf32> to vector<60x1xf32>
    %425 = vector.extract_strided_slice %0 {offsets = [4, 0, 0], sizes = [1, 1, 32], strides = [1, 1, 1]} : vector<5x1x32xf32> to vector<1x1x32xf32>
    %426 = vector.shape_cast %425 : vector<1x1x32xf32> to vector<1x32xf32>
    %427 = vector.broadcast %424 : vector<60x1xf32> to vector<60x32xf32>
    %428 = vector.broadcast %426 : vector<1x32xf32> to vector<60x32xf32>
    %429 = arith.mulf %427, %428 : vector<60x32xf32>
    %430 = arith.addf %423, %429 : vector<60x32xf32>
    %cst_198 = arith.constant 0.000000e+00 : f32
    %431 = vector.broadcast %cst_198 : f32 to vector<60x32xf32>
    %432 = arith.maximumf %430, %431 : vector<60x32xf32>
    %c304_199 = arith.constant 304 : index
    %c0_200 = arith.constant 0 : index
    %433 = vector.load %arg2[%c304_199, %c0_200] : memref<536x120xf32, #tpu.memory_space<vmem>>, vector<150x60xf32>
    %cst_201 = arith.constant dense<0.000000e+00> : vector<150x32xf32>
    %434 = tpu.matmul %433, %432, %cst_201 {dimension_numbers = #tpu.dot_dimension_numbers<[1], [0], [0], [1], [0, 0, 1, 1], [], []>} : vector<150x60xf32>, vector<60x32xf32>, vector<150x32xf32> -> vector<150x32xf32>
    %cst_202 = arith.constant 0.000000e+00 : f32
    %435 = vector.broadcast %cst_202 : f32 to vector<30x32xf32>
    %436 = vector.broadcast %4 : vector<1x32xf32> to vector<30x32xf32>
    %437 = arith.addf %435, %436 : vector<30x32xf32>
    %438 = vector.extract_strided_slice %434 {offsets = [0, 0], sizes = [30, 32], strides = [1, 1]} : vector<150x32xf32> to vector<30x32xf32>
    %439 = vector.extract_strided_slice %1 {offsets = [0, 0, 0], sizes = [1, 32, 32], strides = [1, 1, 1]} : vector<5x32x32xf32> to vector<1x32x32xf32>
    %440 = vector.shape_cast %439 : vector<1x32x32xf32> to vector<32x32xf32>
    %cst_203 = arith.constant dense<0.000000e+00> : vector<30x32xf32>
    %441 = tpu.matmul %438, %440, %cst_203 {dimension_numbers = #tpu.dot_dimension_numbers<[1], [0], [0], [1], [0, 0, 1, 1], [], []>} : vector<30x32xf32>, vector<32x32xf32>, vector<30x32xf32> -> vector<30x32xf32>
    %442 = arith.addf %437, %441 : vector<30x32xf32>
    %443 = vector.extract_strided_slice %434 {offsets = [30, 0], sizes = [30, 32], strides = [1, 1]} : vector<150x32xf32> to vector<30x32xf32>
    %444 = vector.extract_strided_slice %1 {offsets = [1, 0, 0], sizes = [1, 32, 32], strides = [1, 1, 1]} : vector<5x32x32xf32> to vector<1x32x32xf32>
    %445 = vector.shape_cast %444 : vector<1x32x32xf32> to vector<32x32xf32>
    %cst_204 = arith.constant dense<0.000000e+00> : vector<30x32xf32>
    %446 = tpu.matmul %443, %445, %cst_204 {dimension_numbers = #tpu.dot_dimension_numbers<[1], [0], [0], [1], [0, 0, 1, 1], [], []>} : vector<30x32xf32>, vector<32x32xf32>, vector<30x32xf32> -> vector<30x32xf32>
    %447 = arith.addf %442, %446 : vector<30x32xf32>
    %448 = vector.extract_strided_slice %434 {offsets = [60, 0], sizes = [30, 32], strides = [1, 1]} : vector<150x32xf32> to vector<30x32xf32>
    %449 = vector.extract_strided_slice %1 {offsets = [2, 0, 0], sizes = [1, 32, 32], strides = [1, 1, 1]} : vector<5x32x32xf32> to vector<1x32x32xf32>
    %450 = vector.shape_cast %449 : vector<1x32x32xf32> to vector<32x32xf32>
    %cst_205 = arith.constant dense<0.000000e+00> : vector<30x32xf32>
    %451 = tpu.matmul %448, %450, %cst_205 {dimension_numbers = #tpu.dot_dimension_numbers<[1], [0], [0], [1], [0, 0, 1, 1], [], []>} : vector<30x32xf32>, vector<32x32xf32>, vector<30x32xf32> -> vector<30x32xf32>
    %452 = arith.addf %447, %451 : vector<30x32xf32>
    %453 = vector.extract_strided_slice %434 {offsets = [90, 0], sizes = [30, 32], strides = [1, 1]} : vector<150x32xf32> to vector<30x32xf32>
    %454 = vector.extract_strided_slice %1 {offsets = [3, 0, 0], sizes = [1, 32, 32], strides = [1, 1, 1]} : vector<5x32x32xf32> to vector<1x32x32xf32>
    %455 = vector.shape_cast %454 : vector<1x32x32xf32> to vector<32x32xf32>
    %cst_206 = arith.constant dense<0.000000e+00> : vector<30x32xf32>
    %456 = tpu.matmul %453, %455, %cst_206 {dimension_numbers = #tpu.dot_dimension_numbers<[1], [0], [0], [1], [0, 0, 1, 1], [], []>} : vector<30x32xf32>, vector<32x32xf32>, vector<30x32xf32> -> vector<30x32xf32>
    %457 = arith.addf %452, %456 : vector<30x32xf32>
    %458 = vector.extract_strided_slice %434 {offsets = [120, 0], sizes = [30, 32], strides = [1, 1]} : vector<150x32xf32> to vector<30x32xf32>
    %459 = vector.extract_strided_slice %1 {offsets = [4, 0, 0], sizes = [1, 32, 32], strides = [1, 1, 1]} : vector<5x32x32xf32> to vector<1x32x32xf32>
    %460 = vector.shape_cast %459 : vector<1x32x32xf32> to vector<32x32xf32>
    %cst_207 = arith.constant dense<0.000000e+00> : vector<30x32xf32>
    %461 = tpu.matmul %458, %460, %cst_207 {dimension_numbers = #tpu.dot_dimension_numbers<[1], [0], [0], [1], [0, 0, 1, 1], [], []>} : vector<30x32xf32>, vector<32x32xf32>, vector<30x32xf32> -> vector<30x32xf32>
    %462 = arith.addf %457, %461 : vector<30x32xf32>
    %cst_208 = arith.constant 0.000000e+00 : f32
    %463 = vector.broadcast %cst_208 : f32 to vector<30x32xf32>
    %464 = arith.maximumf %462, %463 : vector<30x32xf32>
    %c456_209 = arith.constant 456 : index
    %c0_210 = arith.constant 0 : index
    %465 = vector.load %arg2[%c456_209, %c0_210] : memref<536x120xf32, #tpu.memory_space<vmem>>, vector<75x30xf32>
    %cst_211 = arith.constant dense<0.000000e+00> : vector<75x32xf32>
    %466 = tpu.matmul %465, %464, %cst_211 {dimension_numbers = #tpu.dot_dimension_numbers<[1], [0], [0], [1], [0, 0, 1, 1], [], []>} : vector<75x30xf32>, vector<30x32xf32>, vector<75x32xf32> -> vector<75x32xf32>
    %cst_212 = arith.constant 0.000000e+00 : f32
    %467 = vector.broadcast %cst_212 : f32 to vector<15x32xf32>
    %468 = vector.broadcast %5 : vector<1x32xf32> to vector<15x32xf32>
    %469 = arith.addf %467, %468 : vector<15x32xf32>
    %470 = vector.extract_strided_slice %466 {offsets = [0, 0], sizes = [15, 32], strides = [1, 1]} : vector<75x32xf32> to vector<15x32xf32>
    %471 = vector.extract_strided_slice %2 {offsets = [0, 0, 0], sizes = [1, 32, 32], strides = [1, 1, 1]} : vector<5x32x32xf32> to vector<1x32x32xf32>
    %472 = vector.shape_cast %471 : vector<1x32x32xf32> to vector<32x32xf32>
    %cst_213 = arith.constant dense<0.000000e+00> : vector<15x32xf32>
    %473 = tpu.matmul %470, %472, %cst_213 {dimension_numbers = #tpu.dot_dimension_numbers<[1], [0], [0], [1], [0, 0, 1, 1], [], []>} : vector<15x32xf32>, vector<32x32xf32>, vector<15x32xf32> -> vector<15x32xf32>
    %474 = arith.addf %469, %473 : vector<15x32xf32>
    %475 = vector.extract_strided_slice %466 {offsets = [15, 0], sizes = [15, 32], strides = [1, 1]} : vector<75x32xf32> to vector<15x32xf32>
    %476 = vector.extract_strided_slice %2 {offsets = [1, 0, 0], sizes = [1, 32, 32], strides = [1, 1, 1]} : vector<5x32x32xf32> to vector<1x32x32xf32>
    %477 = vector.shape_cast %476 : vector<1x32x32xf32> to vector<32x32xf32>
    %cst_214 = arith.constant dense<0.000000e+00> : vector<15x32xf32>
    %478 = tpu.matmul %475, %477, %cst_214 {dimension_numbers = #tpu.dot_dimension_numbers<[1], [0], [0], [1], [0, 0, 1, 1], [], []>} : vector<15x32xf32>, vector<32x32xf32>, vector<15x32xf32> -> vector<15x32xf32>
    %479 = arith.addf %474, %478 : vector<15x32xf32>
    %480 = vector.extract_strided_slice %466 {offsets = [30, 0], sizes = [15, 32], strides = [1, 1]} : vector<75x32xf32> to vector<15x32xf32>
    %481 = vector.extract_strided_slice %2 {offsets = [2, 0, 0], sizes = [1, 32, 32], strides = [1, 1, 1]} : vector<5x32x32xf32> to vector<1x32x32xf32>
    %482 = vector.shape_cast %481 : vector<1x32x32xf32> to vector<32x32xf32>
    %cst_215 = arith.constant dense<0.000000e+00> : vector<15x32xf32>
    %483 = tpu.matmul %480, %482, %cst_215 {dimension_numbers = #tpu.dot_dimension_numbers<[1], [0], [0], [1], [0, 0, 1, 1], [], []>} : vector<15x32xf32>, vector<32x32xf32>, vector<15x32xf32> -> vector<15x32xf32>
    %484 = arith.addf %479, %483 : vector<15x32xf32>
    %485 = vector.extract_strided_slice %466 {offsets = [45, 0], sizes = [15, 32], strides = [1, 1]} : vector<75x32xf32> to vector<15x32xf32>
    %486 = vector.extract_strided_slice %2 {offsets = [3, 0, 0], sizes = [1, 32, 32], strides = [1, 1, 1]} : vector<5x32x32xf32> to vector<1x32x32xf32>
    %487 = vector.shape_cast %486 : vector<1x32x32xf32> to vector<32x32xf32>
    %cst_216 = arith.constant dense<0.000000e+00> : vector<15x32xf32>
    %488 = tpu.matmul %485, %487, %cst_216 {dimension_numbers = #tpu.dot_dimension_numbers<[1], [0], [0], [1], [0, 0, 1, 1], [], []>} : vector<15x32xf32>, vector<32x32xf32>, vector<15x32xf32> -> vector<15x32xf32>
    %489 = arith.addf %484, %488 : vector<15x32xf32>
    %490 = vector.extract_strided_slice %466 {offsets = [60, 0], sizes = [15, 32], strides = [1, 1]} : vector<75x32xf32> to vector<15x32xf32>
    %491 = vector.extract_strided_slice %2 {offsets = [4, 0, 0], sizes = [1, 32, 32], strides = [1, 1, 1]} : vector<5x32x32xf32> to vector<1x32x32xf32>
    %492 = vector.shape_cast %491 : vector<1x32x32xf32> to vector<32x32xf32>
    %cst_217 = arith.constant dense<0.000000e+00> : vector<15x32xf32>
    %493 = tpu.matmul %490, %492, %cst_217 {dimension_numbers = #tpu.dot_dimension_numbers<[1], [0], [0], [1], [0, 0, 1, 1], [], []>} : vector<15x32xf32>, vector<32x32xf32>, vector<15x32xf32> -> vector<15x32xf32>
    %494 = arith.addf %489, %493 : vector<15x32xf32>
    %cst_218 = arith.constant 0.000000e+00 : f32
    %495 = vector.broadcast %cst_218 : f32 to vector<15x32xf32>
    %496 = arith.maximumf %494, %495 : vector<15x32xf32>
    %497 = vector.extract_strided_slice %496 {offsets = [0, 0], sizes = [1, 32], strides = [1, 1]} : vector<15x32xf32> to vector<1x32xf32>
    %c0_219 = arith.constant 0 : index
    %c0_220 = arith.constant 0 : index
    %c0_221 = arith.constant 0 : index
    %498 = vector.load %arg5[%c0_219, %c0_220, %c0_221] : memref<15x32x32xf32, #tpu.memory_space<vmem>>, vector<1x32x32xf32>
    %499 = vector.shape_cast %498 : vector<1x32x32xf32> to vector<32x32xf32>
    %cst_222 = arith.constant dense<0.000000e+00> : vector<1x32xf32>
    %500 = tpu.matmul %497, %499, %cst_222 {dimension_numbers = #tpu.dot_dimension_numbers<[1], [0], [0], [1], [0, 0, 1, 1], [], []>} : vector<1x32xf32>, vector<32x32xf32>, vector<1x32xf32> -> vector<1x32xf32>
    %501 = arith.addf %6, %500 : vector<1x32xf32>
    %502 = vector.extract_strided_slice %496 {offsets = [1, 0], sizes = [1, 32], strides = [1, 1]} : vector<15x32xf32> to vector<1x32xf32>
    %c1_223 = arith.constant 1 : index
    %c0_224 = arith.constant 0 : index
    %c0_225 = arith.constant 0 : index
    %503 = vector.load %arg5[%c1_223, %c0_224, %c0_225] : memref<15x32x32xf32, #tpu.memory_space<vmem>>, vector<1x32x32xf32>
    %504 = vector.shape_cast %503 : vector<1x32x32xf32> to vector<32x32xf32>
    %cst_226 = arith.constant dense<0.000000e+00> : vector<1x32xf32>
    %505 = tpu.matmul %502, %504, %cst_226 {dimension_numbers = #tpu.dot_dimension_numbers<[1], [0], [0], [1], [0, 0, 1, 1], [], []>} : vector<1x32xf32>, vector<32x32xf32>, vector<1x32xf32> -> vector<1x32xf32>
    %506 = arith.addf %501, %505 : vector<1x32xf32>
    %507 = vector.extract_strided_slice %496 {offsets = [2, 0], sizes = [1, 32], strides = [1, 1]} : vector<15x32xf32> to vector<1x32xf32>
    %c2_227 = arith.constant 2 : index
    %c0_228 = arith.constant 0 : index
    %c0_229 = arith.constant 0 : index
    %508 = vector.load %arg5[%c2_227, %c0_228, %c0_229] : memref<15x32x32xf32, #tpu.memory_space<vmem>>, vector<1x32x32xf32>
    %509 = vector.shape_cast %508 : vector<1x32x32xf32> to vector<32x32xf32>
    %cst_230 = arith.constant dense<0.000000e+00> : vector<1x32xf32>
    %510 = tpu.matmul %507, %509, %cst_230 {dimension_numbers = #tpu.dot_dimension_numbers<[1], [0], [0], [1], [0, 0, 1, 1], [], []>} : vector<1x32xf32>, vector<32x32xf32>, vector<1x32xf32> -> vector<1x32xf32>
    %511 = arith.addf %506, %510 : vector<1x32xf32>
    %512 = vector.extract_strided_slice %496 {offsets = [3, 0], sizes = [1, 32], strides = [1, 1]} : vector<15x32xf32> to vector<1x32xf32>
    %c3_231 = arith.constant 3 : index
    %c0_232 = arith.constant 0 : index
    %c0_233 = arith.constant 0 : index
    %513 = vector.load %arg5[%c3_231, %c0_232, %c0_233] : memref<15x32x32xf32, #tpu.memory_space<vmem>>, vector<1x32x32xf32>
    %514 = vector.shape_cast %513 : vector<1x32x32xf32> to vector<32x32xf32>
    %cst_234 = arith.constant dense<0.000000e+00> : vector<1x32xf32>
    %515 = tpu.matmul %512, %514, %cst_234 {dimension_numbers = #tpu.dot_dimension_numbers<[1], [0], [0], [1], [0, 0, 1, 1], [], []>} : vector<1x32xf32>, vector<32x32xf32>, vector<1x32xf32> -> vector<1x32xf32>
    %516 = arith.addf %511, %515 : vector<1x32xf32>
    %517 = vector.extract_strided_slice %496 {offsets = [4, 0], sizes = [1, 32], strides = [1, 1]} : vector<15x32xf32> to vector<1x32xf32>
    %c4_235 = arith.constant 4 : index
    %c0_236 = arith.constant 0 : index
    %c0_237 = arith.constant 0 : index
    %518 = vector.load %arg5[%c4_235, %c0_236, %c0_237] : memref<15x32x32xf32, #tpu.memory_space<vmem>>, vector<1x32x32xf32>
    %519 = vector.shape_cast %518 : vector<1x32x32xf32> to vector<32x32xf32>
    %cst_238 = arith.constant dense<0.000000e+00> : vector<1x32xf32>
    %520 = tpu.matmul %517, %519, %cst_238 {dimension_numbers = #tpu.dot_dimension_numbers<[1], [0], [0], [1], [0, 0, 1, 1], [], []>} : vector<1x32xf32>, vector<32x32xf32>, vector<1x32xf32> -> vector<1x32xf32>
    %521 = arith.addf %516, %520 : vector<1x32xf32>
    %522 = vector.extract_strided_slice %496 {offsets = [5, 0], sizes = [1, 32], strides = [1, 1]} : vector<15x32xf32> to vector<1x32xf32>
    %c5_239 = arith.constant 5 : index
    %c0_240 = arith.constant 0 : index
    %c0_241 = arith.constant 0 : index
    %523 = vector.load %arg5[%c5_239, %c0_240, %c0_241] : memref<15x32x32xf32, #tpu.memory_space<vmem>>, vector<1x32x32xf32>
    %524 = vector.shape_cast %523 : vector<1x32x32xf32> to vector<32x32xf32>
    %cst_242 = arith.constant dense<0.000000e+00> : vector<1x32xf32>
    %525 = tpu.matmul %522, %524, %cst_242 {dimension_numbers = #tpu.dot_dimension_numbers<[1], [0], [0], [1], [0, 0, 1, 1], [], []>} : vector<1x32xf32>, vector<32x32xf32>, vector<1x32xf32> -> vector<1x32xf32>
    %526 = arith.addf %521, %525 : vector<1x32xf32>
    %527 = vector.extract_strided_slice %496 {offsets = [6, 0], sizes = [1, 32], strides = [1, 1]} : vector<15x32xf32> to vector<1x32xf32>
    %c6_243 = arith.constant 6 : index
    %c0_244 = arith.constant 0 : index
    %c0_245 = arith.constant 0 : index
    %528 = vector.load %arg5[%c6_243, %c0_244, %c0_245] : memref<15x32x32xf32, #tpu.memory_space<vmem>>, vector<1x32x32xf32>
    %529 = vector.shape_cast %528 : vector<1x32x32xf32> to vector<32x32xf32>
    %cst_246 = arith.constant dense<0.000000e+00> : vector<1x32xf32>
    %530 = tpu.matmul %527, %529, %cst_246 {dimension_numbers = #tpu.dot_dimension_numbers<[1], [0], [0], [1], [0, 0, 1, 1], [], []>} : vector<1x32xf32>, vector<32x32xf32>, vector<1x32xf32> -> vector<1x32xf32>
    %531 = arith.addf %526, %530 : vector<1x32xf32>
    %532 = vector.extract_strided_slice %496 {offsets = [7, 0], sizes = [1, 32], strides = [1, 1]} : vector<15x32xf32> to vector<1x32xf32>
    %c7_247 = arith.constant 7 : index
    %c0_248 = arith.constant 0 : index
    %c0_249 = arith.constant 0 : index
    %533 = vector.load %arg5[%c7_247, %c0_248, %c0_249] : memref<15x32x32xf32, #tpu.memory_space<vmem>>, vector<1x32x32xf32>
    %534 = vector.shape_cast %533 : vector<1x32x32xf32> to vector<32x32xf32>
    %cst_250 = arith.constant dense<0.000000e+00> : vector<1x32xf32>
    %535 = tpu.matmul %532, %534, %cst_250 {dimension_numbers = #tpu.dot_dimension_numbers<[1], [0], [0], [1], [0, 0, 1, 1], [], []>} : vector<1x32xf32>, vector<32x32xf32>, vector<1x32xf32> -> vector<1x32xf32>
    %536 = arith.addf %531, %535 : vector<1x32xf32>
    %537 = vector.extract_strided_slice %496 {offsets = [8, 0], sizes = [1, 32], strides = [1, 1]} : vector<15x32xf32> to vector<1x32xf32>
    %c8_251 = arith.constant 8 : index
    %c0_252 = arith.constant 0 : index
    %c0_253 = arith.constant 0 : index
    %538 = vector.load %arg5[%c8_251, %c0_252, %c0_253] : memref<15x32x32xf32, #tpu.memory_space<vmem>>, vector<1x32x32xf32>
    %539 = vector.shape_cast %538 : vector<1x32x32xf32> to vector<32x32xf32>
    %cst_254 = arith.constant dense<0.000000e+00> : vector<1x32xf32>
    %540 = tpu.matmul %537, %539, %cst_254 {dimension_numbers = #tpu.dot_dimension_numbers<[1], [0], [0], [1], [0, 0, 1, 1], [], []>} : vector<1x32xf32>, vector<32x32xf32>, vector<1x32xf32> -> vector<1x32xf32>
    %541 = arith.addf %536, %540 : vector<1x32xf32>
    %542 = vector.extract_strided_slice %496 {offsets = [9, 0], sizes = [1, 32], strides = [1, 1]} : vector<15x32xf32> to vector<1x32xf32>
    %c9_255 = arith.constant 9 : index
    %c0_256 = arith.constant 0 : index
    %c0_257 = arith.constant 0 : index
    %543 = vector.load %arg5[%c9_255, %c0_256, %c0_257] : memref<15x32x32xf32, #tpu.memory_space<vmem>>, vector<1x32x32xf32>
    %544 = vector.shape_cast %543 : vector<1x32x32xf32> to vector<32x32xf32>
    %cst_258 = arith.constant dense<0.000000e+00> : vector<1x32xf32>
    %545 = tpu.matmul %542, %544, %cst_258 {dimension_numbers = #tpu.dot_dimension_numbers<[1], [0], [0], [1], [0, 0, 1, 1], [], []>} : vector<1x32xf32>, vector<32x32xf32>, vector<1x32xf32> -> vector<1x32xf32>
    %546 = arith.addf %541, %545 : vector<1x32xf32>
    %547 = vector.extract_strided_slice %496 {offsets = [10, 0], sizes = [1, 32], strides = [1, 1]} : vector<15x32xf32> to vector<1x32xf32>
    %c10_259 = arith.constant 10 : index
    %c0_260 = arith.constant 0 : index
    %c0_261 = arith.constant 0 : index
    %548 = vector.load %arg5[%c10_259, %c0_260, %c0_261] : memref<15x32x32xf32, #tpu.memory_space<vmem>>, vector<1x32x32xf32>
    %549 = vector.shape_cast %548 : vector<1x32x32xf32> to vector<32x32xf32>
    %cst_262 = arith.constant dense<0.000000e+00> : vector<1x32xf32>
    %550 = tpu.matmul %547, %549, %cst_262 {dimension_numbers = #tpu.dot_dimension_numbers<[1], [0], [0], [1], [0, 0, 1, 1], [], []>} : vector<1x32xf32>, vector<32x32xf32>, vector<1x32xf32> -> vector<1x32xf32>
    %551 = arith.addf %546, %550 : vector<1x32xf32>
    %552 = vector.extract_strided_slice %496 {offsets = [11, 0], sizes = [1, 32], strides = [1, 1]} : vector<15x32xf32> to vector<1x32xf32>
    %c11_263 = arith.constant 11 : index
    %c0_264 = arith.constant 0 : index
    %c0_265 = arith.constant 0 : index
    %553 = vector.load %arg5[%c11_263, %c0_264, %c0_265] : memref<15x32x32xf32, #tpu.memory_space<vmem>>, vector<1x32x32xf32>
    %554 = vector.shape_cast %553 : vector<1x32x32xf32> to vector<32x32xf32>
    %cst_266 = arith.constant dense<0.000000e+00> : vector<1x32xf32>
    %555 = tpu.matmul %552, %554, %cst_266 {dimension_numbers = #tpu.dot_dimension_numbers<[1], [0], [0], [1], [0, 0, 1, 1], [], []>} : vector<1x32xf32>, vector<32x32xf32>, vector<1x32xf32> -> vector<1x32xf32>
    %556 = arith.addf %551, %555 : vector<1x32xf32>
    %557 = vector.extract_strided_slice %496 {offsets = [12, 0], sizes = [1, 32], strides = [1, 1]} : vector<15x32xf32> to vector<1x32xf32>
    %c12_267 = arith.constant 12 : index
    %c0_268 = arith.constant 0 : index
    %c0_269 = arith.constant 0 : index
    %558 = vector.load %arg5[%c12_267, %c0_268, %c0_269] : memref<15x32x32xf32, #tpu.memory_space<vmem>>, vector<1x32x32xf32>
    %559 = vector.shape_cast %558 : vector<1x32x32xf32> to vector<32x32xf32>
    %cst_270 = arith.constant dense<0.000000e+00> : vector<1x32xf32>
    %560 = tpu.matmul %557, %559, %cst_270 {dimension_numbers = #tpu.dot_dimension_numbers<[1], [0], [0], [1], [0, 0, 1, 1], [], []>} : vector<1x32xf32>, vector<32x32xf32>, vector<1x32xf32> -> vector<1x32xf32>
    %561 = arith.addf %556, %560 : vector<1x32xf32>
    %562 = vector.extract_strided_slice %496 {offsets = [13, 0], sizes = [1, 32], strides = [1, 1]} : vector<15x32xf32> to vector<1x32xf32>
    %c13_271 = arith.constant 13 : index
    %c0_272 = arith.constant 0 : index
    %c0_273 = arith.constant 0 : index
    %563 = vector.load %arg5[%c13_271, %c0_272, %c0_273] : memref<15x32x32xf32, #tpu.memory_space<vmem>>, vector<1x32x32xf32>
    %564 = vector.shape_cast %563 : vector<1x32x32xf32> to vector<32x32xf32>
    %cst_274 = arith.constant dense<0.000000e+00> : vector<1x32xf32>
    %565 = tpu.matmul %562, %564, %cst_274 {dimension_numbers = #tpu.dot_dimension_numbers<[1], [0], [0], [1], [0, 0, 1, 1], [], []>} : vector<1x32xf32>, vector<32x32xf32>, vector<1x32xf32> -> vector<1x32xf32>
    %566 = arith.addf %561, %565 : vector<1x32xf32>
    %567 = vector.extract_strided_slice %496 {offsets = [14, 0], sizes = [1, 32], strides = [1, 1]} : vector<15x32xf32> to vector<1x32xf32>
    %c14_275 = arith.constant 14 : index
    %c0_276 = arith.constant 0 : index
    %c0_277 = arith.constant 0 : index
    %568 = vector.load %arg5[%c14_275, %c0_276, %c0_277] : memref<15x32x32xf32, #tpu.memory_space<vmem>>, vector<1x32x32xf32>
    %569 = vector.shape_cast %568 : vector<1x32x32xf32> to vector<32x32xf32>
    %cst_278 = arith.constant dense<0.000000e+00> : vector<1x32xf32>
    %570 = tpu.matmul %567, %569, %cst_278 {dimension_numbers = #tpu.dot_dimension_numbers<[1], [0], [0], [1], [0, 0, 1, 1], [], []>} : vector<1x32xf32>, vector<32x32xf32>, vector<1x32xf32> -> vector<1x32xf32>
    %571 = arith.addf %566, %570 : vector<1x32xf32>
    %cst_279 = arith.constant 0.000000e+00 : f32
    %572 = vector.broadcast %cst_279 : f32 to vector<1x32xf32>
    %573 = arith.maximumf %571, %572 : vector<1x32xf32>
    %cst_280 = arith.constant dense<0.000000e+00> : vector<1x18xf32>
    %574 = tpu.matmul %573, %8, %cst_280 {dimension_numbers = #tpu.dot_dimension_numbers<[1], [0], [0], [1], [0, 0, 1, 1], [], []>} : vector<1x32xf32>, vector<32x18xf32>, vector<1x18xf32> -> vector<1x18xf32>
    %575 = arith.addf %574, %7 : vector<1x18xf32>
    %c0_281 = arith.constant 0 : index
    %c2_282 = arith.constant 2 : index
    %c0_283 = arith.constant 0 : index
    %576 = vector.load %arg7[%c0_281, %c2_282, %c0_283] : memref<1x4x18xf32, #tpu.memory_space<vmem>>, vector<1x1x18xf32>
    %577 = vector.shape_cast %576 : vector<1x1x18xf32> to vector<1x18xf32>
    %578 = vector.shape_cast %575 : vector<1x18xf32> to vector<1x1x18xf32>
    tpu.vector_store %arg7[%c0_281, %c2_282, %c0_283], %578 {strides = array<i32>} : memref<1x4x18xf32, #tpu.memory_space<vmem>>, vector<1x1x18xf32>,
    %c0_284 = arith.constant 0 : index
    %c3_285 = arith.constant 3 : index
    %c0_286 = arith.constant 0 : index
    %c0_287 = arith.constant 0 : index
    %579 = vector.load %arg1[%c0_284, %c3_285, %c0_286, %c0_287] : memref<1x4x120x1xf32, #tpu.memory_space<vmem>>, vector<1x1x120x1xf32>
    %580 = vector.shape_cast %579 : vector<1x1x120x1xf32> to vector<120x1xf32>
    %c0_288 = arith.constant 0 : index
    %c0_289 = arith.constant 0 : index
    %581 = vector.load %arg2[%c0_288, %c0_289] : memref<536x120xf32, #tpu.memory_space<vmem>>, vector<300x120xf32>
    %cst_290 = arith.constant dense<0.000000e+00> : vector<300x1xf32>
    %582 = tpu.matmul %581, %580, %cst_290 {dimension_numbers = #tpu.dot_dimension_numbers<[1], [0], [0], [1], [0, 0, 1, 1], [], []>} : vector<300x120xf32>, vector<120x1xf32>, vector<300x1xf32> -> vector<300x1xf32>
    %cst_291 = arith.constant 0.000000e+00 : f32
    %583 = vector.broadcast %cst_291 : f32 to vector<60x32xf32>
    %584 = vector.broadcast %3 : vector<1x32xf32> to vector<60x32xf32>
    %585 = arith.addf %583, %584 : vector<60x32xf32>
    %586 = vector.extract_strided_slice %582 {offsets = [0, 0], sizes = [60, 1], strides = [1, 1]} : vector<300x1xf32> to vector<60x1xf32>
    %587 = vector.extract_strided_slice %0 {offsets = [0, 0, 0], sizes = [1, 1, 32], strides = [1, 1, 1]} : vector<5x1x32xf32> to vector<1x1x32xf32>
    %588 = vector.shape_cast %587 : vector<1x1x32xf32> to vector<1x32xf32>
    %589 = vector.broadcast %586 : vector<60x1xf32> to vector<60x32xf32>
    %590 = vector.broadcast %588 : vector<1x32xf32> to vector<60x32xf32>
    %591 = arith.mulf %589, %590 : vector<60x32xf32>
    %592 = arith.addf %585, %591 : vector<60x32xf32>
    %593 = vector.extract_strided_slice %582 {offsets = [60, 0], sizes = [60, 1], strides = [1, 1]} : vector<300x1xf32> to vector<60x1xf32>
    %594 = vector.extract_strided_slice %0 {offsets = [1, 0, 0], sizes = [1, 1, 32], strides = [1, 1, 1]} : vector<5x1x32xf32> to vector<1x1x32xf32>
    %595 = vector.shape_cast %594 : vector<1x1x32xf32> to vector<1x32xf32>
    %596 = vector.broadcast %593 : vector<60x1xf32> to vector<60x32xf32>
    %597 = vector.broadcast %595 : vector<1x32xf32> to vector<60x32xf32>
    %598 = arith.mulf %596, %597 : vector<60x32xf32>
    %599 = arith.addf %592, %598 : vector<60x32xf32>
    %600 = vector.extract_strided_slice %582 {offsets = [120, 0], sizes = [60, 1], strides = [1, 1]} : vector<300x1xf32> to vector<60x1xf32>
    %601 = vector.extract_strided_slice %0 {offsets = [2, 0, 0], sizes = [1, 1, 32], strides = [1, 1, 1]} : vector<5x1x32xf32> to vector<1x1x32xf32>
    %602 = vector.shape_cast %601 : vector<1x1x32xf32> to vector<1x32xf32>
    %603 = vector.broadcast %600 : vector<60x1xf32> to vector<60x32xf32>
    %604 = vector.broadcast %602 : vector<1x32xf32> to vector<60x32xf32>
    %605 = arith.mulf %603, %604 : vector<60x32xf32>
    %606 = arith.addf %599, %605 : vector<60x32xf32>
    %607 = vector.extract_strided_slice %582 {offsets = [180, 0], sizes = [60, 1], strides = [1, 1]} : vector<300x1xf32> to vector<60x1xf32>
    %608 = vector.extract_strided_slice %0 {offsets = [3, 0, 0], sizes = [1, 1, 32], strides = [1, 1, 1]} : vector<5x1x32xf32> to vector<1x1x32xf32>
    %609 = vector.shape_cast %608 : vector<1x1x32xf32> to vector<1x32xf32>
    %610 = vector.broadcast %607 : vector<60x1xf32> to vector<60x32xf32>
    %611 = vector.broadcast %609 : vector<1x32xf32> to vector<60x32xf32>
    %612 = arith.mulf %610, %611 : vector<60x32xf32>
    %613 = arith.addf %606, %612 : vector<60x32xf32>
    %614 = vector.extract_strided_slice %582 {offsets = [240, 0], sizes = [60, 1], strides = [1, 1]} : vector<300x1xf32> to vector<60x1xf32>
    %615 = vector.extract_strided_slice %0 {offsets = [4, 0, 0], sizes = [1, 1, 32], strides = [1, 1, 1]} : vector<5x1x32xf32> to vector<1x1x32xf32>
    %616 = vector.shape_cast %615 : vector<1x1x32xf32> to vector<1x32xf32>
    %617 = vector.broadcast %614 : vector<60x1xf32> to vector<60x32xf32>
    %618 = vector.broadcast %616 : vector<1x32xf32> to vector<60x32xf32>
    %619 = arith.mulf %617, %618 : vector<60x32xf32>
    %620 = arith.addf %613, %619 : vector<60x32xf32>
    %cst_292 = arith.constant 0.000000e+00 : f32
    %621 = vector.broadcast %cst_292 : f32 to vector<60x32xf32>
    %622 = arith.maximumf %620, %621 : vector<60x32xf32>
    %c304_293 = arith.constant 304 : index
    %c0_294 = arith.constant 0 : index
    %623 = vector.load %arg2[%c304_293, %c0_294] : memref<536x120xf32, #tpu.memory_space<vmem>>, vector<150x60xf32>
    %cst_295 = arith.constant dense<0.000000e+00> : vector<150x32xf32>
    %624 = tpu.matmul %623, %622, %cst_295 {dimension_numbers = #tpu.dot_dimension_numbers<[1], [0], [0], [1], [0, 0, 1, 1], [], []>} : vector<150x60xf32>, vector<60x32xf32>, vector<150x32xf32> -> vector<150x32xf32>
    %cst_296 = arith.constant 0.000000e+00 : f32
    %625 = vector.broadcast %cst_296 : f32 to vector<30x32xf32>
    %626 = vector.broadcast %4 : vector<1x32xf32> to vector<30x32xf32>
    %627 = arith.addf %625, %626 : vector<30x32xf32>
    %628 = vector.extract_strided_slice %624 {offsets = [0, 0], sizes = [30, 32], strides = [1, 1]} : vector<150x32xf32> to vector<30x32xf32>
    %629 = vector.extract_strided_slice %1 {offsets = [0, 0, 0], sizes = [1, 32, 32], strides = [1, 1, 1]} : vector<5x32x32xf32> to vector<1x32x32xf32>
    %630 = vector.shape_cast %629 : vector<1x32x32xf32> to vector<32x32xf32>
    %cst_297 = arith.constant dense<0.000000e+00> : vector<30x32xf32>
    %631 = tpu.matmul %628, %630, %cst_297 {dimension_numbers = #tpu.dot_dimension_numbers<[1], [0], [0], [1], [0, 0, 1, 1], [], []>} : vector<30x32xf32>, vector<32x32xf32>, vector<30x32xf32> -> vector<30x32xf32>
    %632 = arith.addf %627, %631 : vector<30x32xf32>
    %633 = vector.extract_strided_slice %624 {offsets = [30, 0], sizes = [30, 32], strides = [1, 1]} : vector<150x32xf32> to vector<30x32xf32>
    %634 = vector.extract_strided_slice %1 {offsets = [1, 0, 0], sizes = [1, 32, 32], strides = [1, 1, 1]} : vector<5x32x32xf32> to vector<1x32x32xf32>
    %635 = vector.shape_cast %634 : vector<1x32x32xf32> to vector<32x32xf32>
    %cst_298 = arith.constant dense<0.000000e+00> : vector<30x32xf32>
    %636 = tpu.matmul %633, %635, %cst_298 {dimension_numbers = #tpu.dot_dimension_numbers<[1], [0], [0], [1], [0, 0, 1, 1], [], []>} : vector<30x32xf32>, vector<32x32xf32>, vector<30x32xf32> -> vector<30x32xf32>
    %637 = arith.addf %632, %636 : vector<30x32xf32>
    %638 = vector.extract_strided_slice %624 {offsets = [60, 0], sizes = [30, 32], strides = [1, 1]} : vector<150x32xf32> to vector<30x32xf32>
    %639 = vector.extract_strided_slice %1 {offsets = [2, 0, 0], sizes = [1, 32, 32], strides = [1, 1, 1]} : vector<5x32x32xf32> to vector<1x32x32xf32>
    %640 = vector.shape_cast %639 : vector<1x32x32xf32> to vector<32x32xf32>
    %cst_299 = arith.constant dense<0.000000e+00> : vector<30x32xf32>
    %641 = tpu.matmul %638, %640, %cst_299 {dimension_numbers = #tpu.dot_dimension_numbers<[1], [0], [0], [1], [0, 0, 1, 1], [], []>} : vector<30x32xf32>, vector<32x32xf32>, vector<30x32xf32> -> vector<30x32xf32>
    %642 = arith.addf %637, %641 : vector<30x32xf32>
    %643 = vector.extract_strided_slice %624 {offsets = [90, 0], sizes = [30, 32], strides = [1, 1]} : vector<150x32xf32> to vector<30x32xf32>
    %644 = vector.extract_strided_slice %1 {offsets = [3, 0, 0], sizes = [1, 32, 32], strides = [1, 1, 1]} : vector<5x32x32xf32> to vector<1x32x32xf32>
    %645 = vector.shape_cast %644 : vector<1x32x32xf32> to vector<32x32xf32>
    %cst_300 = arith.constant dense<0.000000e+00> : vector<30x32xf32>
    %646 = tpu.matmul %643, %645, %cst_300 {dimension_numbers = #tpu.dot_dimension_numbers<[1], [0], [0], [1], [0, 0, 1, 1], [], []>} : vector<30x32xf32>, vector<32x32xf32>, vector<30x32xf32> -> vector<30x32xf32>
    %647 = arith.addf %642, %646 : vector<30x32xf32>
    %648 = vector.extract_strided_slice %624 {offsets = [120, 0], sizes = [30, 32], strides = [1, 1]} : vector<150x32xf32> to vector<30x32xf32>
    %649 = vector.extract_strided_slice %1 {offsets = [4, 0, 0], sizes = [1, 32, 32], strides = [1, 1, 1]} : vector<5x32x32xf32> to vector<1x32x32xf32>
    %650 = vector.shape_cast %649 : vector<1x32x32xf32> to vector<32x32xf32>
    %cst_301 = arith.constant dense<0.000000e+00> : vector<30x32xf32>
    %651 = tpu.matmul %648, %650, %cst_301 {dimension_numbers = #tpu.dot_dimension_numbers<[1], [0], [0], [1], [0, 0, 1, 1], [], []>} : vector<30x32xf32>, vector<32x32xf32>, vector<30x32xf32> -> vector<30x32xf32>
    %652 = arith.addf %647, %651 : vector<30x32xf32>
    %cst_302 = arith.constant 0.000000e+00 : f32
    %653 = vector.broadcast %cst_302 : f32 to vector<30x32xf32>
    %654 = arith.maximumf %652, %653 : vector<30x32xf32>
    %c456_303 = arith.constant 456 : index
    %c0_304 = arith.constant 0 : index
    %655 = vector.load %arg2[%c456_303, %c0_304] : memref<536x120xf32, #tpu.memory_space<vmem>>, vector<75x30xf32>
    %cst_305 = arith.constant dense<0.000000e+00> : vector<75x32xf32>
    %656 = tpu.matmul %655, %654, %cst_305 {dimension_numbers = #tpu.dot_dimension_numbers<[1], [0], [0], [1], [0, 0, 1, 1], [], []>} : vector<75x30xf32>, vector<30x32xf32>, vector<75x32xf32> -> vector<75x32xf32>
    %cst_306 = arith.constant 0.000000e+00 : f32
    %657 = vector.broadcast %cst_306 : f32 to vector<15x32xf32>
    %658 = vector.broadcast %5 : vector<1x32xf32> to vector<15x32xf32>
    %659 = arith.addf %657, %658 : vector<15x32xf32>
    %660 = vector.extract_strided_slice %656 {offsets = [0, 0], sizes = [15, 32], strides = [1, 1]} : vector<75x32xf32> to vector<15x32xf32>
    %661 = vector.extract_strided_slice %2 {offsets = [0, 0, 0], sizes = [1, 32, 32], strides = [1, 1, 1]} : vector<5x32x32xf32> to vector<1x32x32xf32>
    %662 = vector.shape_cast %661 : vector<1x32x32xf32> to vector<32x32xf32>
    %cst_307 = arith.constant dense<0.000000e+00> : vector<15x32xf32>
    %663 = tpu.matmul %660, %662, %cst_307 {dimension_numbers = #tpu.dot_dimension_numbers<[1], [0], [0], [1], [0, 0, 1, 1], [], []>} : vector<15x32xf32>, vector<32x32xf32>, vector<15x32xf32> -> vector<15x32xf32>
    %664 = arith.addf %659, %663 : vector<15x32xf32>
    %665 = vector.extract_strided_slice %656 {offsets = [15, 0], sizes = [15, 32], strides = [1, 1]} : vector<75x32xf32> to vector<15x32xf32>
    %666 = vector.extract_strided_slice %2 {offsets = [1, 0, 0], sizes = [1, 32, 32], strides = [1, 1, 1]} : vector<5x32x32xf32> to vector<1x32x32xf32>
    %667 = vector.shape_cast %666 : vector<1x32x32xf32> to vector<32x32xf32>
    %cst_308 = arith.constant dense<0.000000e+00> : vector<15x32xf32>
    %668 = tpu.matmul %665, %667, %cst_308 {dimension_numbers = #tpu.dot_dimension_numbers<[1], [0], [0], [1], [0, 0, 1, 1], [], []>} : vector<15x32xf32>, vector<32x32xf32>, vector<15x32xf32> -> vector<15x32xf32>
    %669 = arith.addf %664, %668 : vector<15x32xf32>
    %670 = vector.extract_strided_slice %656 {offsets = [30, 0], sizes = [15, 32], strides = [1, 1]} : vector<75x32xf32> to vector<15x32xf32>
    %671 = vector.extract_strided_slice %2 {offsets = [2, 0, 0], sizes = [1, 32, 32], strides = [1, 1, 1]} : vector<5x32x32xf32> to vector<1x32x32xf32>
    %672 = vector.shape_cast %671 : vector<1x32x32xf32> to vector<32x32xf32>
    %cst_309 = arith.constant dense<0.000000e+00> : vector<15x32xf32>
    %673 = tpu.matmul %670, %672, %cst_309 {dimension_numbers = #tpu.dot_dimension_numbers<[1], [0], [0], [1], [0, 0, 1, 1], [], []>} : vector<15x32xf32>, vector<32x32xf32>, vector<15x32xf32> -> vector<15x32xf32>
    %674 = arith.addf %669, %673 : vector<15x32xf32>
    %675 = vector.extract_strided_slice %656 {offsets = [45, 0], sizes = [15, 32], strides = [1, 1]} : vector<75x32xf32> to vector<15x32xf32>
    %676 = vector.extract_strided_slice %2 {offsets = [3, 0, 0], sizes = [1, 32, 32], strides = [1, 1, 1]} : vector<5x32x32xf32> to vector<1x32x32xf32>
    %677 = vector.shape_cast %676 : vector<1x32x32xf32> to vector<32x32xf32>
    %cst_310 = arith.constant dense<0.000000e+00> : vector<15x32xf32>
    %678 = tpu.matmul %675, %677, %cst_310 {dimension_numbers = #tpu.dot_dimension_numbers<[1], [0], [0], [1], [0, 0, 1, 1], [], []>} : vector<15x32xf32>, vector<32x32xf32>, vector<15x32xf32> -> vector<15x32xf32>
    %679 = arith.addf %674, %678 : vector<15x32xf32>
    %680 = vector.extract_strided_slice %656 {offsets = [60, 0], sizes = [15, 32], strides = [1, 1]} : vector<75x32xf32> to vector<15x32xf32>
    %681 = vector.extract_strided_slice %2 {offsets = [4, 0, 0], sizes = [1, 32, 32], strides = [1, 1, 1]} : vector<5x32x32xf32> to vector<1x32x32xf32>
    %682 = vector.shape_cast %681 : vector<1x32x32xf32> to vector<32x32xf32>
    %cst_311 = arith.constant dense<0.000000e+00> : vector<15x32xf32>
    %683 = tpu.matmul %680, %682, %cst_311 {dimension_numbers = #tpu.dot_dimension_numbers<[1], [0], [0], [1], [0, 0, 1, 1], [], []>} : vector<15x32xf32>, vector<32x32xf32>, vector<15x32xf32> -> vector<15x32xf32>
    %684 = arith.addf %679, %683 : vector<15x32xf32>
    %cst_312 = arith.constant 0.000000e+00 : f32
    %685 = vector.broadcast %cst_312 : f32 to vector<15x32xf32>
    %686 = arith.maximumf %684, %685 : vector<15x32xf32>
    %687 = vector.extract_strided_slice %686 {offsets = [0, 0], sizes = [1, 32], strides = [1, 1]} : vector<15x32xf32> to vector<1x32xf32>
    %c0_313 = arith.constant 0 : index
    %c0_314 = arith.constant 0 : index
    %c0_315 = arith.constant 0 : index
    %688 = vector.load %arg5[%c0_313, %c0_314, %c0_315] : memref<15x32x32xf32, #tpu.memory_space<vmem>>, vector<1x32x32xf32>
    %689 = vector.shape_cast %688 : vector<1x32x32xf32> to vector<32x32xf32>
    %cst_316 = arith.constant dense<0.000000e+00> : vector<1x32xf32>
    %690 = tpu.matmul %687, %689, %cst_316 {dimension_numbers = #tpu.dot_dimension_numbers<[1], [0], [0], [1], [0, 0, 1, 1], [], []>} : vector<1x32xf32>, vector<32x32xf32>, vector<1x32xf32> -> vector<1x32xf32>
    %691 = arith.addf %6, %690 : vector<1x32xf32>
    %692 = vector.extract_strided_slice %686 {offsets = [1, 0], sizes = [1, 32], strides = [1, 1]} : vector<15x32xf32> to vector<1x32xf32>
    %c1_317 = arith.constant 1 : index
    %c0_318 = arith.constant 0 : index
    %c0_319 = arith.constant 0 : index
    %693 = vector.load %arg5[%c1_317, %c0_318, %c0_319] : memref<15x32x32xf32, #tpu.memory_space<vmem>>, vector<1x32x32xf32>
    %694 = vector.shape_cast %693 : vector<1x32x32xf32> to vector<32x32xf32>
    %cst_320 = arith.constant dense<0.000000e+00> : vector<1x32xf32>
    %695 = tpu.matmul %692, %694, %cst_320 {dimension_numbers = #tpu.dot_dimension_numbers<[1], [0], [0], [1], [0, 0, 1, 1], [], []>} : vector<1x32xf32>, vector<32x32xf32>, vector<1x32xf32> -> vector<1x32xf32>
    %696 = arith.addf %691, %695 : vector<1x32xf32>
    %697 = vector.extract_strided_slice %686 {offsets = [2, 0], sizes = [1, 32], strides = [1, 1]} : vector<15x32xf32> to vector<1x32xf32>
    %c2_321 = arith.constant 2 : index
    %c0_322 = arith.constant 0 : index
    %c0_323 = arith.constant 0 : index
    %698 = vector.load %arg5[%c2_321, %c0_322, %c0_323] : memref<15x32x32xf32, #tpu.memory_space<vmem>>, vector<1x32x32xf32>
    %699 = vector.shape_cast %698 : vector<1x32x32xf32> to vector<32x32xf32>
    %cst_324 = arith.constant dense<0.000000e+00> : vector<1x32xf32>
    %700 = tpu.matmul %697, %699, %cst_324 {dimension_numbers = #tpu.dot_dimension_numbers<[1], [0], [0], [1], [0, 0, 1, 1], [], []>} : vector<1x32xf32>, vector<32x32xf32>, vector<1x32xf32> -> vector<1x32xf32>
    %701 = arith.addf %696, %700 : vector<1x32xf32>
    %702 = vector.extract_strided_slice %686 {offsets = [3, 0], sizes = [1, 32], strides = [1, 1]} : vector<15x32xf32> to vector<1x32xf32>
    %c3_325 = arith.constant 3 : index
    %c0_326 = arith.constant 0 : index
    %c0_327 = arith.constant 0 : index
    %703 = vector.load %arg5[%c3_325, %c0_326, %c0_327] : memref<15x32x32xf32, #tpu.memory_space<vmem>>, vector<1x32x32xf32>
    %704 = vector.shape_cast %703 : vector<1x32x32xf32> to vector<32x32xf32>
    %cst_328 = arith.constant dense<0.000000e+00> : vector<1x32xf32>
    %705 = tpu.matmul %702, %704, %cst_328 {dimension_numbers = #tpu.dot_dimension_numbers<[1], [0], [0], [1], [0, 0, 1, 1], [], []>} : vector<1x32xf32>, vector<32x32xf32>, vector<1x32xf32> -> vector<1x32xf32>
    %706 = arith.addf %701, %705 : vector<1x32xf32>
    %707 = vector.extract_strided_slice %686 {offsets = [4, 0], sizes = [1, 32], strides = [1, 1]} : vector<15x32xf32> to vector<1x32xf32>
    %c4_329 = arith.constant 4 : index
    %c0_330 = arith.constant 0 : index
    %c0_331 = arith.constant 0 : index
    %708 = vector.load %arg5[%c4_329, %c0_330, %c0_331] : memref<15x32x32xf32, #tpu.memory_space<vmem>>, vector<1x32x32xf32>
    %709 = vector.shape_cast %708 : vector<1x32x32xf32> to vector<32x32xf32>
    %cst_332 = arith.constant dense<0.000000e+00> : vector<1x32xf32>
    %710 = tpu.matmul %707, %709, %cst_332 {dimension_numbers = #tpu.dot_dimension_numbers<[1], [0], [0], [1], [0, 0, 1, 1], [], []>} : vector<1x32xf32>, vector<32x32xf32>, vector<1x32xf32> -> vector<1x32xf32>
    %711 = arith.addf %706, %710 : vector<1x32xf32>
    %712 = vector.extract_strided_slice %686 {offsets = [5, 0], sizes = [1, 32], strides = [1, 1]} : vector<15x32xf32> to vector<1x32xf32>
    %c5_333 = arith.constant 5 : index
    %c0_334 = arith.constant 0 : index
    %c0_335 = arith.constant 0 : index
    %713 = vector.load %arg5[%c5_333, %c0_334, %c0_335] : memref<15x32x32xf32, #tpu.memory_space<vmem>>, vector<1x32x32xf32>
    %714 = vector.shape_cast %713 : vector<1x32x32xf32> to vector<32x32xf32>
    %cst_336 = arith.constant dense<0.000000e+00> : vector<1x32xf32>
    %715 = tpu.matmul %712, %714, %cst_336 {dimension_numbers = #tpu.dot_dimension_numbers<[1], [0], [0], [1], [0, 0, 1, 1], [], []>} : vector<1x32xf32>, vector<32x32xf32>, vector<1x32xf32> -> vector<1x32xf32>
    %716 = arith.addf %711, %715 : vector<1x32xf32>
    %717 = vector.extract_strided_slice %686 {offsets = [6, 0], sizes = [1, 32], strides = [1, 1]} : vector<15x32xf32> to vector<1x32xf32>
    %c6_337 = arith.constant 6 : index
    %c0_338 = arith.constant 0 : index
    %c0_339 = arith.constant 0 : index
    %718 = vector.load %arg5[%c6_337, %c0_338, %c0_339] : memref<15x32x32xf32, #tpu.memory_space<vmem>>, vector<1x32x32xf32>
    %719 = vector.shape_cast %718 : vector<1x32x32xf32> to vector<32x32xf32>
    %cst_340 = arith.constant dense<0.000000e+00> : vector<1x32xf32>
    %720 = tpu.matmul %717, %719, %cst_340 {dimension_numbers = #tpu.dot_dimension_numbers<[1], [0], [0], [1], [0, 0, 1, 1], [], []>} : vector<1x32xf32>, vector<32x32xf32>, vector<1x32xf32> -> vector<1x32xf32>
    %721 = arith.addf %716, %720 : vector<1x32xf32>
    %722 = vector.extract_strided_slice %686 {offsets = [7, 0], sizes = [1, 32], strides = [1, 1]} : vector<15x32xf32> to vector<1x32xf32>
    %c7_341 = arith.constant 7 : index
    %c0_342 = arith.constant 0 : index
    %c0_343 = arith.constant 0 : index
    %723 = vector.load %arg5[%c7_341, %c0_342, %c0_343] : memref<15x32x32xf32, #tpu.memory_space<vmem>>, vector<1x32x32xf32>
    %724 = vector.shape_cast %723 : vector<1x32x32xf32> to vector<32x32xf32>
    %cst_344 = arith.constant dense<0.000000e+00> : vector<1x32xf32>
    %725 = tpu.matmul %722, %724, %cst_344 {dimension_numbers = #tpu.dot_dimension_numbers<[1], [0], [0], [1], [0, 0, 1, 1], [], []>} : vector<1x32xf32>, vector<32x32xf32>, vector<1x32xf32> -> vector<1x32xf32>
    %726 = arith.addf %721, %725 : vector<1x32xf32>
    %727 = vector.extract_strided_slice %686 {offsets = [8, 0], sizes = [1, 32], strides = [1, 1]} : vector<15x32xf32> to vector<1x32xf32>
    %c8_345 = arith.constant 8 : index
    %c0_346 = arith.constant 0 : index
    %c0_347 = arith.constant 0 : index
    %728 = vector.load %arg5[%c8_345, %c0_346, %c0_347] : memref<15x32x32xf32, #tpu.memory_space<vmem>>, vector<1x32x32xf32>
    %729 = vector.shape_cast %728 : vector<1x32x32xf32> to vector<32x32xf32>
    %cst_348 = arith.constant dense<0.000000e+00> : vector<1x32xf32>
    %730 = tpu.matmul %727, %729, %cst_348 {dimension_numbers = #tpu.dot_dimension_numbers<[1], [0], [0], [1], [0, 0, 1, 1], [], []>} : vector<1x32xf32>, vector<32x32xf32>, vector<1x32xf32> -> vector<1x32xf32>
    %731 = arith.addf %726, %730 : vector<1x32xf32>
    %732 = vector.extract_strided_slice %686 {offsets = [9, 0], sizes = [1, 32], strides = [1, 1]} : vector<15x32xf32> to vector<1x32xf32>
    %c9_349 = arith.constant 9 : index
    %c0_350 = arith.constant 0 : index
    %c0_351 = arith.constant 0 : index
    %733 = vector.load %arg5[%c9_349, %c0_350, %c0_351] : memref<15x32x32xf32, #tpu.memory_space<vmem>>, vector<1x32x32xf32>
    %734 = vector.shape_cast %733 : vector<1x32x32xf32> to vector<32x32xf32>
    %cst_352 = arith.constant dense<0.000000e+00> : vector<1x32xf32>
    %735 = tpu.matmul %732, %734, %cst_352 {dimension_numbers = #tpu.dot_dimension_numbers<[1], [0], [0], [1], [0, 0, 1, 1], [], []>} : vector<1x32xf32>, vector<32x32xf32>, vector<1x32xf32> -> vector<1x32xf32>
    %736 = arith.addf %731, %735 : vector<1x32xf32>
    %737 = vector.extract_strided_slice %686 {offsets = [10, 0], sizes = [1, 32], strides = [1, 1]} : vector<15x32xf32> to vector<1x32xf32>
    %c10_353 = arith.constant 10 : index
    %c0_354 = arith.constant 0 : index
    %c0_355 = arith.constant 0 : index
    %738 = vector.load %arg5[%c10_353, %c0_354, %c0_355] : memref<15x32x32xf32, #tpu.memory_space<vmem>>, vector<1x32x32xf32>
    %739 = vector.shape_cast %738 : vector<1x32x32xf32> to vector<32x32xf32>
    %cst_356 = arith.constant dense<0.000000e+00> : vector<1x32xf32>
    %740 = tpu.matmul %737, %739, %cst_356 {dimension_numbers = #tpu.dot_dimension_numbers<[1], [0], [0], [1], [0, 0, 1, 1], [], []>} : vector<1x32xf32>, vector<32x32xf32>, vector<1x32xf32> -> vector<1x32xf32>
    %741 = arith.addf %736, %740 : vector<1x32xf32>
    %742 = vector.extract_strided_slice %686 {offsets = [11, 0], sizes = [1, 32], strides = [1, 1]} : vector<15x32xf32> to vector<1x32xf32>
    %c11_357 = arith.constant 11 : index
    %c0_358 = arith.constant 0 : index
    %c0_359 = arith.constant 0 : index
    %743 = vector.load %arg5[%c11_357, %c0_358, %c0_359] : memref<15x32x32xf32, #tpu.memory_space<vmem>>, vector<1x32x32xf32>
    %744 = vector.shape_cast %743 : vector<1x32x32xf32> to vector<32x32xf32>
    %cst_360 = arith.constant dense<0.000000e+00> : vector<1x32xf32>
    %745 = tpu.matmul %742, %744, %cst_360 {dimension_numbers = #tpu.dot_dimension_numbers<[1], [0], [0], [1], [0, 0, 1, 1], [], []>} : vector<1x32xf32>, vector<32x32xf32>, vector<1x32xf32> -> vector<1x32xf32>
    %746 = arith.addf %741, %745 : vector<1x32xf32>
    %747 = vector.extract_strided_slice %686 {offsets = [12, 0], sizes = [1, 32], strides = [1, 1]} : vector<15x32xf32> to vector<1x32xf32>
    %c12_361 = arith.constant 12 : index
    %c0_362 = arith.constant 0 : index
    %c0_363 = arith.constant 0 : index
    %748 = vector.load %arg5[%c12_361, %c0_362, %c0_363] : memref<15x32x32xf32, #tpu.memory_space<vmem>>, vector<1x32x32xf32>
    %749 = vector.shape_cast %748 : vector<1x32x32xf32> to vector<32x32xf32>
    %cst_364 = arith.constant dense<0.000000e+00> : vector<1x32xf32>
    %750 = tpu.matmul %747, %749, %cst_364 {dimension_numbers = #tpu.dot_dimension_numbers<[1], [0], [0], [1], [0, 0, 1, 1], [], []>} : vector<1x32xf32>, vector<32x32xf32>, vector<1x32xf32> -> vector<1x32xf32>
    %751 = arith.addf %746, %750 : vector<1x32xf32>
    %752 = vector.extract_strided_slice %686 {offsets = [13, 0], sizes = [1, 32], strides = [1, 1]} : vector<15x32xf32> to vector<1x32xf32>
    %c13_365 = arith.constant 13 : index
    %c0_366 = arith.constant 0 : index
    %c0_367 = arith.constant 0 : index
    %753 = vector.load %arg5[%c13_365, %c0_366, %c0_367] : memref<15x32x32xf32, #tpu.memory_space<vmem>>, vector<1x32x32xf32>
    %754 = vector.shape_cast %753 : vector<1x32x32xf32> to vector<32x32xf32>
    %cst_368 = arith.constant dense<0.000000e+00> : vector<1x32xf32>
    %755 = tpu.matmul %752, %754, %cst_368 {dimension_numbers = #tpu.dot_dimension_numbers<[1], [0], [0], [1], [0, 0, 1, 1], [], []>} : vector<1x32xf32>, vector<32x32xf32>, vector<1x32xf32> -> vector<1x32xf32>
    %756 = arith.addf %751, %755 : vector<1x32xf32>
    %757 = vector.extract_strided_slice %686 {offsets = [14, 0], sizes = [1, 32], strides = [1, 1]} : vector<15x32xf32> to vector<1x32xf32>
    %c14_369 = arith.constant 14 : index
    %c0_370 = arith.constant 0 : index
    %c0_371 = arith.constant 0 : index
    %758 = vector.load %arg5[%c14_369, %c0_370, %c0_371] : memref<15x32x32xf32, #tpu.memory_space<vmem>>, vector<1x32x32xf32>
    %759 = vector.shape_cast %758 : vector<1x32x32xf32> to vector<32x32xf32>
    %cst_372 = arith.constant dense<0.000000e+00> : vector<1x32xf32>
    %760 = tpu.matmul %757, %759, %cst_372 {dimension_numbers = #tpu.dot_dimension_numbers<[1], [0], [0], [1], [0, 0, 1, 1], [], []>} : vector<1x32xf32>, vector<32x32xf32>, vector<1x32xf32> -> vector<1x32xf32>
    %761 = arith.addf %756, %760 : vector<1x32xf32>
    %cst_373 = arith.constant 0.000000e+00 : f32
    %762 = vector.broadcast %cst_373 : f32 to vector<1x32xf32>
    %763 = arith.maximumf %761, %762 : vector<1x32xf32>
    %cst_374 = arith.constant dense<0.000000e+00> : vector<1x18xf32>
    %764 = tpu.matmul %763, %8, %cst_374 {dimension_numbers = #tpu.dot_dimension_numbers<[1], [0], [0], [1], [0, 0, 1, 1], [], []>} : vector<1x32xf32>, vector<32x18xf32>, vector<1x18xf32> -> vector<1x18xf32>
    %765 = arith.addf %764, %7 : vector<1x18xf32>
    %c0_375 = arith.constant 0 : index
    %c3_376 = arith.constant 3 : index
    %c0_377 = arith.constant 0 : index
    %766 = vector.load %arg7[%c0_375, %c3_376, %c0_377] : memref<1x4x18xf32, #tpu.memory_space<vmem>>, vector<1x1x18xf32>
    %767 = vector.shape_cast %766 : vector<1x1x18xf32> to vector<1x18xf32>
    %768 = vector.shape_cast %765 : vector<1x18xf32> to vector<1x1x18xf32>
    tpu.vector_store %arg7[%c0_375, %c3_376, %c0_377], %768 {strides = array<i32>} : memref<1x4x18xf32, #tpu.memory_space<vmem>>, vector<1x1x18xf32>,
    return
  }
  func.func @transform_0(%arg0: i32) -> (i32, i32, i32, i32) {
    %c0_i32 = arith.constant 0 : i32
    %c0_i32_0 = arith.constant 0 : i32
    %c0_i32_1 = arith.constant 0 : i32
    %c0_i32_2 = arith.constant 0 : i32
    return %arg0, %c0_i32, %c0_i32_0, %c0_i32_1 : i32, i32, i32, i32
  }
  func.func @transform_1(%arg0: i32) -> (i32, i32) {
    %c0_i32 = arith.constant 0 : i32
    %c0_i32_0 = arith.constant 0 : i32
    %c0_i32_1 = arith.constant 0 : i32
    return %c0_i32, %c0_i32_0 : i32, i32
  }
  func.func @transform_2(%arg0: i32) -> (i32, i32, i32) {
    %c0_i32 = arith.constant 0 : i32
    %c0_i32_0 = arith.constant 0 : i32
    %c0_i32_1 = arith.constant 0 : i32
    %c0_i32_2 = arith.constant 0 : i32
    return %c0_i32, %c0_i32_0, %c0_i32_1 : i32, i32, i32
  }
  func.func @transform_3(%arg0: i32) -> (i32, i32) {
    %c0_i32 = arith.constant 0 : i32
    %c0_i32_0 = arith.constant 0 : i32
    %c0_i32_1 = arith.constant 0 : i32
    return %c0_i32, %c0_i32_0 : i32, i32
  }
  func.func @transform_4(%arg0: i32) -> (i32, i32, i32) {
    %c0_i32 = arith.constant 0 : i32
    %c0_i32_0 = arith.constant 0 : i32
    %c0_i32_1 = arith.constant 0 : i32
    %c0_i32_2 = arith.constant 0 : i32
    return %c0_i32, %c0_i32_0, %c0_i32_1 : i32, i32, i32
  }
  func.func @transform_5(%arg0: i32) -> (i32, i32) {
    %c0_i32 = arith.constant 0 : i32
    %c0_i32_0 = arith.constant 0 : i32
    %c0_i32_1 = arith.constant 0 : i32
    return %c0_i32, %c0_i32_0 : i32, i32
  }
  func.func @transform_6(%arg0: i32) -> (i32, i32, i32) {
    %c0_i32 = arith.constant 0 : i32
    %c0_i32_0 = arith.constant 0 : i32
    %c0_i32_1 = arith.constant 0 : i32
    return %arg0, %c0_i32, %c0_i32_0 : i32, i32, i32
  }
}

module attributes {stable_mosaic.version = 11 : i64} {
  func.func @_gnn_kernel(%arg0: i32, %arg1: memref<1x4x21xf32, #tpu.memory_space<vmem>>, %arg2: memref<16x8xf32, #tpu.memory_space<vmem>>, %arg3: memref<4x16xf32, #tpu.memory_space<vmem>>, %arg4: memref<3x37x40xf32, #tpu.memory_space<vmem>>, %arg5: memref<3x32x16xf32, #tpu.memory_space<vmem>>, %arg6: memref<3x16x1xf32, #tpu.memory_space<vmem>>, %arg7: memref<3x64xf32, #tpu.memory_space<vmem>>, %arg8: memref<1x1x3xf32, #tpu.memory_space<vmem>>, %arg9: memref<1x4x4xf32, #tpu.memory_space<vmem>>, %arg10: memref<4x37xf32, #tpu.memory_space<vmem>>) attributes {dimension_semantics = [#tpu.dimension_semantics<parallel>], iteration_bounds = array<i64: 2>, scalar_prefetch = 0 : i64, scratch_operands = 1 : i64, tpu.core_type = #tpu.core_type<tc>, window_params = [{transform_indices = @transform_0, window_bounds = array<i64: 1, 4, 21>}, {pipeline_mode = #tpu.pipeline_mode<synchronous>, transform_indices = @transform_1, window_bounds = array<i64: 16, 8>}, {pipeline_mode = #tpu.pipeline_mode<synchronous>, transform_indices = @transform_2, window_bounds = array<i64: 4, 16>}, {pipeline_mode = #tpu.pipeline_mode<synchronous>, transform_indices = @transform_3, window_bounds = array<i64: 3, 37, 40>}, {pipeline_mode = #tpu.pipeline_mode<synchronous>, transform_indices = @transform_4, window_bounds = array<i64: 3, 32, 16>}, {pipeline_mode = #tpu.pipeline_mode<synchronous>, transform_indices = @transform_5, window_bounds = array<i64: 3, 16, 1>}, {pipeline_mode = #tpu.pipeline_mode<synchronous>, transform_indices = @transform_6, window_bounds = array<i64: 3, 64>}, {transform_indices = @transform_7, window_bounds = array<i64: 1, 1, 3>}, {transform_indices = @transform_8, window_bounds = array<i64: 1, 4, 4>}]} {
    %c0 = arith.constant 0 : index
    %c0_0 = arith.constant 0 : index
    %0 = vector.load %arg2[%c0, %c0_0] : memref<16x8xf32, #tpu.memory_space<vmem>>, vector<16x4xf32>
    %c0_1 = arith.constant 0 : index
    %c4 = arith.constant 4 : index
    %1 = vector.load %arg2[%c0_1, %c4] : memref<16x8xf32, #tpu.memory_space<vmem>>, vector<16x4xf32>
    %c0_2 = arith.constant 0 : index
    %c0_3 = arith.constant 0 : index
    %2 = vector.load %arg3[%c0_2, %c0_3] : memref<4x16xf32, #tpu.memory_space<vmem>>, vector<4x16xf32>
    %cst = arith.constant 0.000000e+00 : f32
    %3 = vector.broadcast %cst : f32 to vector<4x37xf32>
    %c0_4 = arith.constant 0 : index
    %c0_5 = arith.constant 0 : index
    %4 = vector.load %arg10[%c0_4, %c0_5] : memref<4x37xf32, #tpu.memory_space<vmem>>, vector<4x37xf32>
    tpu.vector_store %arg10[%c0_4, %c0_5], %3 {strides = array<i32>} : memref<4x37xf32, #tpu.memory_space<vmem>>, vector<4x37xf32>,
    %c0_6 = arith.constant 0 : index
    %c0_7 = arith.constant 0 : index
    %c0_8 = arith.constant 0 : index
    %5 = vector.load %arg1[%c0_6, %c0_7, %c0_8] : memref<1x4x21xf32, #tpu.memory_space<vmem>>, vector<1x4x21xf32>
    %6 = vector.shape_cast %5 : vector<1x4x21xf32> to vector<4x21xf32>
    %c0_9 = arith.constant 0 : index
    %c0_10 = arith.constant 0 : index
    %7 = vector.load %arg10[%c0_9, %c0_10] : memref<4x37xf32, #tpu.memory_space<vmem>>, vector<4x21xf32>
    tpu.vector_store %arg10[%c0_9, %c0_10], %6 {strides = array<i32>} : memref<4x37xf32, #tpu.memory_space<vmem>>, vector<4x21xf32>,
    %c0_11 = arith.constant 0 : index
    %c0_12 = arith.constant 0 : index
    %8 = vector.load %arg10[%c0_11, %c0_12] : memref<4x37xf32, #tpu.memory_space<vmem>>, vector<4x37xf32>
    %cst_13 = arith.constant dense<0.000000e+00> : vector<16x37xf32>
    %9 = tpu.matmul %0, %8, %cst_13 {dimension_numbers = #tpu.dot_dimension_numbers<[1], [0], [0], [1], [0, 0, 1, 1], [], []>} : vector<16x4xf32>, vector<4x37xf32>, vector<16x37xf32> -> vector<16x37xf32>
    %10 = math.absf %9 : vector<16x37xf32>
    %c0_14 = arith.constant 0 : index
    %c0_15 = arith.constant 0 : index
    %c0_16 = arith.constant 0 : index
    %11 = vector.load %arg4[%c0_14, %c0_15, %c0_16] : memref<3x37x40xf32, #tpu.memory_space<vmem>>, vector<1x37x32xf32>
    %12 = vector.shape_cast %11 : vector<1x37x32xf32> to vector<37x32xf32>
    %cst_17 = arith.constant dense<0.000000e+00> : vector<16x32xf32>
    %13 = tpu.matmul %10, %12, %cst_17 {dimension_numbers = #tpu.dot_dimension_numbers<[1], [0], [0], [1], [0, 0, 1, 1], [], []>} : vector<16x37xf32>, vector<37x32xf32>, vector<16x32xf32> -> vector<16x32xf32>
    %c0_18 = arith.constant 0 : index
    %c0_19 = arith.constant 0 : index
    %14 = vector.load %arg7[%c0_18, %c0_19] : memref<3x64xf32, #tpu.memory_space<vmem>>, vector<1x32xf32>
    %15 = vector.broadcast %14 : vector<1x32xf32> to vector<16x32xf32>
    %16 = arith.addf %13, %15 : vector<16x32xf32>
    %cst_20 = arith.constant 0.000000e+00 : f32
    %17 = vector.broadcast %cst_20 : f32 to vector<16x32xf32>
    %18 = arith.cmpf oge, %16, %17 : vector<16x32xf32>
    %cst_21 = arith.constant 0.00999999977 : f32
    %19 = vector.broadcast %cst_21 : f32 to vector<16x32xf32>
    %20 = arith.mulf %16, %19 : vector<16x32xf32>
    %21 = arith.select %18, %16, %20 : vector<16x32xi1>, vector<16x32xf32>
    %c0_22 = arith.constant 0 : index
    %c0_23 = arith.constant 0 : index
    %c0_24 = arith.constant 0 : index
    %22 = vector.load %arg5[%c0_22, %c0_23, %c0_24] : memref<3x32x16xf32, #tpu.memory_space<vmem>>, vector<1x32x16xf32>
    %23 = vector.shape_cast %22 : vector<1x32x16xf32> to vector<32x16xf32>
    %cst_25 = arith.constant dense<0.000000e+00> : vector<16x16xf32>
    %24 = tpu.matmul %21, %23, %cst_25 {dimension_numbers = #tpu.dot_dimension_numbers<[1], [0], [0], [1], [0, 0, 1, 1], [], []>} : vector<16x32xf32>, vector<32x16xf32>, vector<16x16xf32> -> vector<16x16xf32>
    %c0_26 = arith.constant 0 : index
    %c32 = arith.constant 32 : index
    %25 = vector.load %arg7[%c0_26, %c32] : memref<3x64xf32, #tpu.memory_space<vmem>>, vector<1x16xf32>
    %26 = vector.broadcast %25 : vector<1x16xf32> to vector<16x16xf32>
    %27 = arith.addf %24, %26 : vector<16x16xf32>
    %cst_27 = arith.constant 0.000000e+00 : f32
    %28 = vector.broadcast %cst_27 : f32 to vector<16x16xf32>
    %29 = arith.cmpf oge, %27, %28 : vector<16x16xf32>
    %cst_28 = arith.constant 0.00999999977 : f32
    %30 = vector.broadcast %cst_28 : f32 to vector<16x16xf32>
    %31 = arith.mulf %27, %30 : vector<16x16xf32>
    %32 = arith.select %29, %27, %31 : vector<16x16xi1>, vector<16x16xf32>
    %c0_29 = arith.constant 0 : index
    %c0_30 = arith.constant 0 : index
    %c0_31 = arith.constant 0 : index
    %33 = vector.load %arg6[%c0_29, %c0_30, %c0_31] : memref<3x16x1xf32, #tpu.memory_space<vmem>>, vector<1x16x1xf32>
    %34 = vector.shape_cast %33 : vector<1x16x1xf32> to vector<16x1xf32>
    %cst_32 = arith.constant dense<0.000000e+00> : vector<16x1xf32>
    %35 = tpu.matmul %32, %34, %cst_32 {dimension_numbers = #tpu.dot_dimension_numbers<[1], [0], [0], [1], [0, 0, 1, 1], [], []>} : vector<16x16xf32>, vector<16x1xf32>, vector<16x1xf32> -> vector<16x1xf32>
    %c0_33 = arith.constant 0 : index
    %c56 = arith.constant 56 : index
    %36 = vector.load %arg7[%c0_33, %c56] : memref<3x64xf32, #tpu.memory_space<vmem>>, vector<1x1xf32>
    %37 = vector.broadcast %36 : vector<1x1xf32> to vector<16x1xf32>
    %38 = arith.addf %35, %37 : vector<16x1xf32>
    %39 = vector.broadcast %38 : vector<16x1xf32> to vector<16x4xf32>
    %40 = arith.mulf %39, %1 : vector<16x4xf32>
    %cst_34 = arith.constant dense<0.000000e+00> : vector<4x4xf32>
    %41 = tpu.matmul %2, %40, %cst_34 {dimension_numbers = #tpu.dot_dimension_numbers<[1], [0], [0], [1], [0, 0, 1, 1], [], []>} : vector<4x16xf32>, vector<16x4xf32>, vector<4x4xf32> -> vector<4x4xf32>
    %cst_35 = arith.constant dense<0xFF800000> : vector<4xf32>
    %42 = vector.multi_reduction <maximumf>, %41, %cst_35 [1] : vector<4x4xf32> to vector<4xf32>
    %43 = vector.shape_cast %42 : vector<4xf32> to vector<4x1xf32>
    %44 = vector.broadcast %43 : vector<4x1xf32> to vector<4x4xf32>
    %45 = arith.subf %41, %44 : vector<4x4xf32>
    %46 = math.exp %45 : vector<4x4xf32>
    %cst_36 = arith.constant dense<0.000000e+00> : vector<4xf32>
    %47 = vector.multi_reduction <add>, %46, %cst_36 [1] : vector<4x4xf32> to vector<4xf32>
    %48 = vector.shape_cast %47 : vector<4xf32> to vector<4x1xf32>
    %49 = vector.broadcast %48 : vector<4x1xf32> to vector<4x4xf32>
    %50 = arith.divf %46, %49 : vector<4x4xf32>
    %cst_37 = arith.constant dense<0.000000e+00> : vector<4x37xf32>
    %51 = tpu.matmul %50, %8, %cst_37 {dimension_numbers = #tpu.dot_dimension_numbers<[1], [0], [0], [1], [0, 0, 1, 1], [], []>} : vector<4x4xf32>, vector<4x37xf32>, vector<4x37xf32> -> vector<4x37xf32>
    %c0_38 = arith.constant 0 : index
    %c0_39 = arith.constant 0 : index
    %c32_40 = arith.constant 32 : index
    %52 = vector.load %arg4[%c0_38, %c0_39, %c32_40] : memref<3x37x40xf32, #tpu.memory_space<vmem>>, vector<1x37x8xf32>
    %53 = vector.shape_cast %52 : vector<1x37x8xf32> to vector<37x8xf32>
    %cst_41 = arith.constant dense<0.000000e+00> : vector<4x8xf32>
    %54 = tpu.matmul %51, %53, %cst_41 {dimension_numbers = #tpu.dot_dimension_numbers<[1], [0], [0], [1], [0, 0, 1, 1], [], []>} : vector<4x37xf32>, vector<37x8xf32>, vector<4x8xf32> -> vector<4x8xf32>
    %c0_42 = arith.constant 0 : index
    %c48 = arith.constant 48 : index
    %55 = vector.load %arg7[%c0_42, %c48] : memref<3x64xf32, #tpu.memory_space<vmem>>, vector<1x8xf32>
    %56 = vector.broadcast %55 : vector<1x8xf32> to vector<4x8xf32>
    %57 = arith.addf %54, %56 : vector<4x8xf32>
    %cst_43 = arith.constant 0.000000e+00 : f32
    %58 = vector.broadcast %cst_43 : f32 to vector<4x8xf32>
    %59 = arith.cmpf oge, %57, %58 : vector<4x8xf32>
    %cst_44 = arith.constant 1.000000e-01 : f32
    %60 = vector.broadcast %cst_44 : f32 to vector<4x8xf32>
    %61 = arith.mulf %57, %60 : vector<4x8xf32>
    %62 = arith.select %59, %57, %61 : vector<4x8xi1>, vector<4x8xf32>
    %c0_45 = arith.constant 0 : index
    %c21 = arith.constant 21 : index
    %63 = vector.load %arg10[%c0_45, %c21] : memref<4x37xf32, #tpu.memory_space<vmem>>, vector<4x8xf32>
    tpu.vector_store %arg10[%c0_45, %c21], %62 {strides = array<i32>} : memref<4x37xf32, #tpu.memory_space<vmem>>, vector<4x8xf32>,
    %c0_46 = arith.constant 0 : index
    %c0_47 = arith.constant 0 : index
    %64 = vector.load %arg10[%c0_46, %c0_47] : memref<4x37xf32, #tpu.memory_space<vmem>>, vector<4x37xf32>
    %cst_48 = arith.constant dense<0.000000e+00> : vector<16x37xf32>
    %65 = tpu.matmul %0, %64, %cst_48 {dimension_numbers = #tpu.dot_dimension_numbers<[1], [0], [0], [1], [0, 0, 1, 1], [], []>} : vector<16x4xf32>, vector<4x37xf32>, vector<16x37xf32> -> vector<16x37xf32>
    %66 = math.absf %65 : vector<16x37xf32>
    %c1 = arith.constant 1 : index
    %c0_49 = arith.constant 0 : index
    %c0_50 = arith.constant 0 : index
    %67 = vector.load %arg4[%c1, %c0_49, %c0_50] : memref<3x37x40xf32, #tpu.memory_space<vmem>>, vector<1x37x32xf32>
    %68 = vector.shape_cast %67 : vector<1x37x32xf32> to vector<37x32xf32>
    %cst_51 = arith.constant dense<0.000000e+00> : vector<16x32xf32>
    %69 = tpu.matmul %66, %68, %cst_51 {dimension_numbers = #tpu.dot_dimension_numbers<[1], [0], [0], [1], [0, 0, 1, 1], [], []>} : vector<16x37xf32>, vector<37x32xf32>, vector<16x32xf32> -> vector<16x32xf32>
    %c1_52 = arith.constant 1 : index
    %c0_53 = arith.constant 0 : index
    %70 = vector.load %arg7[%c1_52, %c0_53] : memref<3x64xf32, #tpu.memory_space<vmem>>, vector<1x32xf32>
    %71 = vector.broadcast %70 : vector<1x32xf32> to vector<16x32xf32>
    %72 = arith.addf %69, %71 : vector<16x32xf32>
    %cst_54 = arith.constant 0.000000e+00 : f32
    %73 = vector.broadcast %cst_54 : f32 to vector<16x32xf32>
    %74 = arith.cmpf oge, %72, %73 : vector<16x32xf32>
    %cst_55 = arith.constant 0.00999999977 : f32
    %75 = vector.broadcast %cst_55 : f32 to vector<16x32xf32>
    %76 = arith.mulf %72, %75 : vector<16x32xf32>
    %77 = arith.select %74, %72, %76 : vector<16x32xi1>, vector<16x32xf32>
    %c1_56 = arith.constant 1 : index
    %c0_57 = arith.constant 0 : index
    %c0_58 = arith.constant 0 : index
    %78 = vector.load %arg5[%c1_56, %c0_57, %c0_58] : memref<3x32x16xf32, #tpu.memory_space<vmem>>, vector<1x32x16xf32>
    %79 = vector.shape_cast %78 : vector<1x32x16xf32> to vector<32x16xf32>
    %cst_59 = arith.constant dense<0.000000e+00> : vector<16x16xf32>
    %80 = tpu.matmul %77, %79, %cst_59 {dimension_numbers = #tpu.dot_dimension_numbers<[1], [0], [0], [1], [0, 0, 1, 1], [], []>} : vector<16x32xf32>, vector<32x16xf32>, vector<16x16xf32> -> vector<16x16xf32>
    %c1_60 = arith.constant 1 : index
    %c32_61 = arith.constant 32 : index
    %81 = vector.load %arg7[%c1_60, %c32_61] : memref<3x64xf32, #tpu.memory_space<vmem>>, vector<1x16xf32>
    %82 = vector.broadcast %81 : vector<1x16xf32> to vector<16x16xf32>
    %83 = arith.addf %80, %82 : vector<16x16xf32>
    %cst_62 = arith.constant 0.000000e+00 : f32
    %84 = vector.broadcast %cst_62 : f32 to vector<16x16xf32>
    %85 = arith.cmpf oge, %83, %84 : vector<16x16xf32>
    %cst_63 = arith.constant 0.00999999977 : f32
    %86 = vector.broadcast %cst_63 : f32 to vector<16x16xf32>
    %87 = arith.mulf %83, %86 : vector<16x16xf32>
    %88 = arith.select %85, %83, %87 : vector<16x16xi1>, vector<16x16xf32>
    %c1_64 = arith.constant 1 : index
    %c0_65 = arith.constant 0 : index
    %c0_66 = arith.constant 0 : index
    %89 = vector.load %arg6[%c1_64, %c0_65, %c0_66] : memref<3x16x1xf32, #tpu.memory_space<vmem>>, vector<1x16x1xf32>
    %90 = vector.shape_cast %89 : vector<1x16x1xf32> to vector<16x1xf32>
    %cst_67 = arith.constant dense<0.000000e+00> : vector<16x1xf32>
    %91 = tpu.matmul %88, %90, %cst_67 {dimension_numbers = #tpu.dot_dimension_numbers<[1], [0], [0], [1], [0, 0, 1, 1], [], []>} : vector<16x16xf32>, vector<16x1xf32>, vector<16x1xf32> -> vector<16x1xf32>
    %c1_68 = arith.constant 1 : index
    %c56_69 = arith.constant 56 : index
    %92 = vector.load %arg7[%c1_68, %c56_69] : memref<3x64xf32, #tpu.memory_space<vmem>>, vector<1x1xf32>
    %93 = vector.broadcast %92 : vector<1x1xf32> to vector<16x1xf32>
    %94 = arith.addf %91, %93 : vector<16x1xf32>
    %95 = vector.broadcast %94 : vector<16x1xf32> to vector<16x4xf32>
    %96 = arith.mulf %95, %1 : vector<16x4xf32>
    %cst_70 = arith.constant dense<0.000000e+00> : vector<4x4xf32>
    %97 = tpu.matmul %2, %96, %cst_70 {dimension_numbers = #tpu.dot_dimension_numbers<[1], [0], [0], [1], [0, 0, 1, 1], [], []>} : vector<4x16xf32>, vector<16x4xf32>, vector<4x4xf32> -> vector<4x4xf32>
    %cst_71 = arith.constant dense<0xFF800000> : vector<4xf32>
    %98 = vector.multi_reduction <maximumf>, %97, %cst_71 [1] : vector<4x4xf32> to vector<4xf32>
    %99 = vector.shape_cast %98 : vector<4xf32> to vector<4x1xf32>
    %100 = vector.broadcast %99 : vector<4x1xf32> to vector<4x4xf32>
    %101 = arith.subf %97, %100 : vector<4x4xf32>
    %102 = math.exp %101 : vector<4x4xf32>
    %cst_72 = arith.constant dense<0.000000e+00> : vector<4xf32>
    %103 = vector.multi_reduction <add>, %102, %cst_72 [1] : vector<4x4xf32> to vector<4xf32>
    %104 = vector.shape_cast %103 : vector<4xf32> to vector<4x1xf32>
    %105 = vector.broadcast %104 : vector<4x1xf32> to vector<4x4xf32>
    %106 = arith.divf %102, %105 : vector<4x4xf32>
    %cst_73 = arith.constant dense<0.000000e+00> : vector<4x37xf32>
    %107 = tpu.matmul %106, %64, %cst_73 {dimension_numbers = #tpu.dot_dimension_numbers<[1], [0], [0], [1], [0, 0, 1, 1], [], []>} : vector<4x4xf32>, vector<4x37xf32>, vector<4x37xf32> -> vector<4x37xf32>
    %c1_74 = arith.constant 1 : index
    %c0_75 = arith.constant 0 : index
    %c32_76 = arith.constant 32 : index
    %108 = vector.load %arg4[%c1_74, %c0_75, %c32_76] : memref<3x37x40xf32, #tpu.memory_space<vmem>>, vector<1x37x8xf32>
    %109 = vector.shape_cast %108 : vector<1x37x8xf32> to vector<37x8xf32>
    %cst_77 = arith.constant dense<0.000000e+00> : vector<4x8xf32>
    %110 = tpu.matmul %107, %109, %cst_77 {dimension_numbers = #tpu.dot_dimension_numbers<[1], [0], [0], [1], [0, 0, 1, 1], [], []>} : vector<4x37xf32>, vector<37x8xf32>, vector<4x8xf32> -> vector<4x8xf32>
    %c1_78 = arith.constant 1 : index
    %c48_79 = arith.constant 48 : index
    %111 = vector.load %arg7[%c1_78, %c48_79] : memref<3x64xf32, #tpu.memory_space<vmem>>, vector<1x8xf32>
    %112 = vector.broadcast %111 : vector<1x8xf32> to vector<4x8xf32>
    %113 = arith.addf %110, %112 : vector<4x8xf32>
    %cst_80 = arith.constant 0.000000e+00 : f32
    %114 = vector.broadcast %cst_80 : f32 to vector<4x8xf32>
    %115 = arith.cmpf oge, %113, %114 : vector<4x8xf32>
    %cst_81 = arith.constant 1.000000e-01 : f32
    %116 = vector.broadcast %cst_81 : f32 to vector<4x8xf32>
    %117 = arith.mulf %113, %116 : vector<4x8xf32>
    %118 = arith.select %115, %113, %117 : vector<4x8xi1>, vector<4x8xf32>
    %c0_82 = arith.constant 0 : index
    %c29 = arith.constant 29 : index
    %119 = vector.load %arg10[%c0_82, %c29] : memref<4x37xf32, #tpu.memory_space<vmem>>, vector<4x8xf32>
    tpu.vector_store %arg10[%c0_82, %c29], %118 {strides = array<i32>} : memref<4x37xf32, #tpu.memory_space<vmem>>, vector<4x8xf32>,
    %c0_83 = arith.constant 0 : index
    %c0_84 = arith.constant 0 : index
    %120 = vector.load %arg10[%c0_83, %c0_84] : memref<4x37xf32, #tpu.memory_space<vmem>>, vector<4x37xf32>
    %cst_85 = arith.constant dense<0.000000e+00> : vector<16x37xf32>
    %121 = tpu.matmul %0, %120, %cst_85 {dimension_numbers = #tpu.dot_dimension_numbers<[1], [0], [0], [1], [0, 0, 1, 1], [], []>} : vector<16x4xf32>, vector<4x37xf32>, vector<16x37xf32> -> vector<16x37xf32>
    %122 = math.absf %121 : vector<16x37xf32>
    %c2 = arith.constant 2 : index
    %c0_86 = arith.constant 0 : index
    %c0_87 = arith.constant 0 : index
    %123 = vector.load %arg4[%c2, %c0_86, %c0_87] : memref<3x37x40xf32, #tpu.memory_space<vmem>>, vector<1x37x32xf32>
    %124 = vector.shape_cast %123 : vector<1x37x32xf32> to vector<37x32xf32>
    %cst_88 = arith.constant dense<0.000000e+00> : vector<16x32xf32>
    %125 = tpu.matmul %122, %124, %cst_88 {dimension_numbers = #tpu.dot_dimension_numbers<[1], [0], [0], [1], [0, 0, 1, 1], [], []>} : vector<16x37xf32>, vector<37x32xf32>, vector<16x32xf32> -> vector<16x32xf32>
    %c2_89 = arith.constant 2 : index
    %c0_90 = arith.constant 0 : index
    %126 = vector.load %arg7[%c2_89, %c0_90] : memref<3x64xf32, #tpu.memory_space<vmem>>, vector<1x32xf32>
    %127 = vector.broadcast %126 : vector<1x32xf32> to vector<16x32xf32>
    %128 = arith.addf %125, %127 : vector<16x32xf32>
    %cst_91 = arith.constant 0.000000e+00 : f32
    %129 = vector.broadcast %cst_91 : f32 to vector<16x32xf32>
    %130 = arith.cmpf oge, %128, %129 : vector<16x32xf32>
    %cst_92 = arith.constant 0.00999999977 : f32
    %131 = vector.broadcast %cst_92 : f32 to vector<16x32xf32>
    %132 = arith.mulf %128, %131 : vector<16x32xf32>
    %133 = arith.select %130, %128, %132 : vector<16x32xi1>, vector<16x32xf32>
    %c2_93 = arith.constant 2 : index
    %c0_94 = arith.constant 0 : index
    %c0_95 = arith.constant 0 : index
    %134 = vector.load %arg5[%c2_93, %c0_94, %c0_95] : memref<3x32x16xf32, #tpu.memory_space<vmem>>, vector<1x32x16xf32>
    %135 = vector.shape_cast %134 : vector<1x32x16xf32> to vector<32x16xf32>
    %cst_96 = arith.constant dense<0.000000e+00> : vector<16x16xf32>
    %136 = tpu.matmul %133, %135, %cst_96 {dimension_numbers = #tpu.dot_dimension_numbers<[1], [0], [0], [1], [0, 0, 1, 1], [], []>} : vector<16x32xf32>, vector<32x16xf32>, vector<16x16xf32> -> vector<16x16xf32>
    %c2_97 = arith.constant 2 : index
    %c32_98 = arith.constant 32 : index
    %137 = vector.load %arg7[%c2_97, %c32_98] : memref<3x64xf32, #tpu.memory_space<vmem>>, vector<1x16xf32>
    %138 = vector.broadcast %137 : vector<1x16xf32> to vector<16x16xf32>
    %139 = arith.addf %136, %138 : vector<16x16xf32>
    %cst_99 = arith.constant 0.000000e+00 : f32
    %140 = vector.broadcast %cst_99 : f32 to vector<16x16xf32>
    %141 = arith.cmpf oge, %139, %140 : vector<16x16xf32>
    %cst_100 = arith.constant 0.00999999977 : f32
    %142 = vector.broadcast %cst_100 : f32 to vector<16x16xf32>
    %143 = arith.mulf %139, %142 : vector<16x16xf32>
    %144 = arith.select %141, %139, %143 : vector<16x16xi1>, vector<16x16xf32>
    %c2_101 = arith.constant 2 : index
    %c0_102 = arith.constant 0 : index
    %c0_103 = arith.constant 0 : index
    %145 = vector.load %arg6[%c2_101, %c0_102, %c0_103] : memref<3x16x1xf32, #tpu.memory_space<vmem>>, vector<1x16x1xf32>
    %146 = vector.shape_cast %145 : vector<1x16x1xf32> to vector<16x1xf32>
    %cst_104 = arith.constant dense<0.000000e+00> : vector<16x1xf32>
    %147 = tpu.matmul %144, %146, %cst_104 {dimension_numbers = #tpu.dot_dimension_numbers<[1], [0], [0], [1], [0, 0, 1, 1], [], []>} : vector<16x16xf32>, vector<16x1xf32>, vector<16x1xf32> -> vector<16x1xf32>
    %c2_105 = arith.constant 2 : index
    %c56_106 = arith.constant 56 : index
    %148 = vector.load %arg7[%c2_105, %c56_106] : memref<3x64xf32, #tpu.memory_space<vmem>>, vector<1x1xf32>
    %149 = vector.broadcast %148 : vector<1x1xf32> to vector<16x1xf32>
    %150 = arith.addf %147, %149 : vector<16x1xf32>
    %151 = vector.broadcast %150 : vector<16x1xf32> to vector<16x4xf32>
    %152 = arith.mulf %151, %1 : vector<16x4xf32>
    %cst_107 = arith.constant dense<0.000000e+00> : vector<4x4xf32>
    %153 = tpu.matmul %2, %152, %cst_107 {dimension_numbers = #tpu.dot_dimension_numbers<[1], [0], [0], [1], [0, 0, 1, 1], [], []>} : vector<4x16xf32>, vector<16x4xf32>, vector<4x4xf32> -> vector<4x4xf32>
    %cst_108 = arith.constant dense<0xFF800000> : vector<4xf32>
    %154 = vector.multi_reduction <maximumf>, %153, %cst_108 [1] : vector<4x4xf32> to vector<4xf32>
    %155 = vector.shape_cast %154 : vector<4xf32> to vector<4x1xf32>
    %156 = vector.broadcast %155 : vector<4x1xf32> to vector<4x4xf32>
    %157 = arith.subf %153, %156 : vector<4x4xf32>
    %158 = math.exp %157 : vector<4x4xf32>
    %cst_109 = arith.constant dense<0.000000e+00> : vector<4xf32>
    %159 = vector.multi_reduction <add>, %158, %cst_109 [1] : vector<4x4xf32> to vector<4xf32>
    %160 = vector.shape_cast %159 : vector<4xf32> to vector<4x1xf32>
    %161 = vector.broadcast %160 : vector<4x1xf32> to vector<4x4xf32>
    %162 = arith.divf %158, %161 : vector<4x4xf32>
    %c0_110 = arith.constant 0 : index
    %c0_111 = arith.constant 0 : index
    %c0_112 = arith.constant 0 : index
    %163 = vector.load %arg9[%c0_110, %c0_111, %c0_112] : memref<1x4x4xf32, #tpu.memory_space<vmem>>, vector<1x4x4xf32>
    %164 = vector.shape_cast %163 : vector<1x4x4xf32> to vector<4x4xf32>
    %165 = vector.shape_cast %162 : vector<4x4xf32> to vector<1x4x4xf32>
    tpu.vector_store %arg9[%c0_110, %c0_111, %c0_112], %165 {strides = array<i32>} : memref<1x4x4xf32, #tpu.memory_space<vmem>>, vector<1x4x4xf32>,
    %166 = vector.extract_strided_slice %162 {offsets = [0, 0], sizes = [1, 4], strides = [1, 1]} : vector<4x4xf32> to vector<1x4xf32>
    %cst_113 = arith.constant dense<0.000000e+00> : vector<1x37xf32>
    %167 = tpu.matmul %166, %120, %cst_113 {dimension_numbers = #tpu.dot_dimension_numbers<[1], [0], [0], [1], [0, 0, 1, 1], [], []>} : vector<1x4xf32>, vector<4x37xf32>, vector<1x37xf32> -> vector<1x37xf32>
    %c2_114 = arith.constant 2 : index
    %c0_115 = arith.constant 0 : index
    %c32_116 = arith.constant 32 : index
    %168 = vector.load %arg4[%c2_114, %c0_115, %c32_116] : memref<3x37x40xf32, #tpu.memory_space<vmem>>, vector<1x37x8xf32>
    %169 = vector.shape_cast %168 : vector<1x37x8xf32> to vector<37x8xf32>
    %cst_117 = arith.constant dense<0.000000e+00> : vector<1x8xf32>
    %170 = tpu.matmul %167, %169, %cst_117 {dimension_numbers = #tpu.dot_dimension_numbers<[1], [0], [0], [1], [0, 0, 1, 1], [], []>} : vector<1x37xf32>, vector<37x8xf32>, vector<1x8xf32> -> vector<1x8xf32>
    %c2_118 = arith.constant 2 : index
    %c48_119 = arith.constant 48 : index
    %171 = vector.load %arg7[%c2_118, %c48_119] : memref<3x64xf32, #tpu.memory_space<vmem>>, vector<1x8xf32>
    %172 = arith.addf %170, %171 : vector<1x8xf32>
    %173 = vector.extract_strided_slice %172 {offsets = [0, 0], sizes = [1, 3], strides = [1, 1]} : vector<1x8xf32> to vector<1x3xf32>
    %cst_120 = arith.constant dense<0xFF800000> : vector<1xf32>
    %174 = vector.multi_reduction <maximumf>, %173, %cst_120 [1] : vector<1x3xf32> to vector<1xf32>
    %175 = vector.shape_cast %174 : vector<1xf32> to vector<1x1xf32>
    %176 = vector.broadcast %175 : vector<1x1xf32> to vector<1x3xf32>
    %177 = arith.subf %173, %176 : vector<1x3xf32>
    %178 = math.exp %177 : vector<1x3xf32>
    %cst_121 = arith.constant dense<0.000000e+00> : vector<1xf32>
    %179 = vector.multi_reduction <add>, %178, %cst_121 [1] : vector<1x3xf32> to vector<1xf32>
    %180 = vector.shape_cast %179 : vector<1xf32> to vector<1x1xf32>
    %181 = math.log %180 : vector<1x1xf32>
    %182 = vector.broadcast %175 : vector<1x1xf32> to vector<1x3xf32>
    %183 = arith.subf %173, %182 : vector<1x3xf32>
    %184 = vector.broadcast %181 : vector<1x1xf32> to vector<1x3xf32>
    %185 = arith.subf %183, %184 : vector<1x3xf32>
    %c0_122 = arith.constant 0 : index
    %c0_123 = arith.constant 0 : index
    %c0_124 = arith.constant 0 : index
    %186 = vector.load %arg8[%c0_122, %c0_123, %c0_124] : memref<1x1x3xf32, #tpu.memory_space<vmem>>, vector<1x1x3xf32>
    %187 = vector.shape_cast %186 : vector<1x1x3xf32> to vector<1x3xf32>
    %188 = vector.shape_cast %185 : vector<1x3xf32> to vector<1x1x3xf32>
    tpu.vector_store %arg8[%c0_122, %c0_123, %c0_124], %188 {strides = array<i32>} : memref<1x1x3xf32, #tpu.memory_space<vmem>>, vector<1x1x3xf32>,
    return
  }
  func.func @transform_0(%arg0: i32) -> (i32, i32, i32) {
    %c0_i32 = arith.constant 0 : i32
    %c0_i32_0 = arith.constant 0 : i32
    %c0_i32_1 = arith.constant 0 : i32
    return %arg0, %c0_i32, %c0_i32_0 : i32, i32, i32
  }
  func.func @transform_1(%arg0: i32) -> (i32, i32) {
    %c0_i32 = arith.constant 0 : i32
    %c0_i32_0 = arith.constant 0 : i32
    %c0_i32_1 = arith.constant 0 : i32
    return %c0_i32, %c0_i32_0 : i32, i32
  }
  func.func @transform_2(%arg0: i32) -> (i32, i32) {
    %c0_i32 = arith.constant 0 : i32
    %c0_i32_0 = arith.constant 0 : i32
    %c0_i32_1 = arith.constant 0 : i32
    return %c0_i32, %c0_i32_0 : i32, i32
  }
  func.func @transform_3(%arg0: i32) -> (i32, i32, i32) {
    %c0_i32 = arith.constant 0 : i32
    %c0_i32_0 = arith.constant 0 : i32
    %c0_i32_1 = arith.constant 0 : i32
    %c0_i32_2 = arith.constant 0 : i32
    return %c0_i32, %c0_i32_0, %c0_i32_1 : i32, i32, i32
  }
  func.func @transform_4(%arg0: i32) -> (i32, i32, i32) {
    %c0_i32 = arith.constant 0 : i32
    %c0_i32_0 = arith.constant 0 : i32
    %c0_i32_1 = arith.constant 0 : i32
    %c0_i32_2 = arith.constant 0 : i32
    return %c0_i32, %c0_i32_0, %c0_i32_1 : i32, i32, i32
  }
  func.func @transform_5(%arg0: i32) -> (i32, i32, i32) {
    %c0_i32 = arith.constant 0 : i32
    %c0_i32_0 = arith.constant 0 : i32
    %c0_i32_1 = arith.constant 0 : i32
    %c0_i32_2 = arith.constant 0 : i32
    return %c0_i32, %c0_i32_0, %c0_i32_1 : i32, i32, i32
  }
  func.func @transform_6(%arg0: i32) -> (i32, i32) {
    %c0_i32 = arith.constant 0 : i32
    %c0_i32_0 = arith.constant 0 : i32
    %c0_i32_1 = arith.constant 0 : i32
    return %c0_i32, %c0_i32_0 : i32, i32
  }
  func.func @transform_7(%arg0: i32) -> (i32, i32, i32) {
    %c0_i32 = arith.constant 0 : i32
    %c0_i32_0 = arith.constant 0 : i32
    %c0_i32_1 = arith.constant 0 : i32
    return %arg0, %c0_i32, %c0_i32_0 : i32, i32, i32
  }
  func.func @transform_8(%arg0: i32) -> (i32, i32, i32) {
    %c0_i32 = arith.constant 0 : i32
    %c0_i32_0 = arith.constant 0 : i32
    %c0_i32_1 = arith.constant 0 : i32
    return %arg0, %c0_i32, %c0_i32_0 : i32, i32, i32
  }
}

</mosaic_0001>

<bundles_post_ra>
// kernel: gnn_model_forward.3
= control target key start
LH: loop header
LB: loop body
LE: loop exit
PB: predicated region body
PF: predicated region fallthrough
CT: control target
= control target key end

     0   :  { %s2117_s0 = inlined_call_operand.vmem [shape: f32[2,4,21], index: 0, kind: input, shape index: {}]   ;;  %s2118_s1 = inlined_call_operand.vmem [shape: f32[16,8], index: 1, kind: input, shape index: {}]   ;;  %s2119_s2 = inlined_call_operand.vmem [shape: f32[4,16], index: 2, kind: input, shape index: {}]   ;;  %s2120_s3 = inlined_call_operand.vmem [shape: f32[3,37,40], index: 3, kind: input, shape index: {}]   ;;  %s2121_s4 = inlined_call_operand.vmem [shape: f32[3,32,16], index: 4, kind: input, shape index: {}]   ;;  %s2122_s5 = inlined_call_operand.vmem [shape: f32[3,16,1], index: 5, kind: input, shape index: {}]   ;;  %s2123_s6 = inlined_call_operand.vmem [shape: f32[3,64], index: 6, kind: input, shape index: {}]   ;;  %s2124_s7 = inlined_call_operand.hbm [shape: f32[2,1,3], index: 7, kind: output, shape index: {0}]   ;;  %s2125_s8 = inlined_call_operand.hbm [shape: f32[2,4,4], index: 8, kind: output, shape index: {1}]  }
   0x1   :  { %2127 = sst [smem:[#allocation9_spill]] %s2117_s0 }
   0x2   :  { %2128 = sst [smem:[#allocation10_spill]] %s2118_s1 }
   0x3   :  { %2129 = sst [smem:[#allocation11_spill]] %s2119_s2 }
   0x4   :  { %14 = vsyncpa [#allocation4], 0 }
   0x5   :  { %16 = vsyncpa [#allocation4 + $0x1], 0 }
   0x6   :  { %17 = vsyncpa [#allocation6], 0 }
   0x7   :  { %19 = vsyncpa [#allocation6 + $0x1], 0  ;;  %s1705_s27 = smov 0   ;;  %s1707_s28 = smov 0  }
   0x8   :  { %s1709_s29 = smov 0   ;;  %s1711_s30 = smov 0  }
   0x9 LB: > { %s1726_s9 = sadd.s32 4294967295, %s1650_s30   ;;  %s1354_s10 = sadd.s32 4294967294, %s1650_s30   ;;  %s1650_s30 = sphi %s1711_s30, %s2139_s30   ;;  %s1646_s29 = sphi %s1709_s29, %s2138_s29   ;;  %s1642_s28 = sphi %s1707_s28, %s2137_s28   ;;  %s1638_s27 = sphi %s1705_s27, %s2136_s27  }
   0xa   : > { %s1730_s11 = sadd.s32 1, %s1650_s30   ;;  %s184_s12 = sadd.s32 1, %s1646_s29 }
   0xb   : > { %s181_s13 = ssub.s32 %s1650_s30, %s1730_s11  ;;  %p194_p0 = scmp.ne.s32.totalorder %s1646_s29, %s1642_s28 }
   0xc   : > { %p182_p1 = scmp.eq.s32.totalorder %s181_s13, 0  ;;  %p195_p2 = scmp.eq.s32.totalorder %s1726_s9, 1 }
   0xd   : > { %p200_p3 = scmp.ne.s32.totalorder %s1642_s28, %s1638_s27  ;;  %p201_p4 = scmp.eq.s32.totalorder %s1354_s10, 1 }
   0xe   : > { %s1741_s14 = scalar_select %p182_p1, %s1646_s29, %s184_s12  }
   0xf   : > { %p1743_p5 = por %p195_p2, %p194_p0  ;;  %p1747_p6 = por %p201_p4, %p200_p3 }
  0x10   : > { %p1357_p7 = scmp.ge.s32.totalorder %s1650_s30, 1  ;;  %p270_p8 = scmp.lt.s32.totalorder %s1650_s30, 3 }
  0x12   : > { %p271_p9 = pnand %p1357_p7, %p270_p8 }
  0x13   : > { %p307_p10 = scmp.lt.s32.totalorder (!%p271_p9), %s1726_s9, 1  ;;  %s2132_s0 = sld [smem:[#allocation9_spill]] (!%p271_p9) }
  0x14   : > { %274 = sbr.rel (%p271_p9) target bundleno = 4823 (0x12d7), region = 48  ;;  %s2133_s1 = sld [smem:[#allocation10_spill]] (!%p271_p9) }
  0x15   : > { %s1654_s21 = smov (!%p271_p9), 72   ;;  %s1656_s26 = smov (!%p271_p9), 124  }
  0x16   : > { %s2134_s2 = sld [smem:[#allocation11_spill]] (!%p271_p9)  ;;  %s2126_s17 = smov (!%p271_p9), 80  }
  0x17   : > { %s1658_s20 = smov (!%p271_p9), 21   ;;  %s1659_s12 = smov (!%p271_p9), 29  }
  0x18   : > { %s2135_s25 = smov (!%p271_p9), 80  }
  0x19   : > { %vm314_vm0 = vcmask 297984   ;;  %v1652_v0 = vmov 0.0   ;;  %v1757_v1 = vld [vmem:[%s2120_s3 + $0x20] sm:$0x1f]  ;;  %s308_s19 = scalar_select %p307_p10, %s1726_s9, 1  ;;  %vm370_vm1 = vcmask 1044480  }
  0x1a   : > { %315 = vst.msk [vmem:[#allocation2] sm:$0xf] %vm314_vm0, %v1652_v0  ;;  %v1763_v2 = vld [vmem:[%s2120_s3 + $0x18] sm:$0xff]  ;;  %v1768_v3 = vld [vmem:[%s2120_s3 + $0x10] sm:$0xff]  ;;  %1363 = vmatpush.msk.msra.mxu1 %vm370_vm1, %v1757_v1  ;;  %vm317_vm2 = vcmask 166912   ;;  %vm327_vm3 = vcmask 1043456  }
  0x1b   : > { %v1495_v4 = vpack.i.bf16 %v1768_v3, %v1763_v2  ;;  %s1359_s24 = sshll.u32 %s308_s19, 2  ;;  %v1782_v6 = vld [vmem:[%s2133_s1] sm:$0xff]  ;;  %vm320_vm4 = vcmask 31744   ;;  %v1787_v7 = vld [vmem:[%s2133_s1 + $0x8] sm:$0xff]  ;;  %v406_v12 = vld [vmem:[%s2121_s4 + $0x18] sm:$0xff]  ;;  %vm363_vm5 = vcmask 302080  }
  0x1c   : > { %s310_s10 = scalar_lea.vmem %s2132_s0, %s1359_s24  ;;  %386 = vmatpush.msra.mxu1 %v1763_v2  ;;  %v1798_v9 = vld [vmem:[%s2120_s3 + $0x8] sm:$0xff]  ;;  %v1804_v10 = vld [vmem:[%s2120_s3] sm:$0xff]  ;;  %430 = vmatpush.msra.mxu2 %v406_v12  ;;  %v405_v18 = vld [vmem:[%s2121_s4 + $0x10] sm:$0xff]  ;;  %vm411_vm7 = vcmask 261120   ;;  %vm452_vm10 = vcmask 130048   ;;  %v1655_v40 = vmov 0  }
  0x1d   : > { %v316_v5 = vld [vmem:[%s310_s10] sm:$0xf]  ;;  %v1500_v11 = vpack.i.bf16 %v1804_v10, %v1798_v9  ;;  %s1653_s10 = smov 96   ;;  %v404_v19 = vld [vmem:[%s2121_s4 + $0x8] sm:$0xff]  ;;  %1489 = vset.pattern.permute.xlu1 %v1655_v40  ;;  %1505 = vset.pattern.permute.xlu0 %v1655_v40  ;;  %vm525_vm12 = vcmask 27648   ;;  %s1576_s0 = scalar_lea.hbm %s2125_s8, 8 }
  0x1e   : > { %318 = vst.msk [vmem:[#allocation2] sm:$0xf] %vm317_vm2, %v316_v5  ;;  %387 = vmatpush.msra.mxu1 %v1768_v3  ;;  %v1817_v17 = vld [vmem:[%s2123_s6] ss:$0 sm:$0xff]  ;;  %431 = vmatpush.msra.mxu2 %v405_v18  ;;  %v448_v29 = vld [vmem:[%s2122_s5 + $0x8] sm:$0xff] }
  0x1f   : > { %408 = vrot.lane.b32.xlu0 %v1817_v17, %s1653_s10  ;;  %v403_v20 = vld [vmem:[%s2121_s4] sm:$0xff]  ;;  %1521 = vset.pattern.permute.xlu2 %v1655_v40  ;;  %v1388_v40 = vld [vmem:[%s2121_s4 + $0x30] sm:$0xff] }
  0x20   : > { %388 = vmatpush.msra.mxu1 %v1798_v9  ;;  %432 = vmatpush.msra.mxu2 %v404_v19  ;;  %v447_v30 = vld [vmem:[%s2122_s5] sm:$0xff] }
  0x21   : > { %v1861_v54 = vld [vmem:[%s2134_s2] sm:$0xf] }
  0x22   : > { %389 = vmatpush.msra.mxu1 %v1804_v10  ;;  %433 = vmatpush.msra.mxu2 %v403_v20 }
  0x25   : > { %v319_v8 = vld [vmem:[#allocation2] sm:$0xf] }
  0x26   : > { %1360 = vmatpush.msk.msra.mxu0 %vm327_vm3, %v319_v8  ;;  %1436 = vmatpush.msk.msra.mxu3 %vm327_vm3, %v319_v8 }
  0x27   : > { %1361 = vmatmul.msk.f32.vlgmr.msra.gmra.mxu0 %vm320_vm4, %v1782_v6  ;;  %1362 = vmatmul.msk.f32.vlgmr.msra.gmra.mxu3 %vm320_vm4, %v1787_v7 }
  0x28   : > { %449 = vrot.lane.b32.xlu0 %v1817_v17, %s1654_s21  ;;  %473 = vmatpush.msrb.mxu3 %v448_v29  ;;  %v1895_v29 = vld [vmem:[%s2120_s3 + $0x30] sm:$0xff] }
  0x2a   : > { %474 = vmatpush.msrb.mxu3 %v447_v30  ;;  %v1900_v30 = vld [vmem:[%s2120_s3 + $0x28] sm:$0xff] }
  0x2c   : > { %1371 = vmatpush.msk.msra.mxu3 %vm327_vm3, %v319_v8 }
  0x91   : > { %v409_v31 = vpop.permute.xlu0 %408 }
  0x9a   : > { %v450_v42 = vpop.permute.xlu0 %449 }
  0xa4   : > { %v348_v13 = vpop.f32.mrf.mxu0 }
  0xa5   : > { %v354_v14 = vand.u32 2147483647, %v348_v13 }
  0xa7   : > { %1364 = vmatmul.msk.f32.vlgmr.msra.gmra.mxu1 %vm363_vm5, %v354_v14 }
  0xaa   : > { %v351_v15 = vpop.f32.mrf.mxu3 }
  0xab   : > { %v355_v16 = vand.u32 2147483647, %v351_v15 }
  0xaf   : > { %1365 = vmatmul.msk.f32.gmra.mxu1 %vm363_vm5, %v355_v16 }
 0x124   : > { %v391_v21 = vpop.f32.mrf.mxu1 }
 0x125   : > { %v392_v22 = vadd.f32 %v1817_v17, %v391_v21  ;;  %v1875_v21 = vld [vmem:[%s2120_s3 + $0x48] sm:$0x1f] }
 0x126   : > { %1383 = vmatpush.msk.msrb.mxu1 %vm370_vm1, %v1875_v21 }
 0x127   : > { %v399_v23 = vmul.f32 0.01, %v392_v22  ;;  %vm397_vm6 = vcmp.ge.f32.partialorder %v392_v22, 0.0 }
 0x129   : > { %v401_v24 = vsel %vm397_vm6, %v392_v22, %v399_v23  ;;  %vm626_vm6 = vcmask 232616  }
 0x12a   : > { %1366 = vmatmul.msk.f32.vlgmr.msra.gmra.mxu2 %vm411_vm7, %v401_v24 }
 0x12c   : > { %v394_v25 = vpop.f32.mrf.mxu1 }
 0x12d   : > { %v395_v26 = vadd.f32 %v1817_v17, %v394_v25 }
 0x12f   : > { %v400_v27 = vmul.f32 0.01, %v395_v26  ;;  %vm398_vm8 = vcmp.ge.f32.partialorder %v395_v26, 0.0 }
 0x131   : > { %v402_v28 = vsel %vm398_vm8, %v395_v26, %v400_v27  ;;  %v1887_v27 = vld [vmem:[%s2120_s3 + $0x38] sm:$0xff] }
 0x132   : > { %1367 = vmatmul.msk.f32.gmra.mxu2 %vm411_vm7, %v402_v28 }
 0x1ad   : > { %v435_v32 = vpop.f32.mrf.mxu2 }
 0x1ae   : > { %v436_v33 = vadd.f32 %v435_v32, %v409_v31 }
 0x1b0   : > { %vm441_vm9 = vcmp.ge.f32.partialorder %v436_v33, 0.0  ;;  %v443_v34 = vmul.f32 0.01, %v436_v33 }
 0x1b2   : > { %v445_v35 = vsel %vm441_vm9, %v436_v33, %v443_v34  ;;  %v1389_v34 = vld [vmem:[%s2121_s4 + $0x38] sm:$0xff] }
 0x1b3   : > { %1368 = vmatmul.msk.f32.vlgmr.msrb.gmra.mxu3 %vm452_vm10, %v445_v35  ;;  %v1919_v35 = vld [vmem:[%s2123_s6 + $0x1] ss:$0 sm:$0xff] }
 0x1b4   : > { %730 = vmatpush.msrb.mxu3 %v1389_v34 }
 0x1b5   : > { %v438_v36 = vpop.f32.mrf.mxu2 }
 0x1b6   : > { %v439_v37 = vadd.f32 %v438_v36, %v409_v31  ;;  %v1516_v31 = vpack.i.bf16 %v1900_v30, %v1895_v29  ;;  %731 = vmatpush.msrb.mxu3 %v1388_v40 }
 0x1b8   : > { %v444_v38 = vmul.f32 0.01, %v439_v37  ;;  %vm442_vm11 = vcmp.ge.f32.partialorder %v439_v37, 0.0 }
 0x1ba   : > { %v446_v39 = vsel %vm442_vm11, %v439_v37, %v444_v38 }
 0x1bb   : > { %1369 = vmatmul.msk.f32.gmra.mxu3 %vm452_vm10, %v446_v39 }
 0x236   : > { %v476_v41 = vpop.f32.mrf.mxu3 }
 0x237   : > { %v477_v45 = vadd.f32 %v476_v41, %v450_v42  ;;  %v1387_v41 = vld [vmem:[%s2121_s4 + $0x28] sm:$0xff] }
 0x238   : > { %732 = vmatpush.msrb.mxu3 %v1387_v41 }
 0x23e   : > { %v479_v43 = vpop.f32.mrf.mxu3 }
 0x23f   : > { %v480_v44 = vadd.f32 %v479_v43, %v450_v42  ;;  %v1386_v42 = vld [vmem:[%s2121_s4 + $0x20] sm:$0xff] }
 0x240   : > { %733 = vmatpush.msrb.mxu3 %v1386_v42 }
 0x241   : > { %489 = vperm.xlu1 %1489, %v480_v44  }
 0x249   : > { %484 = vperm.xlu1 %1489, %v477_v45  }
 0x251   : > { %585 = vrot.lane.b32.xlu1 %v1757_v1, %s1653_s10 }
 0x259   : > { %1496 = vrot.lane.b32.xlu1 %v1495_v4, %s1653_s10 }
 0x261   : > { %1501 = vrot.lane.b32.xlu1 %v1500_v11, %s1653_s10 }
 0x269   : > { %591 = vrot.lane.b32.xlu1 %v1817_v17, %s2126_s17  ;;  %v1882_v17 = vld [vmem:[%s2120_s3 + $0x40] sm:$0xff] }
 0x26a   : > { %686 = vmatpush.msrb.mxu1 %v1882_v17  ;;  %v1511_v28 = vpack.i.bf16 %v1887_v27, %v1882_v17 }
 0x26c   : > { %687 = vmatpush.msrb.mxu1 %v1887_v27 }
 0x26e   : > { %688 = vmatpush.msrb.mxu1 %v1895_v29 }
 0x270   : > { %689 = vmatpush.msrb.mxu1 %v1900_v30 }
 0x2b3   : > { %v490_v46 = vpop.permute.xlu1 %489 }
 0x2b4   : > { %v493_v48 = vmul.f32 %v490_v46, %v1787_v7 }
 0x2bb   : > { %v485_v47 = vpop.permute.xlu1 %484 }
 0x2bc   : > { %v492_v49 = vmul.f32 %v485_v47, %v1782_v6 }
 0x2be   : > { %v1490_v50 = vpack.i.bf16 %v492_v49, %v493_v48 }
 0x2c0   : > { %1491 = vrot.lane.b32.xlu2 %v1490_v50, %s1656_s26 }
 0x2c3   : > { %v586_v62 = vpop.permute.xlu1 %585 }
 0x2c4   : > { %1373 = vmatpush.msk.msrb.mxu2 %vm370_vm1, %v586_v62 }
 0x2cb   : > { %v1497_v63 = vpop.permute.xlu1 %1496 }
 0x2cc   : > { %v1498_v0 = vunpack.i.l.bf16 %v1497_v63  ;;  %v1499_v1 = vunpack.i.h.bf16 %v1497_v63 }
 0x2ce   : > { %611 = vmatpush.msrb.mxu2 %v1498_v0 }
 0x2d0   : > { %612 = vmatpush.msrb.mxu2 %v1499_v1 }
 0x2d3   : > { %v1502_v3 = vpop.permute.xlu1 %1501 }
 0x2d4   : > { %v1503_v4 = vunpack.i.l.bf16 %v1502_v3  ;;  %v1504_v5 = vunpack.i.h.bf16 %v1502_v3 }
 0x2d6   : > { %613 = vmatpush.msrb.mxu2 %v1503_v4 }
 0x2d8   : > { %614 = vmatpush.msrb.mxu2 %v1504_v5 }
 0x2db   : > { %v592_v22 = vpop.permute.xlu1 %591 }
 0x31a   : > { %v1492_v51 = vpop.permute.xlu2 %1491 }
 0x31b   : > { %v1493_v52 = vunpack.i.l.bf16 %v1492_v51  ;;  %v1494_v53 = vunpack.i.h.bf16 %v1492_v51  ;;  %v1393_v51 = vld [vmem:[%s2122_s5 + $0x18] sm:$0xff] }
 0x31c   : > { %773 = vmatpush.msra.mxu2 %v1393_v51  ;;  %v1988_v51 = vld [vmem:[%s2120_s3 + $0x68] sm:$0xff] }
 0x31d   : > { %519 = vmatpush.msrb.mxu0 %v1493_v52  ;;  %v1392_v52 = vld [vmem:[%s2122_s5 + $0x10] sm:$0xff] }
 0x31e   : > { %774 = vmatpush.msra.mxu2 %v1392_v52  ;;  %v1994_v52 = vld [vmem:[%s2120_s3 + $0x60] sm:$0xff] }
 0x31f   : > { %520 = vmatpush.msrb.mxu0 %v1494_v53 }
 0x320   : > { %1370 = vmatmul.msk.f32.vlgmr.msrb.gmra.mxu0 %vm452_vm10, %v1861_v54 }
 0x39d   : > { %v522_v55 = vpop.f32.mrf.mxu0 }
 0x39e   : > { %v526_v56 = vsel %vm525_vm12, %v522_v55, -inf }
 0x39f   : > { %527 = vmax.xlane.f32.xlu2 %v526_v56 }
 0x3b7   : > { %709 = vrot.lane.b32.xlu2 %v1919_v35, %s1653_s10 }
 0x412   : > { %v528_v57 = vpop.xlane.xlu2 %527 }
 0x413   : > { %v529_v58 = vsub.f32 %v522_v55, %v528_v57 }
 0x415   : > { %v530_v59 = vmul.f32 1.442695, %v529_v58 }
 0x417   : > { %1540 = vpow2.f32 %v530_v59 }
 0x41a   : > { %v710_v53 = vpop.permute.xlu2 %709 }
 0x41d   : > { %v1541_v60 = vpop.eup %1540 }
 0x41e   : > { %v532_v61 = vsel %vm525_vm12, %v1541_v60, 0.0 }
 0x41f   : > { %533 = vadd.xlane.f32.xlu0 %v532_v61 }
 0x492   : > { %v534_v2 = vpop.xlane.xlu0 %533 }
 0x493   : > { %1542 = vrcp.f32 %v534_v2  ;;  %v546_v11 = vand.u32 2147483648, %v534_v2  ;;  %v544_v13 = vand.u32 2147483647, %v534_v2  ;;  %vm540_vm14 = vweird.f32 %v534_v2 }
 0x495   : > { %v547_v15 = vor.u32 1.1754944e-38, %v546_v11  ;;  %vm545_vm0 = vcmp.eq.f32.partialorder %v544_v13, 8.507059e+37 }
 0x499   : > { %v1543_v8 = vpop.eup %1542 }
 0x49a   : > { %v536_v9 = vmul.f32 %v1543_v8, %v534_v2  ;;  %vm541_vm13 = vweird.f32 %v1543_v8 }
 0x49b   : > { %vm542_vm15 = vmor %vm540_vm14, %vm541_vm13 }
 0x49c   : > { %v537_v10 = vsub.f32 1.0, %v536_v9 }
 0x49e   : > { %v538_v12 = vmul.f32 %v1543_v8, %v537_v10 }
 0x4a0   : > { %v539_v14 = vadd.f32 %v1543_v8, %v538_v12 }
 0x4a2   : > { %v543_v16 = vsel %vm542_vm15, %v1543_v8, %v539_v14 }
 0x4a3   : > { %v548_v18 = vsel %vm545_vm0, %v547_v15, %v543_v16 }
 0x4a4   : > { %v549_v19 = vmul.f32 %v1541_v60, %v548_v18 }
 0x4a6   : > { %1372 = vmatmul.msk.f32.vlgmr.msra.gmra.mxu3 %vm320_vm4, %v549_v19 }
 0x529   : > { %v570_v20 = vpop.f32.mrf.mxu3 }
 0x52a   : > { %1374 = vmatmul.msk.f32.vlgmr.msrb.gmra.mxu2 %vm363_vm5, %v570_v20 }
 0x5ad   : > { %v616_v23 = vpop.f32.mrf.mxu2 }
 0x5ae   : > { %v617_v24 = vadd.f32 %v616_v23, %v592_v22 }
 0x5b0   : > { %v620_v25 = vmul.f32 0.1, %v617_v24  ;;  %vm619_vm2 = vcmp.ge.f32.partialorder %v617_v24, 0.0 }
 0x5b2   : > { %v621_v26 = vsel %vm619_vm2, %v617_v24, %v620_v25 }
 0x5b3   : > { %623 = vrot.lane.b32.xlu1 %v621_v26, %s1658_s20 }
 0x5bb   : > { %750 = vrot.lane.b32.xlu1 %v1919_v35, %s1654_s21 }
 0x625   : > { %v624_v32 = vpop.permute.xlu1 %623 }
 0x626   : > { %627 = vst.msk [vmem:[#allocation2] sm:$0xf] %vm626_vm6, %v624_v32 }
 0x62d   : > { %v628_v33 = vld [vmem:[#allocation2] sm:$0xf]  ;;  %v751_v63 = vpop.permute.xlu1 %750 }
 0x62e   : > { %1375 = vmatpush.msk.msra.mxu0 %vm327_vm3, %v628_v33  ;;  %1397 = vmatpush.msk.msra.mxu1 %vm327_vm3, %v628_v33 }
 0x62f   : > { %1376 = vmatmul.msk.f32.vlgmr.msra.gmra.mxu0 %vm320_vm4, %v1782_v6 }
 0x637   : > { %1377 = vmatmul.msk.f32.gmra.mxu0 %vm320_vm4, %v1787_v7 }
 0x6ac   : > { %v649_v36 = vpop.f32.mrf.mxu0 }
 0x6ad   : > { %v655_v37 = vand.u32 2147483647, %v649_v36 }
 0x6af   : > { %1384 = vmatmul.msk.f32.vlgmr.msrb.gmra.mxu1 %vm363_vm5, %v655_v37 }
 0x6b4   : > { %v652_v38 = vpop.f32.mrf.mxu0 }
 0x6b5   : > { %v656_v39 = vand.u32 2147483647, %v652_v38 }
 0x6b7   : > { %1385 = vmatmul.msk.f32.gmra.mxu1 %vm363_vm5, %v656_v39 }
 0x72c   : > { %v691_v43 = vpop.f32.mrf.mxu1 }
 0x72d   : > { %v692_v44 = vadd.f32 %v1919_v35, %v691_v43 }
 0x72f   : > { %vm697_vm8 = vcmp.ge.f32.partialorder %v692_v44, 0.0  ;;  %v699_v45 = vmul.f32 0.01, %v692_v44 }
 0x731   : > { %v701_v46 = vsel %vm697_vm8, %v692_v44, %v699_v45  ;;  %vm922_vm8 = vcmask 298216  }
 0x732   : > { %1390 = vmatmul.msk.f32.vlgmr.msrb.gmra.mxu3 %vm411_vm7, %v701_v46  ;;  %v1415_v46 = vld [vmem:[%s2121_s4 + $0x58] sm:$0xff] }
 0x733   : > { %1026 = vmatpush.msrb.mxu1 %v1415_v46 }
 0x734   : > { %v694_v47 = vpop.f32.mrf.mxu1 }
 0x735   : > { %v695_v48 = vadd.f32 %v1919_v35, %v694_v47  ;;  %v1414_v47 = vld [vmem:[%s2121_s4 + $0x50] sm:$0xff] }
 0x736   : > { %1027 = vmatpush.msrb.mxu1 %v1414_v47 }
 0x737   : > { %v700_v49 = vmul.f32 0.01, %v695_v48  ;;  %vm698_vm9 = vcmp.ge.f32.partialorder %v695_v48, 0.0 }
 0x739   : > { %v702_v50 = vsel %vm698_vm9, %v695_v48, %v700_v49  ;;  %v1413_v48 = vld [vmem:[%s2121_s4 + $0x48] sm:$0xff]  ;;  %v1412_v49 = vld [vmem:[%s2121_s4 + $0x40] sm:$0xff] }
 0x73a   : > { %1391 = vmatmul.msk.f32.gmra.mxu3 %vm411_vm7, %v702_v50  ;;  %1028 = vmatpush.msrb.mxu1 %v1413_v48  ;;  %v1408_v50 = vld [vmem:[%s2120_s3 + $0x70] sm:$0x1f] }
 0x73c   : > { %1029 = vmatpush.msrb.mxu1 %v1412_v49 }
 0x7b5   : > { %v735_v55 = vpop.f32.mrf.mxu3 }
 0x7b6   : > { %v736_v56 = vadd.f32 %v735_v55, %v710_v53 }
 0x7b8   : > { %vm741_vm11 = vcmp.ge.f32.partialorder %v736_v56, 0.0  ;;  %v743_v57 = vmul.f32 0.01, %v736_v56 }
 0x7ba   : > { %v745_v58 = vsel %vm741_vm11, %v736_v56, %v743_v57  ;;  %v2007_v56 = vld [vmem:[%s2120_s3 + $0x58] sm:$0xff]  ;;  %v2013_v57 = vld [vmem:[%s2120_s3 + $0x50] sm:$0xff] }
 0x7bb   : > { %1394 = vmatmul.msk.f32.vlgmr.msra.gmra.mxu2 %vm452_vm10, %v745_v58  ;;  %v1539_v58 = vld [vmem:[%s2123_s6 + $0x2] ss:$0 sm:$0xff] }
 0x7bd   : > { %v738_v59 = vpop.f32.mrf.mxu3 }
 0x7be   : > { %v739_v60 = vadd.f32 %v738_v59, %v710_v53 }
 0x7c0   : > { %v744_v61 = vmul.f32 0.01, %v739_v60  ;;  %vm742_vm13 = vcmp.ge.f32.partialorder %v739_v60, 0.0 }
 0x7c2   : > { %v746_v62 = vsel %vm742_vm13, %v739_v60, %v744_v61 }
 0x7c3   : > { %1395 = vmatmul.msk.f32.gmra.mxu2 %vm452_vm10, %v746_v62 }
 0x83e   : > { %v776_v0 = vpop.f32.mrf.mxu2 }
 0x83f   : > { %v777_v1 = vadd.f32 %v776_v0, %v751_v63 }
 0x841   : > { %784 = vperm.xlu1 %1489, %v777_v1  }
 0x846   : > { %v779_v2 = vpop.f32.mrf.mxu2 }
 0x847   : > { %v780_v3 = vadd.f32 %v779_v2, %v751_v63 }
 0x849   : > { %789 = vperm.xlu0 %1505, %v780_v3  }
 0x851   : > { %881 = vrot.lane.b32.xlu0 %v1875_v21, %s1653_s10 }
 0x859   : > { %1512 = vrot.lane.b32.xlu0 %v1511_v28, %s1653_s10 }
 0x861   : > { %1517 = vrot.lane.b32.xlu0 %v1516_v31, %s1653_s10 }
 0x8b3   : > { %v785_v4 = vpop.permute.xlu1 %784 }
 0x8b4   : > { %v792_v8 = vmul.f32 %v785_v4, %v1782_v6 }
 0x8bb   : > { %v790_v5 = vpop.permute.xlu0 %789 }
 0x8bc   : > { %v793_v9 = vmul.f32 %v790_v5, %v1787_v7 }
 0x8be   : > { %v1506_v10 = vpack.i.bf16 %v792_v8, %v793_v9  ;;  %v1419_v9 = vld [vmem:[%s2122_s5 + $0x28] sm:$0xff] }
 0x8c0   : > { %1507 = vrot.lane.b32.xlu1 %v1506_v10, %s1656_s26  ;;  %v1418_v10 = vld [vmem:[%s2122_s5 + $0x20] sm:$0xff] }
 0x8c3   : > { %v882_v22 = vpop.permute.xlu0 %881 }
 0x8c4   : > { %1399 = vmatpush.msk.msra.mxu3 %vm370_vm1, %v882_v22 }
 0x8cb   : > { %v1513_v23 = vpop.permute.xlu0 %1512 }
 0x8cc   : > { %v1515_v24 = vunpack.i.h.bf16 %v1513_v23  ;;  %v1514_v25 = vunpack.i.l.bf16 %v1513_v23 }
 0x8ce   : > { %907 = vmatpush.msra.mxu3 %v1514_v25 }
 0x8d0   : > { %908 = vmatpush.msra.mxu3 %v1515_v24 }
 0x8d3   : > { %v1518_v17 = vpop.permute.xlu0 %1517 }
 0x8d4   : > { %v1520_v27 = vunpack.i.h.bf16 %v1518_v17  ;;  %v1519_v28 = vunpack.i.l.bf16 %v1518_v17 }
 0x8d6   : > { %909 = vmatpush.msra.mxu3 %v1519_v28 }
 0x8d8   : > { %910 = vmatpush.msra.mxu3 %v1520_v27 }
 0x8da   : > { %1069 = vmatpush.msrb.mxu3 %v1419_v9 }
 0x8dc   : > { %1070 = vmatpush.msrb.mxu3 %v1418_v10 }
 0x932   : > { %v1508_v11 = vpop.permute.xlu1 %1507 }
 0x933   : > { %v1509_v12 = vunpack.i.l.bf16 %v1508_v11  ;;  %v1510_v13 = vunpack.i.h.bf16 %v1508_v11 }
 0x935   : > { %816 = vmatpush.msrb.mxu0 %v1509_v12 }
 0x937   : > { %817 = vmatpush.msrb.mxu0 %v1510_v13 }
 0x938   : > { %1396 = vmatmul.msk.f32.vlgmr.msrb.gmra.mxu0 %vm452_vm10, %v1861_v54 }
 0x939   : > { %1409 = vmatpush.msk.msra.mxu0 %vm370_vm1, %v1408_v50 }
 0x93b   : > { %982 = vmatpush.msra.mxu0 %v1988_v51 }
 0x93d   : > { %983 = vmatpush.msra.mxu0 %v1994_v52 }
 0x93f   : > { %984 = vmatpush.msra.mxu0 %v2007_v56 }
 0x941   : > { %985 = vmatpush.msra.mxu0 %v2013_v57 }
 0x9b5   : > { %v819_v14 = vpop.f32.mrf.mxu0 }
 0x9b6   : > { %v822_v15 = vsel %vm525_vm12, %v819_v14, -inf }
 0x9b7   : > { %823 = vmax.xlane.f32.xlu2 %v822_v15 }
 0x9cf   : > { %887 = vrot.lane.b32.xlu2 %v1919_v35, %s2126_s17  ;;  %s2051_s17 = sand.u32 1, %s1642_s28  }
 0x9d0   : > { %s1358_s22 = sshll.u32 %s2051_s17, 2  ;;  %s1239_s20 = scalar_lea.sflag [#allocation6], %s2051_s17 }
 0xa2a   : > { %v824_v16 = vpop.xlane.xlu2 %823 }
 0xa2b   : > { %v825_v18 = vsub.f32 %v819_v14, %v824_v16 }
 0xa2d   : > { %v826_v19 = vmul.f32 1.442695, %v825_v18 }
 0xa2f   : > { %1544 = vpow2.f32 %v826_v19 }
 0xa32   : > { %v888_v41 = vpop.permute.xlu2 %887 }
 0xa35   : > { %v1545_v20 = vpop.eup %1544 }
 0xa36   : > { %v828_v21 = vsel %vm525_vm12, %v1545_v20, 0.0 }
 0xa37   : > { %829 = vadd.xlane.f32.xlu1 %v828_v21 }
 0xa50   : > { %1005 = vrot.lane.b32.xlu1 %v1539_v58, %s1653_s10 }
 0xaaa   : > { %v830_v26 = vpop.xlane.xlu1 %829 }
 0xaab   : > { %1546 = vrcp.f32 %v830_v26  ;;  %v842_v32 = vand.u32 2147483648, %v830_v26  ;;  %v840_v34 = vand.u32 2147483647, %v830_v26  ;;  %vm836_vm15 = vweird.f32 %v830_v26 }
 0xaad   : > { %v843_v36 = vor.u32 1.1754944e-38, %v842_v32  ;;  %vm841_vm2 = vcmp.eq.f32.partialorder %v840_v34, 8.507059e+37 }
 0xab1   : > { %v1547_v29 = vpop.eup %1546 }
 0xab2   : > { %v832_v30 = vmul.f32 %v1547_v29, %v830_v26  ;;  %vm837_vm14 = vweird.f32 %v1547_v29 }
 0xab3   : > { %vm838_vm0 = vmor %vm836_vm15, %vm837_vm14 }
 0xab4   : > { %v833_v31 = vsub.f32 1.0, %v832_v30 }
 0xab6   : > { %v834_v33 = vmul.f32 %v1547_v29, %v833_v31 }
 0xab8   : > { %v835_v35 = vadd.f32 %v1547_v29, %v834_v33 }
 0xaba   : > { %v839_v37 = vsel %vm838_vm0, %v1547_v29, %v835_v35 }
 0xabb   : > { %v844_v38 = vsel %vm841_vm2, %v843_v36, %v839_v37 }
 0xabc   : > { %v845_v39 = vmul.f32 %v1545_v20, %v844_v38  ;;  %v1429_v38 = vld [vmem:[%s2120_s3 + $0x70] sm:$0x1f] }
 0xabe   : > { %1398 = vmatmul.msk.f32.vlgmr.msra.gmra.mxu1 %vm320_vm4, %v845_v39  ;;  %v1532_v39 = vpack.i.bf16 %v2013_v57, %v2007_v56 }
 0xac2   : > { %v1006_v11 = vpop.permute.xlu1 %1005 }
 0xb3b   : > { %v866_v40 = vpop.f32.mrf.mxu1 }
 0xb3c   : > { %1400 = vmatmul.msk.f32.vlgmr.msra.gmra.mxu3 %vm363_vm5, %v866_v40 }
 0xbbf   : > { %v912_v42 = vpop.f32.mrf.mxu3 }
 0xbc0   : > { %v913_v43 = vadd.f32 %v912_v42, %v888_v41 }
 0xbc2   : > { %v916_v44 = vmul.f32 0.1, %v913_v43  ;;  %vm915_vm6 = vcmp.ge.f32.partialorder %v913_v43, 0.0 }
 0xbc4   : > { %v917_v45 = vsel %vm915_vm6, %v913_v43, %v916_v44 }
 0xbc5   : > { %919 = vrot.lane.b32.xlu0 %v917_v45, %s1659_s12  ;;  %s1433_s12 = sshll.u32 %s1726_s9, 2 }
 0xbc6   : > { %s1262_s18 = scalar_lea.hbm %s2125_s8, %s1433_s12 }
 0xbcd   : > { %1046 = vrot.lane.b32.xlu0 %v1539_v58, %s1654_s21 }
 0xc37   : > { %v920_v53 = vpop.permute.xlu0 %919 }
 0xc38   : > { %923 = vst.msk [vmem:[#allocation2] sm:$0xf] %vm922_vm8, %v920_v53 }
 0xc3f   : > { %v924_v55 = vld [vmem:[#allocation2] sm:$0xf]  ;;  %v1047_v21 = vpop.permute.xlu0 %1046 }
 0xc40   : > { %1401 = vmatpush.msk.msrb.mxu2 %vm327_vm3, %v924_v55  ;;  %1423 = vmatpush.msk.msra.mxu1 %vm327_vm3, %v924_v55 }
 0xc41   : > { %1402 = vmatmul.msk.f32.vlgmr.msrb.gmra.mxu2 %vm320_vm4, %v1782_v6 }
 0xc49   : > { %1403 = vmatmul.msk.f32.gmra.mxu2 %vm320_vm4, %v1787_v7 }
 0xcc4   : > { %v945_v59 = vpop.f32.mrf.mxu2 }
 0xcc5   : > { %v951_v60 = vand.u32 2147483647, %v945_v59 }
 0xcc7   : > { %1410 = vmatmul.msk.f32.vlgmr.msra.gmra.mxu0 %vm363_vm5, %v951_v60  ;;  %v1171_v60 = vld [vmem:[%s2123_s6 + $0x2] sm:$0x1] }
 0xccc   : > { %v948_v61 = vpop.f32.mrf.mxu2 }
 0xccd   : > { %v952_v62 = vand.u32 2147483647, %v948_v61 }
 0xccf   : > { %1411 = vmatmul.msk.f32.gmra.mxu0 %vm363_vm5, %v952_v62 }
 0xd44   : > { %v987_v63 = vpop.f32.mrf.mxu0 }
 0xd45   : > { %v988_v0 = vadd.f32 %v1539_v58, %v987_v63 }
 0xd47   : > { %vm993_vm3 = vcmp.ge.f32.partialorder %v988_v0, 0.0  ;;  %v995_v1 = vmul.f32 0.01, %v988_v0 }
 0xd49   : > { %v997_v2 = vsel %vm993_vm3, %v988_v0, %v995_v1 }
 0xd4a   : > { %1416 = vmatmul.msk.f32.vlgmr.msrb.gmra.mxu1 %vm411_vm7, %v997_v2 }
 0xd4c   : > { %v990_v3 = vpop.f32.mrf.mxu0 }
 0xd4d   : > { %v991_v4 = vadd.f32 %v1539_v58, %v990_v3 }
 0xd4f   : > { %v996_v5 = vmul.f32 0.01, %v991_v4  ;;  %vm994_vm9 = vcmp.ge.f32.partialorder %v991_v4, 0.0 }
 0xd51   : > { %v998_v8 = vsel %vm994_vm9, %v991_v4, %v996_v5 }
 0xd52   : > { %1417 = vmatmul.msk.f32.gmra.mxu1 %vm411_vm7, %v998_v8 }
 0xdc7   : > { %v1031_v12 = vpop.f32.mrf.mxu1 }
 0xdc8   : > { %v1032_v13 = vadd.f32 %v1031_v12, %v1006_v11 }
 0xdca   : > { %vm1037_vm11 = vcmp.ge.f32.partialorder %v1032_v13, 0.0  ;;  %v1039_v14 = vmul.f32 0.01, %v1032_v13 }
 0xdcc   : > { %v1041_v15 = vsel %vm1037_vm11, %v1032_v13, %v1039_v14 }
 0xdcd   : > { %1420 = vmatmul.msk.f32.vlgmr.msrb.gmra.mxu3 %vm452_vm10, %v1041_v15 }
 0xdcf   : > { %v1034_v16 = vpop.f32.mrf.mxu1 }
 0xdd0   : > { %v1035_v18 = vadd.f32 %v1034_v16, %v1006_v11 }
 0xdd2   : > { %v1040_v19 = vmul.f32 0.01, %v1035_v18  ;;  %vm1038_vm7 = vcmp.ge.f32.partialorder %v1035_v18, 0.0 }
 0xdd4   : > { %v1042_v20 = vsel %vm1038_vm7, %v1035_v18, %v1040_v19 }
 0xdd5   : > { %1421 = vmatmul.msk.f32.gmra.mxu3 %vm452_vm10, %v1042_v20 }
 0xe50   : > { %v1072_v22 = vpop.f32.mrf.mxu3 }
 0xe51   : > { %v1073_v23 = vadd.f32 %v1072_v22, %v1047_v21 }
 0xe53   : > { %1080 = vperm.xlu2 %1521, %v1073_v23  }
 0xe58   : > { %v1075_v24 = vpop.f32.mrf.mxu3 }
 0xe59   : > { %v1076_v25 = vadd.f32 %v1075_v24, %v1047_v21 }
 0xe5b   : > { %1085 = vperm.xlu0 %1505, %v1076_v25  }
 0xead   : > { %v1081_v26 = vpop.permute.xlu2 %1080 }
 0xeae   : > { %v1088_v27 = vmul.f32 %v1081_v26, %v1782_v6 }
 0xecd   : > { %v1086_v17 = vpop.permute.xlu0 %1085 }
 0xece   : > { %v1089_v28 = vmul.f32 %v1086_v17, %v1787_v7 }
 0xed0   : > { %v1522_v29 = vpack.i.bf16 %v1088_v27, %v1089_v28 }
 0xed2   : > { %1523 = vrot.lane.b32.xlu0 %v1522_v29, %s1656_s26  ;;  %s1266_s26 = sshll.u32 %s1262_s18, 4  ;;  %s1267_s26 = int_to_ptr.hbm [resolvable:$true] %s1266_s26 }
 0xeda   : > { %1185 = vrot.lane.b32.xlu0 %v1429_v38, %s1653_s10 }
 0xf44   : > { %v1524_v30 = vpop.permute.xlu0 %1523 }
 0xf45   : > { %v1525_v31 = vunpack.i.l.bf16 %v1524_v30  ;;  %v1526_v32 = vunpack.i.h.bf16 %v1524_v30 }
 0xf47   : > { %1112 = vmatpush.msra.mxu2 %v1525_v31 }
 0xf49   : > { %1113 = vmatpush.msra.mxu2 %v1526_v32 }
 0xf4a   : > { %1422 = vmatmul.msk.f32.vlgmr.msra.gmra.mxu2 %vm452_vm10, %v1861_v54  ;;  %v1527_v54 = vpack.i.bf16 %v1994_v52, %v1988_v51 }
 0xf4c   : > { %1528 = vrot.lane.b32.xlu0 %v1527_v54, %s1653_s10  ;;  %v1186_v52 = vpop.permute.xlu0 %1185 }
 0xf4d   : > { %1430 = vmatpush.msk.msrb.mxu0 %vm370_vm1, %v1186_v52  ;;  %vm1220_vm1 = vcmask 16384  }
 0xf54   : > { %1533 = vrot.lane.b32.xlu0 %v1532_v39, %s1653_s10  ;;  %s2055_s10 = scalar_lea.vmem [#allocation5], %s1358_s22  ;;  %s1570_s22 = sshra.s32 %s1267_s26, 4  ;;  %s1571_s22 = int_to_ptr.hbm [resolvable:$true] %s1570_s22 }
 0xf55   : > { %s1264_s19 = sshll.u32 %s2055_s10, 4  ;;  %s1572_s23 = scalar_lea.hbm %s1571_s22, 4  ;;  %s1265_s19 = int_to_ptr.vmem [resolvable:$true] %s1264_s19 }
 0xf56   : > { %p1573_p11 = scmp.ne.s32.totalorder %s1571_s22, %s1572_s23  ;;  %p1577_p0 = scmp.lt.s32.totalorder %s1571_s22, %s2125_s8 }
 0xf57   : > { %p1578_p1 = scmp.lt.s32.totalorder %s1576_s0, %s1572_s23 }
 0xf58   : > { %p1574_p12 = pnand %p1573_p11, %p1743_p5 }
 0xf59   : > { %p1579_p2 = por %p1578_p1, %p1577_p0 }
 0xf5a   : > { %p1575_p13 = pneg %p1574_p12 }
 0xf5c   : > { %1192 = vrot.lane.b32.xlu0 %v1171_v60, %s2135_s25  ;;  %p1580_p3 = pnand %p1579_p2, %p1575_p13 }
 0xfbe   : > { %v1529_v53 = vpop.permute.xlu0 %1528 }
 0xfbf   : > { %v1531_v55 = vunpack.i.h.bf16 %v1529_v53  ;;  %v1530_v56 = vunpack.i.l.bf16 %v1529_v53 }
 0xfc1   : > { %1212 = vmatpush.msrb.mxu0 %v1530_v56 }
 0xfc3   : > { %1213 = vmatpush.msrb.mxu0 %v1531_v55 }
 0xfc6   : > { %v1534_v57 = vpop.permute.xlu0 %1533 }
 0xfc7   : > { %v1536_v58 = vunpack.i.h.bf16 %v1534_v57  ;;  %v1535_v59 = vunpack.i.l.bf16 %v1534_v57 }
 0xfc9   : > { %1214 = vmatpush.msrb.mxu0 %v1535_v59 }
 0xfcb   : > { %1215 = vmatpush.msrb.mxu0 %v1536_v58 }
 0xfcd   : > { %v1115_v33 = vpop.f32.mrf.mxu2 }
 0xfce   : > { %v1118_v34 = vsel %vm525_vm12, %v1115_v33, -inf  ;;  %v1193_v62 = vpop.permute.xlu0 %1192 }
 0xfcf   : > { %1119 = vmax.xlane.f32.xlu2 %v1118_v34 }
0x1042   : > { %v1120_v35 = vpop.xlane.xlu2 %1119 }
0x1043   : > { %v1121_v36 = vsub.f32 %v1115_v33, %v1120_v35 }
0x1045   : > { %v1122_v6 = vmul.f32 1.442695, %v1121_v36 }
0x1047   : > { %1548 = vpow2.f32 %v1122_v6 }
0x104d   : > { %v1549_v7 = vpop.eup %1548 }
0x104e   : > { %v1124_v37 = vsel %vm525_vm12, %v1549_v7, 0.0 }
0x104f   : > { %1125 = vadd.xlane.f32.xlu1 %v1124_v37 }
0x10c2   : > { %v1126_v40 = vpop.xlane.xlu1 %1125 }
0x10c3   : > { %1550 = vrcp.f32 %v1126_v40  ;;  %v1138_v44 = vand.u32 2147483648, %v1126_v40  ;;  %v1136_v46 = vand.u32 2147483647, %v1126_v40  ;;  %vm1132_vm13 = vweird.f32 %v1126_v40 }
0x10c5   : > { %v1139_v48 = vor.u32 1.1754944e-38, %v1138_v44  ;;  %vm1137_vm15 = vcmp.eq.f32.partialorder %v1136_v46, 8.507059e+37 }
0x10c9   : > { %v1551_v41 = vpop.eup %1550 }
0x10ca   : > { %v1128_v42 = vmul.f32 %v1551_v41, %v1126_v40  ;;  %vm1133_vm10 = vweird.f32 %v1551_v41 }
0x10cb   : > { %vm1134_vm14 = vmor %vm1132_vm13, %vm1133_vm10 }
0x10cc   : > { %v1129_v43 = vsub.f32 1.0, %v1128_v42 }
0x10ce   : > { %v1130_v45 = vmul.f32 %v1551_v41, %v1129_v43 }
0x10d0   : > { %v1131_v47 = vadd.f32 %v1551_v41, %v1130_v45 }
0x10d2   : > { %v1135_v49 = vsel %vm1134_vm14, %v1551_v41, %v1131_v47 }
0x10d3   : > { %v1140_v50 = vsel %vm1137_vm15, %v1139_v48, %v1135_v49 }
0x10d4   : > { %v1141_v51 = vmul.f32 %v1549_v7, %v1140_v50 }
0x10d6   : > { %1424 = vmatmul.msk.f32.vlgmr.msra.gmra.mxu1 %vm320_vm4, %v1141_v51  ;;  %1142 = vst.msk [vmem:[%s2055_s10] sm:$0xf] %vm525_vm12, %v1141_v51 }
0x1153   : > { %v1163_v61 = vpop.f32.mrf.mxu1 }
0x1154   : > { %1431 = vmatmul.msk.f32.vlgmr.msrb.gmra.mxu0 %vm363_vm5, %v1163_v61 }
0x11d1   : > { %v1217_v63 = vpop.f32.mrf.mxu0 }
0x11d2   : > { %v1218_v0 = vadd.f32 %v1217_v63, %v1193_v62 }
0x11d4   : > { %v1221_v1 = vsel %vm1220_vm1, %v1218_v0, -inf }
0x11d5   : > { %1222 = vmax.xlane.f32.xlu0 %v1221_v1 }
0x1248   : > { %v1223_v2 = vpop.xlane.xlu0 %1222 }
0x1249   : > { %v1224_v3 = vsub.f32 %v1218_v0, %v1223_v2 }
0x124b   : > { %v1225_v4 = vmul.f32 1.442695, %v1224_v3 }
0x124d   : > { %1552 = vpow2.f32 %v1225_v4 }
0x1253   : > { %v1553_v5 = vpop.eup %1552 }
0x1254   : > { %v1227_v8 = vsel %vm1220_vm1, %v1553_v5, 0.0 }
0x1255   : > { %1228 = vadd.xlane.f32.xlu2 %v1227_v8 }
0x1256   : > { %1583 = shalt.err (!%p1580_p3)
}
0x1257   : > { %1438 = dma.vmem_to_hbm [thread:$0]  (%p1743_p5), %s1265_s19, 64, %s1267_s26, %s1239_s20  }
0x1258   : > { %s1248_s21 = scalar_lea.hbm %s2124_s7, %s1726_s9  ;;  %s299_s1 = scalar_lea.vmem [#allocation3], %s2051_s17 }
0x1259   : > { %s1250_s2 = sshll.u32 %s299_s1, 4  ;;  %s1252_s0 = sshll.u32 %s1248_s21, 4  ;;  %s1251_s2 = int_to_ptr.vmem [resolvable:$true] %s1250_s2  ;;  %s1253_s0 = int_to_ptr.hbm [resolvable:$true] %s1252_s0 }
0x125a   : > { %s1235_s13 = scalar_lea.sflag [#allocation4], %s2051_s17  ;;  %s1598_s18 = sshra.s32 %s1253_s0, 4  ;;  %s1599_s18 = int_to_ptr.hbm [resolvable:$true] %s1598_s18 }
0x125b   : > { %s1600_s19 = scalar_lea.hbm %s1599_s18, 1  ;;  %s1604_s20 = scalar_lea.hbm %s2124_s7, 2 }
0x125c   : > { %p1601_p4 = scmp.ne.s32.totalorder %s1599_s18, %s1600_s19  ;;  %p1605_p9 = scmp.lt.s32.totalorder %s1599_s18, %s2124_s7 }
0x125d   : > { %p1606_p10 = scmp.lt.s32.totalorder %s1604_s20, %s1600_s19 }
0x125e   : > { %p1602_p7 = pnand %p1601_p4, %p1743_p5 }
0x125f   : > { %p1607_p11 = por %p1606_p10, %p1605_p9 }
0x1260   : > { %p1603_p8 = pneg %p1602_p7 }
0x1262   : > { %p1608_p12 = pnand %p1607_p11, %p1603_p8 }
0x12c8   : > { %v1229_v9 = vpop.xlane.xlu2 %1228 }
0x12c9   : > { %1554 = vlog2.f32 %v1229_v9 }
0x12cf   : > { %v1555_v10 = vpop.eup %1554 }
0x12d0   : > { %v1231_v11 = vmul.f32 0.6931472, %v1555_v10 }
0x12d2   : > { %v1232_v12 = vsub.f32 %v1224_v3, %v1231_v11 }
0x12d4   : > { %1233 = vst.msk [vmem:[%s299_s1] sm:$0x1] %vm1220_vm1, %v1232_v12 }
0x12d5   : > { %1611 = shalt.err (!%p1608_p12)
}
0x12d6   : > { %1437 = dma.vmem_to_hbm [thread:$0]  (%p1743_p5), %s1251_s2, 16, %s1253_s0, %s1235_s13  }
0x12d7 PF: > { %p1448_p13 = scmp.ge.s32.totalorder %s1650_s30, 2  ;;  %s1278_s17 = sand.u32 1, %s1638_s27  }
0x12d8   : > { %s1279_s24 = scalar_lea.sflag [#allocation4], %s1278_s17 }
0x12d9   : > { %p1442_p0 = pnand %p1448_p13, %p1747_p6 }
0x12db   : > { %p1443_p1 = pneg %p1442_p0 }
0x12dd   : > { %1629 = dma.done.wait (%p1443_p1), %s1279_s24, 16  }
0x12de   : > { %1631 = vsyncadd (%p1443_p1), %s1279_s24, 4294967280  ;;  %s1288_s25 = scalar_lea.sflag [#allocation6], %s1278_s17 }
0x12df   : > { %1633 = dma.done.wait (%p1443_p1), %s1288_s25, 64  }
0x12e0   : > { %1635 = vsyncadd (%p1443_p1), %s1288_s25, 4294967232  ;;  %p22_p5 = scmp.ge.s32.totalorder %s1730_s11, 4   ;;  %s2136_s27 = smov %s1642_s28 }
0x12e1   : > { %s2137_s28 = smov %s1646_s29  ;;  %s2138_s29 = smov %s1741_s14 }
0x12e2   : > { %s2139_s30 = smov %s1730_s11  ;;  %24 = sbr.rel (!%p22_p5) target bundleno = 9 (0x9), region = 106 }
0x12e7   :  { %1294 = vsyncpa [#allocation4], 1 }
0x12e8   :  { %1296 = vsyncpa [#allocation4 + $0x1], 1 }
0x12e9   :  { %1297 = vsyncpa [#allocation6], 1 }
0x12ea   :  { %1299 = vsyncpa [#allocation6 + $0x1], 1 }

// kernel: gnn_model_forward.2
= control target key start
LH: loop header
LB: loop body
LE: loop exit
PB: predicated region body
PF: predicated region fallthrough
CT: control target
= control target key end

     0   :  { %s8372_s21 = smov 0   ;;  %s11721_s0 = inlined_call_operand.vmem [shape: f32[2,4,120,1], index: 0, kind: input, shape index: {}]   ;;  %s11722_s1 = inlined_call_operand.vmem [shape: f32[536,120], index: 1, kind: input, shape index: {}]   ;;  %s11723_s2 = inlined_call_operand.vmem [shape: f32[5,72,32], index: 2, kind: input, shape index: {}]   ;;  %s11724_s3 = inlined_call_operand.vmem [shape: f32[5,32], index: 3, kind: input, shape index: {}]   ;;  %s11725_s4 = inlined_call_operand.vmem [shape: f32[15,32,32], index: 4, kind: input, shape index: {}]   ;;  %s11726_s5 = inlined_call_operand.vmem [shape: f32[32,18], index: 5, kind: input, shape index: {}]   ;;  %s11727_s6 = inlined_call_operand.vmem [shape: f32[2,4,18], index: 6, kind: output, shape index: {}]  }
   0x1 LB: > { %s7419_s22 = sadd.s32 4294967295, %s8334_s21   ;;  %p7423_p0 = scmp.ge.s32.totalorder %s8334_s21, 1  ;;  %s8334_s21 = sphi %s8372_s21, %s16_s21  }
   0x2   : > { %p212_p1 = scmp.lt.s32.totalorder %s8334_s21, 3 }
   0x4   : > { %p213_p2 = pnand %p7423_p0, %p212_p1 }
   0x5   : > { %p241_p3 = scmp.lt.s32.totalorder (!%p213_p2), %s7419_s22, 1 }
   0x6   : > { %216 = sbr.rel (%p213_p2) target bundleno = 5742 (0x166e), region = 44 }
   0xb   : > { %s11729_s22 = smov (!%p241_p3, %s7419_s22), 1  ;;  %v319_v15 = vld [vmem:[%s11722_s1] sm:$0xff]  ;;  %vm357_vm0 = vcmask 982016   ;;  %v320_v16 = vld [vmem:[%s11722_s1 + $0x8] sm:$0xff]  ;;  %v321_v17 = vld [vmem:[%s11722_s1 + $0x10] sm:$0xff]  ;;  %v8336_v27 = vmov 0  }
   0xc   : > { %s8161_s23 = smul.u32 480, %s11729_s22  ;;  %v322_v18 = vld [vmem:[%s11722_s1 + $0x18] sm:$0xff]  ;;  %v323_v19 = vld [vmem:[%s11722_s1 + $0x20] sm:$0xff]  ;;  %v324_v20 = vld [vmem:[%s11722_s1 + $0x28] sm:$0xff]  ;;  %8171 = vset.pattern.permute.xlu1 %v8336_v27  ;;  %8172 = vset.pattern.permute.xlu0 %v8336_v27  ;;  %vm714_vm1 = vcmask 1043456   ;;  %vm970_vm2 = vcmask 490496  }
   0xd   : > { %v325_v21 = vld [vmem:[%s11722_s1 + $0x30] sm:$0xff]  ;;  %v326_v22 = vld [vmem:[%s11722_s1 + $0x38] sm:$0xff]  ;;  %v327_v23 = vld [vmem:[%s11722_s1 + $0x40] sm:$0xff]  ;;  %8173 = vset.pattern.permute.xlu2 %v8336_v27  ;;  %vm1107_vm3 = vcmask 261120   ;;  %vm1157_vm4 = vcmask 1041408   ;;  %vm1265_vm5 = vcmask 1045504  }
   0xe   : > { %s8386_s26 = scalar_lea.vmem %s11721_s0, %s8161_s23  ;;  %v328_v24 = vld [vmem:[%s11722_s1 + $0x48] sm:$0xff]  ;;  %v329_v25 = vld [vmem:[%s11722_s1 + $0x50] sm:$0xff]  ;;  %v330_v26 = vld [vmem:[%s11722_s1 + $0x58] sm:$0xff]  ;;  %vm1373_vm6 = vcmask 244736   ;;  %vm1489_vm7 = vcmask 1040384   ;;  %vm1562_vm8 = vcmask 1042432  }
   0xf   : > { %v318_v0 = vld [vmem:[%s8386_s26 + $0x70] sm:$0xff]  ;;  %v317_v1 = vld [vmem:[%s8386_s26 + $0x68] sm:$0xff]  ;;  %v316_v2 = vld [vmem:[%s8386_s26 + $0x60] sm:$0xff]  ;;  %s7425_s23 = sshll.u32 %s11729_s22, 2  ;;  %vm2093_vm9 = vcmask 139264  }
  0x10   : > { %473 = vmatpush.msra.mxu0 %v318_v0  ;;  %v315_v3 = vld [vmem:[%s8386_s26 + $0x58] sm:$0xff]  ;;  %v314_v4 = vld [vmem:[%s8386_s26 + $0x50] sm:$0xff]  ;;  %v313_v5 = vld [vmem:[%s8386_s26 + $0x48] sm:$0xff]  ;;  %s9399_s29 = scalar_lea.vmem %s11727_s6, %s7425_s23 }
  0x11   : > { %v312_v6 = vld [vmem:[%s8386_s26 + $0x40] sm:$0xff]  ;;  %v311_v7 = vld [vmem:[%s8386_s26 + $0x38] sm:$0xff]  ;;  %v310_v8 = vld [vmem:[%s8386_s26 + $0x30] sm:$0xff] }
  0x12   : > { %474 = vmatpush.msra.mxu0 %v317_v1  ;;  %v309_v9 = vld [vmem:[%s8386_s26 + $0x28] sm:$0xff]  ;;  %v308_v10 = vld [vmem:[%s8386_s26 + $0x20] sm:$0xff]  ;;  %v307_v11 = vld [vmem:[%s8386_s26 + $0x18] sm:$0xff] }
  0x13   : > { %v306_v12 = vld [vmem:[%s8386_s26 + $0x10] sm:$0xff]  ;;  %v305_v13 = vld [vmem:[%s8386_s26 + $0x8] sm:$0xff]  ;;  %v304_v14 = vld [vmem:[%s8386_s26] sm:$0xff] }
  0x14   : > { %475 = vmatpush.msra.mxu0 %v316_v2  ;;  %v331_v28 = vld [vmem:[%s11722_s1 + $0x60] sm:$0xff]  ;;  %v332_v29 = vld [vmem:[%s11722_s1 + $0x68] sm:$0xff]  ;;  %v333_v30 = vld [vmem:[%s11722_s1 + $0x70] sm:$0xff] }
  0x15   : > { %v334_v31 = vld [vmem:[%s11722_s1 + $0x78] sm:$0xff]  ;;  %v335_v33 = vld [vmem:[%s11722_s1 + $0x80] sm:$0xff]  ;;  %v336_v35 = vld [vmem:[%s11722_s1 + $0x88] sm:$0xff] }
  0x16   : > { %476 = vmatpush.msra.mxu0 %v315_v3  ;;  %v337_v37 = vld [vmem:[%s11722_s1 + $0x90] sm:$0xff]  ;;  %v338_v39 = vld [vmem:[%s11722_s1 + $0x98] sm:$0xff]  ;;  %v339_v41 = vld [vmem:[%s11722_s1 + $0xa0] sm:$0xff] }
  0x17   : > { %v340_v43 = vld [vmem:[%s11722_s1 + $0xa8] sm:$0xff]  ;;  %v341_v45 = vld [vmem:[%s11722_s1 + $0xb0] sm:$0xff]  ;;  %v342_v47 = vld [vmem:[%s11722_s1 + $0xb8] sm:$0xff] }
  0x18   : > { %477 = vmatpush.msra.mxu0 %v314_v4  ;;  %v343_v49 = vld [vmem:[%s11722_s1 + $0xc0] sm:$0xff]  ;;  %v344_v51 = vld [vmem:[%s11722_s1 + $0xc8] sm:$0xff]  ;;  %v345_v53 = vld [vmem:[%s11722_s1 + $0xd0] sm:$0xff] }
  0x19   : > { %v346_v55 = vld [vmem:[%s11722_s1 + $0xd8] sm:$0xff]  ;;  %v347_v57 = vld [vmem:[%s11722_s1 + $0xe0] sm:$0xff]  ;;  %v348_v59 = vld [vmem:[%s11722_s1 + $0xe8] sm:$0xff] }
  0x1a   : > { %478 = vmatpush.msra.mxu0 %v313_v5  ;;  %v349_v61 = vld [vmem:[%s11722_s1 + $0xf0] sm:$0xff]  ;;  %v350_v63 = vld [vmem:[%s11722_s1 + $0xf8] sm:$0xff]  ;;  %v351_v1 = vld [vmem:[%s11722_s1 + $0x100] sm:$0xff] }
  0x1b   : > { %v352_v3 = vld [vmem:[%s11722_s1 + $0x108] sm:$0xff]  ;;  %v353_v5 = vld [vmem:[%s11722_s1 + $0x110] sm:$0xff] }
  0x1c   : > { %479 = vmatpush.msra.mxu0 %v312_v6 }
  0x1e   : > { %480 = vmatpush.msra.mxu0 %v311_v7  ;;  %v354_v7 = vld [vmem:[%s11722_s1 + $0x118] sm:$0xff] }
  0x20   : > { %481 = vmatpush.msra.mxu0 %v310_v8 }
  0x22   : > { %482 = vmatpush.msra.mxu0 %v309_v9  ;;  %v355_v9 = vld [vmem:[%s11722_s1 + $0x120] sm:$0xff] }
  0x24   : > { %483 = vmatpush.msra.mxu0 %v308_v10 }
  0x26   : > { %484 = vmatpush.msra.mxu0 %v307_v11  ;;  %v356_v11 = vld [vmem:[%s11722_s1 + $0x128] sm:$0xf] }
  0x28   : > { %485 = vmatpush.msra.mxu0 %v306_v12 }
  0x2a   : > { %486 = vmatpush.msra.mxu0 %v305_v13 }
  0x2c   : > { %487 = vmatpush.msra.mxu0 %v304_v14 }
  0x2d   : > { %7426 = vmatmul.msk.f32.vlgmr.msra.gmra.mxu0 %vm357_vm0, %v319_v15 }
  0x35   : > { %7427 = vmatmul.msk.f32.gmra.mxu0 %vm357_vm0, %v320_v16 }
  0x3d   : > { %7428 = vmatmul.msk.f32.gmra.mxu0 %vm357_vm0, %v321_v17 }
  0x45   : > { %7429 = vmatmul.msk.f32.gmra.mxu0 %vm357_vm0, %v322_v18 }
  0x4d   : > { %7430 = vmatmul.msk.f32.gmra.mxu0 %vm357_vm0, %v323_v19 }
  0x55   : > { %7431 = vmatmul.msk.f32.gmra.mxu0 %vm357_vm0, %v324_v20 }
  0x5d   : > { %7432 = vmatmul.msk.f32.gmra.mxu0 %vm357_vm0, %v325_v21 }
  0x65   : > { %7433 = vmatmul.msk.f32.gmra.mxu0 %vm357_vm0, %v326_v22 }
  0x6d   : > { %7434 = vmatmul.msk.f32.gmra.mxu0 %vm357_vm0, %v327_v23 }
  0x75   : > { %7435 = vmatmul.msk.f32.gmra.mxu0 %vm357_vm0, %v328_v24 }
  0x7d   : > { %7436 = vmatmul.msk.f32.gmra.mxu0 %vm357_vm0, %v329_v25 }
  0x85   : > { %7437 = vmatmul.msk.f32.gmra.mxu0 %vm357_vm0, %v330_v26 }
  0x8d   : > { %7438 = vmatmul.msk.f32.gmra.mxu0 %vm357_vm0, %v331_v28 }
  0x95   : > { %7439 = vmatmul.msk.f32.gmra.mxu0 %vm357_vm0, %v332_v29 }
  0x9d   : > { %7440 = vmatmul.msk.f32.gmra.mxu0 %vm357_vm0, %v333_v30 }
  0xa5   : > { %7441 = vmatmul.msk.f32.gmra.mxu0 %vm357_vm0, %v334_v31 }
  0xaa   : > { %v489_v32 = vpop.f32.mrf.mxu0 }
  0xab   : > { %607 = vperm.xlu1 %8171, %v489_v32  }
  0xad   : > { %7442 = vmatmul.msk.f32.gmra.mxu0 %vm357_vm0, %v335_v33 }
  0xb2   : > { %v492_v34 = vpop.f32.mrf.mxu0 }
  0xb3   : > { %612 = vperm.xlu0 %8172, %v492_v34  }
  0xb5   : > { %7443 = vmatmul.msk.f32.gmra.mxu0 %vm357_vm0, %v336_v35 }
  0xba   : > { %v495_v36 = vpop.f32.mrf.mxu0 }
  0xbb   : > { %617 = vperm.xlu1 %8171, %v495_v36  }
  0xbd   : > { %7444 = vmatmul.msk.f32.gmra.mxu0 %vm357_vm0, %v337_v37 }
  0xc2   : > { %v498_v38 = vpop.f32.mrf.mxu0 }
  0xc3   : > { %622 = vperm.xlu2 %8173, %v498_v38  }
  0xc5   : > { %7445 = vmatmul.msk.f32.gmra.mxu0 %vm357_vm0, %v338_v39 }
  0xca   : > { %v501_v40 = vpop.f32.mrf.mxu0 }
  0xcb   : > { %627 = vperm.xlu1 %8171, %v501_v40  }
  0xcd   : > { %7446 = vmatmul.msk.f32.gmra.mxu0 %vm357_vm0, %v339_v41 }
  0xd2   : > { %v504_v42 = vpop.f32.mrf.mxu0 }
  0xd3   : > { %632 = vperm.xlu2 %8173, %v504_v42  }
  0xd5   : > { %7447 = vmatmul.msk.f32.gmra.mxu0 %vm357_vm0, %v340_v43 }
  0xda   : > { %v507_v44 = vpop.f32.mrf.mxu0 }
  0xdb   : > { %637 = vperm.xlu1 %8171, %v507_v44  }
  0xdd   : > { %7448 = vmatmul.msk.f32.gmra.mxu0 %vm357_vm0, %v341_v45 }
  0xe2   : > { %v510_v46 = vpop.f32.mrf.mxu0 }
  0xe3   : > { %642 = vperm.xlu0 %8172, %v510_v46  }
  0xe5   : > { %7449 = vmatmul.msk.f32.gmra.mxu0 %vm357_vm0, %v342_v47 }
  0xea   : > { %v513_v48 = vpop.f32.mrf.mxu0 }
  0xeb   : > { %664 = vperm.xlu1 %8171, %v513_v48  }
  0xed   : > { %7450 = vmatmul.msk.f32.gmra.mxu0 %vm357_vm0, %v343_v49 }
  0xf2   : > { %v516_v50 = vpop.f32.mrf.mxu0 }
  0xf3   : > { %669 = vperm.xlu2 %8173, %v516_v50  }
  0xf5   : > { %7451 = vmatmul.msk.f32.gmra.mxu0 %vm357_vm0, %v344_v51 }
  0xfa   : > { %v519_v52 = vpop.f32.mrf.mxu0 }
  0xfb   : > { %674 = vperm.xlu0 %8172, %v519_v52  }
  0xfd   : > { %7452 = vmatmul.msk.f32.gmra.mxu0 %vm357_vm0, %v345_v53  ;;  %v8175_v53 = vld [vmem:[%s11723_s2] ss:$0 sm:$0xff] }
 0x102   : > { %v522_v54 = vpop.f32.mrf.mxu0 }
 0x103   : > { %679 = vperm.xlu2 %8173, %v522_v54  }
 0x105   : > { %7453 = vmatmul.msk.f32.gmra.mxu0 %vm357_vm0, %v346_v55 }
 0x10a   : > { %v525_v56 = vpop.f32.mrf.mxu0 }
 0x10b   : > { %684 = vperm.xlu2 %8173, %v525_v56   ;;  %v8176_v56 = vld [vmem:[%s11723_s2 + $0x48] ss:$0 sm:$0xff] }
 0x10d   : > { %7454 = vmatmul.msk.f32.gmra.mxu0 %vm357_vm0, %v347_v57  ;;  %v8174_v57 = vld [vmem:[%s11724_s3] ss:$0 sm:$0xff] }
 0x112   : > { %v528_v58 = vpop.f32.mrf.mxu0 }
 0x113   : > { %689 = vperm.xlu1 %8171, %v528_v58  }
 0x115   : > { %7455 = vmatmul.msk.f32.gmra.mxu0 %vm357_vm0, %v348_v59 }
 0x11a   : > { %v531_v60 = vpop.f32.mrf.mxu0 }
 0x11b   : > { %694 = vperm.xlu0 %8172, %v531_v60  }
 0x11d   : > { %7456 = vmatmul.msk.f32.gmra.mxu0 %vm357_vm0, %v349_v61  ;;  %v623_v28 = vpop.permute.xlu2 %622  ;;  %v608_v30 = vpop.permute.xlu1 %607 }
 0x11e   : > { %v646_v58 = vmul.f32 %v8175_v53, %v608_v30  ;;  %v649_v60 = vmul.f32 %v8175_v53, %v623_v28 }
 0x122   : > { %v534_v62 = vpop.f32.mrf.mxu0 }
 0x125   : > { %7457 = vmatmul.msk.f32.gmra.mxu0 %vm357_vm0, %v350_v63  ;;  %v613_v29 = vpop.permute.xlu0 %612 }
 0x12a   : > { %v537_v0 = vpop.f32.mrf.mxu0 }
 0x12b   : > { %753 = vperm.xlu2 %8173, %v537_v0  }
 0x12d   : > { %7458 = vmatmul.msk.f32.gmra.mxu0 %vm357_vm0, %v351_v1  ;;  %v633_v31 = vpop.permute.xlu2 %632  ;;  %v618_v33 = vpop.permute.xlu1 %617 }
 0x132   : > { %v540_v2 = vpop.f32.mrf.mxu0 }
 0x133   : > { %758 = vperm.xlu2 %8173, %v540_v2   ;;  %v8588_v2 = vadd.f32 %v8174_v57, %v646_v58 }
 0x135   : > { %7459 = vmatmul.msk.f32.gmra.mxu0 %vm357_vm0, %v352_v3 }
 0x13a   : > { %v543_v4 = vpop.f32.mrf.mxu0 }
 0x13b   : > { %763 = vperm.xlu1 %8171, %v543_v4  }
 0x13d   : > { %7460 = vmatmul.msk.f32.gmra.mxu0 %vm357_vm0, %v353_v5  ;;  %v628_v36 = vpop.permute.xlu1 %627 }
 0x142   : > { %v546_v6 = vpop.f32.mrf.mxu0 }
 0x143   : > { %768 = vperm.xlu2 %8173, %v546_v6  }
 0x145   : > { %7461 = vmatmul.msk.f32.gmra.mxu0 %vm357_vm0, %v354_v7  ;;  %v647_v7 = vmul.f32 %v8175_v53, %v613_v29 }
 0x14a   : > { %v549_v8 = vpop.f32.mrf.mxu0 }
 0x14b   : > { %773 = vperm.xlu0 %8172, %v549_v8   ;;  %v648_v8 = vmul.f32 %v8175_v53, %v618_v33 }
 0x14d   : > { %7462 = vmatmul.msk.f32.gmra.mxu0 %vm357_vm0, %v355_v9  ;;  %v670_v34 = vpop.permute.xlu2 %669  ;;  %v638_v39 = vpop.permute.xlu1 %637  ;;  %v651_v9 = vmul.f32 %v8175_v53, %v633_v31 }
 0x14e   : > { %v700_v0 = vmul.f32 %v8176_v56, %v670_v34 }
 0x152   : > { %v552_v10 = vpop.f32.mrf.mxu0 }
 0x153   : > { %778 = vperm.xlu2 %8173, %v552_v10   ;;  %v650_v10 = vmul.f32 %v8175_v53, %v628_v36  ;;  %v8613_v36 = vld [vmem:[%s11723_s2 + $0x90] ss:$0 sm:$0xff] }
 0x155   : > { %7463 = vmatmul.msk.f32.gmra.mxu0 %vm357_vm0, %v356_v11  ;;  %v8555_v32 = vpop.permute.xlu0 %642 }
 0x156   : > { %v8605_v34 = vmul.f32 %v8176_v56, %v8555_v32 }
 0x15a   : > { %v555_v12 = vpop.f32.mrf.mxu0 }
 0x15b   : > { %783 = vperm.xlu0 %8172, %v555_v12   ;;  %v657_v12 = vadd.f32 %v8174_v57, %v649_v60 }
 0x15d   : > { %v680_v37 = vpop.permute.xlu2 %679  ;;  %v665_v42 = vpop.permute.xlu1 %664 }
 0x15e   : > { %v702_v61 = vmul.f32 %v8176_v56, %v680_v37  ;;  %v8586_v1 = vmul.f32 %v8176_v56, %v665_v42 }
 0x162   : > { %v558_v13 = vpop.f32.mrf.mxu0 }
 0x163   : > { %805 = vperm.xlu1 %8171, %v558_v13   ;;  %v652_v13 = vmul.f32 %v8175_v53, %v638_v39 }
 0x165   : > { %v685_v40 = vpop.permute.xlu2 %684  ;;  %v660_v28 = vadd.f32 %v8174_v57, %v652_v13 }
 0x166   : > { %v703_v59 = vmul.f32 %v8176_v56, %v685_v40 }
 0x168   : > { %v724_v3 = vrot.slane %v703_v59, 4 }
 0x16a   : > { %v561_v14 = vpop.f32.mrf.mxu0 }
 0x16b   : > { %810 = vperm.xlu0 %8172, %v561_v14   ;;  %v722_v14 = vrot.slane %v702_v61, 4 }
 0x16d   : > { %v675_v35 = vpop.permute.xlu0 %674 }
 0x172   : > { %v564_v15 = vpop.f32.mrf.mxu0 }
 0x173   : > { %815 = vperm.xlu2 %8173, %v564_v15  }
 0x17a   : > { %v567_v16 = vpop.f32.mrf.mxu0 }
 0x17b   : > { %820 = vperm.xlu0 %8172, %v567_v16   ;;  %v8593_v16 = vld [vmem:[%s11723_s2 + $0xd8] ss:$0 sm:$0xff] }
 0x182   : > { %v570_v17 = vpop.f32.mrf.mxu0 }
 0x183   : > { %825 = vperm.xlu1 %8171, %v570_v17   ;;  %v718_v17 = vrot.slane %v700_v0, 4 }
 0x185   : > { %v8559_v43 = vpop.permute.xlu2 %753  ;;  %v690_v45 = vpop.permute.xlu1 %689 }
 0x186   : > { %v704_v4 = vmul.f32 %v8176_v56, %v690_v45 }
 0x18a   : > { %v573_v18 = vpop.f32.mrf.mxu0 }
 0x18b   : > { %830 = vperm.xlu0 %8172, %v573_v18   ;;  %v653_v18 = vmul.f32 %v8175_v53, %v8555_v32 }
 0x18d   : > { %v695_v38 = vpop.permute.xlu0 %694  ;;  %v8565_v47 = vpop.permute.xlu2 %758  ;;  %v661_v37 = vadd.f32 %v8174_v57, %v653_v18 }
 0x18e   : > { %v705_v5 = vmul.f32 %v8176_v56, %v695_v38 }
 0x192   : > { %v576_v19 = vpop.f32.mrf.mxu0 }
 0x193   : > { %835 = vperm.xlu1 %8171, %v576_v19   ;;  %v716_v19 = vrot.slane %v8586_v1, 4 }
 0x19a   : > { %v579_v20 = vpop.f32.mrf.mxu0 }
 0x19d   : > { %v8571_v50 = vpop.permute.xlu2 %768 }
 0x1a2   : > { %v582_v21 = vpop.f32.mrf.mxu0 }
 0x1aa   : > { %v585_v22 = vpop.f32.mrf.mxu0 }
 0x1ad   : > { %v8567_v48 = vpop.permute.xlu1 %763  ;;  %v779_v54 = vpop.permute.xlu2 %778 }
 0x1b2   : > { %v588_v23 = vpop.f32.mrf.mxu0 }
 0x1ba   : > { %v591_v24 = vpop.f32.mrf.mxu0 }
 0x1bb   : > { %908 = vperm.xlu0 %8172, %v591_v24   ;;  %v8599_v24 = vadd.f32 %v8174_v57, %v647_v7 }
 0x1bd   : > { %v8557_v41 = vpop.permute.xlu0 %773 }
 0x1be   : > { %v792_v59 = vmul.f32 %v8613_v36, %v8557_v41  ;;  %v791_v41 = vmul.f32 %v8613_v36, %v8571_v50 }
 0x1c2   : > { %v594_v25 = vpop.f32.mrf.mxu0 }
 0x1c3   : > { %913 = vperm.xlu2 %8173, %v594_v25   ;;  %v656_v25 = vadd.f32 %v8174_v57, %v648_v8 }
 0x1ca   : > { %v597_v26 = vpop.f32.mrf.mxu0 }
 0x1cb   : > { %898 = vperm.xlu2 %8173, %v585_v22   ;;  %918 = vperm.xlu0 %8172, %v597_v26   ;;  %v725_v22 = vsel %vm714_vm1, %v722_v14, %v724_v3  ;;  %v659_v26 = vadd.f32 %v8174_v57, %v651_v9 }
 0x1cd   : > { %v8561_v44 = vpop.permute.xlu0 %783  ;;  %v816_v6 = vpop.permute.xlu2 %815 }
 0x1ce   : > { %v794_v58 = vmul.f32 %v8613_v36, %v8561_v44 }
 0x1d2   : > { %v600_v27 = vpop.f32.mrf.mxu0 }
 0x1d3   : > { %903 = vperm.xlu0 %8172, %v588_v23   ;;  %923 = vperm.xlu1 %8171, %v600_v27   ;;  %v658_v27 = vadd.f32 %v8174_v57, %v650_v10 }
 0x1d5   : > { %v8573_v51 = vpop.permute.xlu1 %805  ;;  %v742_v38 = vadd.f32 %v725_v22, %v658_v27  ;;  %v788_v27 = vmul.f32 %v8613_v36, %v8559_v43 }
 0x1d7   : > { %v799_v18 = vadd.f32 %v791_v41, %v742_v38 }
 0x1db   : > { %893 = vperm.xlu0 %8172, %v582_v21   ;;  %748 = vperm.xlu1 %8171, %v534_v62   ;;  %v701_v62 = vmul.f32 %v8176_v56, %v675_v35  ;;  %v728_v21 = vrot.slane %v705_v5, 4  ;;  %v719_v35 = vsel %vm714_vm1, %v716_v19, %v718_v17  ;;  %v793_v56 = vmul.f32 %v8613_v36, %v779_v54  ;;  %v8632_v54 = vld [vmem:[%s11723_s2 + $0x120] ss:$0 sm:$0xff] }
 0x1dc   : > { %v790_v5 = vmul.f32 %v8613_v36, %v8567_v48  ;;  %v840_v48 = vmul.f32 %v8593_v16, %v8573_v51 }
 0x1dd   : > { %v8563_v46 = vpop.permute.xlu0 %810  ;;  %v720_v15 = vrot.slane %v701_v62, 4  ;;  %v789_v62 = vmul.f32 %v8613_v36, %v8565_v47 }
 0x1de   : > { %v841_v57 = vmul.f32 %v8593_v16, %v8563_v46  ;;  %v842_v46 = vmul.f32 %v8593_v16, %v816_v6 }
 0x1df   : > { %v721_v29 = vsel %vm714_vm1, %v718_v17, %v720_v15  ;;  %v723_v30 = vsel %vm714_vm1, %v720_v15, %v722_v14 }
 0x1e0   : > { %v741_v53 = vadd.f32 %v723_v30, %v657_v12  ;;  %v858_v10 = vrot.slane %v841_v57, 4 }
 0x1e3   : > { %888 = vperm.xlu1 %8171, %v579_v20   ;;  %v726_v20 = vrot.slane %v704_v4, 4 }
 0x1e5   : > { %v729_v39 = vsel %vm714_vm1, %v726_v20, %v728_v21  ;;  %v727_v40 = vsel %vm714_vm1, %v724_v3, %v726_v20  ;;  %v860_v20 = vrot.slane %v842_v46, 4 }
 0x1e6   : > { %v744_v0 = vadd.f32 %v729_v39, %v660_v28  ;;  %v743_v3 = vadd.f32 %v727_v40, %v659_v26  ;;  %v798_v28 = vadd.f32 %v790_v5, %v741_v53  ;;  %v715_v39 = vrot.slane %v8605_v34, 4 }
 0x1e8   : > { %v801_v7 = vadd.f32 %v793_v56, %v744_v0  ;;  %v800_v9 = vadd.f32 %v792_v59, %v743_v3  ;;  %v717_v59 = vsel %vm714_vm1, %v715_v39, %v716_v19 }
 0x1ed   : > { %v8569_v49 = vpop.permute.xlu0 %820 }
 0x1ee   : > { %v843_v60 = vmul.f32 %v8593_v16, %v8569_v49 }
 0x1f5   : > { %v826_v55 = vpop.permute.xlu1 %825 }
 0x1f6   : > { %v844_v42 = vmul.f32 %v8593_v16, %v826_v55  ;;  %v745_v55 = vadd.f32 %v728_v21, %v661_v37 }
 0x1f8   : > { %v864_v4 = vrot.slane %v844_v42, 4  ;;  %v802_v47 = vadd.f32 %v794_v58, %v745_v55  ;;  %v856_v42 = vrot.slane %v840_v48, 4  ;;  %v839_v55 = vmul.f32 %v8593_v16, %v8561_v44  ;;  %v256_v48 = vld [vmem:[%s11723_s2 + $0x10] sm:$0xff] }
 0x1fa   : > { %v859_v34 = vsel %vm714_vm1, %v856_v42, %v858_v10 }
 0x1fd   : > { %v831_v52 = vpop.permute.xlu0 %830 }
 0x1fe   : > { %v845_v31 = vmul.f32 %v8593_v16, %v831_v52  ;;  %v740_v52 = vadd.f32 %v721_v29, %v656_v25 }
 0x200   : > { %v866_v61 = vrot.slane %v845_v31, 4  ;;  %v861_v31 = vsel %vm714_vm1, %v858_v10, %v860_v20  ;;  %v797_v40 = vadd.f32 %v789_v62, %v740_v52  ;;  %v738_v62 = vadd.f32 %v717_v59, %v8588_v2  ;;  %v954_v10 = vld [vmem:[%s11722_s1 + $0x148] sm:$0xff]  ;;  %v263_v59 = vld [vmem:[%s11723_s2 + $0x98] sm:$0xff] }
 0x202   : > { %v867_v14 = vsel %vm714_vm1, %v864_v4, %v866_v61 }
 0x203   : > { %v883_v26 = vadd.f32 %v867_v14, %v800_v9  ;;  %v952_v9 = vld [vmem:[%s11722_s1 + $0x138] sm:$0xff]  ;;  %v958_v14 = vld [vmem:[%s11722_s1 + $0x168] sm:$0xff] }
 0x205   : > { %v836_v11 = vpop.permute.xlu1 %835 }
 0x206   : > { %v846_v23 = vmul.f32 %v8593_v16, %v836_v11  ;;  %v862_v11 = vrot.slane %v843_v60, 4  ;;  %v880_v60 = vadd.f32 %v861_v31, %v797_v40  ;;  %v967_v31 = vld [vmem:[%s11722_s1 + $0x1b0] sm:$0xff] }
 0x207   : > { %v8780_v40 = vld [vmem:[%s11723_s2 + $0xf0] sm:$0xff] }
 0x208   : > { %v868_v45 = vrot.slane %v846_v23, 4  ;;  %v865_v21 = vsel %vm714_vm1, %v862_v11, %v864_v4  ;;  %v863_v30 = vsel %vm714_vm1, %v860_v20, %v862_v11  ;;  %v855_v4 = vrot.slane %v839_v55, 4  ;;  %v955_v11 = vld [vmem:[%s11722_s1 + $0x150] sm:$0xff]  ;;  %v962_v20 = vld [vmem:[%s11722_s1 + $0x188] sm:$0xff] }
 0x209   : > { %v882_v38 = vadd.f32 %v865_v21, %v799_v18  ;;  %v881_v53 = vadd.f32 %v863_v30, %v798_v28  ;;  %v257_v18 = vld [vmem:[%s11723_s2 + $0x18] sm:$0xff]  ;;  %v255_v21 = vld [vmem:[%s11723_s2 + $0x8] sm:$0xff] }
 0x20a   : > { %v869_v49 = vsel %vm714_vm1, %v866_v61, %v868_v45  ;;  %v885_v50 = vadd.f32 %v868_v45, %v802_v47  ;;  %v857_v5 = vsel %vm714_vm1, %v855_v4, %v856_v42  ;;  %v262_v28 = vld [vmem:[%s11723_s2 + $0x68] sm:$0xff] }
 0x20b   : > { %v884_v17 = vadd.f32 %v869_v49, %v801_v7  ;;  %v8808_v55 = vld [vmem:[%s11723_s2 + $0xe8] sm:$0xff] }
 0x21d   : > { %v914_v32 = vpop.permute.xlu2 %913 }
 0x21e   : > { %v932_v6 = vmul.f32 %v8632_v54, %v914_v32 }
 0x220   : > { %v940_v37 = vadd.f32 %v932_v6, %v883_v26  ;;  %v960_v6 = vld [vmem:[%s11722_s1 + $0x178] sm:$0xff]  ;;  %v965_v26 = vld [vmem:[%s11722_s1 + $0x1a0] sm:$0xff] }
 0x222   : > { %v948_v52 = vmax.f32 %v940_v37, 0.0 }
 0x225   : > { %v899_v29 = vpop.permute.xlu2 %898 }
 0x226   : > { %v929_v45 = vmul.f32 %v8632_v54, %v899_v29  ;;  %v261_v29 = vld [vmem:[%s11723_s2 + $0x60] sm:$0xff] }
 0x228   : > { %v937_v0 = vadd.f32 %v929_v45, %v880_v60  ;;  %v266_v45 = vld [vmem:[%s11723_s2 + $0xb0] sm:$0xff] }
 0x22a   : > { %v945_v49 = vmax.f32 %v937_v0, 0.0 }
 0x22d   : > { %v8584_v63 = vpop.permute.xlu0 %908 }
 0x22e   : > { %v931_v22 = vmul.f32 %v8632_v54, %v8584_v63  ;;  %v739_v63 = vadd.f32 %v719_v35, %v8599_v24 }
 0x230   : > { %v939_v32 = vadd.f32 %v931_v22, %v882_v38  ;;  %v796_v56 = vadd.f32 %v788_v27, %v739_v63  ;;  %v963_v22 = vld [vmem:[%s11722_s1 + $0x190] sm:$0xff]  ;;  %v966_v27 = vld [vmem:[%s11722_s1 + $0x1a8] sm:$0xff]  ;;  %v968_v38 = vld [vmem:[%s11722_s1 + $0x1b8] sm:$0xff] }
 0x231   : > { %v969_v63 = vld [vmem:[%s11722_s1 + $0x1c0] sm:$0x3f] }
 0x232   : > { %v947_v1 = vmax.f32 %v939_v32, 0.0  ;;  %v879_v19 = vadd.f32 %v859_v34, %v796_v56 }
 0x23d   : > { %v919_v33 = vpop.permute.xlu0 %918 }
 0x23e   : > { %v933_v8 = vmul.f32 %v8632_v54, %v919_v33 }
 0x240   : > { %v941_v25 = vadd.f32 %v933_v8, %v884_v17  ;;  %v951_v8 = vld [vmem:[%s11722_s1 + $0x130] sm:$0xff]  ;;  %v258_v17 = vld [vmem:[%s11723_s2 + $0x20] sm:$0xff] }
 0x241   : > { %1132 = vmatpush.msra.mxu2 %v258_v17 }
 0x242   : > { %v949_v43 = vmax.f32 %v941_v25, 0.0  ;;  %v8739_v25 = vld [vmem:[%s11723_s2 + $0xf8] sm:$0xff] }
 0x243   : > { %1133 = vmatpush.msra.mxu2 %v257_v18 }
 0x245   : > { %v904_v12 = vpop.permute.xlu0 %903  ;;  %v924_v13 = vpop.permute.xlu1 %923  ;;  %1134 = vmatpush.msra.mxu2 %v256_v48 }
 0x246   : > { %v934_v15 = vmul.f32 %v8632_v54, %v924_v13  ;;  %v930_v33 = vmul.f32 %v8632_v54, %v904_v12  ;;  %v956_v12 = vld [vmem:[%s11722_s1 + $0x158] sm:$0xff]  ;;  %v957_v13 = vld [vmem:[%s11722_s1 + $0x160] sm:$0xff] }
 0x247   : > { %1135 = vmatpush.msra.mxu2 %v255_v21 }
 0x248   : > { %v942_v23 = vadd.f32 %v934_v15, %v885_v50  ;;  %v938_v61 = vadd.f32 %v930_v33, %v881_v53  ;;  %v959_v50 = vld [vmem:[%s11722_s1 + $0x170] sm:$0xff]  ;;  %v961_v15 = vld [vmem:[%s11722_s1 + $0x180] sm:$0xff]  ;;  %v260_v33 = vld [vmem:[%s11723_s2 + $0x58] sm:$0xff] }
 0x249   : > { %1187 = vmatpush.msrb.mxu2 %v262_v28  ;;  %v264_v53 = vld [vmem:[%s11723_s2 + $0xa0] sm:$0xff] }
 0x24a   : > { %v950_v51 = vmax.f32 %v942_v23, 0.0  ;;  %v946_v41 = vmax.f32 %v938_v61, 0.0  ;;  %v964_v23 = vld [vmem:[%s11722_s1 + $0x198] sm:$0xff] }
 0x24b   : > { %1188 = vmatpush.msrb.mxu2 %v261_v29 }
 0x24c   : > { %7464 = vmatpush.msk.msra.mxu1 %vm714_vm1, %v950_v51  ;;  %v259_v51 = vld [vmem:[%s11723_s2 + $0x50] sm:$0xff] }
 0x24d   : > { %v894_v58 = vpop.permute.xlu0 %893  ;;  %v749_v57 = vpop.permute.xlu1 %748  ;;  %1189 = vmatpush.msrb.mxu2 %v260_v33  ;;  %v8867_v33 = vld [vmem:[%s11723_s2 + $0x40] sm:$0xff] }
 0x24e   : > { %v928_v24 = vmul.f32 %v8632_v54, %v894_v58  ;;  %v787_v35 = vmul.f32 %v8613_v36, %v749_v57  ;;  %1040 = vmatpush.msra.mxu1 %v949_v43  ;;  %v265_v43 = vld [vmem:[%s11723_s2 + $0xa8] sm:$0xff]  ;;  %1474 = vmatpush.msrb.mxu0 %v8867_v33 }
 0x24f   : > { %1190 = vmatpush.msrb.mxu2 %v259_v51 }
 0x250   : > { %1041 = vmatpush.msra.mxu1 %v948_v52  ;;  %v795_v3 = vadd.f32 %v787_v35, %v738_v62  ;;  %v936_v46 = vadd.f32 %v928_v24, %v879_v19 }
 0x252   : > { %1042 = vmatpush.msra.mxu1 %v947_v1  ;;  %v944_v44 = vmax.f32 %v936_v46, 0.0  ;;  %v878_v16 = vadd.f32 %v857_v5, %v795_v3  ;;  %v8817_v46 = vld [vmem:[%s11723_s2 + $0xe0] sm:$0xff] }
 0x254   : > { %1043 = vmatpush.msra.mxu1 %v946_v41 }
 0x255   : > { %v889_v36 = vpop.permute.xlu1 %888 }
 0x256   : > { %v927_v7 = vmul.f32 %v8632_v54, %v889_v36  ;;  %1044 = vmatpush.msra.mxu1 %v945_v49  ;;  %v953_v54 = vld [vmem:[%s11722_s1 + $0x140] sm:$0xff] }
 0x258   : > { %1045 = vmatpush.msra.mxu1 %v944_v44  ;;  %v935_v2 = vadd.f32 %v927_v7, %v878_v16 }
 0x25a   : > { %v943_v47 = vmax.f32 %v935_v2, 0.0  ;;  %v8829_v2 = vld [vmem:[%s11723_s2 + $0x140] sm:$0xff] }
 0x25c   : > { %1046 = vmatpush.msra.mxu1 %v943_v47  ;;  %v8835_v47 = vld [vmem:[%s11723_s2 + $0x138] sm:$0xff] }
 0x25d   : > { %7465 = vmatmul.msk.f32.vlgmr.msra.gmra.mxu1 %vm970_vm2, %v951_v8  ;;  %v8841_v8 = vld [vmem:[%s11723_s2 + $0x130] sm:$0xff] }
 0x25e   : > { %1293 = vmatpush.msrb.mxu1 %v8739_v25 }
 0x260   : > { %1294 = vmatpush.msrb.mxu1 %v8780_v40 }
 0x262   : > { %1295 = vmatpush.msrb.mxu1 %v8808_v55 }
 0x264   : > { %1296 = vmatpush.msrb.mxu1 %v8817_v46 }
 0x265   : > { %7466 = vmatmul.msk.f32.gmra.mxu1 %vm970_vm2, %v952_v9 }
 0x26d   : > { %7467 = vmatmul.msk.f32.gmra.mxu1 %vm970_vm2, %v953_v54  ;;  %v8847_v54 = vld [vmem:[%s11723_s2 + $0x128] sm:$0xff] }
 0x275   : > { %7468 = vmatmul.msk.f32.gmra.mxu1 %vm970_vm2, %v954_v10 }
 0x27d   : > { %7469 = vmatmul.msk.f32.gmra.mxu1 %vm970_vm2, %v955_v11 }
 0x285   : > { %7470 = vmatmul.msk.f32.gmra.mxu1 %vm970_vm2, %v956_v12 }
 0x28d   : > { %7471 = vmatmul.msk.f32.gmra.mxu1 %vm970_vm2, %v957_v13 }
 0x295   : > { %7472 = vmatmul.msk.f32.gmra.mxu1 %vm970_vm2, %v958_v14 }
 0x29d   : > { %7473 = vmatmul.msk.f32.gmra.mxu1 %vm970_vm2, %v959_v50 }
 0x2a5   : > { %7474 = vmatmul.msk.f32.gmra.mxu1 %vm970_vm2, %v960_v6 }
 0x2ad   : > { %7475 = vmatmul.msk.f32.gmra.mxu1 %vm970_vm2, %v961_v15 }
 0x2b5   : > { %7476 = vmatmul.msk.f32.gmra.mxu1 %vm970_vm2, %v962_v20 }
 0x2bd   : > { %7477 = vmatmul.msk.f32.gmra.mxu1 %vm970_vm2, %v963_v22 }
 0x2c5   : > { %7478 = vmatmul.msk.f32.gmra.mxu1 %vm970_vm2, %v964_v23 }
 0x2cd   : > { %7479 = vmatmul.msk.f32.gmra.mxu1 %vm970_vm2, %v965_v26 }
 0x2d5   : > { %7480 = vmatmul.msk.f32.gmra.mxu1 %vm970_vm2, %v966_v27 }
 0x2da   : > { %v1048_v30 = vpop.f32.mrf.mxu1 }
 0x2db   : > { %7484 = vmatmul.msk.f32.vlgmr.msra.gmra.mxu2 %vm1107_vm3, %v1048_v30 }
 0x2dc   : > { %1241 = vmatpush.msra.mxu2 %v266_v45 }
 0x2dd   : > { %7481 = vmatmul.msk.f32.gmra.mxu1 %vm970_vm2, %v967_v31 }
 0x2de   : > { %1242 = vmatpush.msra.mxu2 %v265_v43 }
 0x2e0   : > { %1243 = vmatpush.msra.mxu2 %v264_v53 }
 0x2e2   : > { %v1051_v37 = vpop.f32.mrf.mxu1  ;;  %1244 = vmatpush.msra.mxu2 %v263_v59 }
 0x2e3   : > { %7485 = vmatmul.msk.f32.gmra.mxu2 %vm1107_vm3, %v1051_v37 }
 0x2e5   : > { %7482 = vmatmul.msk.f32.gmra.mxu1 %vm970_vm2, %v968_v38 }
 0x2ea   : > { %v1054_v39 = vpop.f32.mrf.mxu1 }
 0x2eb   : > { %7486 = vmatmul.msk.f32.gmra.mxu2 %vm1107_vm3, %v1054_v39 }
 0x2ed   : > { %7483 = vmatmul.msk.f32.gmra.mxu1 %vm970_vm2, %v969_v63 }
 0x2f2   : > { %v1057_v42 = vpop.f32.mrf.mxu1 }
 0x2f3   : > { %7487 = vmatmul.msk.f32.gmra.mxu2 %vm1107_vm3, %v1057_v42  ;;  %v1158_v56 = vrot.slane %v1057_v42, 6 }
 0x2fa   : > { %v1060_v32 = vpop.f32.mrf.mxu1 }
 0x2fb   : > { %v1159_v58 = vrot.slane %v1060_v32, 6  ;;  %v8873_v32 = vld [vmem:[%s11723_s2 + $0x38] sm:$0xff] }
 0x2fc   : > { %1475 = vmatpush.msrb.mxu0 %v8873_v32 }
 0x2fd   : > { %v1160_v57 = vsel %vm1157_vm4, %v1158_v56, %v1159_v58 }
 0x2fe   : > { %7488 = vmatmul.msk.f32.vlgmr.msrb.gmra.mxu2 %vm1107_vm3, %v1160_v57  ;;  %v8180_v57 = vld [vmem:[%s11724_s3 + $0x1] ss:$0 sm:$0xff] }
 0x2ff   : > { %8157 = vmatpush.msrb.mxu2 %v8739_v25 }
 0x301   : > { %8158 = vmatpush.msrb.mxu2 %v8780_v40 }
 0x302   : > { %v1063_v60 = vpop.f32.mrf.mxu1 }
 0x303   : > { %v1161_v34 = vrot.slane %v1063_v60, 6  ;;  %8159 = vmatpush.msrb.mxu2 %v8808_v55 }
 0x305   : > { %v1162_v24 = vsel %vm1157_vm4, %v1159_v58, %v1161_v34  ;;  %8160 = vmatpush.msrb.mxu2 %v8817_v46 }
 0x306   : > { %7489 = vmatmul.msk.f32.gmra.mxu2 %vm1107_vm3, %v1162_v24 }
 0x30a   : > { %v1066_v35 = vpop.f32.mrf.mxu1 }
 0x30b   : > { %v1163_v52 = vrot.slane %v1066_v35, 6 }
 0x30d   : > { %v1164_v61 = vsel %vm1157_vm4, %v1161_v34, %v1163_v52 }
 0x30e   : > { %7490 = vmatmul.msk.f32.gmra.mxu2 %vm1107_vm3, %v1164_v61 }
 0x312   : > { %v1069_v62 = vpop.f32.mrf.mxu1 }
 0x313   : > { %v1165_v1 = vrot.slane %v1069_v62, 6  ;;  %v1212_v3 = vrot.slane %v1069_v62, 4 }
 0x315   : > { %v1166_v0 = vsel %vm1157_vm4, %v1163_v52, %v1165_v1 }
 0x316   : > { %7491 = vmatmul.msk.f32.gmra.mxu2 %vm1107_vm3, %v1166_v0 }
 0x31a   : > { %v1072_v19 = vpop.f32.mrf.mxu1 }
 0x31b   : > { %v1213_v41 = vrot.slane %v1072_v19, 4 }
 0x31d   : > { %v1214_v4 = vsel %vm714_vm1, %v1212_v3, %v1213_v41 }
 0x31e   : > { %7492 = vmatmul.msk.f32.vlgmr.msra.gmra.mxu2 %vm1107_vm3, %v1214_v4 }
 0x31f   : > { %1338 = vmatpush.msra.mxu2 %v8829_v2 }
 0x321   : > { %1339 = vmatpush.msra.mxu2 %v8835_v47 }
 0x322   : > { %v1075_v49 = vpop.f32.mrf.mxu1 }
 0x323   : > { %v1215_v36 = vrot.slane %v1075_v49, 4  ;;  %1340 = vmatpush.msra.mxu2 %v8841_v8 }
 0x325   : > { %v1216_v5 = vsel %vm714_vm1, %v1213_v41, %v1215_v36  ;;  %1341 = vmatpush.msra.mxu2 %v8847_v54 }
 0x326   : > { %7493 = vmatmul.msk.f32.gmra.mxu2 %vm1107_vm3, %v1216_v5 }
 0x32a   : > { %v1078_v7 = vpop.f32.mrf.mxu1 }
 0x32b   : > { %v1217_v44 = vrot.slane %v1078_v7, 4 }
 0x32d   : > { %v1218_v16 = vsel %vm714_vm1, %v1215_v36, %v1217_v44 }
 0x32e   : > { %7494 = vmatmul.msk.f32.gmra.mxu2 %vm1107_vm3, %v1218_v16 }
 0x332   : > { %v1081_v9 = vpop.f32.mrf.mxu1 }
 0x333   : > { %v1219_v10 = vrot.slane %v1081_v9, 4  ;;  %v1266_v13 = vrot.slane %v1081_v9, 2 }
 0x335   : > { %v1220_v11 = vsel %vm714_vm1, %v1217_v44, %v1219_v10 }
 0x336   : > { %7495 = vmatmul.msk.f32.gmra.mxu2 %vm1107_vm3, %v1220_v11 }
 0x33a   : > { %v1084_v12 = vpop.f32.mrf.mxu1 }
 0x33b   : > { %v1267_v14 = vrot.slane %v1084_v12, 2 }
 0x33d   : > { %v1268_v50 = vsel %vm1265_vm5, %v1266_v13, %v1267_v14 }
 0x33e   : > { %7496 = vmatmul.msk.f32.vlgmr.msrb.gmra.mxu1 %vm1107_vm3, %v1268_v50 }
 0x342   : > { %v1087_v6 = vpop.f32.mrf.mxu1 }
 0x343   : > { %v1269_v15 = vrot.slane %v1087_v6, 2 }
 0x345   : > { %v1270_v17 = vsel %vm1265_vm5, %v1267_v14, %v1269_v15 }
 0x346   : > { %7497 = vmatmul.msk.f32.gmra.mxu1 %vm1107_vm3, %v1270_v17  ;;  %v1364_v17 = vld [vmem:[%s11722_s1 + $0x1d0] sm:$0xff] }
 0x34a   : > { %v1090_v18 = vpop.f32.mrf.mxu1 }
 0x34b   : > { %v1271_v20 = vrot.slane %v1090_v18, 2  ;;  %v1365_v18 = vld [vmem:[%s11722_s1 + $0x1d8] sm:$0xff] }
 0x34d   : > { %7499 = vmatmul.msk.f32.vlgmr.msrb.gmra.mxu2 %vm1107_vm3, %v1271_v20  ;;  %v1272_v48 = vsel %vm1265_vm5, %v1269_v15, %v1271_v20  ;;  %v1363_v15 = vld [vmem:[%s11722_s1 + $0x1c8] sm:$0xff]  ;;  %v1366_v20 = vld [vmem:[%s11722_s1 + $0x1e0] sm:$0xff] }
 0x34e   : > { %7498 = vmatmul.msk.f32.gmra.mxu1 %vm1107_vm3, %v1272_v48  ;;  %v1367_v48 = vld [vmem:[%s11722_s1 + $0x1e8] sm:$0xff] }
 0x352   : > { %v1093_v21 = vpop.f32.mrf.mxu1 }
 0x355   : > { %7500 = vmatmul.msk.f32.vlgmr.msra.gmra.mxu2 %vm1107_vm3, %v1093_v21  ;;  %v276_v21 = vld [vmem:[%s11723_s2 + $0x30] sm:$0xff] }
 0x356   : > { %1476 = vmatpush.msrb.mxu0 %v276_v21 }
 0x35a   : > { %v1096_v22 = vpop.f32.mrf.mxu1 }
 0x35d   : > { %7501 = vmatmul.msk.f32.gmra.mxu2 %vm1107_vm3, %v1096_v22  ;;  %v1368_v22 = vld [vmem:[%s11722_s1 + $0x1f0] sm:$0xff] }
 0x35e   : > { %v1137_v23 = vpop.f32.mrf.mxu2 }
 0x35f   : > { %v1149_v1 = vadd.f32 %v8180_v57, %v1137_v23  ;;  %v1369_v23 = vld [vmem:[%s11722_s1 + $0x1f8] sm:$0xff] }
 0x362   : > { %v1099_v26 = vpop.f32.mrf.mxu1 }
 0x365   : > { %7502 = vmatmul.msk.f32.gmra.mxu2 %vm1107_vm3, %v1099_v26  ;;  %v1370_v26 = vld [vmem:[%s11722_s1 + $0x200] sm:$0xff] }
 0x366   : > { %v1140_v27 = vpop.f32.mrf.mxu2 }
 0x367   : > { %v1150_v35 = vadd.f32 %v8180_v57, %v1140_v27  ;;  %v1371_v27 = vld [vmem:[%s11722_s1 + $0x208] sm:$0xff] }
 0x36a   : > { %v1102_v28 = vpop.f32.mrf.mxu1 }
 0x36d   : > { %7503 = vmatmul.msk.f32.gmra.mxu2 %vm1107_vm3, %v1102_v28  ;;  %v1372_v28 = vld [vmem:[%s11722_s1 + $0x210] sm:$0x7] }
 0x36e   : > { %v1143_v29 = vpop.f32.mrf.mxu2 }
 0x36f   : > { %v1151_v34 = vadd.f32 %v8180_v57, %v1143_v29  ;;  %v275_v29 = vld [vmem:[%s11723_s2 + $0x28] sm:$0xff] }
 0x370   : > { %1477 = vmatpush.msrb.mxu0 %v275_v29 }
 0x372   : > { %3115 = vmatpush.msra.mxu0 %v8829_v2  ;;  %v280_v2 = vld [vmem:[%s11723_s2 + $0x78] sm:$0xff] }
 0x374   : > { %3116 = vmatpush.msra.mxu0 %v8835_v47  ;;  %v279_v47 = vld [vmem:[%s11723_s2 + $0x70] sm:$0xff] }
 0x376   : > { %v1146_v30 = vpop.f32.mrf.mxu2  ;;  %3117 = vmatpush.msra.mxu0 %v8841_v8  ;;  %v286_v8 = vld [vmem:[%s11723_s2 + $0xd0] sm:$0xff] }
 0x377   : > { %v1152_v24 = vadd.f32 %v8180_v57, %v1146_v30  ;;  %v282_v30 = vld [vmem:[%s11723_s2 + $0x88] sm:$0xff] }
 0x378   : > { %3118 = vmatpush.msra.mxu0 %v8847_v54  ;;  %1511 = vmatpush.msrb.mxu2 %v282_v30  ;;  %v285_v54 = vld [vmem:[%s11723_s2 + $0xc8] sm:$0xff]  ;;  %v7543_v30 = vld [vmem:[%s11725_s4 + $0x90] sm:$0xff] }
 0x381   : > { %v1192_v31 = vpop.f32.mrf.mxu2 }
 0x382   : > { %v1204_v41 = vadd.f32 %v1192_v31, %v1149_v1  ;;  %v294_v31 = vld [vmem:[%s11723_s2 + $0x160] sm:$0xff] }
 0x389   : > { %v1195_v51 = vpop.f32.mrf.mxu2 }
 0x38a   : > { %v1205_v0 = vadd.f32 %v1195_v51, %v1150_v35  ;;  %v281_v51 = vld [vmem:[%s11723_s2 + $0x80] sm:$0xff] }
 0x38b   : > { %1512 = vmatpush.msrb.mxu2 %v281_v51  ;;  %v7539_v51 = vld [vmem:[%s11725_s4 + $0x78] sm:$0xff] }
 0x38d   : > { %1513 = vmatpush.msrb.mxu2 %v280_v2  ;;  %v7542_v2 = vld [vmem:[%s11725_s4 + $0x88] sm:$0xff] }
 0x38f   : > { %1514 = vmatpush.msrb.mxu2 %v279_v47  ;;  %v7538_v47 = vld [vmem:[%s11725_s4 + $0x70] sm:$0xff] }
 0x391   : > { %v1198_v37 = vpop.f32.mrf.mxu2  ;;  %1547 = vmatpush.msra.mxu2 %v286_v8  ;;  %v7549_v8 = vld [vmem:[%s11725_s4 + $0xb8] sm:$0xff] }
 0x392   : > { %v1206_v52 = vadd.f32 %v1198_v37, %v1151_v34 }
 0x393   : > { %1548 = vmatpush.msra.mxu2 %v285_v54 }
 0x399   : > { %v1201_v38 = vpop.f32.mrf.mxu2 }
 0x39a   : > { %v1207_v61 = vadd.f32 %v1201_v38, %v1152_v24  ;;  %v284_v38 = vld [vmem:[%s11723_s2 + $0xc0] sm:$0xff] }
 0x39b   : > { %1549 = vmatpush.msra.mxu2 %v284_v38  ;;  %v7537_v38 = vld [vmem:[%s11725_s4 + $0x68] sm:$0xff] }
 0x3a1   : > { %v1246_v39 = vpop.f32.mrf.mxu2 }
 0x3a2   : > { %v1258_v7 = vadd.f32 %v1246_v39, %v1204_v41  ;;  %v293_v39 = vld [vmem:[%s11723_s2 + $0x158] sm:$0xff] }
 0x3a9   : > { %v1249_v63 = vpop.f32.mrf.mxu2 }
 0x3aa   : > { %v1259_v4 = vadd.f32 %v1249_v63, %v1205_v0  ;;  %v283_v63 = vld [vmem:[%s11723_s2 + $0xb8] sm:$0xff] }
 0x3ab   : > { %1550 = vmatpush.msra.mxu2 %v283_v63  ;;  %v7536_v63 = vld [vmem:[%s11725_s4 + $0x60] sm:$0xff] }
 0x3b1   : > { %v1252_v42 = vpop.f32.mrf.mxu2 }
 0x3b2   : > { %v1260_v19 = vadd.f32 %v1252_v42, %v1206_v52 }
 0x3b9   : > { %v1255_v45 = vpop.f32.mrf.mxu2 }
 0x3ba   : > { %v1261_v3 = vadd.f32 %v1255_v45, %v1207_v61 }
 0x3bb   : > { %v1298_v53 = vpop.f32.mrf.mxu1 }
 0x3bc   : > { %v1310_v10 = vadd.f32 %v1298_v53, %v1258_v7 }
 0x3c3   : > { %v1301_v59 = vpop.f32.mrf.mxu1 }
 0x3c4   : > { %v1311_v44 = vadd.f32 %v1301_v59, %v1259_v4  ;;  %v288_v59 = vld [vmem:[%s11723_s2 + $0x108] sm:$0xff] }
 0x3cb   : > { %v1304_v62 = vpop.f32.mrf.mxu1 }
 0x3cc   : > { %v1312_v49 = vadd.f32 %v1304_v62, %v1260_v19  ;;  %v291_v62 = vld [vmem:[%s11723_s2 + $0x148] sm:$0xff] }
 0x3d0   : > { %v1307_v43 = vpop.f32.mrf.mxu2 }
 0x3d1   : > { %v1313_v36 = vadd.f32 %v1307_v43, %v1261_v3 }
 0x3d8   : > { %v1343_v56 = vpop.f32.mrf.mxu2 }
 0x3d9   : > { %v1355_v13 = vadd.f32 %v1343_v56, %v1310_v10  ;;  %v290_v56 = vld [vmem:[%s11723_s2 + $0x118] sm:$0xff] }
 0x3db   : > { %v1359_v6 = vmax.f32 %v1355_v13, 0.0 }
 0x3e0   : > { %v1346_v58 = vpop.f32.mrf.mxu2 }
 0x3e1   : > { %v1356_v11 = vadd.f32 %v1346_v58, %v1311_v44 }
 0x3e3   : > { %v1360_v50 = vmax.f32 %v1356_v11, 0.0 }
 0x3e8   : > { %v1349_v60 = vpop.f32.mrf.mxu2 }
 0x3e9   : > { %v1357_v16 = vadd.f32 %v1349_v60, %v1312_v49  ;;  %v287_v60 = vld [vmem:[%s11723_s2 + $0x100] sm:$0xff] }
 0x3eb   : > { %v1361_v14 = vmax.f32 %v1357_v16, 0.0 }
 0x3f0   : > { %v1352_v5 = vpop.f32.mrf.mxu2 }
 0x3f1   : > { %v1358_v9 = vadd.f32 %v1352_v5, %v1313_v36 }
 0x3f3   : > { %v1362_v12 = vmax.f32 %v1358_v9, 0.0 }
 0x3f5   : > { %7504 = vmatpush.msk.msra.mxu3 %vm1265_vm5, %v1362_v12 }
 0x3f7   : > { %1420 = vmatpush.msra.mxu3 %v1361_v14 }
 0x3f9   : > { %1421 = vmatpush.msra.mxu3 %v1360_v50 }
 0x3fb   : > { %1422 = vmatpush.msra.mxu3 %v1359_v6  ;;  %v7529_v6 = vld [vmem:[%s11725_s4 + $0x38] sm:$0xff] }
 0x3fc   : > { %7505 = vmatmul.msk.f32.vlgmr.msra.gmra.mxu3 %vm1373_vm6, %v1363_v15  ;;  %v1638_v15 = vld [vmem:[%s11725_s4 + $0x18] sm:$0xff] }
 0x3fd   : > { %1620 = vmatpush.msrb.mxu3 %v294_v31  ;;  %1654 = vmatpush.msra.mxu1 %v1638_v15  ;;  %v7531_v31 = vld [vmem:[%s11725_s4 + $0x40] sm:$0xff] }
 0x3ff   : > { %1621 = vmatpush.msrb.mxu3 %v293_v39  ;;  %v7548_v39 = vld [vmem:[%s11725_s4 + $0xb0] sm:$0xff] }
 0x404   : > { %7506 = vmatmul.msk.f32.gmra.mxu3 %vm1373_vm6, %v1364_v17  ;;  %v7528_v17 = vld [vmem:[%s11725_s4 + $0x30] sm:$0xff] }
 0x40c   : > { %7507 = vmatmul.msk.f32.gmra.mxu3 %vm1373_vm6, %v1365_v18 }
 0x414   : > { %7508 = vmatmul.msk.f32.gmra.mxu3 %vm1373_vm6, %v1366_v20  ;;  %v1637_v20 = vld [vmem:[%s11725_s4 + $0x10] sm:$0xff] }
 0x415   : > { %1655 = vmatpush.msra.mxu1 %v1637_v20 }
 0x41c   : > { %7509 = vmatmul.msk.f32.gmra.mxu3 %vm1373_vm6, %v1367_v48  ;;  %v7527_v48 = vld [vmem:[%s11725_s4 + $0x28] sm:$0xff] }
 0x424   : > { %7510 = vmatmul.msk.f32.gmra.mxu3 %vm1373_vm6, %v1368_v22  ;;  %v1636_v22 = vld [vmem:[%s11725_s4 + $0x8] sm:$0xff] }
 0x425   : > { %1656 = vmatpush.msra.mxu1 %v1636_v22  ;;  %v7578_v22 = vld [vmem:[%s11725_s4 + $0x170] sm:$0xff] }
 0x42c   : > { %7511 = vmatmul.msk.f32.gmra.mxu3 %vm1373_vm6, %v1369_v23  ;;  %v7526_v23 = vld [vmem:[%s11725_s4 + $0x20] sm:$0xff] }
 0x434   : > { %7512 = vmatmul.msk.f32.gmra.mxu3 %vm1373_vm6, %v1370_v26  ;;  %v7533_v26 = vld [vmem:[%s11725_s4 + $0x50] sm:$0xff] }
 0x43c   : > { %7513 = vmatmul.msk.f32.gmra.mxu3 %vm1373_vm6, %v1371_v27  ;;  %v7544_v27 = vld [vmem:[%s11725_s4 + $0x98] sm:$0xff] }
 0x444   : > { %7514 = vmatmul.msk.f32.gmra.mxu3 %vm1373_vm6, %v1372_v28  ;;  %v1635_v28 = vld [vmem:[%s11725_s4] sm:$0xff] }
 0x445   : > { %1657 = vmatpush.msra.mxu1 %v1635_v28 }
 0x447   : > { %1741 = vmatpush.msrb.mxu1 %v7539_v51 }
 0x449   : > { %1742 = vmatpush.msrb.mxu1 %v7538_v47  ;;  %v7576_v47 = vld [vmem:[%s11725_s4 + $0x160] sm:$0xff] }
 0x44b   : > { %1743 = vmatpush.msrb.mxu1 %v7537_v38  ;;  %v7583_v38 = vld [vmem:[%s11725_s4 + $0x190] sm:$0xff] }
 0x44d   : > { %1744 = vmatpush.msrb.mxu1 %v7536_v63  ;;  %v7587_v63 = vld [vmem:[%s11725_s4 + $0x1a8] sm:$0xff] }
 0x47f   : > { %v1424_v37 = vpop.f32.mrf.mxu3 }
 0x480   : > { %7515 = vmatmul.msk.f32.vlgmr.msrb.gmra.mxu0 %vm1107_vm3, %v1424_v37  ;;  %v7541_v37 = vld [vmem:[%s11725_s4 + $0x80] sm:$0xff] }
 0x481   : > { %3248 = vmatpush.msrb.mxu0 %v8867_v33  ;;  %v289_v33 = vld [vmem:[%s11723_s2 + $0x110] sm:$0xff] }
 0x483   : > { %3249 = vmatpush.msrb.mxu0 %v8873_v32  ;;  %v292_v32 = vld [vmem:[%s11723_s2 + $0x150] sm:$0xff] }
 0x484   : > { %1622 = vmatpush.msrb.mxu3 %v292_v32 }
 0x485   : > { %3250 = vmatpush.msrb.mxu0 %v276_v21  ;;  %v7534_v21 = vld [vmem:[%s11725_s4 + $0x58] sm:$0xff] }
 0x486   : > { %1623 = vmatpush.msrb.mxu3 %v291_v62  ;;  %v7559_v62 = vld [vmem:[%s11725_s4 + $0xf8] sm:$0xff] }
 0x487   : > { %v1427_v42 = vpop.f32.mrf.mxu3  ;;  %3251 = vmatpush.msrb.mxu0 %v275_v29  ;;  %v7532_v29 = vld [vmem:[%s11725_s4 + $0x48] sm:$0xff] }
 0x488   : > { %7516 = vmatmul.msk.f32.gmra.mxu0 %vm1107_vm3, %v1427_v42  ;;  %v1490_v43 = vrot.slane %v1427_v42, 7  ;;  %1712 = vmatpush.msra.mxu3 %v7534_v21  ;;  %v7547_v42 = vld [vmem:[%s11725_s4 + $0xa8] sm:$0xff] }
 0x489   : > { %v7567_v21 = vld [vmem:[%s11725_s4 + $0x128] sm:$0xff] }
 0x48a   : > { %1713 = vmatpush.msra.mxu3 %v7533_v26  ;;  %v7572_v26 = vld [vmem:[%s11725_s4 + $0x148] sm:$0xff] }
 0x48c   : > { %1714 = vmatpush.msra.mxu3 %v7532_v29  ;;  %v7571_v29 = vld [vmem:[%s11725_s4 + $0x140] sm:$0xff] }
 0x48e   : > { %1715 = vmatpush.msra.mxu3 %v7531_v31 }
 0x48f   : > { %v1430_v45 = vpop.f32.mrf.mxu3 }
 0x490   : > { %v1491_v53 = vrot.slane %v1430_v45, 7  ;;  %v7546_v45 = vld [vmem:[%s11725_s4 + $0xa0] sm:$0xff] }
 0x492   : > { %v1492_v58 = vsel %vm1489_vm7, %v1490_v43, %v1491_v53 }
 0x493   : > { %7517 = vmatmul.msk.f32.vlgmr.msrb.gmra.mxu2 %vm1107_vm3, %v1492_v58 }
 0x494   : > { %1584 = vmatpush.msrb.mxu2 %v290_v56 }
 0x496   : > { %1585 = vmatpush.msrb.mxu2 %v289_v33 }
 0x497   : > { %v1433_v57 = vpop.f32.mrf.mxu3 }
 0x498   : > { %v1493_v34 = vrot.slane %v1433_v57, 7  ;;  %1586 = vmatpush.msrb.mxu2 %v288_v59  ;;  %v1526_v52 = vrot.slane %v1433_v57, 6 }
 0x49a   : > { %v1494_v24 = vsel %vm1489_vm7, %v1491_v53, %v1493_v34  ;;  %1587 = vmatpush.msrb.mxu2 %v287_v60  ;;  %v8181_v53 = vld [vmem:[%s11724_s3 + $0x2] ss:$0 sm:$0xff] }
 0x49b   : > { %7518 = vmatmul.msk.f32.gmra.mxu2 %vm1107_vm3, %v1494_v24 }
 0x49f   : > { %v1436_v35 = vpop.f32.mrf.mxu3 }
 0x4a0   : > { %v1527_v61 = vrot.slane %v1436_v35, 6  ;;  %v7554_v35 = vld [vmem:[%s11725_s4 + $0xd8] sm:$0xff] }
 0x4a2   : > { %v1528_v1 = vsel %vm1157_vm4, %v1526_v52, %v1527_v61 }
 0x4a3   : > { %7519 = vmatmul.msk.f32.vlgmr.msra.gmra.mxu2 %vm1107_vm3, %v1528_v1  ;;  %v7553_v1 = vld [vmem:[%s11725_s4 + $0xd0] sm:$0xff] }
 0x4a4   : > { %1683 = vmatpush.msra.mxu2 %v7529_v6  ;;  %v7561_v6 = vld [vmem:[%s11725_s4 + $0x100] sm:$0xff] }
 0x4a6   : > { %1684 = vmatpush.msra.mxu2 %v7528_v17  ;;  %v7568_v17 = vld [vmem:[%s11725_s4 + $0x130] sm:$0xff] }
 0x4a7   : > { %v1439_v0 = vpop.f32.mrf.mxu3 }
 0x4a8   : > { %v1529_v19 = vrot.slane %v1439_v0, 6  ;;  %v1563_v4 = vrot.slane %v1439_v0, 5  ;;  %1685 = vmatpush.msra.mxu2 %v7527_v48  ;;  %v7573_v48 = vld [vmem:[%s11725_s4 + $0x150] sm:$0xff] }
 0x4aa   : > { %v1530_v3 = vsel %vm1157_vm4, %v1527_v61, %v1529_v19  ;;  %1686 = vmatpush.msra.mxu2 %v7526_v23  ;;  %v7564_v19 = vld [vmem:[%s11725_s4 + $0x118] sm:$0xff] }
 0x4ab   : > { %7520 = vmatmul.msk.f32.gmra.mxu2 %vm1107_vm3, %v1530_v3  ;;  %v7558_v3 = vld [vmem:[%s11725_s4 + $0xf0] sm:$0xff] }
 0x4af   : > { %v1442_v41 = vpop.f32.mrf.mxu3 }
 0x4b0   : > { %v1564_v49 = vrot.slane %v1442_v41, 5  ;;  %v7552_v41 = vld [vmem:[%s11725_s4 + $0xc8] sm:$0xff] }
 0x4b2   : > { %v1565_v36 = vsel %vm1562_vm8, %v1563_v4, %v1564_v49  ;;  %v7563_v4 = vld [vmem:[%s11725_s4 + $0x110] sm:$0xff] }
 0x4b3   : > { %7521 = vmatmul.msk.f32.vlgmr.msrb.gmra.mxu2 %vm1107_vm3, %v1565_v36  ;;  %v7557_v36 = vld [vmem:[%s11725_s4 + $0xe8] sm:$0xff] }
 0x4b4   : > { %1770 = vmatpush.msrb.mxu2 %v7544_v27  ;;  %v7577_v27 = vld [vmem:[%s11725_s4 + $0x168] sm:$0xff] }
 0x4b6   : > { %1771 = vmatpush.msrb.mxu2 %v7543_v30  ;;  %v7566_v30 = vld [vmem:[%s11725_s4 + $0x120] sm:$0xff] }
 0x4b7   : > { %v1445_v5 = vpop.f32.mrf.mxu3 }
 0x4b8   : > { %v1566_v7 = vrot.slane %v1445_v5, 5  ;;  %v1599_v9 = vrot.slane %v1445_v5, 4  ;;  %1772 = vmatpush.msrb.mxu2 %v7542_v2  ;;  %v7551_v5 = vld [vmem:[%s11725_s4 + $0xc0] sm:$0xff]  ;;  %v7589_v2 = vld [vmem:[%s11725_s4 + $0x1b8] sm:$0xff] }
 0x4ba   : > { %v1567_v44 = vsel %vm1562_vm8, %v1564_v49, %v1566_v7  ;;  %1773 = vmatpush.msrb.mxu2 %v7541_v37  ;;  %v7562_v7 = vld [vmem:[%s11725_s4 + $0x108] sm:$0xff]  ;;  %v7588_v37 = vld [vmem:[%s11725_s4 + $0x1b0] sm:$0xff] }
 0x4bb   : > { %7522 = vmatmul.msk.f32.gmra.mxu2 %vm1107_vm3, %v1567_v44 }
 0x4bf   : > { %v1448_v16 = vpop.f32.mrf.mxu3 }
 0x4c0   : > { %v1600_v10 = vrot.slane %v1448_v16, 4 }
 0x4c2   : > { %v1601_v11 = vsel %vm714_vm1, %v1599_v9, %v1600_v10  ;;  %v7556_v9 = vld [vmem:[%s11725_s4 + $0xe0] sm:$0xff] }
 0x4c3   : > { %7523 = vmatmul.msk.f32.vlgmr.msrb.gmra.mxu3 %vm1107_vm3, %v1601_v11 }
 0x4c4   : > { %1799 = vmatpush.msrb.mxu3 %v7549_v8  ;;  %v7584_v8 = vld [vmem:[%s11725_s4 + $0x198] sm:$0xff] }
 0x4c6   : > { %1800 = vmatpush.msrb.mxu3 %v7548_v39  ;;  %v7593_v39 = vld [vmem:[%s11725_s4 + $0x1d0] sm:$0xff] }
 0x4c7   : > { %v1451_v12 = vpop.f32.mrf.mxu3 }
 0x4c8   : > { %v1602_v13 = vrot.slane %v1451_v12, 4  ;;  %1801 = vmatpush.msrb.mxu3 %v7547_v42  ;;  %v7592_v42 = vld [vmem:[%s11725_s4 + $0x1c8] sm:$0xff] }
 0x4ca   : > { %v1603_v14 = vsel %vm714_vm1, %v1600_v10, %v1602_v13  ;;  %1802 = vmatpush.msrb.mxu3 %v7546_v45  ;;  %v7569_v10 = vld [vmem:[%s11725_s4 + $0x138] sm:$0xff] }
 0x4cb   : > { %7524 = vmatmul.msk.f32.gmra.mxu3 %vm1107_vm3, %v1603_v14 }
 0x4fd   : > { %v1479_v56 = vpop.f32.mrf.mxu0 }
 0x4fe   : > { %v1485_v58 = vadd.f32 %v8181_v53, %v1479_v56 }
 0x505   : > { %v1482_v0 = vpop.f32.mrf.mxu0 }
 0x506   : > { %v1486_v49 = vadd.f32 %v8181_v53, %v1482_v0  ;;  %v7582_v53 = vld [vmem:[%s11725_s4 + $0x188] sm:$0xff]  ;;  %v7604_v0 = vld [vmem:[%s8386_s26 + $0xb0] sm:$0xff] }
 0x516   : > { %v1516_v50 = vpop.f32.mrf.mxu2 }
 0x517   : > { %v1522_v33 = vadd.f32 %v1516_v50, %v1485_v58  ;;  %v7574_v50 = vld [vmem:[%s11725_s4 + $0x158] sm:$0xff] }
 0x51e   : > { %v9007_v18 = vpop.f32.mrf.mxu2 }
 0x51f   : > { %v1523_v44 = vadd.f32 %v9007_v18, %v1486_v49  ;;  %v7579_v18 = vld [vmem:[%s11725_s4 + $0x178] sm:$0xff]  ;;  %v7599_v49 = vld [vmem:[%s8386_s26 + $0x88] sm:$0xff] }
 0x526   : > { %v1552_v54 = vpop.f32.mrf.mxu2 }
 0x527   : > { %v1558_v59 = vadd.f32 %v1552_v54, %v1522_v33  ;;  %v7594_v54 = vld [vmem:[%s11725_s4 + $0x1d8] sm:$0xff]  ;;  %v7611_v33 = vld [vmem:[%s8386_s26 + $0xe8] sm:$0xff] }
 0x52e   : > { %v1555_v43 = vpop.f32.mrf.mxu2 }
 0x52f   : > { %v1559_v12 = vadd.f32 %v1555_v43, %v1523_v44  ;;  %v7586_v43 = vld [vmem:[%s11725_s4 + $0x1a0] sm:$0xff]  ;;  %v2112_v44 = vld [vmem:[%s11722_s1 + $0x8] sm:$0xff] }
 0x536   : > { %v1589_v32 = vpop.f32.mrf.mxu2 }
 0x537   : > { %v1595_v57 = vadd.f32 %v1589_v32, %v1558_v59  ;;  %v7581_v32 = vld [vmem:[%s11725_s4 + $0x180] sm:$0xff] }
 0x538   : > { %v7591_v59 = vld [vmem:[%s11725_s4 + $0x1c0] sm:$0xff] }
 0x53e   : > { %v1592_v11 = vpop.f32.mrf.mxu2 }
 0x53f   : > { %v1596_v20 = vadd.f32 %v1592_v11, %v1559_v12  ;;  %v2120_v12 = vld [vmem:[%s11722_s1 + $0x48] sm:$0xff] }
 0x546   : > { %v1625_v60 = vpop.f32.mrf.mxu3 }
 0x547   : > { %v1631_v34 = vadd.f32 %v1625_v60, %v1595_v57  ;;  %v7610_v57 = vld [vmem:[%s8386_s26 + $0xe0] sm:$0xff]  ;;  %v7609_v60 = vld [vmem:[%s8386_s26 + $0xd8] sm:$0xff] }
 0x549   : > { %v9075_v24 = vmax.f32 %v1631_v34, 0.0 }
 0x54b   : > { %7525 = vmatmul.msk.f32.vlgmr.msra.gmra.mxu1 %vm1107_vm3, %v9075_v24  ;;  %v1668_v52 = vrot.slane %v9075_v24, 1  ;;  %v1697_v61 = vrot.slane %v9075_v24, 2  ;;  %v1726_v16 = vrot.slane %v9075_v24, 3  ;;  %v1755_v13 = vrot.slane %v9075_v24, 4 }
 0x54c   : > { %1828 = vmatpush.msra.mxu1 %v7554_v35  ;;  %v1784_v14 = vrot.slane %v9075_v24, 5  ;;  %v1813_v28 = vrot.slane %v9075_v24, 6  ;;  %v1842_v51 = vrot.slane %v9075_v24, 7  ;;  %v7608_v24 = vld [vmem:[%s8386_s26 + $0xd0] sm:$0xff] }
 0x54d   : > { %7530 = vmatmul.msk.f32.vlgmr.msra.gmra.mxu2 %vm1107_vm3, %v1668_v52  ;;  %7535 = vmatmul.msk.f32.vlgmr.msra.gmra.mxu3 %vm1107_vm3, %v1697_v61  ;;  %v7607_v61 = vld [vmem:[%s8386_s26 + $0xc8] sm:$0xff] }
 0x54e   : > { %1857 = vmatpush.msra.mxu2 %v7559_v62  ;;  %1829 = vmatpush.msra.mxu1 %v7553_v1  ;;  %v1628_v15 = vpop.f32.mrf.mxu3  ;;  %v7606_v62 = vld [vmem:[%s8386_s26 + $0xc0] sm:$0xff]  ;;  %v7605_v1 = vld [vmem:[%s8386_s26 + $0xb8] sm:$0xff] }
 0x54f   : > { %1886 = vmatpush.msra.mxu3 %v7564_v19  ;;  %v1632_v23 = vadd.f32 %v1628_v15, %v1596_v20  ;;  %v7603_v19 = vld [vmem:[%s8386_s26 + $0xa8] sm:$0xff]  ;;  %v2121_v15 = vld [vmem:[%s11722_s1 + $0x50] sm:$0xff] }
 0x550   : > { %1858 = vmatpush.msra.mxu2 %v7558_v3  ;;  %1830 = vmatpush.msra.mxu1 %v7552_v41  ;;  %v7602_v3 = vld [vmem:[%s8386_s26 + $0xa0] sm:$0xff]  ;;  %v7601_v41 = vld [vmem:[%s8386_s26 + $0x98] sm:$0xff] }
 0x551   : > { %1887 = vmatpush.msra.mxu3 %v7563_v4  ;;  %v1634_v31 = vmax.f32 %v1632_v23, 0.0  ;;  %v7600_v4 = vld [vmem:[%s8386_s26 + $0x90] sm:$0xff]  ;;  %v300_v23 = vld [vmem:[%s11726_s5] sm:$0xff] }
 0x552   : > { %1859 = vmatpush.msra.mxu2 %v7557_v36  ;;  %1831 = vmatpush.msra.mxu1 %v7551_v5  ;;  %v7598_v36 = vld [vmem:[%s8386_s26 + $0x80] sm:$0xff]  ;;  %v7597_v5 = vld [vmem:[%s8386_s26 + $0x78] sm:$0xff] }
 0x553   : > { %7540 = vmatmul.msk.f32.vlgmr.msrb.gmra.mxu1 %vm1107_vm3, %v1726_v16  ;;  %1888 = vmatpush.msra.mxu3 %v7562_v7  ;;  %v1900_v45 = vrot.slane %v1634_v31, 1  ;;  %v1929_v56 = vrot.slane %v1634_v31, 2  ;;  %v1958_v58 = vrot.slane %v1634_v31, 3  ;;  %v1987_v34 = vrot.slane %v1634_v31, 4  ;;  %v2111_v7 = vld [vmem:[%s11722_s1] sm:$0xff]  ;;  %v2113_v16 = vld [vmem:[%s11722_s1 + $0x10] sm:$0xff] }
 0x554   : > { %1860 = vmatpush.msra.mxu2 %v7556_v9  ;;  %1915 = vmatpush.msrb.mxu1 %v7569_v10  ;;  %v2016_v35 = vrot.slane %v1634_v31, 5  ;;  %v2045_v52 = vrot.slane %v1634_v31, 6  ;;  %v2118_v9 = vld [vmem:[%s11722_s1 + $0x38] sm:$0xff]  ;;  %v2119_v10 = vld [vmem:[%s11722_s1 + $0x40] sm:$0xff] }
 0x555   : > { %7545 = vmatmul.msk.f32.vlgmr.msrb.gmra.mxu2 %vm1107_vm3, %v1755_v13  ;;  %7550 = vmatmul.msk.f32.vlgmr.msrb.gmra.mxu3 %vm1107_vm3, %v1784_v14  ;;  %v298_v13 = vld [vmem:[%s11724_s3 + $0x3] sm:$0x1] }
 0x556   : > { %1944 = vmatpush.msrb.mxu2 %v7574_v50  ;;  %1889 = vmatpush.msra.mxu3 %v7561_v6 }
 0x557   : > { %1916 = vmatpush.msrb.mxu1 %v7568_v17  ;;  %v303_v17 = vld [vmem:[%s11726_s5 + $0x18] sm:$0xff] }
 0x558   : > { %1973 = vmatpush.msrb.mxu3 %v7579_v18  ;;  %1945 = vmatpush.msrb.mxu2 %v7573_v48  ;;  %v302_v48 = vld [vmem:[%s11726_s5 + $0x10] sm:$0xff] }
 0x559   : > { %1917 = vmatpush.msrb.mxu1 %v7567_v21 }
 0x55a   : > { %1974 = vmatpush.msrb.mxu3 %v7578_v22  ;;  %1946 = vmatpush.msrb.mxu2 %v7572_v26  ;;  %v301_v22 = vld [vmem:[%s11726_s5 + $0x8] sm:$0xff] }
 0x55b   : > { %7555 = vmatmul.msk.f32.vlgmr.msra.gmra.mxu1 %vm1107_vm3, %v1813_v28 }
 0x55c   : > { %1975 = vmatpush.msrb.mxu3 %v7577_v27  ;;  %1947 = vmatpush.msrb.mxu2 %v7571_v29  ;;  %v2122_v29 = vld [vmem:[%s11722_s1 + $0x58] sm:$0xff] }
 0x55d   : > { %1918 = vmatpush.msrb.mxu1 %v7566_v30  ;;  %7560 = vmatmul.msk.f32.vlgmr.msra.gmra.mxu2 %vm1107_vm3, %v1842_v51  ;;  %v8182_v30 = vld [vmem:[%s11723_s2 + $0x20] sm:$0xff] }
 0x55e   : > { %7565 = vmatmul.msk.f32.vlgmr.msra.gmra.mxu3 %vm1107_vm3, %v1634_v31  ;;  %2031 = vmatpush.msra.mxu2 %v7589_v2  ;;  %v8183_v2 = vld [vmem:[%s11723_s2 + $0x18] sm:$0xff] }
 0x55f   : > { %1976 = vmatpush.msrb.mxu3 %v7576_v47  ;;  %2002 = vmatpush.msra.mxu1 %v7584_v8  ;;  %v8184_v8 = vld [vmem:[%s11723_s2 + $0x10] sm:$0xff] }
 0x560   : > { %2032 = vmatpush.msra.mxu2 %v7588_v37 }
 0x561   : > { %2060 = vmatpush.msra.mxu3 %v7594_v54  ;;  %2003 = vmatpush.msra.mxu1 %v7583_v38  ;;  %v8185_v54 = vld [vmem:[%s11723_s2 + $0x8] sm:$0xff] }
 0x562   : > { %2033 = vmatpush.msra.mxu2 %v7587_v63  ;;  %v2123_v63 = vld [vmem:[%s11722_s1 + $0x60] sm:$0xff] }
 0x563   : > { %2061 = vmatpush.msra.mxu3 %v7593_v39  ;;  %7570 = vmatmul.msk.f32.vlgmr.msrb.gmra.mxu1 %vm1107_vm3, %v1900_v45 }
 0x564   : > { %2034 = vmatpush.msra.mxu2 %v7586_v43  ;;  %2004 = vmatpush.msra.mxu1 %v7582_v53 }
 0x565   : > { %2062 = vmatpush.msra.mxu3 %v7592_v42  ;;  %7575 = vmatmul.msk.f32.vlgmr.msrb.gmra.mxu2 %vm1107_vm3, %v1929_v56 }
 0x566   : > { %7580 = vmatmul.msk.f32.vlgmr.msrb.gmra.mxu3 %vm1107_vm3, %v1958_v58  ;;  %2264 = vmatpush.msrb.mxu2 %v7611_v33  ;;  %v2124_v33 = vld [vmem:[%s11722_s1 + $0x68] sm:$0xff] }
 0x567   : > { %2005 = vmatpush.msra.mxu1 %v7581_v32  ;;  %2063 = vmatpush.msra.mxu3 %v7591_v59 }
 0x568   : > { %2265 = vmatpush.msrb.mxu2 %v7610_v57 }
 0x569   : > { %2085 = vmatpush.msrb.mxu1 %v303_v17  ;;  %v2137_v17 = vld [vmem:[%s11722_s1 + $0xd0] sm:$0xff] }
 0x56a   : > { %2266 = vmatpush.msrb.mxu2 %v7609_v60 }
 0x56b   : > { %7585 = vmatmul.msk.f32.vlgmr.msra.gmra.mxu1 %vm1107_vm3, %v1987_v34 }
 0x56c   : > { %2267 = vmatpush.msrb.mxu2 %v7608_v24  ;;  %2086 = vmatpush.msrb.mxu1 %v302_v48  ;;  %v2125_v24 = vld [vmem:[%s11722_s1 + $0x70] sm:$0xff] }
 0x56d   : > { %7590 = vmatmul.msk.f32.vlgmr.msra.gmra.mxu2 %vm1107_vm3, %v2016_v35 }
 0x56e   : > { %7595 = vmatmul.msk.f32.vlgmr.msra.gmra.mxu3 %vm1107_vm3, %v2045_v52  ;;  %2268 = vmatpush.msrb.mxu2 %v7607_v61 }
 0x56f   : > { %2087 = vmatpush.msrb.mxu1 %v301_v22 }
 0x570   : > { %2269 = vmatpush.msrb.mxu2 %v7606_v62 }
 0x571   : > { %2088 = vmatpush.msrb.mxu1 %v300_v23  ;;  %v2140_v23 = vld [vmem:[%s11722_s1 + $0xe8] sm:$0xff] }
 0x572   : > { %2270 = vmatpush.msrb.mxu2 %v7605_v1  ;;  %v2126_v1 = vld [vmem:[%s11722_s1 + $0x78] sm:$0xff] }
 0x573   : > { %2911 = vmatpush.msra.mxu1 %v8182_v30 }
 0x574   : > { %2271 = vmatpush.msrb.mxu2 %v7604_v0  ;;  %v8186_v0 = vld [vmem:[%s11723_s2 + $0x68] sm:$0xff] }
 0x575   : > { %2912 = vmatpush.msra.mxu1 %v8183_v2 }
 0x576   : > { %2272 = vmatpush.msrb.mxu2 %v7603_v19  ;;  %v8187_v19 = vld [vmem:[%s11723_s2 + $0x60] sm:$0xff] }
 0x577   : > { %2913 = vmatpush.msra.mxu1 %v8184_v8 }
 0x578   : > { %2273 = vmatpush.msrb.mxu2 %v7602_v3  ;;  %v8188_v3 = vld [vmem:[%s11723_s2 + $0x58] sm:$0xff] }
 0x579   : > { %2914 = vmatpush.msra.mxu1 %v8185_v54  ;;  %v2144_v54 = vld [vmem:[%s11722_s1 + $0x108] sm:$0xff] }
 0x57a   : > { %2274 = vmatpush.msrb.mxu2 %v7601_v41  ;;  %v8189_v41 = vld [vmem:[%s11723_s2 + $0x50] sm:$0xff] }
 0x57c   : > { %2275 = vmatpush.msrb.mxu2 %v7600_v4  ;;  %v2127_v4 = vld [vmem:[%s11722_s1 + $0x80] sm:$0xff] }
 0x57e   : > { %2276 = vmatpush.msrb.mxu2 %v7599_v49 }
 0x580   : > { %2277 = vmatpush.msrb.mxu2 %v7598_v36  ;;  %v2128_v36 = vld [vmem:[%s11722_s1 + $0x88] sm:$0xff] }
 0x582   : > { %2278 = vmatpush.msrb.mxu2 %v7597_v5 }
 0x583   : > { %7612 = vmatmul.msk.f32.vlgmr.msrb.gmra.mxu2 %vm357_vm0, %v2111_v7  ;;  %v2129_v7 = vld [vmem:[%s11722_s1 + $0x90] sm:$0xff] }
 0x584   : > { %4827 = vmatpush.msra.mxu2 %v8739_v25  ;;  %v2114_v25 = vld [vmem:[%s11722_s1 + $0x18] sm:$0xff] }
 0x586   : > { %4828 = vmatpush.msra.mxu2 %v8780_v40  ;;  %v2115_v40 = vld [vmem:[%s11722_s1 + $0x20] sm:$0xff] }
 0x588   : > { %4829 = vmatpush.msra.mxu2 %v8808_v55  ;;  %v2116_v55 = vld [vmem:[%s11722_s1 + $0x28] sm:$0xff] }
 0x58a   : > { %4830 = vmatpush.msra.mxu2 %v8817_v46  ;;  %v2117_v46 = vld [vmem:[%s11722_s1 + $0x30] sm:$0xff] }
 0x58b   : > { %7613 = vmatmul.msk.f32.gmra.mxu2 %vm357_vm0, %v2112_v44 }
 0x593   : > { %7614 = vmatmul.msk.f32.gmra.mxu2 %vm357_vm0, %v2113_v16  ;;  %v2130_v16 = vld [vmem:[%s11722_s1 + $0x98] sm:$0xff] }
 0x59b   : > { %7615 = vmatmul.msk.f32.gmra.mxu2 %vm357_vm0, %v2114_v25 }
 0x5a3   : > { %7616 = vmatmul.msk.f32.gmra.mxu2 %vm357_vm0, %v2115_v40  ;;  %v2131_v40 = vld [vmem:[%s11722_s1 + $0xa0] sm:$0xff] }
 0x5ab   : > { %7617 = vmatmul.msk.f32.gmra.mxu2 %vm357_vm0, %v2116_v55 }
 0x5b3   : > { %7618 = vmatmul.msk.f32.gmra.mxu2 %vm357_vm0, %v2117_v46  ;;  %v2132_v46 = vld [vmem:[%s11722_s1 + $0xa8] sm:$0xff] }
 0x5bb   : > { %7619 = vmatmul.msk.f32.gmra.mxu2 %vm357_vm0, %v2118_v9 }
 0x5c3   : > { %7620 = vmatmul.msk.f32.gmra.mxu2 %vm357_vm0, %v2119_v10  ;;  %v2133_v10 = vld [vmem:[%s11722_s1 + $0xb0] sm:$0xff] }
 0x5c8   : > { %v1659_v11 = vpop.f32.mrf.mxu1 }
 0x5c9   : > { %v1662_v14 = vadd.f32 %v1659_v11, %v298_v13 }
 0x5cb   : > { %7621 = vmatmul.msk.f32.gmra.mxu2 %vm357_vm0, %v2120_v12  ;;  %v2134_v12 = vld [vmem:[%s11722_s1 + $0xb8] sm:$0xff] }
 0x5d0   : > { %v1688_v50 = vpop.f32.mrf.mxu2  ;;  %v1717_v6 = vpop.f32.mrf.mxu3 }
 0x5d1   : > { %v1691_v18 = vadd.f32 %v1688_v50, %v1662_v14  ;;  %v1746_v20 = vpop.f32.mrf.mxu1  ;;  %v2135_v14 = vld [vmem:[%s11722_s1 + $0xc0] sm:$0xff] }
 0x5d3   : > { %v1720_v21 = vadd.f32 %v1717_v6, %v1691_v18  ;;  %7622 = vmatmul.msk.f32.gmra.mxu2 %vm357_vm0, %v2121_v15  ;;  %v2136_v6 = vld [vmem:[%s11722_s1 + $0xc8] sm:$0xff] }
 0x5d5   : > { %v1749_v26 = vadd.f32 %v1746_v20, %v1720_v21  ;;  %v2138_v20 = vld [vmem:[%s11722_s1 + $0xd8] sm:$0xff]  ;;  %v2139_v21 = vld [vmem:[%s11722_s1 + $0xe0] sm:$0xff] }
 0x5d8   : > { %v1775_v27 = vpop.f32.mrf.mxu2  ;;  %v1804_v28 = vpop.f32.mrf.mxu3 }
 0x5d9   : > { %v1778_v31 = vadd.f32 %v1775_v27, %v1749_v26  ;;  %v1833_v51 = vpop.f32.mrf.mxu1  ;;  %v2141_v27 = vld [vmem:[%s11722_s1 + $0xf0] sm:$0xff] }
 0x5db   : > { %v1807_v47 = vadd.f32 %v1804_v28, %v1778_v31  ;;  %7623 = vmatmul.msk.f32.gmra.mxu2 %vm357_vm0, %v2122_v29  ;;  %v299_v28 = vld [vmem:[%s11724_s3 + $0x4] sm:$0x1] }
 0x5dd   : > { %v1836_v37 = vadd.f32 %v1833_v51, %v1807_v47  ;;  %v2142_v51 = vld [vmem:[%s11722_s1 + $0xf8] sm:$0xff]  ;;  %v2143_v47 = vld [vmem:[%s11722_s1 + $0x100] sm:$0xff] }
 0x5e0   : > { %v1862_v38 = vpop.f32.mrf.mxu2 }
 0x5e1   : > { %v1891_v39 = vpop.f32.mrf.mxu3  ;;  %v1865_v42 = vadd.f32 %v1862_v38, %v1836_v37  ;;  %v1920_v43 = vpop.f32.mrf.mxu1  ;;  %v2145_v38 = vld [vmem:[%s11722_s1 + $0x110] sm:$0xff] }
 0x5e3   : > { %v1894_v45 = vadd.f32 %v1891_v39, %v1865_v42  ;;  %7624 = vmatmul.msk.f32.gmra.mxu2 %vm357_vm0, %v2123_v63  ;;  %v2146_v63 = vld [vmem:[%s11722_s1 + $0x118] sm:$0xff] }
 0x5e5   : > { %v1923_v53 = vadd.f32 %v1920_v43, %v1894_v45  ;;  %v2147_v45 = vld [vmem:[%s11722_s1 + $0x120] sm:$0xff] }
 0x5e8   : > { %v1949_v56 = vpop.f32.mrf.mxu2 }
 0x5e9   : > { %v1978_v58 = vpop.f32.mrf.mxu3  ;;  %v1952_v32 = vadd.f32 %v1949_v56, %v1923_v53  ;;  %v2007_v57 = vpop.f32.mrf.mxu1 }
 0x5eb   : > { %v1981_v59 = vadd.f32 %v1978_v58, %v1952_v32  ;;  %7625 = vmatmul.msk.f32.gmra.mxu2 %vm357_vm0, %v2124_v33  ;;  %v2148_v58 = vld [vmem:[%s11722_s1 + $0x128] sm:$0xf] }
 0x5ed   : > { %v2010_v60 = vadd.f32 %v2007_v57, %v1981_v59 }
 0x5f0   : > { %v2036_v34 = vpop.f32.mrf.mxu2 }
 0x5f1   : > { %v2039_v35 = vadd.f32 %v2036_v34, %v2010_v60  ;;  %v2065_v52 = vpop.f32.mrf.mxu3 }
 0x5f3   : > { %v2068_v61 = vadd.f32 %v2065_v52, %v2039_v35  ;;  %7626 = vmatmul.msk.f32.gmra.mxu2 %vm357_vm0, %v2125_v24  ;;  %v9446_v24 = vld [vmem:[%s11723_s2 + $0x48] ss:$0 sm:$0xff]  ;;  %v9453_v52 = vld [vmem:[%s11723_s2] ss:$0 sm:$0xff] }
 0x5f5   : > { %v2069_v62 = vmax.f32 %v2068_v61, 0.0 }
 0x5f7   : > { %7596 = vmatmul.msk.f32.vlgmr.msrb.gmra.mxu1 %vm1107_vm3, %v2069_v62 }
 0x5f8   : > { %2965 = vmatpush.msrb.mxu1 %v8186_v0 }
 0x5fa   : > { %2966 = vmatpush.msrb.mxu1 %v8187_v19 }
 0x5fb   : > { %7627 = vmatmul.msk.f32.gmra.mxu2 %vm357_vm0, %v2126_v1 }
 0x5fc   : > { %2967 = vmatpush.msrb.mxu1 %v8188_v3  ;;  %v9463_v3 = vld [vmem:[%s11724_s3] ss:$0 sm:$0xff] }
 0x5fe   : > { %2968 = vmatpush.msrb.mxu1 %v8189_v41 }
 0x603   : > { %7628 = vmatmul.msk.f32.gmra.mxu2 %vm357_vm0, %v2127_v4 }
 0x606   : > { %v2280_v49 = vpop.f32.mrf.mxu2 }
 0x607   : > { %2396 = vperm.xlu0 %8172, %v2280_v49  }
 0x60b   : > { %7629 = vmatmul.msk.f32.gmra.mxu2 %vm357_vm0, %v2128_v36 }
 0x60e   : > { %v2283_v5 = vpop.f32.mrf.mxu2 }
 0x60f   : > { %2401 = vperm.xlu2 %8173, %v2283_v5  }
 0x613   : > { %7630 = vmatmul.msk.f32.gmra.mxu2 %vm357_vm0, %v2129_v7 }
 0x616   : > { %v2286_v44 = vpop.f32.mrf.mxu2 }
 0x617   : > { %2406 = vperm.xlu0 %8172, %v2286_v44  }
 0x61b   : > { %7631 = vmatmul.msk.f32.gmra.mxu2 %vm357_vm0, %v2130_v16 }
 0x61e   : > { %v2289_v25 = vpop.f32.mrf.mxu2 }
 0x61f   : > { %2411 = vperm.xlu1 %8171, %v2289_v25  }
 0x623   : > { %7632 = vmatmul.msk.f32.gmra.mxu2 %vm357_vm0, %v2131_v40 }
 0x626   : > { %v2292_v55 = vpop.f32.mrf.mxu2 }
 0x627   : > { %2416 = vperm.xlu0 %8172, %v2292_v55  }
 0x62b   : > { %7633 = vmatmul.msk.f32.gmra.mxu2 %vm357_vm0, %v2132_v46 }
 0x62e   : > { %v2295_v9 = vpop.f32.mrf.mxu2 }
 0x62f   : > { %2421 = vperm.xlu1 %8171, %v2295_v9  }
 0x633   : > { %7634 = vmatmul.msk.f32.gmra.mxu2 %vm357_vm0, %v2133_v10 }
 0x636   : > { %v2298_v11 = vpop.f32.mrf.mxu2 }
 0x637   : > { %2426 = vperm.xlu2 %8173, %v2298_v11  }
 0x63b   : > { %7635 = vmatmul.msk.f32.gmra.mxu2 %vm357_vm0, %v2134_v12 }
 0x63e   : > { %v2301_v13 = vpop.f32.mrf.mxu2 }
 0x63f   : > { %2431 = vperm.xlu2 %8173, %v2301_v13  }
 0x643   : > { %7636 = vmatmul.msk.f32.gmra.mxu2 %vm357_vm0, %v2135_v14 }
 0x646   : > { %v2304_v50 = vpop.f32.mrf.mxu2 }
 0x647   : > { %2452 = vperm.xlu0 %8172, %v2304_v50  }
 0x64b   : > { %7637 = vmatmul.msk.f32.gmra.mxu2 %vm357_vm0, %v2136_v6 }
 0x64e   : > { %v2307_v15 = vpop.f32.mrf.mxu2 }
 0x64f   : > { %2457 = vperm.xlu1 %8171, %v2307_v15  }
 0x653   : > { %7638 = vmatmul.msk.f32.gmra.mxu2 %vm357_vm0, %v2137_v17 }
 0x656   : > { %v2310_v18 = vpop.f32.mrf.mxu2 }
 0x657   : > { %2462 = vperm.xlu2 %8173, %v2310_v18  }
 0x65b   : > { %7639 = vmatmul.msk.f32.gmra.mxu2 %vm357_vm0, %v2138_v20 }
 0x65e   : > { %v2313_v48 = vpop.f32.mrf.mxu2 }
 0x65f   : > { %2467 = vperm.xlu1 %8171, %v2313_v48  }
 0x663   : > { %7640 = vmatmul.msk.f32.gmra.mxu2 %vm357_vm0, %v2139_v21 }
 0x666   : > { %v2316_v22 = vpop.f32.mrf.mxu2 }
 0x667   : > { %2472 = vperm.xlu0 %8172, %v2316_v22  }
 0x669   : > { %v9428_v53 = vpop.permute.xlu2 %2401 }
 0x66b   : > { %7641 = vmatmul.msk.f32.gmra.mxu2 %vm357_vm0, %v2140_v23 }
 0x66e   : > { %v2319_v26 = vpop.f32.mrf.mxu2 }
 0x66f   : > { %2477 = vperm.xlu1 %8171, %v2319_v26  }
 0x673   : > { %7642 = vmatmul.msk.f32.gmra.mxu2 %vm357_vm0, %v2141_v27 }
 0x674   : > { %v2090_v29 = vpop.f32.mrf.mxu1 }
 0x675   : > { %v2091_v30 = vadd.f32 %v2090_v29, %v299_v28 }
 0x676   : > { %v2322_v31 = vpop.f32.mrf.mxu2 }
 0x677   : > { %2094 = vst.msk [vmem:[%s9399_s29] sm:$0x1] %vm2093_vm9, %v2091_v30  ;;  %2482 = vperm.xlu0 %8172, %v2322_v31  }
 0x679   : > { %v2397_v43 = vpop.permute.xlu0 %2396 }
 0x67a   : > { %v2434_v61 = vmul.f32 %v9453_v52, %v2397_v43 }
 0x67b   : > { %7643 = vmatmul.msk.f32.gmra.mxu2 %vm357_vm0, %v2142_v51 }
 0x67c   : > { %v2442_v41 = vadd.f32 %v9463_v3, %v2434_v61 }
 0x67e   : > { %v9407_v2 = vpop.f32.mrf.mxu2 }
 0x683   : > { %7644 = vmatmul.msk.f32.gmra.mxu2 %vm357_vm0, %v2143_v47 }
 0x686   : > { %v2328_v8 = vpop.f32.mrf.mxu2 }
 0x687   : > { %2539 = vperm.xlu1 %8171, %v2328_v8  }
 0x689   : > { %v9434_v33 = vpop.permute.xlu0 %2406 }
 0x68b   : > { %7645 = vmatmul.msk.f32.gmra.mxu2 %vm357_vm0, %v2144_v54 }
 0x68e   : > { %v2331_v37 = vpop.f32.mrf.mxu2 }
 0x68f   : > { %2544 = vperm.xlu1 %8171, %v2331_v37  }
 0x691   : > { %v9436_v32 = vpop.permute.xlu2 %2426  ;;  %v2412_v50 = vpop.permute.xlu1 %2411 }
 0x692   : > { %v2440_v61 = vmul.f32 %v9453_v52, %v9436_v32  ;;  %v9513_v32 = vld [vmem:[%s11723_s2 + $0xd8] ss:$0 sm:$0xff] }
 0x693   : > { %7646 = vmatmul.msk.f32.gmra.mxu2 %vm357_vm0, %v2145_v38 }
 0x696   : > { %v2334_v39 = vpop.f32.mrf.mxu2 }
 0x697   : > { %2549 = vperm.xlu0 %8172, %v2334_v39  }
 0x699   : > { %v9439_v57 = vpop.permute.xlu0 %2416  ;;  %v9441_v60 = vpop.permute.xlu2 %2431 }
 0x69a   : > { %v2485_v35 = vmul.f32 %v9446_v24, %v9441_v60 }
 0x69b   : > { %7647 = vmatmul.msk.f32.gmra.mxu2 %vm357_vm0, %v2146_v63 }
 0x69c   : > { %v2501_v0 = vrot.slane %v2485_v35, 4  ;;  %v2437_v35 = vmul.f32 %v9453_v52, %v2412_v50 }
 0x69e   : > { %v2337_v42 = vpop.f32.mrf.mxu2 }
 0x69f   : > { %2554 = vperm.xlu1 %8171, %v2337_v42   ;;  %v2435_v42 = vmul.f32 %v9453_v52, %v9428_v53 }
 0x6a1   : > { %v2422_v6 = vpop.permute.xlu1 %2421 }
 0x6a3   : > { %7648 = vmatmul.msk.f32.gmra.mxu2 %vm357_vm0, %v2147_v45 }
 0x6a6   : > { %v2340_v56 = vpop.f32.mrf.mxu2 }
 0x6a7   : > { %2559 = vperm.xlu2 %8173, %v2340_v56  }
 0x6ab   : > { %7649 = vmatmul.msk.f32.gmra.mxu2 %vm357_vm0, %v2148_v58 }
 0x6ae   : > { %v2343_v59 = vpop.f32.mrf.mxu2 }
 0x6af   : > { %2564 = vperm.xlu1 %8171, %v2343_v59  }
 0x6b1   : > { %v2463_v17 = vpop.permute.xlu2 %2462 }
 0x6b2   : > { %v2488_v38 = vmul.f32 %v9446_v24, %v2463_v17 }
 0x6b4   : > { %v2506_v53 = vrot.slane %v2488_v38, 4 }
 0x6b6   : > { %v2346_v34 = vpop.f32.mrf.mxu2 }
 0x6b7   : > { %2569 = vperm.xlu2 %8173, %v2346_v34   ;;  %v2436_v34 = vmul.f32 %v9453_v52, %v9434_v33  ;;  %v2439_v33 = vmul.f32 %v9453_v52, %v2422_v6 }
 0x6b9   : > { %v2453_v62 = vpop.permute.xlu0 %2452 }
 0x6ba   : > { %v9457_v1 = vmul.f32 %v9446_v24, %v2453_v62  ;;  %v2438_v62 = vmul.f32 %v9453_v52, %v9439_v57 }
 0x6bc   : > { %v2502_v19 = vrot.slane %v9457_v1, 4 }
 0x6be   : > { %v2349_v4 = vpop.f32.mrf.mxu2  ;;  %v2503_v49 = vsel %vm714_vm1, %v2501_v0, %v2502_v19 }
 0x6bf   : > { %2590 = vperm.xlu0 %8172, %v2349_v4   ;;  %v9469_v36 = vadd.f32 %v2503_v49, %v2442_v41  ;;  %v9504_v49 = vadd.f32 %v9463_v3, %v2435_v42 }
 0x6c1   : > { %v2458_v15 = vpop.permute.xlu1 %2457 }
 0x6c2   : > { %v2487_v37 = vmul.f32 %v9446_v24, %v2458_v15 }
 0x6c4   : > { %v2504_v45 = vrot.slane %v2487_v37, 4 }
 0x6c6   : > { %v2352_v5 = vpop.f32.mrf.mxu2 }
 0x6c7   : > { %2595 = vperm.xlu2 %8173, %v2352_v5  }
 0x6ce   : > { %v2355_v7 = vpop.f32.mrf.mxu2 }
 0x6cf   : > { %2600 = vperm.xlu1 %8171, %v2355_v7  }
 0x6d1   : > { %v2468_v18 = vpop.permute.xlu1 %2467 }
 0x6d2   : > { %v2489_v39 = vmul.f32 %v9446_v24, %v2468_v18 }
 0x6d4   : > { %v2508_v41 = vrot.slane %v2489_v39, 4 }
 0x6d6   : > { %v2358_v44 = vpop.f32.mrf.mxu2 }
 0x6d7   : > { %2605 = vperm.xlu2 %8173, %v2358_v44   ;;  %v2507_v44 = vsel %vm714_vm1, %v2504_v45, %v2506_v53 }
 0x6d9   : > { %v2473_v22 = vpop.permute.xlu0 %2472 }
 0x6da   : > { %v2490_v43 = vmul.f32 %v9446_v24, %v2473_v22 }
 0x6dc   : > { %v2510_v5 = vrot.slane %v2490_v43, 4 }
 0x6de   : > { %v2361_v16 = vpop.f32.mrf.mxu2  ;;  %v2511_v6 = vsel %vm714_vm1, %v2508_v41, %v2510_v5 }
 0x6df   : > { %2610 = vperm.xlu0 %8172, %v2361_v16   ;;  %v2444_v16 = vadd.f32 %v9463_v3, %v2436_v34 }
 0x6e1   : > { %v2478_v48 = vpop.permute.xlu1 %2477 }
 0x6e2   : > { %v2491_v63 = vmul.f32 %v9446_v24, %v2478_v48 }
 0x6e4   : > { %v2512_v4 = vrot.slane %v2491_v63, 4 }
 0x6e6   : > { %v2364_v25 = vpop.f32.mrf.mxu2 }
 0x6e7   : > { %2615 = vperm.xlu2 %8173, %v2364_v25   ;;  %v2445_v25 = vadd.f32 %v9463_v3, %v2437_v35 }
 0x6e9   : > { %v2483_v27 = vpop.permute.xlu0 %2482 }
 0x6ea   : > { %v2492_v56 = vmul.f32 %v9446_v24, %v2483_v27  ;;  %v2441_v24 = vmul.f32 %v9453_v52, %v9441_v60  ;;  %v2446_v60 = vadd.f32 %v9463_v3, %v2438_v62  ;;  %v2513_v52 = vsel %vm714_vm1, %v2510_v5, %v2512_v4 }
 0x6ec   : > { %v2514_v7 = vrot.slane %v2492_v56, 4  ;;  %v2528_v39 = vadd.f32 %v2511_v6, %v2446_v60 }
 0x6ee   : > { %v2367_v40 = vpop.f32.mrf.mxu2  ;;  %v2515_v15 = vsel %vm714_vm1, %v2512_v4, %v2514_v7 }
 0x6ef   : > { %2620 = vperm.xlu0 %8172, %v2367_v40   ;;  %v2448_v40 = vadd.f32 %v9463_v3, %v2440_v61 }
 0x6f1   : > { %v2530_v63 = vadd.f32 %v2515_v15, %v2448_v40 }
 0x6f6   : > { %v2370_v55 = vpop.f32.mrf.mxu2 }
 0x6f9   : > { %v9474_v23 = vpop.permute.xlu1 %2539 }
 0x6fe   : > { %v2373_v46 = vpop.f32.mrf.mxu2 }
 0x701   : > { %v2560_v20 = vpop.permute.xlu2 %2559  ;;  %v9478_v28 = vpop.permute.xlu1 %2544 }
 0x706   : > { %v2376_v9 = vpop.f32.mrf.mxu2 }
 0x709   : > { %v9480_v30 = vpop.permute.xlu0 %2549 }
 0x70e   : > { %v2379_v10 = vpop.f32.mrf.mxu2 }
 0x711   : > { %v9472_v21 = vpop.permute.xlu2 %2569  ;;  %v9482_v31 = vpop.permute.xlu1 %2554 }
 0x716   : > { %v2382_v11 = vpop.f32.mrf.mxu2 }
 0x717   : > { %2692 = vperm.xlu2 %8173, %v2382_v11   ;;  %v2447_v11 = vadd.f32 %v9463_v3, %v2439_v33 }
 0x719   : > { %v2529_v48 = vadd.f32 %v2513_v52, %v2447_v11 }
 0x71e   : > { %v2385_v12 = vpop.f32.mrf.mxu2 }
 0x71f   : > { %2697 = vperm.xlu1 %8171, %v2385_v12   ;;  %v2505_v12 = vsel %vm714_vm1, %v2502_v19, %v2504_v45 }
 0x721   : > { %v9476_v26 = vpop.permute.xlu2 %2595  ;;  %v2565_v47 = vpop.permute.xlu1 %2564 }
 0x726   : > { %v2388_v13 = vpop.f32.mrf.mxu2 }
 0x727   : > { %2682 = vperm.xlu1 %8171, %v2376_v9   ;;  %2702 = vperm.xlu2 %8173, %v2388_v13   ;;  %v2526_v13 = vadd.f32 %v2507_v44, %v2444_v16 }
 0x72e   : > { %v2391_v14 = vpop.f32.mrf.mxu2 }
 0x72f   : > { %2687 = vperm.xlu2 %8173, %v2379_v10   ;;  %2707 = vperm.xlu0 %8172, %v2391_v14   ;;  %v2449_v10 = vadd.f32 %v9463_v3, %v2441_v24  ;;  %v9532_v14 = vld [vmem:[%s11723_s2 + $0x90] ss:$0 sm:$0xff] }
 0x730   : > { %v2577_v50 = vmul.f32 %v9532_v14, %v2560_v20  ;;  %v2579_v1 = vmul.f32 %v9532_v14, %v9472_v21  ;;  %v2578_v19 = vmul.f32 %v9532_v14, %v2565_v47  ;;  %v2573_v38 = vmul.f32 %v9532_v14, %v9474_v23  ;;  %v8195_v23 = vld [vmem:[%s11723_s2 + $0x120] ss:$0 sm:$0xff] }
 0x731   : > { %v2606_v29 = vpop.permute.xlu2 %2605  ;;  %v2531_v37 = vadd.f32 %v2514_v7, %v2449_v10  ;;  %v2576_v45 = vmul.f32 %v9532_v14, %v9482_v31  ;;  %v2625_v47 = vmul.f32 %v9513_v32, %v9476_v26  ;;  %v2575_v43 = vmul.f32 %v9532_v14, %v9480_v30 }
 0x732   : > { %v2627_v22 = vmul.f32 %v9513_v32, %v2606_v29  ;;  %v2585_v42 = vadd.f32 %v2577_v50, %v2529_v48  ;;  %v2574_v30 = vmul.f32 %v9532_v14, %v9478_v28 }
 0x733   : > { %v2587_v56 = vadd.f32 %v2579_v1, %v2531_v37  ;;  %v2584_v24 = vadd.f32 %v2576_v45, %v2528_v39  ;;  %v2642_v33 = vrot.slane %v2625_v47, 4 }
 0x734   : > { %v2646_v61 = vrot.slane %v2627_v22, 4  ;;  %v2582_v10 = vadd.f32 %v2574_v30, %v2526_v13  ;;  %v2742_v30 = vld [vmem:[%s11722_s1 + $0x170] sm:$0xff] }
 0x737   : > { %2677 = vperm.xlu2 %8173, %v2373_v46   ;;  %2534 = vperm.xlu0 %8172, %v9407_v2   ;;  %v9484_v2 = vpop.permute.xlu0 %2590 }
 0x738   : > { %v2624_v35 = vmul.f32 %v9513_v32, %v9484_v2 }
 0x73a   : > { %v2640_v16 = vrot.slane %v2624_v35, 4  ;;  %v8201_v35 = vld [vmem:[%s11723_s2 + $0x110] sm:$0xff] }
 0x73f   : > { %2672 = vperm.xlu0 %8172, %v2370_v55   ;;  %v2509_v55 = vsel %vm714_vm1, %v2506_v53, %v2508_v41 }
 0x740   : > { %v2527_v3 = vadd.f32 %v2509_v55, %v2445_v25 }
 0x741   : > { %v2616_v51 = vpop.permute.xlu2 %2615  ;;  %v2601_v58 = vpop.permute.xlu1 %2600 }
 0x742   : > { %v2629_v46 = vmul.f32 %v9513_v32, %v2616_v51  ;;  %v2626_v27 = vmul.f32 %v9513_v32, %v2601_v58  ;;  %v2586_v58 = vadd.f32 %v2578_v19, %v2530_v63 }
 0x744   : > { %v2650_v51 = vrot.slane %v2629_v46, 4  ;;  %v2644_v31 = vrot.slane %v2626_v27, 4 }
 0x746   : > { %v2647_v25 = vsel %vm714_vm1, %v2644_v31, %v2646_v61  ;;  %v2645_v40 = vsel %vm714_vm1, %v2642_v33, %v2644_v31  ;;  %v8202_v31 = vld [vmem:[%s11723_s2 + $0x108] sm:$0xff] }
 0x747   : > { %v2664_v48 = vadd.f32 %v2645_v40, %v2582_v10  ;;  %v8204_v40 = vld [vmem:[%s11723_s2 + $0xb0] sm:$0xff] }
 0x751   : > { %v2611_v54 = vpop.permute.xlu0 %2610 }
 0x752   : > { %v2628_v9 = vmul.f32 %v9513_v32, %v2611_v54 }
 0x754   : > { %v2648_v54 = vrot.slane %v2628_v9, 4  ;;  %v2525_v9 = vadd.f32 %v2505_v12, %v9504_v49  ;;  %v2623_v49 = vmul.f32 %v9513_v32, %v9472_v21 }
 0x756   : > { %v2651_v62 = vsel %vm714_vm1, %v2648_v54, %v2650_v51  ;;  %v2649_v5 = vsel %vm714_vm1, %v2646_v61, %v2648_v54  ;;  %v2736_v61 = vld [vmem:[%s11722_s1 + $0x140] sm:$0xff] }
 0x757   : > { %v2667_v2 = vadd.f32 %v2651_v62, %v2585_v42  ;;  %v2666_v52 = vadd.f32 %v2649_v5, %v2584_v24  ;;  %v8203_v62 = vld [vmem:[%s11723_s2 + $0x100] sm:$0xff]  ;;  %v2743_v24 = vld [vmem:[%s11722_s1 + $0x178] sm:$0xff]  ;;  %v2745_v5 = vld [vmem:[%s11722_s1 + $0x188] sm:$0xff] }
 0x761   : > { %v2621_v0 = vpop.permute.xlu0 %2620 }
 0x762   : > { %v2630_v57 = vmul.f32 %v9513_v32, %v2621_v0 }
 0x764   : > { %v2652_v17 = vrot.slane %v2630_v57, 4  ;;  %v2583_v57 = vadd.f32 %v2575_v43, %v2527_v3  ;;  %v8197_v43 = vld [vmem:[%s11723_s2 + $0x80] sm:$0xff] }
 0x766   : > { %v2653_v29 = vsel %vm714_vm1, %v2650_v51, %v2652_v17  ;;  %v2669_v0 = vadd.f32 %v2652_v17, %v2587_v56  ;;  %v2665_v6 = vadd.f32 %v2647_v25, %v2583_v57  ;;  %v2581_v17 = vadd.f32 %v2573_v38, %v2525_v9  ;;  %v2735_v56 = vld [vmem:[%s11722_s1 + $0x138] sm:$0xff]  ;;  %v2750_v57 = vld [vmem:[%s11722_s1 + $0x1b0] sm:$0xff] }
 0x767   : > { %v2668_v53 = vadd.f32 %v2653_v29, %v2586_v58  ;;  %v2639_v38 = vrot.slane %v2623_v49, 4  ;;  %v2734_v29 = vld [vmem:[%s11722_s1 + $0x130] sm:$0xff]  ;;  %v8198_v58 = vld [vmem:[%s11723_s2 + $0x78] sm:$0xff] }
 0x768   : > { %v2751_v25 = vld [vmem:[%s11722_s1 + $0x1b8] sm:$0xff] }
 0x769   : > { %v2641_v63 = vsel %vm714_vm1, %v2639_v38, %v2640_v16 }
 0x771   : > { %v9486_v8 = vpop.permute.xlu2 %2692 }
 0x781   : > { %v2703_v59 = vpop.permute.xlu2 %2702 }
 0x782   : > { %v2716_v34 = vmul.f32 %v8195_v23, %v2703_v59  ;;  %v2714_v59 = vmul.f32 %v8195_v23, %v9486_v8 }
 0x784   : > { %v2724_v7 = vadd.f32 %v2716_v34, %v2668_v53  ;;  %v2722_v50 = vadd.f32 %v2714_v59, %v2666_v52  ;;  %v8200_v34 = vld [vmem:[%s11723_s2 + $0x118] sm:$0xff]  ;;  %v2746_v59 = vld [vmem:[%s11722_s1 + $0x190] sm:$0xff]  ;;  %v8206_v52 = vld [vmem:[%s11723_s2 + $0xa0] sm:$0xff] }
 0x785   : > { %v2739_v53 = vld [vmem:[%s11722_s1 + $0x158] sm:$0xff] }
 0x786   : > { %v2732_v8 = vmax.f32 %v2724_v7, 0.0  ;;  %v2730_v12 = vmax.f32 %v2722_v50, 0.0  ;;  %v2747_v7 = vld [vmem:[%s11722_s1 + $0x198] sm:$0xff] }
 0x789   : > { %v2688_v20 = vpop.permute.xlu2 %2687 }
 0x78a   : > { %v2713_v55 = vmul.f32 %v8195_v23, %v2688_v20 }
 0x78c   : > { %v2721_v1 = vadd.f32 %v2713_v55, %v2665_v6 }
 0x78e   : > { %v2729_v54 = vmax.f32 %v2721_v1, 0.0 }
 0x791   : > { %v2698_v18 = vpop.permute.xlu1 %2697  ;;  %v2678_v11 = vpop.permute.xlu2 %2677 }
 0x792   : > { %v2715_v41 = vmul.f32 %v8195_v23, %v2698_v18  ;;  %v2643_v18 = vsel %vm714_vm1, %v2640_v16, %v2642_v33  ;;  %v2711_v22 = vmul.f32 %v8195_v23, %v2678_v11  ;;  %v2744_v33 = vld [vmem:[%s11722_s1 + $0x180] sm:$0xff] }
 0x793   : > { %v2663_v13 = vadd.f32 %v2643_v18, %v2581_v17  ;;  %v9698_v17 = vld [vmem:[%s11723_s2 + $0xf0] sm:$0xff] }
 0x794   : > { %v2723_v46 = vadd.f32 %v2715_v41, %v2667_v2  ;;  %v2740_v41 = vld [vmem:[%s11722_s1 + $0x160] sm:$0xff] }
 0x795   : > { %v2719_v20 = vadd.f32 %v2711_v22, %v2663_v13  ;;  %v2748_v2 = vld [vmem:[%s11722_s1 + $0x1a0] sm:$0xff] }
 0x796   : > { %v2731_v19 = vmax.f32 %v2723_v46, 0.0  ;;  %v8207_v46 = vld [vmem:[%s11723_s2 + $0x98] sm:$0xff] }
 0x799   : > { %v2683_v60 = vpop.permute.xlu1 %2682 }
 0x79a   : > { %v2712_v15 = vmul.f32 %v8195_v23, %v2683_v60  ;;  %v8205_v60 = vld [vmem:[%s11723_s2 + $0xa8] sm:$0xff] }
 0x79c   : > { %v2720_v51 = vadd.f32 %v2712_v15, %v2664_v48  ;;  %v9692_v15 = vld [vmem:[%s11723_s2 + $0xf8] sm:$0xff] }
 0x79e   : > { %v2728_v39 = vmax.f32 %v2720_v51, 0.0 }
 0x7a1   : > { %v2708_v26 = vpop.permute.xlu0 %2707 }
 0x7a2   : > { %v2717_v4 = vmul.f32 %v8195_v23, %v2708_v26  ;;  %v2737_v26 = vld [vmem:[%s11722_s1 + $0x148] sm:$0xff] }
 0x7a4   : > { %v2725_v44 = vadd.f32 %v2717_v4, %v2669_v0  ;;  %v2738_v0 = vld [vmem:[%s11722_s1 + $0x150] sm:$0xff]  ;;  %v2741_v4 = vld [vmem:[%s11722_s1 + $0x168] sm:$0xff] }
 0x7a6   : > { %v2733_v28 = vmax.f32 %v2725_v44, 0.0  ;;  %v2749_v44 = vld [vmem:[%s11722_s1 + $0x1a8] sm:$0xff] }
 0x7a8   : > { %7650 = vmatpush.msk.msrb.mxu3 %vm714_vm1, %v2733_v28  ;;  %v2752_v28 = vld [vmem:[%s11722_s1 + $0x1c0] sm:$0x3f] }
 0x7a9   : > { %v2535_v3 = vpop.permute.xlu0 %2534 }
 0x7aa   : > { %v2572_v27 = vmul.f32 %v9532_v14, %v2535_v3  ;;  %2822 = vmatpush.msrb.mxu3 %v2732_v8  ;;  %v2727_v14 = vmax.f32 %v2719_v20, 0.0  ;;  %v9704_v3 = vld [vmem:[%s11723_s2 + $0xe8] sm:$0xff] }
 0x7ac   : > { %2823 = vmatpush.msrb.mxu3 %v2731_v19  ;;  %v2580_v37 = vadd.f32 %v2572_v27, %v9469_v36  ;;  %v8196_v36 = vld [vmem:[%s11723_s2 + $0x88] sm:$0xff]  ;;  %v9711_v19 = vld [vmem:[%s11723_s2 + $0xe0] sm:$0xff] }
 0x7ae   : > { %2824 = vmatpush.msrb.mxu3 %v2730_v12  ;;  %v2662_v45 = vadd.f32 %v2641_v63, %v2580_v37 }
 0x7b0   : > { %2825 = vmatpush.msrb.mxu3 %v2729_v54 }
 0x7b1   : > { %v2673_v42 = vpop.permute.xlu0 %2672 }
 0x7b2   : > { %v2710_v47 = vmul.f32 %v8195_v23, %v2673_v42  ;;  %2826 = vmatpush.msrb.mxu3 %v2728_v39  ;;  %v8199_v23 = vld [vmem:[%s11723_s2 + $0x70] sm:$0xff] }
 0x7b4   : > { %v2718_v21 = vadd.f32 %v2710_v47, %v2662_v45  ;;  %2827 = vmatpush.msrb.mxu3 %v2727_v14 }
 0x7b6   : > { %v2726_v32 = vmax.f32 %v2718_v21, 0.0 }
 0x7b8   : > { %2828 = vmatpush.msrb.mxu3 %v2726_v32 }
 0x7b9   : > { %7651 = vmatmul.msk.f32.vlgmr.msrb.gmra.mxu3 %vm970_vm2, %v2734_v29 }
 0x7ba   : > { %3284 = vmatpush.msra.mxu3 %v8196_v36 }
 0x7bc   : > { %3285 = vmatpush.msra.mxu3 %v8197_v43 }
 0x7be   : > { %3286 = vmatpush.msra.mxu3 %v8198_v58 }
 0x7c0   : > { %3287 = vmatpush.msra.mxu3 %v8199_v23 }
 0x7c1   : > { %7652 = vmatmul.msk.f32.gmra.mxu3 %vm970_vm2, %v2735_v56 }
 0x7c2   : > { %3356 = vmatpush.msrb.mxu3 %v8200_v34 }
 0x7c4   : > { %3357 = vmatpush.msrb.mxu3 %v8201_v35 }
 0x7c6   : > { %3358 = vmatpush.msrb.mxu3 %v8202_v31 }
 0x7c8   : > { %3359 = vmatpush.msrb.mxu3 %v8203_v62 }
 0x7c9   : > { %7653 = vmatmul.msk.f32.gmra.mxu3 %vm970_vm2, %v2736_v61 }
 0x7d1   : > { %7654 = vmatmul.msk.f32.gmra.mxu3 %vm970_vm2, %v2737_v26 }
 0x7d9   : > { %7655 = vmatmul.msk.f32.gmra.mxu3 %vm970_vm2, %v2738_v0  ;;  %v8212_v0 = vld [vmem:[%s11723_s2 + $0xd0] sm:$0xff] }
 0x7e1   : > { %7656 = vmatmul.msk.f32.gmra.mxu3 %vm970_vm2, %v2739_v53  ;;  %v8213_v53 = vld [vmem:[%s11723_s2 + $0xc8] sm:$0xff] }
 0x7e9   : > { %7657 = vmatmul.msk.f32.gmra.mxu3 %vm970_vm2, %v2740_v41 }
 0x7f1   : > { %7658 = vmatmul.msk.f32.gmra.mxu3 %vm970_vm2, %v2741_v4  ;;  %v8214_v4 = vld [vmem:[%s11723_s2 + $0xc0] sm:$0xff] }
 0x7f9   : > { %7659 = vmatmul.msk.f32.gmra.mxu3 %vm970_vm2, %v2742_v30 }
 0x801   : > { %7660 = vmatmul.msk.f32.gmra.mxu3 %vm970_vm2, %v2743_v24  ;;  %v8215_v24 = vld [vmem:[%s11723_s2 + $0xb8] sm:$0xff] }
 0x809   : > { %7661 = vmatmul.msk.f32.gmra.mxu3 %vm970_vm2, %v2744_v33 }
 0x811   : > { %7662 = vmatmul.msk.f32.gmra.mxu3 %vm970_vm2, %v2745_v5 }
 0x819   : > { %7663 = vmatmul.msk.f32.gmra.mxu3 %vm970_vm2, %v2746_v59 }
 0x821   : > { %7664 = vmatmul.msk.f32.gmra.mxu3 %vm970_vm2, %v2747_v7 }
 0x829   : > { %7665 = vmatmul.msk.f32.gmra.mxu3 %vm970_vm2, %v2748_v2 }
 0x831   : > { %7666 = vmatmul.msk.f32.gmra.mxu3 %vm970_vm2, %v2749_v44 }
 0x839   : > { %7667 = vmatmul.msk.f32.gmra.mxu3 %vm970_vm2, %v2750_v57 }
 0x83c   : > { %v2830_v16 = vpop.f32.mrf.mxu3 }
 0x83d   : > { %7670 = vmatmul.msk.f32.vlgmr.msra.gmra.mxu1 %vm1107_vm3, %v2830_v16 }
 0x83e   : > { %3019 = vmatpush.msra.mxu1 %v8204_v40 }
 0x840   : > { %3020 = vmatpush.msra.mxu1 %v8205_v60 }
 0x841   : > { %7668 = vmatmul.msk.f32.gmra.mxu3 %vm970_vm2, %v2751_v25 }
 0x842   : > { %3021 = vmatpush.msra.mxu1 %v8206_v52 }
 0x844   : > { %v2833_v55 = vpop.f32.mrf.mxu3  ;;  %3022 = vmatpush.msra.mxu1 %v8207_v46 }
 0x845   : > { %7671 = vmatmul.msk.f32.gmra.mxu1 %vm1107_vm3, %v2833_v55 }
 0x849   : > { %7669 = vmatmul.msk.f32.gmra.mxu3 %vm970_vm2, %v2752_v28 }
 0x84c   : > { %v2836_v9 = vpop.f32.mrf.mxu3 }
 0x84d   : > { %7672 = vmatmul.msk.f32.gmra.mxu1 %vm1107_vm3, %v2836_v9 }
 0x854   : > { %v2839_v10 = vpop.f32.mrf.mxu3 }
 0x855   : > { %7673 = vmatmul.msk.f32.gmra.mxu1 %vm1107_vm3, %v2839_v10  ;;  %v2936_v50 = vrot.slane %v2839_v10, 6 }
 0x85c   : > { %v2842_v11 = vpop.f32.mrf.mxu3 }
 0x85d   : > { %v2937_v8 = vrot.slane %v2842_v11, 6 }
 0x85f   : > { %v2938_v6 = vsel %vm1157_vm4, %v2936_v50, %v2937_v8 }
 0x860   : > { %7674 = vmatmul.msk.f32.vlgmr.msrb.gmra.mxu1 %vm1107_vm3, %v2938_v6 }
 0x861   : > { %3070 = vmatpush.msrb.mxu1 %v9692_v15 }
 0x863   : > { %3071 = vmatpush.msrb.mxu1 %v9698_v17 }
 0x864   : > { %v2845_v18 = vpop.f32.mrf.mxu3 }
 0x865   : > { %v2939_v48 = vrot.slane %v2845_v18, 6  ;;  %3072 = vmatpush.msrb.mxu1 %v9704_v3 }
 0x867   : > { %v2940_v1 = vsel %vm1157_vm4, %v2937_v8, %v2939_v48  ;;  %3073 = vmatpush.msrb.mxu1 %v9711_v19  ;;  %v8216_v8 = vld [vmem:[%s11724_s3 + $0x1] ss:$0 sm:$0xff] }
 0x868   : > { %7675 = vmatmul.msk.f32.gmra.mxu1 %vm1107_vm3, %v2940_v1 }
 0x86c   : > { %v2848_v22 = vpop.f32.mrf.mxu3 }
 0x86d   : > { %v2941_v27 = vrot.slane %v2848_v22, 6 }
 0x86f   : > { %v2942_v49 = vsel %vm1157_vm4, %v2939_v48, %v2941_v27 }
 0x870   : > { %7676 = vmatmul.msk.f32.gmra.mxu1 %vm1107_vm3, %v2942_v49 }
 0x874   : > { %v2851_v12 = vpop.f32.mrf.mxu3 }
 0x875   : > { %v2943_v13 = vrot.slane %v2851_v12, 6  ;;  %v2990_v20 = vrot.slane %v2851_v12, 4 }
 0x877   : > { %v2944_v51 = vsel %vm1157_vm4, %v2941_v27, %v2943_v13 }
 0x878   : > { %7677 = vmatmul.msk.f32.gmra.mxu1 %vm1107_vm3, %v2944_v51 }
 0x87c   : > { %v2854_v54 = vpop.f32.mrf.mxu3 }
 0x87d   : > { %v2991_v37 = vrot.slane %v2854_v54, 4 }
 0x87f   : > { %v2992_v38 = vsel %vm714_vm1, %v2990_v20, %v2991_v37 }
 0x880   : > { %7678 = vmatmul.msk.f32.vlgmr.msra.gmra.mxu1 %vm1107_vm3, %v2992_v38 }
 0x884   : > { %v2857_v39 = vpop.f32.mrf.mxu3 }
 0x885   : > { %v2993_v63 = vrot.slane %v2857_v39, 4 }
 0x887   : > { %v2994_v42 = vsel %vm714_vm1, %v2991_v37, %v2993_v63 }
 0x888   : > { %7679 = vmatmul.msk.f32.gmra.mxu1 %vm1107_vm3, %v2994_v42 }
 0x88c   : > { %v2860_v14 = vpop.f32.mrf.mxu3 }
 0x88d   : > { %v2995_v45 = vrot.slane %v2860_v14, 4 }
 0x88f   : > { %v2996_v47 = vsel %vm714_vm1, %v2993_v63, %v2995_v45 }
 0x890   : > { %7680 = vmatmul.msk.f32.gmra.mxu1 %vm1107_vm3, %v2996_v47 }
 0x894   : > { %v2863_v21 = vpop.f32.mrf.mxu3 }
 0x895   : > { %v2997_v32 = vrot.slane %v2863_v21, 4  ;;  %v3043_v43 = vrot.slane %v2863_v21, 2 }
 0x897   : > { %v2998_v29 = vsel %vm714_vm1, %v2995_v45, %v2997_v32 }
 0x898   : > { %7681 = vmatmul.msk.f32.gmra.mxu1 %vm1107_vm3, %v2998_v29 }
 0x89c   : > { %v2866_v36 = vpop.f32.mrf.mxu3 }
 0x89d   : > { %v3044_v56 = vrot.slane %v2866_v36, 2 }
 0x89f   : > { %v3045_v58 = vsel %vm1265_vm5, %v3043_v43, %v3044_v56 }
 0x8a0   : > { %7682 = vmatmul.msk.f32.vlgmr.msrb.gmra.mxu1 %vm1107_vm3, %v3045_v58  ;;  %v3140_v58 = vld [vmem:[%s11722_s1 + $0x1c8] sm:$0xff] }
 0x8a4   : > { %v2869_v23 = vpop.f32.mrf.mxu3 }
 0x8a5   : > { %v3046_v34 = vrot.slane %v2869_v23, 2  ;;  %v3141_v23 = vld [vmem:[%s11722_s1 + $0x1d0] sm:$0xff] }
 0x8a7   : > { %v3047_v35 = vsel %vm1265_vm5, %v3044_v56, %v3046_v34 }
 0x8a8   : > { %7683 = vmatmul.msk.f32.gmra.mxu1 %vm1107_vm3, %v3047_v35  ;;  %v3143_v35 = vld [vmem:[%s11722_s1 + $0x1e0] sm:$0xff] }
 0x8ac   : > { %v2872_v61 = vpop.f32.mrf.mxu3 }
 0x8ad   : > { %v3048_v31 = vrot.slane %v2872_v61, 2  ;;  %v3144_v61 = vld [vmem:[%s11722_s1 + $0x1e8] sm:$0xff] }
 0x8af   : > { %v3049_v62 = vsel %vm1265_vm5, %v3046_v34, %v3048_v31  ;;  %v3142_v34 = vld [vmem:[%s11722_s1 + $0x1d8] sm:$0xff] }
 0x8b0   : > { %7684 = vmatmul.msk.f32.gmra.mxu1 %vm1107_vm3, %v3049_v62  ;;  %v3146_v62 = vld [vmem:[%s11722_s1 + $0x1f8] sm:$0xff] }
 0x8b4   : > { %v2875_v26 = vpop.f32.mrf.mxu3 }
 0x8b5   : > { %7686 = vmatmul.msk.f32.vlgmr.msra.gmra.mxu0 %vm1107_vm3, %v2875_v26  ;;  %v3147_v26 = vld [vmem:[%s11722_s1 + $0x200] sm:$0xff] }
 0x8b6   : > { %3320 = vmatpush.msra.mxu0 %v8212_v0  ;;  %v3148_v0 = vld [vmem:[%s11722_s1 + $0x208] sm:$0xff] }
 0x8b8   : > { %7685 = vmatmul.msk.f32.gmra.mxu1 %vm1107_vm3, %v3048_v31  ;;  %3321 = vmatpush.msra.mxu0 %v8213_v53  ;;  %v3145_v31 = vld [vmem:[%s11722_s1 + $0x1f0] sm:$0xff] }
 0x8b9   : > { %v3149_v53 = vld [vmem:[%s11722_s1 + $0x210] sm:$0x7] }
 0x8ba   : > { %v2916_v41 = vpop.f32.mrf.mxu1  ;;  %3322 = vmatpush.msra.mxu0 %v8214_v4  ;;  %v8217_v4 = vld [vmem:[%s11723_s2 + $0x160] sm:$0xff] }
 0x8bb   : > { %v2928_v49 = vadd.f32 %v8216_v8, %v2916_v41 }
 0x8bc   : > { %v2878_v30 = vpop.f32.mrf.mxu3  ;;  %3323 = vmatpush.msra.mxu0 %v8215_v24  ;;  %v8219_v24 = vld [vmem:[%s11723_s2 + $0x150] sm:$0xff] }
 0x8bd   : > { %7687 = vmatmul.msk.f32.gmra.mxu0 %vm1107_vm3, %v2878_v30  ;;  %v8218_v30 = vld [vmem:[%s11723_s2 + $0x158] sm:$0xff] }
 0x8c2   : > { %v2919_v33 = vpop.f32.mrf.mxu1 }
 0x8c3   : > { %v2929_v48 = vadd.f32 %v8216_v8, %v2919_v33 }
 0x8c4   : > { %v2881_v5 = vpop.f32.mrf.mxu3 }
 0x8c5   : > { %7688 = vmatmul.msk.f32.gmra.mxu0 %vm1107_vm3, %v2881_v5  ;;  %v8220_v5 = vld [vmem:[%s11723_s2 + $0x148] sm:$0xff] }
 0x8ca   : > { %v2922_v59 = vpop.f32.mrf.mxu1 }
 0x8cb   : > { %v2930_v6 = vadd.f32 %v8216_v8, %v2922_v59 }
 0x8cc   : > { %v2884_v7 = vpop.f32.mrf.mxu3 }
 0x8cd   : > { %7689 = vmatmul.msk.f32.gmra.mxu0 %vm1107_vm3, %v2884_v7 }
 0x8d2   : > { %v2925_v2 = vpop.f32.mrf.mxu1 }
 0x8d3   : > { %v2931_v18 = vadd.f32 %v8216_v8, %v2925_v2 }
 0x8dd   : > { %v2970_v44 = vpop.f32.mrf.mxu1 }
 0x8de   : > { %v2982_v54 = vadd.f32 %v2970_v44, %v2928_v49 }
 0x8e5   : > { %v2973_v57 = vpop.f32.mrf.mxu1 }
 0x8e6   : > { %v2983_v12 = vadd.f32 %v2973_v57, %v2929_v48 }
 0x8ed   : > { %v2976_v16 = vpop.f32.mrf.mxu1 }
 0x8ee   : > { %v2984_v1 = vadd.f32 %v2976_v16, %v2930_v6 }
 0x8f5   : > { %v2979_v25 = vpop.f32.mrf.mxu1 }
 0x8f6   : > { %v2985_v22 = vadd.f32 %v2979_v25, %v2931_v18 }
 0x8fd   : > { %v3024_v40 = vpop.f32.mrf.mxu1 }
 0x8fe   : > { %v3036_v63 = vadd.f32 %v3024_v40, %v2982_v54  ;;  %v7720_v54 = vld [vmem:[%s11725_s4 + $0x58] sm:$0xff] }
 0x905   : > { %v3027_v60 = vpop.f32.mrf.mxu1 }
 0x906   : > { %v3037_v20 = vadd.f32 %v3027_v60, %v2983_v12 }
 0x90d   : > { %v3030_v52 = vpop.f32.mrf.mxu1 }
 0x90e   : > { %v3038_v13 = vadd.f32 %v3030_v52, %v2984_v1 }
 0x915   : > { %v3033_v55 = vpop.f32.mrf.mxu1 }
 0x916   : > { %v3039_v51 = vadd.f32 %v3033_v55, %v2985_v22 }
 0x91d   : > { %v3075_v46 = vpop.f32.mrf.mxu1 }
 0x91e   : > { %v3087_v47 = vadd.f32 %v3075_v46, %v3036_v63  ;;  %v7718_v63 = vld [vmem:[%s11725_s4 + $0x48] sm:$0xff] }
 0x925   : > { %v3078_v28 = vpop.f32.mrf.mxu1 }
 0x926   : > { %v3088_v42 = vadd.f32 %v3078_v28, %v3037_v20 }
 0x92d   : > { %v3081_v11 = vpop.f32.mrf.mxu1 }
 0x92e   : > { %v3089_v37 = vadd.f32 %v3081_v11, %v3038_v13 }
 0x932   : > { %v3120_v9 = vpop.f32.mrf.mxu0 }
 0x933   : > { %v3132_v29 = vadd.f32 %v3120_v9, %v3087_v47  ;;  %v7734_v47 = vld [vmem:[%s11725_s4 + $0xb0] sm:$0xff] }
 0x935   : > { %v3084_v27 = vpop.f32.mrf.mxu1  ;;  %v3136_v56 = vmax.f32 %v3132_v29, 0.0  ;;  %v7733_v29 = vld [vmem:[%s11725_s4 + $0xa8] sm:$0xff] }
 0x936   : > { %v3090_v38 = vadd.f32 %v3084_v27, %v3039_v51 }
 0x93a   : > { %v3123_v10 = vpop.f32.mrf.mxu0 }
 0x93b   : > { %v3133_v21 = vadd.f32 %v3123_v10, %v3088_v42  ;;  %v7735_v42 = vld [vmem:[%s11725_s4 + $0xb8] sm:$0xff] }
 0x93d   : > { %v3137_v43 = vmax.f32 %v3133_v21, 0.0  ;;  %v7730_v21 = vld [vmem:[%s11725_s4 + $0x98] sm:$0xff] }
 0x942   : > { %v3126_v50 = vpop.f32.mrf.mxu0 }
 0x943   : > { %v3134_v14 = vadd.f32 %v3126_v50, %v3089_v37  ;;  %v3410_v37 = vld [vmem:[%s11725_s4 + $0x18] sm:$0xff] }
 0x945   : > { %v3138_v36 = vmax.f32 %v3134_v14, 0.0  ;;  %v3408_v14 = vld [vmem:[%s11725_s4 + $0x8] sm:$0xff] }
 0x94a   : > { %v3129_v39 = vpop.f32.mrf.mxu0 }
 0x94b   : > { %v3135_v45 = vadd.f32 %v3129_v39, %v3090_v38  ;;  %v7719_v38 = vld [vmem:[%s11725_s4 + $0x50] sm:$0xff] }
 0x94c   : > { %v3409_v39 = vld [vmem:[%s11725_s4 + $0x10] sm:$0xff] }
 0x94d   : > { %v3139_v32 = vmax.f32 %v3135_v45, 0.0  ;;  %v7717_v45 = vld [vmem:[%s11725_s4 + $0x40] sm:$0xff] }
 0x94f   : > { %7690 = vmatpush.msk.msra.mxu1 %vm1265_vm5, %v3139_v32  ;;  %v3407_v32 = vld [vmem:[%s11725_s4] sm:$0xff] }
 0x951   : > { %3196 = vmatpush.msra.mxu1 %v3138_v36  ;;  %v7729_v36 = vld [vmem:[%s11725_s4 + $0x90] sm:$0xff] }
 0x953   : > { %3197 = vmatpush.msra.mxu1 %v3137_v43  ;;  %v7715_v43 = vld [vmem:[%s11725_s4 + $0x38] sm:$0xff] }
 0x955   : > { %3198 = vmatpush.msra.mxu1 %v3136_v56  ;;  %v7732_v56 = vld [vmem:[%s11725_s4 + $0xa0] sm:$0xff] }
 0x956   : > { %7691 = vmatmul.msk.f32.vlgmr.msra.gmra.mxu1 %vm1373_vm6, %v3140_v58 }
 0x957   : > { %3566 = vmatpush.msrb.mxu1 %v7735_v42  ;;  %v7780_v42 = vld [vmem:[%s11725_s4 + $0x1d8] sm:$0xff] }
 0x959   : > { %3567 = vmatpush.msrb.mxu1 %v7734_v47  ;;  %v7779_v47 = vld [vmem:[%s11725_s4 + $0x1d0] sm:$0xff] }
 0x95b   : > { %3568 = vmatpush.msrb.mxu1 %v7733_v29 }
 0x95d   : > { %3569 = vmatpush.msrb.mxu1 %v7732_v56 }
 0x95e   : > { %7692 = vmatmul.msk.f32.gmra.mxu1 %vm1373_vm6, %v3141_v23  ;;  %v7728_v23 = vld [vmem:[%s11725_s4 + $0x88] sm:$0xff] }
 0x966   : > { %7693 = vmatmul.msk.f32.gmra.mxu1 %vm1373_vm6, %v3142_v34  ;;  %v7714_v34 = vld [vmem:[%s11725_s4 + $0x30] sm:$0xff] }
 0x96e   : > { %7694 = vmatmul.msk.f32.gmra.mxu1 %vm1373_vm6, %v3143_v35  ;;  %v7750_v35 = vld [vmem:[%s11725_s4 + $0x118] sm:$0xff] }
 0x96f   : > { %3650 = vmatpush.msra.mxu1 %v7750_v35  ;;  %v7777_v35 = vld [vmem:[%s11725_s4 + $0x1c0] sm:$0xff] }
 0x976   : > { %7695 = vmatmul.msk.f32.gmra.mxu1 %vm1373_vm6, %v3144_v61 }
 0x97e   : > { %7696 = vmatmul.msk.f32.gmra.mxu1 %vm1373_vm6, %v3145_v31  ;;  %v7727_v31 = vld [vmem:[%s11725_s4 + $0x80] sm:$0xff] }
 0x986   : > { %7697 = vmatmul.msk.f32.gmra.mxu1 %vm1373_vm6, %v3146_v62  ;;  %v7713_v62 = vld [vmem:[%s11725_s4 + $0x28] sm:$0xff] }
 0x98e   : > { %7698 = vmatmul.msk.f32.gmra.mxu1 %vm1373_vm6, %v3147_v26  ;;  %v7749_v26 = vld [vmem:[%s11725_s4 + $0x110] sm:$0xff] }
 0x98f   : > { %3651 = vmatpush.msra.mxu1 %v7749_v26  ;;  %v7753_v26 = vld [vmem:[%s11725_s4 + $0x128] sm:$0xff] }
 0x996   : > { %7699 = vmatmul.msk.f32.gmra.mxu1 %vm1373_vm6, %v3148_v0  ;;  %v7712_v0 = vld [vmem:[%s11725_s4 + $0x20] sm:$0xff] }
 0x99e   : > { %7700 = vmatmul.msk.f32.gmra.mxu1 %vm1373_vm6, %v3149_v53  ;;  %v7748_v53 = vld [vmem:[%s11725_s4 + $0x108] sm:$0xff] }
 0x99f   : > { %3652 = vmatpush.msra.mxu1 %v7748_v53  ;;  %v7772_v53 = vld [vmem:[%s11725_s4 + $0x1a0] sm:$0xff] }
 0x9d3   : > { %v3200_v41 = vpop.f32.mrf.mxu1 }
 0x9d4   : > { %7701 = vmatmul.msk.f32.vlgmr.msrb.gmra.mxu0 %vm1107_vm3, %v3200_v41  ;;  %v7747_v41 = vld [vmem:[%s11725_s4 + $0x100] sm:$0xff] }
 0x9d5   : > { %3392 = vmatpush.msrb.mxu0 %v8217_v4  ;;  %3653 = vmatpush.msra.mxu1 %v7747_v41  ;;  %v7752_v41 = vld [vmem:[%s11725_s4 + $0x120] sm:$0xff] }
 0x9d7   : > { %3393 = vmatpush.msrb.mxu0 %v8218_v30 }
 0x9d9   : > { %3394 = vmatpush.msrb.mxu0 %v8219_v24 }
 0x9db   : > { %v3203_v33 = vpop.f32.mrf.mxu1  ;;  %3395 = vmatpush.msrb.mxu0 %v8220_v5 }
 0x9dc   : > { %7702 = vmatmul.msk.f32.gmra.mxu0 %vm1107_vm3, %v3203_v33  ;;  %v3263_v7 = vrot.slane %v3203_v33, 7  ;;  %v8221_v33 = vld [vmem:[%s11724_s3 + $0x2] ss:$0 sm:$0xff] }
 0x9e3   : > { %v3206_v59 = vpop.f32.mrf.mxu1 }
 0x9e4   : > { %v3264_v2 = vrot.slane %v3206_v59, 7 }
 0x9e6   : > { %v3265_v44 = vsel %vm1489_vm7, %v3263_v7, %v3264_v2 }
 0x9e7   : > { %7703 = vmatmul.msk.f32.vlgmr.msra.gmra.mxu3 %vm1107_vm3, %v3265_v44 }
 0x9e8   : > { %3426 = vmatpush.msra.mxu3 %v3410_v37 }
 0x9ea   : > { %3427 = vmatpush.msra.mxu3 %v3409_v39  ;;  %v7762_v39 = vld [vmem:[%s11725_s4 + $0x160] sm:$0xff] }
 0x9eb   : > { %v3209_v57 = vpop.f32.mrf.mxu1 }
 0x9ec   : > { %v3266_v16 = vrot.slane %v3209_v57, 7  ;;  %v3299_v60 = vrot.slane %v3209_v57, 6  ;;  %3428 = vmatpush.msra.mxu3 %v3408_v14  ;;  %v7759_v14 = vld [vmem:[%s11725_s4 + $0x150] sm:$0xff] }
 0x9ee   : > { %v3267_v25 = vsel %vm1489_vm7, %v3264_v2, %v3266_v16  ;;  %3429 = vmatpush.msra.mxu3 %v3407_v32  ;;  %v7778_v32 = vld [vmem:[%s11725_s4 + $0x1c8] sm:$0xff] }
 0x9ef   : > { %7704 = vmatmul.msk.f32.gmra.mxu3 %vm1107_vm3, %v3267_v25 }
 0x9f3   : > { %v3212_v40 = vpop.f32.mrf.mxu1 }
 0x9f4   : > { %v3300_v52 = vrot.slane %v3212_v40, 6 }
 0x9f6   : > { %v3301_v55 = vsel %vm1157_vm4, %v3299_v60, %v3300_v52 }
 0x9f7   : > { %7705 = vmatmul.msk.f32.vlgmr.msra.gmra.mxu0 %vm1107_vm3, %v3301_v55 }
 0x9f8   : > { %3482 = vmatpush.msra.mxu0 %v7720_v54  ;;  %v7740_v54 = vld [vmem:[%s11725_s4 + $0xd8] sm:$0xff] }
 0x9fa   : > { %3483 = vmatpush.msra.mxu0 %v7719_v38  ;;  %v7760_v38 = vld [vmem:[%s11725_s4 + $0x158] sm:$0xff] }
 0x9fb   : > { %v3215_v46 = vpop.f32.mrf.mxu1 }
 0x9fc   : > { %v3302_v28 = vrot.slane %v3215_v46, 6  ;;  %v3335_v11 = vrot.slane %v3215_v46, 5  ;;  %3484 = vmatpush.msra.mxu0 %v7718_v63  ;;  %v7739_v63 = vld [vmem:[%s11725_s4 + $0xd0] sm:$0xff] }
 0x9fe   : > { %v3303_v9 = vsel %vm1157_vm4, %v3300_v52, %v3302_v28  ;;  %3485 = vmatpush.msra.mxu0 %v7717_v45  ;;  %v7725_v52 = vld [vmem:[%s11725_s4 + $0x78] sm:$0xff]  ;;  %v7738_v45 = vld [vmem:[%s11725_s4 + $0xc8] sm:$0xff] }
 0x9ff   : > { %7706 = vmatmul.msk.f32.gmra.mxu0 %vm1107_vm3, %v3303_v9 }
 0xa03   : > { %v3218_v10 = vpop.f32.mrf.mxu1 }
 0xa04   : > { %v3336_v50 = vrot.slane %v3218_v10, 5  ;;  %v7745_v10 = vld [vmem:[%s11725_s4 + $0xf8] sm:$0xff] }
 0xa06   : > { %v3337_v8 = vsel %vm1562_vm8, %v3335_v11, %v3336_v50  ;;  %v7724_v11 = vld [vmem:[%s11725_s4 + $0x70] sm:$0xff] }
 0xa07   : > { %7707 = vmatmul.msk.f32.vlgmr.msrb.gmra.mxu3 %vm1107_vm3, %v3337_v8 }
 0xa08   : > { %3454 = vmatpush.msrb.mxu3 %v7715_v43  ;;  %v7737_v43 = vld [vmem:[%s11725_s4 + $0xc0] sm:$0xff] }
 0xa0a   : > { %3455 = vmatpush.msrb.mxu3 %v7714_v34  ;;  %v7755_v34 = vld [vmem:[%s11725_s4 + $0x138] sm:$0xff] }
 0xa0b   : > { %v3221_v6 = vpop.f32.mrf.mxu1 }
 0xa0c   : > { %v3338_v18 = vrot.slane %v3221_v6, 5  ;;  %v3371_v22 = vrot.slane %v3221_v6, 4  ;;  %3456 = vmatpush.msrb.mxu3 %v7713_v62  ;;  %v7744_v6 = vld [vmem:[%s11725_s4 + $0xf0] sm:$0xff]  ;;  %v7773_v62 = vld [vmem:[%s11725_s4 + $0x1a8] sm:$0xff] }
 0xa0e   : > { %v3339_v48 = vsel %vm1562_vm8, %v3336_v50, %v3338_v18  ;;  %3457 = vmatpush.msrb.mxu3 %v7712_v0  ;;  %v7765_v50 = vld [vmem:[%s11725_s4 + $0x178] sm:$0xff]  ;;  %v7723_v18 = vld [vmem:[%s11725_s4 + $0x68] sm:$0xff] }
 0xa0f   : > { %7708 = vmatmul.msk.f32.gmra.mxu3 %vm1107_vm3, %v3339_v48 }
 0xa13   : > { %v3224_v1 = vpop.f32.mrf.mxu1 }
 0xa14   : > { %v3372_v27 = vrot.slane %v3224_v1, 4  ;;  %v7764_v1 = vld [vmem:[%s11725_s4 + $0x170] sm:$0xff] }
 0xa16   : > { %v3373_v49 = vsel %vm714_vm1, %v3371_v22, %v3372_v27 }
 0xa17   : > { %7709 = vmatmul.msk.f32.vlgmr.msrb.gmra.mxu0 %vm1107_vm3, %v3373_v49  ;;  %v7722_v49 = vld [vmem:[%s11725_s4 + $0x60] sm:$0xff] }
 0xa18   : > { %3538 = vmatpush.msrb.mxu0 %v7730_v21  ;;  %v7758_v21 = vld [vmem:[%s11725_s4 + $0x148] sm:$0xff] }
 0xa1a   : > { %3539 = vmatpush.msrb.mxu0 %v7729_v36  ;;  %v7757_v36 = vld [vmem:[%s11725_s4 + $0x140] sm:$0xff] }
 0xa1b   : > { %v3227_v12 = vpop.f32.mrf.mxu1 }
 0xa1c   : > { %v3374_v13 = vrot.slane %v3227_v12, 4  ;;  %3540 = vmatpush.msrb.mxu0 %v7728_v23  ;;  %v7763_v12 = vld [vmem:[%s11725_s4 + $0x168] sm:$0xff]  ;;  %v7775_v23 = vld [vmem:[%s11725_s4 + $0x1b8] sm:$0xff] }
 0xa1e   : > { %v3375_v51 = vsel %vm714_vm1, %v3372_v27, %v3374_v13  ;;  %3541 = vmatpush.msrb.mxu0 %v7727_v31  ;;  %v7743_v27 = vld [vmem:[%s11725_s4 + $0xe8] sm:$0xff]  ;;  %v7754_v31 = vld [vmem:[%s11725_s4 + $0x130] sm:$0xff] }
 0xa1f   : > { %7710 = vmatmul.msk.f32.gmra.mxu0 %vm1107_vm3, %v3375_v51  ;;  %v7742_v51 = vld [vmem:[%s11725_s4 + $0xe0] sm:$0xff] }
 0xa51   : > { %v3253_v20 = vpop.f32.mrf.mxu0 }
 0xa52   : > { %v3259_v5 = vadd.f32 %v8221_v33, %v3253_v20 }
 0xa59   : > { %v3256_v58 = vpop.f32.mrf.mxu0 }
 0xa5a   : > { %v3260_v16 = vadd.f32 %v8221_v33, %v3256_v58  ;;  %v7770_v33 = vld [vmem:[%s11725_s4 + $0x198] sm:$0xff] }
 0xa6a   : > { %v3289_v61 = vpop.f32.mrf.mxu3 }
 0xa6b   : > { %v3295_v7 = vadd.f32 %v3289_v61, %v3259_v5  ;;  %v7774_v61 = vld [vmem:[%s11725_s4 + $0x1b0] sm:$0xff]  ;;  %v7796_v5 = vld [vmem:[%s8386_s26 + $0x158] sm:$0xff] }
 0xa72   : > { %v3292_v30 = vpop.f32.mrf.mxu3 }
 0xa73   : > { %v3296_v40 = vadd.f32 %v3292_v30, %v3260_v16  ;;  %v7767_v16 = vld [vmem:[%s11725_s4 + $0x180] sm:$0xff] }
 0xa74   : > { %v3325_v4 = vpop.f32.mrf.mxu0 }
 0xa75   : > { %v3331_v2 = vadd.f32 %v3325_v4, %v3295_v7  ;;  %v7795_v7 = vld [vmem:[%s8386_s26 + $0x150] sm:$0xff] }
 0xa7c   : > { %v3328_v24 = vpop.f32.mrf.mxu0 }
 0xa7d   : > { %v3332_v46 = vadd.f32 %v3328_v24, %v3296_v40  ;;  %v7797_v24 = vld [vmem:[%s8386_s26 + $0x160] sm:$0xff] }
 0xa7e   : > { %v7793_v40 = vld [vmem:[%s8386_s26 + $0x140] sm:$0xff] }
 0xa8a   : > { %v3361_v59 = vpop.f32.mrf.mxu3 }
 0xa8b   : > { %v3367_v44 = vadd.f32 %v3361_v59, %v3331_v2  ;;  %v7769_v59 = vld [vmem:[%s11725_s4 + $0x190] sm:$0xff]  ;;  %v7768_v2 = vld [vmem:[%s11725_s4 + $0x188] sm:$0xff] }
 0xa92   : > { %v3364_v55 = vpop.f32.mrf.mxu3 }
 0xa93   : > { %v3368_v8 = vadd.f32 %v3364_v55, %v3332_v46  ;;  %v7791_v55 = vld [vmem:[%s8386_s26 + $0x130] sm:$0xff] }
 0xa94   : > { %v3397_v57 = vpop.f32.mrf.mxu0  ;;  %v8223_v46 = vld [vmem:[%s11726_s5 + $0x10] sm:$0xff] }
 0xa95   : > { %v3403_v25 = vadd.f32 %v3397_v57, %v3367_v44  ;;  %v7794_v57 = vld [vmem:[%s8386_s26 + $0x148] sm:$0xff] }
 0xa97   : > { %v9899_v60 = vmax.f32 %v3403_v25, 0.0 }
 0xa99   : > { %7711 = vmatmul.msk.f32.vlgmr.msra.gmra.mxu3 %vm1107_vm3, %v9899_v60  ;;  %v3467_v28 = vrot.slane %v9899_v60, 2  ;;  %v3551_v9 = vrot.slane %v9899_v60, 5  ;;  %v3439_v13 = vrot.slane %v9899_v60, 1  ;;  %v3523_v37 = vrot.slane %v9899_v60, 4 }
 0xa9a   : > { %3510 = vmatpush.msra.mxu3 %v7725_v52  ;;  %v3495_v29 = vrot.slane %v9899_v60, 3  ;;  %v3607_v56 = vrot.slane %v9899_v60, 7  ;;  %v3579_v0 = vrot.slane %v9899_v60, 6  ;;  %v7792_v60 = vld [vmem:[%s8386_s26 + $0x138] sm:$0xff] }
 0xa9b   : > { %7721 = vmatmul.msk.f32.vlgmr.msra.gmra.mxu0 %vm1107_vm3, %v3467_v28  ;;  %7736 = vmatmul.msk.f32.vlgmr.msrb.gmra.mxu1 %vm1107_vm3, %v3551_v9  ;;  %v8222_v52 = vld [vmem:[%s11726_s5 + $0x18] sm:$0xff]  ;;  %v7790_v9 = vld [vmem:[%s8386_s26 + $0x128] sm:$0xff] }
 0xa9c   : > { %v3400_v48 = vpop.f32.mrf.mxu0  ;;  %3622 = vmatpush.msra.mxu0 %v7745_v10  ;;  %3511 = vmatpush.msra.mxu3 %v7724_v11  ;;  %v8224_v10 = vld [vmem:[%s11726_s5 + $0x8] sm:$0xff]  ;;  %v7789_v11 = vld [vmem:[%s8386_s26 + $0x120] sm:$0xff] }
 0xa9d   : > { %v3404_v22 = vadd.f32 %v3400_v48, %v3368_v8  ;;  %3734 = vmatpush.msrb.mxu1 %v7765_v50  ;;  %v8225_v50 = vld [vmem:[%s11726_s5] sm:$0xff]  ;;  %v7788_v8 = vld [vmem:[%s8386_s26 + $0x118] sm:$0xff] }
 0xa9e   : > { %3623 = vmatpush.msra.mxu0 %v7744_v6  ;;  %3512 = vmatpush.msra.mxu3 %v7723_v18  ;;  %v8226_v6 = vld [vmem:[%s11723_s2 + $0x20] sm:$0xff]  ;;  %v7787_v18 = vld [vmem:[%s8386_s26 + $0x110] sm:$0xff]  ;;  %v8227_v48 = vld [vmem:[%s11723_s2 + $0x18] sm:$0xff] }
 0xa9f   : > { %3735 = vmatpush.msrb.mxu1 %v7764_v1  ;;  %v9944_v20 = vmax.f32 %v3404_v22, 0.0  ;;  %v7786_v1 = vld [vmem:[%s8386_s26 + $0x108] sm:$0xff]  ;;  %v8228_v22 = vld [vmem:[%s11723_s2 + $0x10] sm:$0xff] }
 0xaa0   : > { %3624 = vmatpush.msra.mxu0 %v7743_v27  ;;  %3513 = vmatpush.msra.mxu3 %v7722_v49  ;;  %v7785_v27 = vld [vmem:[%s8386_s26 + $0x100] sm:$0xff]  ;;  %v8229_v49 = vld [vmem:[%s11723_s2 + $0x8] sm:$0xff] }
 0xaa1   : > { %7716 = vmatmul.msk.f32.vlgmr.msrb.gmra.mxu3 %vm1107_vm3, %v3439_v13  ;;  %3736 = vmatpush.msrb.mxu1 %v7763_v12  ;;  %v3719_v58 = vrot.slane %v9944_v20, 3  ;;  %v3691_v4 = vrot.slane %v9944_v20, 2  ;;  %v3803_v30 = vrot.slane %v9944_v20, 6  ;;  %v3663_v44 = vrot.slane %v9944_v20, 1  ;;  %v7784_v12 = vld [vmem:[%s8386_s26 + $0xf8] sm:$0xff]  ;;  %v7783_v13 = vld [vmem:[%s8386_s26 + $0xf0] sm:$0xff] }
 0xaa2   : > { %3625 = vmatpush.msra.mxu0 %v7742_v51  ;;  %3594 = vmatpush.msrb.mxu3 %v7740_v54  ;;  %v3775_v25 = vrot.slane %v9944_v20, 5  ;;  %v3747_v28 = vrot.slane %v9944_v20, 4  ;;  %v3868_v51 = vld [vmem:[%s11722_s1] sm:$0xff]  ;;  %v3869_v54 = vld [vmem:[%s11722_s1 + $0x8] sm:$0xff] }
 0xaa3   : > { %7731 = vmatmul.msk.f32.vlgmr.msrb.gmra.mxu0 %vm1107_vm3, %v3523_v37  ;;  %7751 = vmatmul.msk.f32.vlgmr.msra.gmra.mxu1 %vm1107_vm3, %v9944_v20  ;;  %v3870_v20 = vld [vmem:[%s11722_s1 + $0x10] sm:$0xff]  ;;  %v3875_v37 = vld [vmem:[%s11722_s1 + $0x38] sm:$0xff] }
 0xaa4   : > { %3706 = vmatpush.msrb.mxu0 %v7760_v38  ;;  %3737 = vmatpush.msrb.mxu1 %v7762_v39  ;;  %v3876_v38 = vld [vmem:[%s11722_s1 + $0x40] sm:$0xff]  ;;  %v3877_v39 = vld [vmem:[%s11722_s1 + $0x48] sm:$0xff] }
 0xaa5   : > { %3595 = vmatpush.msrb.mxu3 %v7739_v63 }
 0xaa6   : > { %3818 = vmatpush.msra.mxu1 %v7780_v42  ;;  %3707 = vmatpush.msrb.mxu0 %v7759_v14  ;;  %v3878_v14 = vld [vmem:[%s11722_s1 + $0x50] sm:$0xff] }
 0xaa7   : > { %3596 = vmatpush.msrb.mxu3 %v7738_v45 }
 0xaa8   : > { %3819 = vmatpush.msra.mxu1 %v7779_v47  ;;  %3708 = vmatpush.msrb.mxu0 %v7758_v21  ;;  %v8230_v47 = vld [vmem:[%s11724_s3 + $0x3] sm:$0x1] }
 0xaa9   : > { %7726 = vmatmul.msk.f32.vlgmr.msra.gmra.mxu3 %vm1107_vm3, %v3495_v29 }
 0xaaa   : > { %3820 = vmatpush.msra.mxu1 %v7778_v32  ;;  %3709 = vmatpush.msrb.mxu0 %v7757_v36  ;;  %v3879_v32 = vld [vmem:[%s11722_s1 + $0x58] sm:$0xff] }
 0xaab   : > { %3597 = vmatpush.msrb.mxu3 %v7737_v43  ;;  %7746 = vmatmul.msk.f32.vlgmr.msra.gmra.mxu0 %vm1107_vm3, %v3607_v56 }
 0xaac   : > { %7766 = vmatmul.msk.f32.vlgmr.msrb.gmra.mxu1 %vm1107_vm3, %v3719_v58  ;;  %3790 = vmatpush.msra.mxu0 %v7775_v23 }
 0xaad   : > { %3678 = vmatpush.msra.mxu3 %v7755_v34  ;;  %3821 = vmatpush.msra.mxu1 %v7777_v35  ;;  %v3880_v34 = vld [vmem:[%s11722_s1 + $0x60] sm:$0xff] }
 0xaae   : > { %3791 = vmatpush.msra.mxu0 %v7774_v61 }
 0xaaf   : > { %3679 = vmatpush.msra.mxu3 %v7754_v31 }
 0xab0   : > { %3792 = vmatpush.msra.mxu0 %v7773_v62 }
 0xab1   : > { %3680 = vmatpush.msra.mxu3 %v7753_v26 }
 0xab2   : > { %7741 = vmatmul.msk.f32.vlgmr.msrb.gmra.mxu3 %vm1107_vm3, %v3579_v0  ;;  %3793 = vmatpush.msra.mxu0 %v7772_v53  ;;  %v3881_v53 = vld [vmem:[%s11722_s1 + $0x68] sm:$0xff] }
 0xab3   : > { %3681 = vmatpush.msra.mxu3 %v7752_v41  ;;  %7761 = vmatmul.msk.f32.vlgmr.msrb.gmra.mxu0 %vm1107_vm3, %v3691_v4 }
 0xab4   : > { %7781 = vmatmul.msk.f32.vlgmr.msra.gmra.mxu1 %vm1107_vm3, %v3803_v30  ;;  %4021 = vmatpush.msrb.mxu0 %v7797_v24 }
 0xab5   : > { %3762 = vmatpush.msrb.mxu3 %v7770_v33 }
 0xab6   : > { %4022 = vmatpush.msrb.mxu0 %v7796_v5 }
 0xab7   : > { %3763 = vmatpush.msrb.mxu3 %v7769_v59  ;;  %v3882_v59 = vld [vmem:[%s11722_s1 + $0x70] sm:$0xff] }
 0xab8   : > { %4023 = vmatpush.msrb.mxu0 %v7795_v7 }
 0xab9   : > { %3764 = vmatpush.msrb.mxu3 %v7768_v2 }
 0xaba   : > { %7756 = vmatmul.msk.f32.vlgmr.msra.gmra.mxu3 %vm1107_vm3, %v3663_v44  ;;  %4024 = vmatpush.msrb.mxu0 %v7794_v57 }
 0xabb   : > { %3765 = vmatpush.msrb.mxu3 %v7767_v16  ;;  %7776 = vmatmul.msk.f32.vlgmr.msra.gmra.mxu0 %vm1107_vm3, %v3775_v25  ;;  %v3883_v25 = vld [vmem:[%s11722_s1 + $0x78] sm:$0xff] }
 0xabc   : > { %4025 = vmatpush.msrb.mxu0 %v7793_v40 }
 0xabd   : > { %3843 = vmatpush.msra.mxu3 %v8222_v52 }
 0xabe   : > { %4026 = vmatpush.msrb.mxu0 %v7792_v60 }
 0xabf   : > { %3844 = vmatpush.msra.mxu3 %v8223_v46 }
 0xac0   : > { %4027 = vmatpush.msrb.mxu0 %v7791_v55 }
 0xac1   : > { %3845 = vmatpush.msra.mxu3 %v8224_v10  ;;  %v8232_v10 = vld [vmem:[%s11723_s2 + $0x60] sm:$0xff] }
 0xac2   : > { %7771 = vmatmul.msk.f32.vlgmr.msrb.gmra.mxu3 %vm1107_vm3, %v3747_v28  ;;  %4028 = vmatpush.msrb.mxu0 %v7790_v9  ;;  %v3884_v28 = vld [vmem:[%s11722_s1 + $0x80] sm:$0xff]  ;;  %v8231_v9 = vld [vmem:[%s11723_s2 + $0x68] sm:$0xff] }
 0xac3   : > { %3846 = vmatpush.msra.mxu3 %v8225_v50  ;;  %v8234_v50 = vld [vmem:[%s11723_s2 + $0x50] sm:$0xff] }
 0xac4   : > { %4029 = vmatpush.msrb.mxu0 %v7789_v11  ;;  %v8233_v11 = vld [vmem:[%s11723_s2 + $0x58] sm:$0xff] }
 0xac5   : > { %4668 = vmatpush.msrb.mxu3 %v8226_v6  ;;  %v3885_v6 = vld [vmem:[%s11722_s1 + $0x88] sm:$0xff] }
 0xac6   : > { %4030 = vmatpush.msrb.mxu0 %v7788_v8 }
 0xac7   : > { %4669 = vmatpush.msrb.mxu3 %v8227_v48  ;;  %v3886_v48 = vld [vmem:[%s11722_s1 + $0x90] sm:$0xff] }
 0xac8   : > { %4031 = vmatpush.msrb.mxu0 %v7787_v18 }
 0xac9   : > { %4670 = vmatpush.msrb.mxu3 %v8228_v22  ;;  %v3887_v22 = vld [vmem:[%s11722_s1 + $0x98] sm:$0xff] }
 0xaca   : > { %4032 = vmatpush.msrb.mxu0 %v7786_v1 }
 0xacb   : > { %4671 = vmatpush.msrb.mxu3 %v8229_v49  ;;  %v3888_v49 = vld [vmem:[%s11722_s1 + $0xa0] sm:$0xff] }
 0xacc   : > { %4033 = vmatpush.msrb.mxu0 %v7785_v27 }
 0xace   : > { %4034 = vmatpush.msrb.mxu0 %v7784_v12 }
 0xad0   : > { %4035 = vmatpush.msrb.mxu0 %v7783_v13  ;;  %v3889_v13 = vld [vmem:[%s11722_s1 + $0xa8] sm:$0xff] }
 0xad1   : > { %7798 = vmatmul.msk.f32.vlgmr.msrb.gmra.mxu0 %vm357_vm0, %v3868_v51 }
 0xad2   : > { %6584 = vmatpush.msra.mxu0 %v9692_v15  ;;  %v3871_v15 = vld [vmem:[%s11722_s1 + $0x18] sm:$0xff] }
 0xad4   : > { %6585 = vmatpush.msra.mxu0 %v9698_v17  ;;  %v3872_v17 = vld [vmem:[%s11722_s1 + $0x20] sm:$0xff] }
 0xad6   : > { %6586 = vmatpush.msra.mxu0 %v9704_v3  ;;  %v3873_v3 = vld [vmem:[%s11722_s1 + $0x28] sm:$0xff] }
 0xad8   : > { %6587 = vmatpush.msra.mxu0 %v9711_v19  ;;  %v3874_v19 = vld [vmem:[%s11722_s1 + $0x30] sm:$0xff] }
 0xad9   : > { %7799 = vmatmul.msk.f32.gmra.mxu0 %vm357_vm0, %v3869_v54  ;;  %v3890_v54 = vld [vmem:[%s11722_s1 + $0xb0] sm:$0xff] }
 0xae1   : > { %7800 = vmatmul.msk.f32.gmra.mxu0 %vm357_vm0, %v3870_v20 }
 0xae9   : > { %7801 = vmatmul.msk.f32.gmra.mxu0 %vm357_vm0, %v3871_v15  ;;  %v3891_v15 = vld [vmem:[%s11722_s1 + $0xb8] sm:$0xff] }
 0xaf1   : > { %7802 = vmatmul.msk.f32.gmra.mxu0 %vm357_vm0, %v3872_v17 }
 0xaf9   : > { %7803 = vmatmul.msk.f32.gmra.mxu0 %vm357_vm0, %v3873_v3  ;;  %v3892_v3 = vld [vmem:[%s11722_s1 + $0xc0] sm:$0xff] }
 0xb01   : > { %7804 = vmatmul.msk.f32.gmra.mxu0 %vm357_vm0, %v3874_v19 }
 0xb09   : > { %7805 = vmatmul.msk.f32.gmra.mxu0 %vm357_vm0, %v3875_v37  ;;  %v3893_v37 = vld [vmem:[%s11722_s1 + $0xc8] sm:$0xff] }
 0xb11   : > { %7806 = vmatmul.msk.f32.gmra.mxu0 %vm357_vm0, %v3876_v38 }
 0xb18   : > { %v3487_v42 = vpop.f32.mrf.mxu0  ;;  %v3571_v43 = vpop.f32.mrf.mxu1 }
 0xb19   : > { %7807 = vmatmul.msk.f32.gmra.mxu0 %vm357_vm0, %v3877_v39  ;;  %v3894_v39 = vld [vmem:[%s11722_s1 + $0xd0] sm:$0xff] }
 0xb1c   : > { %v3431_v63 = vpop.f32.mrf.mxu3 }
 0xb1d   : > { %v3434_v21 = vadd.f32 %v8230_v47, %v3431_v63 }
 0xb20   : > { %v3543_v36 = vpop.f32.mrf.mxu0  ;;  %v3655_v62 = vpop.f32.mrf.mxu1 }
 0xb21   : > { %7808 = vmatmul.msk.f32.gmra.mxu0 %vm357_vm0, %v3878_v14 }
 0xb24   : > { %v3459_v45 = vpop.f32.mrf.mxu3 }
 0xb25   : > { %v3462_v29 = vadd.f32 %v3459_v45, %v3434_v21  ;;  %v3896_v45 = vld [vmem:[%s11722_s1 + $0xe0] sm:$0xff]  ;;  %v3897_v21 = vld [vmem:[%s11722_s1 + $0xe8] sm:$0xff] }
 0xb27   : > { %v3490_v56 = vadd.f32 %v3487_v42, %v3462_v29  ;;  %v3895_v42 = vld [vmem:[%s11722_s1 + $0xd8] sm:$0xff]  ;;  %v3898_v29 = vld [vmem:[%s11722_s1 + $0xf0] sm:$0xff] }
 0xb28   : > { %v3627_v61 = vpop.f32.mrf.mxu0 }
 0xb29   : > { %7809 = vmatmul.msk.f32.gmra.mxu0 %vm357_vm0, %v3879_v32  ;;  %v3739_v5 = vpop.f32.mrf.mxu1 }
 0xb2c   : > { %v3515_v58 = vpop.f32.mrf.mxu3 }
 0xb2d   : > { %v3518_v23 = vadd.f32 %v3515_v58, %v3490_v56  ;;  %v3900_v58 = vld [vmem:[%s11722_s1 + $0x100] sm:$0xff] }
 0xb2f   : > { %v3546_v35 = vadd.f32 %v3543_v36, %v3518_v23 }
 0xb30   : > { %v3711_v30 = vpop.f32.mrf.mxu0 }
 0xb31   : > { %7810 = vmatmul.msk.f32.gmra.mxu0 %vm357_vm0, %v3880_v34  ;;  %v3574_v31 = vadd.f32 %v3571_v43, %v3546_v35  ;;  %v3823_v60 = vpop.f32.mrf.mxu1  ;;  %v3899_v43 = vld [vmem:[%s11722_s1 + $0xf8] sm:$0xff]  ;;  %v8235_v34 = vld [vmem:[%s11724_s3 + $0x4] sm:$0x1] }
 0xb35   : > { %v3599_v26 = vpop.f32.mrf.mxu3 }
 0xb36   : > { %v3602_v0 = vadd.f32 %v3599_v26, %v3574_v31  ;;  %v3901_v31 = vld [vmem:[%s11722_s1 + $0x108] sm:$0xff] }
 0xb38   : > { %v3630_v41 = vadd.f32 %v3627_v61, %v3602_v0  ;;  %v3795_v16 = vpop.f32.mrf.mxu0  ;;  %v3902_v0 = vld [vmem:[%s11722_s1 + $0x110] sm:$0xff] }
 0xb39   : > { %7811 = vmatmul.msk.f32.gmra.mxu0 %vm357_vm0, %v3881_v53 }
 0xb3a   : > { %v3658_v4 = vadd.f32 %v3655_v62, %v3630_v41 }
 0xb3d   : > { %v3683_v24 = vpop.f32.mrf.mxu3 }
 0xb3e   : > { %v3686_v33 = vadd.f32 %v3683_v24, %v3658_v4  ;;  %v3903_v4 = vld [vmem:[%s11722_s1 + $0x118] sm:$0xff] }
 0xb40   : > { %v3714_v7 = vadd.f32 %v3711_v30, %v3686_v33 }
 0xb41   : > { %7812 = vmatmul.msk.f32.gmra.mxu0 %vm357_vm0, %v3882_v59 }
 0xb42   : > { %v3742_v2 = vadd.f32 %v3739_v5, %v3714_v7  ;;  %v3904_v5 = vld [vmem:[%s11722_s1 + $0x120] sm:$0xff] }
 0xb45   : > { %v3767_v44 = vpop.f32.mrf.mxu3 }
 0xb46   : > { %v3770_v57 = vadd.f32 %v3767_v44, %v3742_v2  ;;  %v3905_v44 = vld [vmem:[%s11722_s1 + $0x128] sm:$0xf] }
 0xb48   : > { %v3798_v40 = vadd.f32 %v3795_v16, %v3770_v57  ;;  %v10267_v57 = vld [vmem:[%s11723_s2 + $0x48] ss:$0 sm:$0xff] }
 0xb49   : > { %7813 = vmatmul.msk.f32.gmra.mxu0 %vm357_vm0, %v3883_v25  ;;  %v10273_v25 = vld [vmem:[%s11723_s2] ss:$0 sm:$0xff] }
 0xb4a   : > { %v3826_v52 = vadd.f32 %v3823_v60, %v3798_v40 }
 0xb4c   : > { %v3827_v55 = vmax.f32 %v3826_v52, 0.0 }
 0xb4e   : > { %7782 = vmatmul.msk.f32.vlgmr.msra.gmra.mxu3 %vm1107_vm3, %v3827_v55  ;;  %v4037_v46 = vpop.f32.mrf.mxu0 }
 0xb4f   : > { %4722 = vmatpush.msra.mxu3 %v8231_v9  ;;  %4153 = vperm.xlu2 %8173, %v4037_v46   ;;  %v10286_v9 = vld [vmem:[%s11724_s3] ss:$0 sm:$0xff] }
 0xb51   : > { %4723 = vmatpush.msra.mxu3 %v8232_v10  ;;  %7814 = vmatmul.msk.f32.gmra.mxu0 %vm357_vm0, %v3884_v28 }
 0xb53   : > { %4724 = vmatpush.msra.mxu3 %v8233_v11 }
 0xb55   : > { %4725 = vmatpush.msra.mxu3 %v8234_v50 }
 0xb56   : > { %v4040_v8 = vpop.f32.mrf.mxu0 }
 0xb57   : > { %4158 = vperm.xlu1 %8171, %v4040_v8  }
 0xb59   : > { %7815 = vmatmul.msk.f32.gmra.mxu0 %vm357_vm0, %v3885_v6 }
 0xb5e   : > { %v4043_v18 = vpop.f32.mrf.mxu0 }
 0xb5f   : > { %4163 = vperm.xlu2 %8173, %v4043_v18  }
 0xb61   : > { %7816 = vmatmul.msk.f32.gmra.mxu0 %vm357_vm0, %v3886_v48 }
 0xb66   : > { %v4046_v1 = vpop.f32.mrf.mxu0 }
 0xb67   : > { %4168 = vperm.xlu0 %8172, %v4046_v1  }
 0xb69   : > { %7817 = vmatmul.msk.f32.gmra.mxu0 %vm357_vm0, %v3887_v22 }
 0xb6e   : > { %v4049_v27 = vpop.f32.mrf.mxu0 }
 0xb6f   : > { %4173 = vperm.xlu2 %8173, %v4049_v27  }
 0xb71   : > { %7818 = vmatmul.msk.f32.gmra.mxu0 %vm357_vm0, %v3888_v49 }
 0xb76   : > { %v4052_v12 = vpop.f32.mrf.mxu0 }
 0xb77   : > { %4178 = vperm.xlu0 %8172, %v4052_v12  }
 0xb79   : > { %7819 = vmatmul.msk.f32.gmra.mxu0 %vm357_vm0, %v3889_v13 }
 0xb7e   : > { %v4055_v51 = vpop.f32.mrf.mxu0 }
 0xb7f   : > { %4183 = vperm.xlu1 %8171, %v4055_v51  }
 0xb81   : > { %7820 = vmatmul.msk.f32.gmra.mxu0 %vm357_vm0, %v3890_v54 }
 0xb86   : > { %v4058_v20 = vpop.f32.mrf.mxu0 }
 0xb87   : > { %4188 = vperm.xlu1 %8171, %v4058_v20  }
 0xb89   : > { %7821 = vmatmul.msk.f32.gmra.mxu0 %vm357_vm0, %v3891_v15 }
 0xb8e   : > { %v4061_v17 = vpop.f32.mrf.mxu0 }
 0xb8f   : > { %4209 = vperm.xlu2 %8173, %v4061_v17  }
 0xb91   : > { %7822 = vmatmul.msk.f32.gmra.mxu0 %vm357_vm0, %v3892_v3 }
 0xb96   : > { %v4064_v19 = vpop.f32.mrf.mxu0 }
 0xb97   : > { %4214 = vperm.xlu0 %8172, %v4064_v19  }
 0xb99   : > { %7823 = vmatmul.msk.f32.gmra.mxu0 %vm357_vm0, %v3893_v37 }
 0xb9e   : > { %v4067_v38 = vpop.f32.mrf.mxu0 }
 0xb9f   : > { %4219 = vperm.xlu1 %8171, %v4067_v38  }
 0xba1   : > { %7824 = vmatmul.msk.f32.gmra.mxu0 %vm357_vm0, %v3894_v39 }
 0xba6   : > { %v4070_v63 = vpop.f32.mrf.mxu0 }
 0xba7   : > { %4224 = vperm.xlu0 %8172, %v4070_v63  }
 0xba9   : > { %7825 = vmatmul.msk.f32.gmra.mxu0 %vm357_vm0, %v3895_v42  ;;  %v4154_v62 = vpop.permute.xlu2 %4153 }
 0xbaa   : > { %v4191_v40 = vmul.f32 %v10273_v25, %v4154_v62 }
 0xbac   : > { %v4199_v10 = vadd.f32 %v10286_v9, %v4191_v40 }
 0xbae   : > { %v4073_v14 = vpop.f32.mrf.mxu0 }
 0xbaf   : > { %4229 = vperm.xlu2 %8173, %v4073_v14  }
 0xbb1   : > { %7826 = vmatmul.msk.f32.gmra.mxu0 %vm357_vm0, %v3896_v45 }
 0xbb6   : > { %v4076_v47 = vpop.f32.mrf.mxu0 }
 0xbb7   : > { %4234 = vperm.xlu0 %8172, %v4076_v47  }
 0xbb9   : > { %7827 = vmatmul.msk.f32.gmra.mxu0 %vm357_vm0, %v3897_v21  ;;  %v10247_v53 = vpop.permute.xlu2 %4163 }
 0xbbe   : > { %v4079_v32 = vpop.f32.mrf.mxu0 }
 0xbbf   : > { %4239 = vperm.xlu2 %8173, %v4079_v32  }
 0xbc1   : > { %7828 = vmatmul.msk.f32.gmra.mxu0 %vm357_vm0, %v3898_v29 }
 0xbc6   : > { %v10224_v36 = vpop.f32.mrf.mxu0 }
 0xbc9   : > { %7829 = vmatmul.msk.f32.gmra.mxu0 %vm357_vm0, %v3899_v43  ;;  %v4159_v30 = vpop.permute.xlu1 %4158  ;;  %v10253_v24 = vpop.permute.xlu2 %4173 }
 0xbca   : > { %v4192_v48 = vmul.f32 %v10273_v25, %v4159_v30 }
 0xbcc   : > { %v4200_v49 = vadd.f32 %v10286_v9, %v4192_v48 }
 0xbce   : > { %v4085_v56 = vpop.f32.mrf.mxu0 }
 0xbcf   : > { %4296 = vperm.xlu0 %8172, %v4085_v56  }
 0xbd1   : > { %v3848_v23 = vpop.f32.mrf.mxu3  ;;  %7830 = vmatmul.msk.f32.gmra.mxu0 %vm357_vm0, %v3900_v58 }
 0xbd2   : > { %v3849_v35 = vadd.f32 %v8235_v34, %v3848_v23 }
 0xbd4   : > { %3851 = vst.msk [vmem:[%s9399_s29 + $0x1] sm:$0x1] %vm2093_vm9, %v3849_v35 }
 0xbd6   : > { %v4088_v61 = vpop.f32.mrf.mxu0 }
 0xbd7   : > { %4301 = vperm.xlu0 %8172, %v4088_v61  }
 0xbd9   : > { %7831 = vmatmul.msk.f32.gmra.mxu0 %vm357_vm0, %v3901_v31  ;;  %v10276_v60 = vpop.permute.xlu0 %4168 }
 0xbde   : > { %v4091_v26 = vpop.f32.mrf.mxu0 }
 0xbdf   : > { %4306 = vperm.xlu2 %8173, %v4091_v26  }
 0xbe1   : > { %7832 = vmatmul.msk.f32.gmra.mxu0 %vm357_vm0, %v3902_v0 }
 0xbe6   : > { %v4094_v41 = vpop.f32.mrf.mxu0 }
 0xbe7   : > { %4311 = vperm.xlu0 %8172, %v4094_v41  }
 0xbe9   : > { %7833 = vmatmul.msk.f32.gmra.mxu0 %vm357_vm0, %v3903_v4  ;;  %v4210_v7 = vpop.permute.xlu2 %4209  ;;  %v10292_v6 = vpop.permute.xlu0 %4178 }
 0xbea   : > { %v4243_v16 = vmul.f32 %v10267_v57, %v4210_v7 }
 0xbec   : > { %v4259_v46 = vrot.slane %v4243_v16, 4 }
 0xbee   : > { %v4097_v33 = vpop.f32.mrf.mxu0 }
 0xbef   : > { %4316 = vperm.xlu1 %8171, %v4097_v33   ;;  %v10324_v33 = vld [vmem:[%s11723_s2 + $0xd8] ss:$0 sm:$0xff] }
 0xbf1   : > { %v10258_v59 = vpop.permute.xlu1 %4183  ;;  %7834 = vmatmul.msk.f32.gmra.mxu0 %vm357_vm0, %v3904_v5 }
 0xbf6   : > { %v4100_v2 = vpop.f32.mrf.mxu0 }
 0xbf7   : > { %4321 = vperm.xlu0 %8172, %v4100_v2  }
 0xbf9   : > { %v10278_v52 = vpop.permute.xlu1 %4188  ;;  %7835 = vmatmul.msk.f32.gmra.mxu0 %vm357_vm0, %v3905_v44  ;;  %v10331_v44 = vld [vmem:[%s11723_s2 + $0x90] ss:$0 sm:$0xff] }
 0xbfa   : > { %v4242_v55 = vmul.f32 %v10267_v57, %v10278_v52  ;;  %v4198_v41 = vmul.f32 %v10273_v25, %v10278_v52 }
 0xbfc   : > { %v4258_v28 = vrot.slane %v4242_v55, 4  ;;  %v4206_v2 = vadd.f32 %v10286_v9, %v4198_v41 }
 0xbfe   : > { %v4103_v11 = vpop.f32.mrf.mxu0  ;;  %v4260_v50 = vsel %vm714_vm1, %v4258_v28, %v4259_v46 }
 0xbff   : > { %4326 = vperm.xlu1 %8171, %v4103_v11   ;;  %v10290_v8 = vadd.f32 %v4260_v50, %v4199_v10  ;;  %v10338_v11 = vld [vmem:[%s11723_s2 + $0x120] ss:$0 sm:$0xff] }
 0xc06   : > { %v4106_v18 = vpop.f32.mrf.mxu0 }
 0xc07   : > { %4347 = vperm.xlu2 %8173, %v4106_v18  }
 0xc09   : > { %v4215_v1 = vpop.permute.xlu0 %4214  ;;  %v4230_v47 = vpop.permute.xlu2 %4229 }
 0xc0a   : > { %v10296_v22 = vmul.f32 %v10267_v57, %v4215_v1 }
 0xc0c   : > { %v4261_v27 = vrot.slane %v10296_v22, 4 }
 0xc0e   : > { %v4109_v12 = vpop.f32.mrf.mxu0  ;;  %v4262_v13 = vsel %vm714_vm1, %v4259_v46, %v4261_v27 }
 0xc0f   : > { %4352 = vperm.xlu1 %8171, %v4109_v12   ;;  %v10303_v51 = vadd.f32 %v4262_v13, %v4200_v49  ;;  %v4247_v12 = vmul.f32 %v10267_v57, %v4230_v47  ;;  %v4195_v13 = vmul.f32 %v10273_v25, %v10253_v24 }
 0xc11   : > { %v4220_v29 = vpop.permute.xlu1 %4219 }
 0xc16   : > { %v4112_v54 = vpop.f32.mrf.mxu0 }
 0xc17   : > { %4357 = vperm.xlu0 %8172, %v4112_v54   ;;  %v4196_v54 = vmul.f32 %v10273_v25, %v10292_v6  ;;  %v4193_v6 = vmul.f32 %v10273_v25, %v10247_v53 }
 0xc19   : > { %v4225_v21 = vpop.permute.xlu0 %4224  ;;  %v4240_v32 = vpop.permute.xlu2 %4239 }
 0xc1a   : > { %v4249_v26 = vmul.f32 %v10267_v57, %v4240_v32  ;;  %v4246_v1 = vmul.f32 %v10267_v57, %v4225_v21 }
 0xc1c   : > { %v4271_v30 = vrot.slane %v4249_v26, 4 }
 0xc1e   : > { %v4115_v20 = vpop.f32.mrf.mxu0  ;;  %v4288_v40 = vadd.f32 %v4271_v30, %v4206_v2 }
 0xc1f   : > { %4362 = vperm.xlu1 %8171, %v4115_v20  }
 0xc26   : > { %v4118_v15 = vpop.f32.mrf.mxu0 }
 0xc27   : > { %4367 = vperm.xlu2 %8173, %v4118_v15   ;;  %v4197_v15 = vmul.f32 %v10273_v25, %v10258_v59  ;;  %v4204_v59 = vadd.f32 %v10286_v9, %v4196_v54 }
 0xc29   : > { %v4235_v43 = vpop.permute.xlu0 %4234 }
 0xc2a   : > { %v4248_v18 = vmul.f32 %v10267_v57, %v4235_v43 }
 0xc2e   : > { %v4121_v17 = vpop.f32.mrf.mxu0 }
 0xc2f   : > { %4372 = vperm.xlu1 %8171, %v4121_v17   ;;  %v4269_v17 = vrot.slane %v4248_v18, 4 }
 0xc36   : > { %v4124_v3 = vpop.f32.mrf.mxu0 }
 0xc37   : > { %4377 = vperm.xlu2 %8173, %v4124_v3  }
 0xc39   : > { %v10306_v56 = vpop.permute.xlu2 %4306 }
 0xc3a   : > { %v4332_v22 = vmul.f32 %v10331_v44, %v10306_v56 }
 0xc3e   : > { %v4127_v19 = vpop.f32.mrf.mxu0 }
 0xc41   : > { %v10308_v58 = vpop.permute.xlu0 %4296 }
 0xc46   : > { %v4130_v37 = vpop.f32.mrf.mxu0 }
 0xc49   : > { %v10314_v61 = vpop.permute.xlu0 %4301 }
 0xc4e   : > { %v4133_v38 = vpop.f32.mrf.mxu0 }
 0xc56   : > { %v4136_v39 = vpop.f32.mrf.mxu0 }
 0xc5e   : > { %v4139_v63 = vpop.f32.mrf.mxu0 }
 0xc5f   : > { %4449 = vperm.xlu1 %8171, %v4139_v63  }
 0xc61   : > { %v4317_v23 = vpop.permute.xlu1 %4316  ;;  %v10310_v34 = vpop.permute.xlu2 %4347 }
 0xc62   : > { %v4334_v43 = vmul.f32 %v10331_v44, %v4317_v23 }
 0xc66   : > { %v4142_v42 = vpop.f32.mrf.mxu0 }
 0xc67   : > { %4454 = vperm.xlu0 %8172, %v4142_v42   ;;  %v4203_v42 = vadd.f32 %v10286_v9, %v4195_v13 }
 0xc6e   : > { %v4145_v14 = vpop.f32.mrf.mxu0 }
 0xc6f   : > { %4439 = vperm.xlu0 %8172, %v4133_v38   ;;  %4459 = vperm.xlu1 %8171, %v4145_v14   ;;  %v4267_v38 = vrot.slane %v4247_v12, 4  ;;  %v4205_v14 = vadd.f32 %v10286_v9, %v4197_v15 }
 0xc71   : > { %v10312_v35 = vpop.permute.xlu1 %4326 }
 0xc72   : > { %v4336_v16 = vmul.f32 %v10331_v44, %v10312_v35 }
 0xc74   : > { %v4344_v55 = vadd.f32 %v4336_v16, %v4288_v40 }
 0xc76   : > { %v4148_v45 = vpop.f32.mrf.mxu0 }
 0xc77   : > { %4444 = vperm.xlu1 %8171, %v4136_v39   ;;  %4464 = vperm.xlu2 %8173, %v4148_v45   ;;  %v4272_v45 = vsel %vm714_vm1, %v4269_v17, %v4271_v30  ;;  %v4194_v30 = vmul.f32 %v10273_v25, %v10276_v60 }
 0xc78   : > { %v4287_v2 = vadd.f32 %v4272_v45, %v4205_v14 }
 0xc7f   : > { %4434 = vperm.xlu1 %8171, %v4130_v37   ;;  %4291 = vperm.xlu2 %8173, %v10224_v36   ;;  %v4312_v36 = vpop.permute.xlu0 %4311  ;;  %v4265_v37 = vrot.slane %v4246_v1, 4 }
 0xc80   : > { %v4333_v53 = vmul.f32 %v10331_v44, %v4312_v36 }
 0xc81   : > { %v4368_v31 = vpop.permute.xlu2 %4367  ;;  %v10316_v62 = vpop.permute.xlu1 %4352 }
 0xc82   : > { %v4385_v39 = vmul.f32 %v10324_v33, %v4368_v31  ;;  %v4382_v36 = vmul.f32 %v10324_v33, %v10316_v62 }
 0xc84   : > { %v4405_v26 = vrot.slane %v4385_v39, 4  ;;  %v4399_v13 = vrot.slane %v4382_v36, 4  ;;  %v8244_v36 = vld [vmem:[%s11723_s2 + $0xc0] sm:$0xff] }
 0xc87   : > { %4429 = vperm.xlu2 %8173, %v4127_v19   ;;  %v4322_v7 = vpop.permute.xlu0 %4321  ;;  %v4245_v19 = vmul.f32 %v10267_v57, %v4220_v29  ;;  %v4270_v57 = vsel %vm714_vm1, %v4267_v38, %v4269_v17  ;;  %v4268_v29 = vsel %vm714_vm1, %v4265_v37, %v4267_v38 }
 0xc88   : > { %v4335_v31 = vmul.f32 %v10331_v44, %v4322_v7  ;;  %v4285_v16 = vadd.f32 %v4268_v29, %v4203_v42  ;;  %v4380_v42 = vmul.f32 %v10324_v33, %v10312_v35 }
 0xc89   : > { %v4263_v32 = vrot.slane %v4245_v19, 4 }
 0xc8a   : > { %v4343_v7 = vadd.f32 %v4335_v31, %v4287_v2 }
 0xc8b   : > { %v4266_v62 = vsel %vm714_vm1, %v4263_v32, %v4265_v37 }
 0xc8f   : > { %v4358_v48 = vpop.permute.xlu0 %4357 }
 0xc91   : > { %v4378_v0 = vpop.permute.xlu2 %4377  ;;  %v4363_v4 = vpop.permute.xlu1 %4362 }
 0xc92   : > { %v4387_v5 = vmul.f32 %v10324_v33, %v4378_v0  ;;  %v4384_v24 = vmul.f32 %v10324_v33, %v4363_v4  ;;  %v4383_v0 = vmul.f32 %v10324_v33, %v4358_v48  ;;  %v4201_v4 = vadd.f32 %v10286_v9, %v4193_v6 }
 0xc94   : > { %v4409_v52 = vrot.slane %v4387_v5, 4  ;;  %v4403_v41 = vrot.slane %v4384_v24, 4  ;;  %v4286_v5 = vadd.f32 %v4270_v57, %v4204_v59 }
 0xc96   : > { %v4426_v10 = vadd.f32 %v4409_v52, %v4344_v55  ;;  %v4342_v55 = vadd.f32 %v4334_v43, %v4286_v5  ;;  %v4406_v25 = vsel %vm714_vm1, %v4403_v41, %v4405_v26 }
 0xca1   : > { %v4373_v46 = vpop.permute.xlu1 %4372 }
 0xca2   : > { %v4386_v3 = vmul.f32 %v10324_v33, %v4373_v46 }
 0xca4   : > { %v4407_v47 = vrot.slane %v4386_v3, 4 }
 0xca6   : > { %v4408_v40 = vsel %vm714_vm1, %v4405_v26, %v4407_v47  ;;  %v4410_v23 = vsel %vm714_vm1, %v4407_v47, %v4409_v52 }
 0xca7   : > { %v4424_v48 = vadd.f32 %v4408_v40, %v4342_v55  ;;  %v4425_v52 = vadd.f32 %v4410_v23, %v4343_v7  ;;  %v8242_v55 = vld [vmem:[%s11723_s2 + $0xd0] sm:$0xff]  ;;  %v4492_v7 = vld [vmem:[%s11722_s1 + $0x138] sm:$0xff] }
 0xcd1   : > { %v4465_v28 = vpop.permute.xlu2 %4464  ;;  %v4450_v63 = vpop.permute.xlu1 %4449 }
 0xcd2   : > { %v4474_v50 = vmul.f32 %v10338_v11, %v4465_v28  ;;  %v4264_v28 = vsel %vm714_vm1, %v4261_v27, %v4263_v32  ;;  %v4471_v18 = vmul.f32 %v10338_v11, %v4450_v63  ;;  %v4331_v27 = vmul.f32 %v10331_v44, %v10314_v61 }
 0xcd3   : > { %v4283_v17 = vadd.f32 %v4264_v28, %v4201_v4  ;;  %v4381_v61 = vmul.f32 %v10324_v33, %v10310_v34  ;;  %v4330_v32 = vmul.f32 %v10331_v44, %v10308_v58  ;;  %v4396_v34 = vrot.slane %v4380_v42, 4  ;;  %v8246_v28 = vld [vmem:[%s11723_s2 + $0x160] sm:$0xff] }
 0xcd4   : > { %v4482_v49 = vadd.f32 %v4474_v50, %v4426_v10  ;;  %v4341_v10 = vadd.f32 %v4333_v53, %v4285_v16  ;;  %v4401_v50 = vrot.slane %v4383_v0, 4 }
 0xcd5   : > { %v4339_v24 = vadd.f32 %v4331_v27, %v4283_v17  ;;  %v4397_v31 = vrot.slane %v4381_v61, 4  ;;  %v4338_v0 = vadd.f32 %v4330_v32, %v10303_v51  ;;  %v4491_v51 = vld [vmem:[%s11722_s1 + $0x130] sm:$0xff]  ;;  %v4501_v27 = vld [vmem:[%s11722_s1 + $0x180] sm:$0xff] }
 0xcd6   : > { %v4490_v20 = vmax.f32 %v4482_v49, 0.0  ;;  %v4202_v49 = vadd.f32 %v10286_v9, %v4194_v30  ;;  %v4423_v54 = vadd.f32 %v4406_v25, %v4341_v10  ;;  %v4402_v39 = vsel %vm714_vm1, %v4399_v13, %v4401_v50  ;;  %v8247_v10 = vld [vmem:[%s11723_s2 + $0x158] sm:$0xff]  ;;  %v8248_v25 = vld [vmem:[%s11723_s2 + $0x150] sm:$0xff] }
 0xcd7   : > { %v4404_v37 = vsel %vm714_vm1, %v4401_v50, %v4403_v41  ;;  %v4421_v59 = vadd.f32 %v4402_v39, %v4339_v24  ;;  %v4400_v26 = vsel %vm714_vm1, %v4397_v31, %v4399_v13  ;;  %v4398_v5 = vsel %vm714_vm1, %v4396_v34, %v4397_v31  ;;  %v4493_v50 = vld [vmem:[%s11722_s1 + $0x140] sm:$0xff]  ;;  %v4503_v13 = vld [vmem:[%s11722_s1 + $0x190] sm:$0xff]  ;;  %v4508_v24 = vld [vmem:[%s11722_s1 + $0x1b8] sm:$0xff] }
 0xcd8   : > { %7836 = vmatpush.msk.msrb.mxu1 %vm714_vm1, %v4490_v20  ;;  %v4284_v19 = vadd.f32 %v4266_v62, %v4202_v49  ;;  %v4479_v38 = vadd.f32 %v4471_v18, %v4423_v54  ;;  %v4420_v2 = vadd.f32 %v4400_v26, %v4338_v0  ;;  %v4494_v18 = vld [vmem:[%s11722_s1 + $0x148] sm:$0xff]  ;;  %v4499_v62 = vld [vmem:[%s11722_s1 + $0x170] sm:$0xff]  ;;  %v4504_v54 = vld [vmem:[%s11722_s1 + $0x198] sm:$0xff] }
 0xcd9   : > { %v4455_v21 = vpop.permute.xlu0 %4454  ;;  %v4292_v12 = vpop.permute.xlu2 %4291  ;;  %v4498_v49 = vld [vmem:[%s11722_s1 + $0x168] sm:$0xff]  ;;  %v8252_v39 = vld [vmem:[%s11723_s2 + $0xa0] sm:$0xff]  ;;  %v8256_v32 = vld [vmem:[%s11723_s2 + $0x130] sm:$0xff] }
 0xcda   : > { %v4472_v46 = vmul.f32 %v10338_v11, %v4455_v21  ;;  %v4340_v63 = vadd.f32 %v4332_v22, %v4284_v19  ;;  %v4487_v57 = vmax.f32 %v4479_v38, 0.0  ;;  %v4329_v45 = vmul.f32 %v10331_v44, %v4292_v12  ;;  %v4500_v22 = vld [vmem:[%s11722_s1 + $0x178] sm:$0xff]  ;;  %v4502_v12 = vld [vmem:[%s11722_s1 + $0x188] sm:$0xff]  ;;  %v8250_v19 = vld [vmem:[%s11723_s2 + $0xb0] sm:$0xff] }
 0xcdb   : > { %v8251_v38 = vld [vmem:[%s11723_s2 + $0xa8] sm:$0xff] }
 0xcdc   : > { %v4480_v20 = vadd.f32 %v4472_v46, %v4424_v48  ;;  %v4422_v47 = vadd.f32 %v4404_v37, %v4340_v63  ;;  %v4337_v35 = vadd.f32 %v4329_v45, %v10290_v8  ;;  %v8245_v46 = vld [vmem:[%s11723_s2 + $0xb8] sm:$0xff]  ;;  %v4495_v48 = vld [vmem:[%s11722_s1 + $0x150] sm:$0xff] }
 0xcdd   : > { %v8253_v37 = vld [vmem:[%s11723_s2 + $0x98] sm:$0xff] }
 0xcde   : > { %v4488_v56 = vmax.f32 %v4480_v20, 0.0  ;;  %v4419_v44 = vadd.f32 %v4398_v5, %v4337_v35  ;;  %v4505_v20 = vld [vmem:[%s11722_s1 + $0x1a0] sm:$0xff]  ;;  %v8255_v45 = vld [vmem:[%s11723_s2 + $0x138] sm:$0xff] }
 0xce1   : > { %v4460_v60 = vpop.permute.xlu1 %4459  ;;  %v4440_v3 = vpop.permute.xlu0 %4439 }
 0xce2   : > { %v4473_v1 = vmul.f32 %v10338_v11, %v4460_v60  ;;  %v4469_v6 = vmul.f32 %v10338_v11, %v4440_v3  ;;  %v4430_v53 = vpop.permute.xlu2 %4429  ;;  %v8249_v60 = vld [vmem:[%s11723_s2 + $0x148] sm:$0xff]  ;;  %v4507_v3 = vld [vmem:[%s11722_s1 + $0x1b0] sm:$0xff] }
 0xce3   : > { %v4467_v4 = vmul.f32 %v10338_v11, %v4430_v53 }
 0xce4   : > { %v4481_v15 = vadd.f32 %v4473_v1, %v4425_v52  ;;  %v4477_v29 = vadd.f32 %v4469_v6, %v4421_v59  ;;  %v4496_v52 = vld [vmem:[%s11722_s1 + $0x158] sm:$0xff]  ;;  %v4497_v1 = vld [vmem:[%s11722_s1 + $0x160] sm:$0xff] }
 0xce5   : > { %v4475_v16 = vadd.f32 %v4467_v4, %v4419_v44  ;;  %v8259_v44 = vld [vmem:[%s11723_s2 + $0x38] sm:$0xff] }
 0xce6   : > { %v4489_v9 = vmax.f32 %v4481_v15, 0.0  ;;  %v4485_v41 = vmax.f32 %v4477_v29, 0.0  ;;  %v4506_v15 = vld [vmem:[%s11722_s1 + $0x1a8] sm:$0xff] }
 0xce7   : > { %v4483_v23 = vmax.f32 %v4475_v16, 0.0  ;;  %v8260_v16 = vld [vmem:[%s11723_s2 + $0x30] sm:$0xff] }
 0xce8   : > { %4579 = vmatpush.msrb.mxu1 %v4489_v9 }
 0xce9   : > { %v4445_v14 = vpop.permute.xlu1 %4444 }
 0xcea   : > { %v4470_v21 = vmul.f32 %v10338_v11, %v4445_v14  ;;  %4580 = vmatpush.msrb.mxu1 %v4488_v56  ;;  %v4509_v56 = vld [vmem:[%s11722_s1 + $0x1c0] sm:$0x3f] }
 0xcec   : > { %v4478_v43 = vadd.f32 %v4470_v21, %v4422_v47  ;;  %4581 = vmatpush.msrb.mxu1 %v4487_v57  ;;  %v8254_v57 = vld [vmem:[%s11723_s2 + $0x140] sm:$0xff] }
 0xcee   : > { %v4486_v33 = vmax.f32 %v4478_v43, 0.0  ;;  %v8257_v43 = vld [vmem:[%s11723_s2 + $0x128] sm:$0xff] }
 0xcf0   : > { %4582 = vmatpush.msrb.mxu1 %v4486_v33 }
 0xcf1   : > { %v4435_v58 = vpop.permute.xlu1 %4434 }
 0xcf2   : > { %v4468_v30 = vmul.f32 %v10338_v11, %v4435_v58  ;;  %4583 = vmatpush.msrb.mxu1 %v4485_v41  ;;  %v8243_v11 = vld [vmem:[%s11723_s2 + $0xc8] sm:$0xff]  ;;  %v8258_v58 = vld [vmem:[%s11723_s2 + $0x40] sm:$0xff] }
 0xcf4   : > { %v4476_v40 = vadd.f32 %v4468_v30, %v4420_v2 }
 0xcf6   : > { %v4484_v8 = vmax.f32 %v4476_v40, 0.0 }
 0xcf8   : > { %4584 = vmatpush.msrb.mxu1 %v4484_v8  ;;  %v8261_v8 = vld [vmem:[%s11723_s2 + $0x28] sm:$0xff] }
 0xcfa   : > { %4585 = vmatpush.msrb.mxu1 %v4483_v23 }
 0xcfb   : > { %7837 = vmatmul.msk.f32.vlgmr.msrb.gmra.mxu1 %vm970_vm2, %v4491_v51 }
 0xcfc   : > { %5077 = vmatpush.msra.mxu1 %v8242_v55 }
 0xcfe   : > { %5078 = vmatpush.msra.mxu1 %v8243_v11 }
 0xd00   : > { %5079 = vmatpush.msra.mxu1 %v8244_v36 }
 0xd02   : > { %5080 = vmatpush.msra.mxu1 %v8245_v46 }
 0xd03   : > { %7838 = vmatmul.msk.f32.gmra.mxu1 %vm970_vm2, %v4492_v7 }
 0xd04   : > { %5149 = vmatpush.msrb.mxu1 %v8246_v28 }
 0xd06   : > { %5150 = vmatpush.msrb.mxu1 %v8247_v10 }
 0xd08   : > { %5151 = vmatpush.msrb.mxu1 %v8248_v25 }
 0xd0a   : > { %5152 = vmatpush.msrb.mxu1 %v8249_v60 }
 0xd0b   : > { %7839 = vmatmul.msk.f32.gmra.mxu1 %vm970_vm2, %v4493_v50 }
 0xd13   : > { %7840 = vmatmul.msk.f32.gmra.mxu1 %vm970_vm2, %v4494_v18 }
 0xd1b   : > { %7841 = vmatmul.msk.f32.gmra.mxu1 %vm970_vm2, %v4495_v48 }
 0xd23   : > { %7842 = vmatmul.msk.f32.gmra.mxu1 %vm970_vm2, %v4496_v52 }
 0xd2b   : > { %7843 = vmatmul.msk.f32.gmra.mxu1 %vm970_vm2, %v4497_v1 }
 0xd33   : > { %7844 = vmatmul.msk.f32.gmra.mxu1 %vm970_vm2, %v4498_v49 }
 0xd3b   : > { %7845 = vmatmul.msk.f32.gmra.mxu1 %vm970_vm2, %v4499_v62  ;;  %v8262_v62 = vld [vmem:[%s11723_s2 + $0x88] sm:$0xff] }
 0xd43   : > { %7846 = vmatmul.msk.f32.gmra.mxu1 %vm970_vm2, %v4500_v22  ;;  %v8263_v22 = vld [vmem:[%s11723_s2 + $0x80] sm:$0xff] }
 0xd4b   : > { %7847 = vmatmul.msk.f32.gmra.mxu1 %vm970_vm2, %v4501_v27  ;;  %v8264_v27 = vld [vmem:[%s11723_s2 + $0x78] sm:$0xff] }
 0xd53   : > { %7848 = vmatmul.msk.f32.gmra.mxu1 %vm970_vm2, %v4502_v12 }
 0xd5b   : > { %7849 = vmatmul.msk.f32.gmra.mxu1 %vm970_vm2, %v4503_v13  ;;  %v8265_v13 = vld [vmem:[%s11723_s2 + $0x70] sm:$0xff] }
 0xd63   : > { %7850 = vmatmul.msk.f32.gmra.mxu1 %vm970_vm2, %v4504_v54 }
 0xd6b   : > { %7851 = vmatmul.msk.f32.gmra.mxu1 %vm970_vm2, %v4505_v20 }
 0xd73   : > { %7852 = vmatmul.msk.f32.gmra.mxu1 %vm970_vm2, %v4506_v15 }
 0xd78   : > { %v4587_v17 = vpop.f32.mrf.mxu1 }
 0xd79   : > { %7856 = vmatmul.msk.f32.vlgmr.msrb.gmra.mxu3 %vm1107_vm3, %v4587_v17 }
 0xd7a   : > { %4776 = vmatpush.msrb.mxu3 %v8250_v19 }
 0xd7b   : > { %7853 = vmatmul.msk.f32.gmra.mxu1 %vm970_vm2, %v4507_v3 }
 0xd7c   : > { %4777 = vmatpush.msrb.mxu3 %v8251_v38 }
 0xd7e   : > { %4778 = vmatpush.msrb.mxu3 %v8252_v39 }
 0xd80   : > { %v4590_v9 = vpop.f32.mrf.mxu1  ;;  %4779 = vmatpush.msrb.mxu3 %v8253_v37 }
 0xd81   : > { %7857 = vmatmul.msk.f32.gmra.mxu3 %vm1107_vm3, %v4590_v9 }
 0xd83   : > { %7854 = vmatmul.msk.f32.gmra.mxu1 %vm970_vm2, %v4508_v24 }
 0xd88   : > { %v4593_v63 = vpop.f32.mrf.mxu1 }
 0xd89   : > { %7858 = vmatmul.msk.f32.gmra.mxu3 %vm1107_vm3, %v4593_v63 }
 0xd8b   : > { %7855 = vmatmul.msk.f32.gmra.mxu1 %vm970_vm2, %v4509_v56 }
 0xd90   : > { %v4596_v6 = vpop.f32.mrf.mxu1 }
 0xd91   : > { %7859 = vmatmul.msk.f32.gmra.mxu3 %vm1107_vm3, %v4596_v6  ;;  %v4693_v42 = vrot.slane %v4596_v6, 6 }
 0xd98   : > { %v4599_v61 = vpop.f32.mrf.mxu1 }
 0xd99   : > { %v4694_v59 = vrot.slane %v4599_v61, 6 }
 0xd9b   : > { %v4695_v14 = vsel %vm1157_vm4, %v4693_v42, %v4694_v59 }
 0xd9c   : > { %7860 = vmatmul.msk.f32.vlgmr.msra.gmra.mxu3 %vm1107_vm3, %v4695_v14 }
 0xd9d   : > { %4872 = vmatpush.msra.mxu3 %v8254_v57 }
 0xd9f   : > { %4873 = vmatpush.msra.mxu3 %v8255_v45 }
 0xda0   : > { %v4602_v47 = vpop.f32.mrf.mxu1 }
 0xda1   : > { %v4696_v21 = vrot.slane %v4602_v47, 6  ;;  %4874 = vmatpush.msra.mxu3 %v8256_v32  ;;  %v8266_v47 = vld [vmem:[%s11724_s3 + $0x1] ss:$0 sm:$0xff] }
 0xda3   : > { %v4697_v29 = vsel %vm1157_vm4, %v4694_v59, %v4696_v21  ;;  %4875 = vmatpush.msra.mxu3 %v8257_v43 }
 0xda4   : > { %7861 = vmatmul.msk.f32.gmra.mxu3 %vm1107_vm3, %v4697_v29 }
 0xda8   : > { %v4605_v31 = vpop.f32.mrf.mxu1 }
 0xda9   : > { %v4698_v34 = vrot.slane %v4605_v31, 6 }
 0xdab   : > { %v4699_v53 = vsel %vm1157_vm4, %v4696_v21, %v4698_v34 }
 0xdac   : > { %7862 = vmatmul.msk.f32.gmra.mxu3 %vm1107_vm3, %v4699_v53 }
 0xdb0   : > { %v4608_v35 = vpop.f32.mrf.mxu1 }
 0xdb1   : > { %v4700_v33 = vrot.slane %v4608_v35, 6  ;;  %v4747_v41 = vrot.slane %v4608_v35, 4 }
 0xdb3   : > { %v4701_v26 = vsel %vm1157_vm4, %v4698_v34, %v4700_v33 }
 0xdb4   : > { %7863 = vmatmul.msk.f32.gmra.mxu3 %vm1107_vm3, %v4701_v26 }
 0xdb8   : > { %v4611_v0 = vpop.f32.mrf.mxu1 }
 0xdb9   : > { %v4748_v4 = vrot.slane %v4611_v0, 4 }
 0xdbb   : > { %v4749_v5 = vsel %vm714_vm1, %v4747_v41, %v4748_v4 }
 0xdbc   : > { %7864 = vmatmul.msk.f32.vlgmr.msrb.gmra.mxu3 %vm1107_vm3, %v4749_v5 }
 0xdbd   : > { %5005 = vmatpush.msrb.mxu3 %v8258_v58 }
 0xdbf   : > { %5006 = vmatpush.msrb.mxu3 %v8259_v44 }
 0xdc0   : > { %v4614_v2 = vpop.f32.mrf.mxu1 }
 0xdc1   : > { %v4750_v30 = vrot.slane %v4614_v2, 4  ;;  %5007 = vmatpush.msrb.mxu3 %v8260_v16 }
 0xdc3   : > { %v4751_v40 = vsel %vm714_vm1, %v4748_v4, %v4750_v30  ;;  %5008 = vmatpush.msrb.mxu3 %v8261_v8 }
 0xdc4   : > { %7865 = vmatmul.msk.f32.gmra.mxu3 %vm1107_vm3, %v4751_v40 }
 0xdc8   : > { %v4617_v23 = vpop.f32.mrf.mxu1 }
 0xdc9   : > { %v4752_v51 = vrot.slane %v4617_v23, 4 }
 0xdcb   : > { %v4753_v55 = vsel %vm714_vm1, %v4750_v30, %v4752_v51 }
 0xdcc   : > { %7866 = vmatmul.msk.f32.gmra.mxu3 %vm1107_vm3, %v4753_v55 }
 0xdd0   : > { %v4620_v11 = vpop.f32.mrf.mxu1 }
 0xdd1   : > { %v4754_v7 = vrot.slane %v4620_v11, 4  ;;  %v4800_v28 = vrot.slane %v4620_v11, 2 }
 0xdd3   : > { %v4755_v36 = vsel %vm714_vm1, %v4752_v51, %v4754_v7 }
 0xdd4   : > { %7867 = vmatmul.msk.f32.gmra.mxu3 %vm1107_vm3, %v4755_v36  ;;  %v4897_v36 = vld [vmem:[%s11722_s1 + $0x1c8] sm:$0xff] }
 0xdd8   : > { %v4623_v46 = vpop.f32.mrf.mxu1 }
 0xdd9   : > { %v4801_v10 = vrot.slane %v4623_v46, 2  ;;  %v4898_v46 = vld [vmem:[%s11722_s1 + $0x1d0] sm:$0xff] }
 0xddb   : > { %v4802_v50 = vsel %vm1265_vm5, %v4800_v28, %v4801_v10  ;;  %v4899_v28 = vld [vmem:[%s11722_s1 + $0x1d8] sm:$0xff] }
 0xddc   : > { %7868 = vmatmul.msk.f32.vlgmr.msra.gmra.mxu2 %vm1107_vm3, %v4802_v50  ;;  %v4901_v50 = vld [vmem:[%s11722_s1 + $0x1e8] sm:$0xff] }
 0xde0   : > { %v4626_v25 = vpop.f32.mrf.mxu1 }
 0xde1   : > { %v4803_v60 = vrot.slane %v4626_v25, 2  ;;  %v4902_v25 = vld [vmem:[%s11722_s1 + $0x1f0] sm:$0xff] }
 0xde3   : > { %v4804_v18 = vsel %vm1265_vm5, %v4801_v10, %v4803_v60  ;;  %v4900_v10 = vld [vmem:[%s11722_s1 + $0x1e0] sm:$0xff] }
 0xde4   : > { %7869 = vmatmul.msk.f32.gmra.mxu2 %vm1107_vm3, %v4804_v18  ;;  %v4904_v18 = vld [vmem:[%s11722_s1 + $0x200] sm:$0xff] }
 0xde8   : > { %v4629_v48 = vpop.f32.mrf.mxu1 }
 0xde9   : > { %v4805_v52 = vrot.slane %v4629_v48, 2  ;;  %v4905_v48 = vld [vmem:[%s11722_s1 + $0x208] sm:$0xff] }
 0xdeb   : > { %v4806_v1 = vsel %vm1265_vm5, %v4803_v60, %v4805_v52  ;;  %v4903_v60 = vld [vmem:[%s11722_s1 + $0x1f8] sm:$0xff] }
 0xdec   : > { %7870 = vmatmul.msk.f32.gmra.mxu2 %vm1107_vm3, %v4806_v1 }
 0xdf0   : > { %v4632_v49 = vpop.f32.mrf.mxu1 }
 0xdf1   : > { %7872 = vmatmul.msk.f32.vlgmr.msra.gmra.mxu3 %vm1107_vm3, %v4632_v49  ;;  %v8267_v49 = vld [vmem:[%s11723_s2 + $0x118] sm:$0xff] }
 0xdf2   : > { %5041 = vmatpush.msra.mxu3 %v8262_v62  ;;  %v8268_v62 = vld [vmem:[%s11723_s2 + $0x110] sm:$0xff] }
 0xdf4   : > { %7871 = vmatmul.msk.f32.gmra.mxu2 %vm1107_vm3, %v4805_v52  ;;  %5042 = vmatpush.msra.mxu3 %v8263_v22  ;;  %v4906_v52 = vld [vmem:[%s11722_s1 + $0x210] sm:$0x7]  ;;  %v8269_v22 = vld [vmem:[%s11723_s2 + $0x108] sm:$0xff] }
 0xdf6   : > { %5043 = vmatpush.msra.mxu3 %v8264_v27 }
 0xdf8   : > { %v4635_v12 = vpop.f32.mrf.mxu1  ;;  %5044 = vmatpush.msra.mxu3 %v8265_v13 }
 0xdf9   : > { %7873 = vmatmul.msk.f32.gmra.mxu3 %vm1107_vm3, %v4635_v12  ;;  %v8270_v12 = vld [vmem:[%s11723_s2 + $0x100] sm:$0xff] }
 0xdfc   : > { %v4673_v54 = vpop.f32.mrf.mxu3 }
 0xdfd   : > { %v4685_v53 = vadd.f32 %v8266_v47, %v4673_v54 }
 0xe00   : > { %v4638_v20 = vpop.f32.mrf.mxu1 }
 0xe01   : > { %7874 = vmatmul.msk.f32.gmra.mxu3 %vm1107_vm3, %v4638_v20 }
 0xe04   : > { %v4676_v17 = vpop.f32.mrf.mxu3 }
 0xe05   : > { %v4686_v29 = vadd.f32 %v8266_v47, %v4676_v17 }
 0xe08   : > { %v4641_v15 = vpop.f32.mrf.mxu1 }
 0xe09   : > { %7875 = vmatmul.msk.f32.gmra.mxu3 %vm1107_vm3, %v4641_v15 }
 0xe0c   : > { %v4679_v3 = vpop.f32.mrf.mxu3 }
 0xe0d   : > { %v4687_v21 = vadd.f32 %v8266_v47, %v4679_v3 }
 0xe14   : > { %v4682_v19 = vpop.f32.mrf.mxu3 }
 0xe15   : > { %v4688_v32 = vadd.f32 %v8266_v47, %v4682_v19 }
 0xe1f   : > { %v4727_v38 = vpop.f32.mrf.mxu3 }
 0xe20   : > { %v4739_v0 = vadd.f32 %v4727_v38, %v4685_v53  ;;  %v5167_v53 = vld [vmem:[%s11725_s4 + $0x18] sm:$0xff] }
 0xe27   : > { %v4730_v39 = vpop.f32.mrf.mxu3 }
 0xe28   : > { %v4740_v35 = vadd.f32 %v4730_v39, %v4686_v29 }
 0xe2f   : > { %v4733_v9 = vpop.f32.mrf.mxu3 }
 0xe30   : > { %v4741_v43 = vadd.f32 %v4733_v9, %v4687_v21 }
 0xe37   : > { %v4736_v24 = vpop.f32.mrf.mxu3 }
 0xe38   : > { %v4742_v31 = vadd.f32 %v4736_v24, %v4688_v32 }
 0xe3f   : > { %v4781_v37 = vpop.f32.mrf.mxu3 }
 0xe40   : > { %v4793_v44 = vadd.f32 %v4781_v37, %v4739_v0  ;;  %v7906_v0 = vld [vmem:[%s11725_s4 + $0x58] sm:$0xff] }
 0xe47   : > { %v4784_v63 = vpop.f32.mrf.mxu3 }
 0xe48   : > { %v4794_v41 = vadd.f32 %v4784_v63, %v4740_v35  ;;  %v5166_v35 = vld [vmem:[%s11725_s4 + $0x10] sm:$0xff] }
 0xe4f   : > { %v4787_v56 = vpop.f32.mrf.mxu3 }
 0xe50   : > { %v4795_v33 = vadd.f32 %v4787_v56, %v4741_v43 }
 0xe57   : > { %v4790_v61 = vpop.f32.mrf.mxu3 }
 0xe58   : > { %v4796_v26 = vadd.f32 %v4790_v61, %v4742_v31 }
 0xe5f   : > { %v4832_v6 = vpop.f32.mrf.mxu2 }
 0xe60   : > { %v4844_v40 = vadd.f32 %v4832_v6, %v4793_v44  ;;  %v7905_v44 = vld [vmem:[%s11725_s4 + $0x50] sm:$0xff] }
 0xe67   : > { %v4835_v42 = vpop.f32.mrf.mxu2 }
 0xe68   : > { %v4845_v2 = vadd.f32 %v4835_v42, %v4794_v41  ;;  %v7911_v41 = vld [vmem:[%s11725_s4 + $0x78] sm:$0xff] }
 0xe6f   : > { %v4838_v57 = vpop.f32.mrf.mxu2 }
 0xe70   : > { %v4846_v4 = vadd.f32 %v4838_v57, %v4795_v33 }
 0xe74   : > { %v4877_v59 = vpop.f32.mrf.mxu3 }
 0xe75   : > { %v4889_v51 = vadd.f32 %v4877_v59, %v4844_v40  ;;  %v7909_v40 = vld [vmem:[%s11725_s4 + $0x68] sm:$0xff] }
 0xe77   : > { %v4841_v34 = vpop.f32.mrf.mxu2  ;;  %v4893_v7 = vmax.f32 %v4889_v51, 0.0  ;;  %v7908_v51 = vld [vmem:[%s11725_s4 + $0x60] sm:$0xff] }
 0xe78   : > { %v4847_v5 = vadd.f32 %v4841_v34, %v4796_v26  ;;  %v5165_v26 = vld [vmem:[%s11725_s4 + $0x8] sm:$0xff] }
 0xe7c   : > { %v4880_v14 = vpop.f32.mrf.mxu3 }
 0xe7d   : > { %v4890_v8 = vadd.f32 %v4880_v14, %v4845_v2  ;;  %v7910_v2 = vld [vmem:[%s11725_s4 + $0x70] sm:$0xff] }
 0xe7f   : > { %v4894_v11 = vmax.f32 %v4890_v8, 0.0  ;;  %v7899_v8 = vld [vmem:[%s11725_s4 + $0x28] sm:$0xff] }
 0xe84   : > { %v4883_v45 = vpop.f32.mrf.mxu3 }
 0xe85   : > { %v4891_v30 = vadd.f32 %v4883_v45, %v4846_v4  ;;  %v5164_v4 = vld [vmem:[%s11725_s4] sm:$0xff] }
 0xe87   : > { %v4895_v55 = vmax.f32 %v4891_v30, 0.0  ;;  %v7900_v30 = vld [vmem:[%s11725_s4 + $0x30] sm:$0xff] }
 0xe8c   : > { %v4886_v58 = vpop.f32.mrf.mxu3 }
 0xe8d   : > { %v4892_v16 = vadd.f32 %v4886_v58, %v4847_v5  ;;  %v7901_v58 = vld [vmem:[%s11725_s4 + $0x38] sm:$0xff] }
 0xe8f   : > { %v4896_v23 = vmax.f32 %v4892_v16, 0.0  ;;  %v7904_v16 = vld [vmem:[%s11725_s4 + $0x48] sm:$0xff] }
 0xe91   : > { %7876 = vmatpush.msk.msrb.mxu2 %vm1265_vm5, %v4896_v23  ;;  %v7903_v23 = vld [vmem:[%s11725_s4 + $0x40] sm:$0xff] }
 0xe93   : > { %4953 = vmatpush.msrb.mxu2 %v4895_v55  ;;  %v7898_v55 = vld [vmem:[%s11725_s4 + $0x20] sm:$0xff] }
 0xe95   : > { %4954 = vmatpush.msrb.mxu2 %v4894_v11  ;;  %v7921_v11 = vld [vmem:[%s11725_s4 + $0xb8] sm:$0xff] }
 0xe97   : > { %4955 = vmatpush.msrb.mxu2 %v4893_v7  ;;  %v7926_v7 = vld [vmem:[%s11725_s4 + $0xd8] sm:$0xff] }
 0xe98   : > { %7877 = vmatmul.msk.f32.vlgmr.msrb.gmra.mxu2 %vm1373_vm6, %v4897_v36 }
 0xe99   : > { %5239 = vmatpush.msra.mxu2 %v7906_v0  ;;  %v7950_v0 = vld [vmem:[%s11725_s4 + $0x170] sm:$0xff] }
 0xe9b   : > { %5240 = vmatpush.msra.mxu2 %v7905_v44 }
 0xe9d   : > { %5241 = vmatpush.msra.mxu2 %v7904_v16 }
 0xe9f   : > { %5242 = vmatpush.msra.mxu2 %v7903_v23  ;;  %v7953_v23 = vld [vmem:[%s11725_s4 + $0x180] sm:$0xff] }
 0xea0   : > { %7878 = vmatmul.msk.f32.gmra.mxu2 %vm1373_vm6, %v4898_v46  ;;  %v7920_v46 = vld [vmem:[%s11725_s4 + $0xb0] sm:$0xff] }
 0xea1   : > { %5323 = vmatpush.msrb.mxu2 %v7921_v11  ;;  %v7965_v11 = vld [vmem:[%s11725_s4 + $0x1d0] sm:$0xff] }
 0xea3   : > { %5324 = vmatpush.msrb.mxu2 %v7920_v46  ;;  %v8272_v46 = vld [vmem:[%s11726_s5 + $0x18] sm:$0xff] }
 0xea8   : > { %7879 = vmatmul.msk.f32.gmra.mxu2 %vm1373_vm6, %v4899_v28  ;;  %v7925_v28 = vld [vmem:[%s11725_s4 + $0xd0] sm:$0xff] }
 0xeb0   : > { %7880 = vmatmul.msk.f32.gmra.mxu2 %vm1373_vm6, %v4900_v10  ;;  %v7919_v10 = vld [vmem:[%s11725_s4 + $0xa8] sm:$0xff] }
 0xeb1   : > { %5325 = vmatpush.msrb.mxu2 %v7919_v10  ;;  %v7961_v10 = vld [vmem:[%s11725_s4 + $0x1b8] sm:$0xff] }
 0xeb8   : > { %7881 = vmatmul.msk.f32.gmra.mxu2 %vm1373_vm6, %v4901_v50  ;;  %v7924_v50 = vld [vmem:[%s11725_s4 + $0xc8] sm:$0xff] }
 0xec0   : > { %7882 = vmatmul.msk.f32.gmra.mxu2 %vm1373_vm6, %v4902_v25  ;;  %v7918_v25 = vld [vmem:[%s11725_s4 + $0xa0] sm:$0xff] }
 0xec1   : > { %5326 = vmatpush.msrb.mxu2 %v7918_v25 }
 0xec8   : > { %7883 = vmatmul.msk.f32.gmra.mxu2 %vm1373_vm6, %v4903_v60  ;;  %v7923_v60 = vld [vmem:[%s11725_s4 + $0xc0] sm:$0xff] }
 0xed0   : > { %7884 = vmatmul.msk.f32.gmra.mxu2 %vm1373_vm6, %v4904_v18 }
 0xed8   : > { %7885 = vmatmul.msk.f32.gmra.mxu2 %vm1373_vm6, %v4905_v48 }
 0xee0   : > { %7886 = vmatmul.msk.f32.gmra.mxu2 %vm1373_vm6, %v4906_v52 }
 0xf1b   : > { %v4957_v1 = vpop.f32.mrf.mxu2 }
 0xf1c   : > { %7887 = vmatmul.msk.f32.vlgmr.msrb.gmra.mxu3 %vm1107_vm3, %v4957_v1  ;;  %v8271_v1 = vld [vmem:[%s11724_s3 + $0x2] ss:$0 sm:$0xff] }
 0xf1d   : > { %5113 = vmatpush.msrb.mxu3 %v8267_v49 }
 0xf1f   : > { %5114 = vmatpush.msrb.mxu3 %v8268_v62 }
 0xf21   : > { %5115 = vmatpush.msrb.mxu3 %v8269_v22 }
 0xf23   : > { %v4960_v27 = vpop.f32.mrf.mxu2  ;;  %5116 = vmatpush.msrb.mxu3 %v8270_v12 }
 0xf24   : > { %7888 = vmatmul.msk.f32.gmra.mxu3 %vm1107_vm3, %v4960_v27  ;;  %v5020_v54 = vrot.slane %v4960_v27, 7 }
 0xf2b   : > { %v4963_v13 = vpop.f32.mrf.mxu2 }
 0xf2c   : > { %v5021_v20 = vrot.slane %v4963_v13, 7 }
 0xf2e   : > { %v5022_v15 = vsel %vm1489_vm7, %v5020_v54, %v5021_v20 }
 0xf2f   : > { %7889 = vmatmul.msk.f32.vlgmr.msra.gmra.mxu3 %vm1107_vm3, %v5022_v15  ;;  %v7916_v15 = vld [vmem:[%s11725_s4 + $0x98] sm:$0xff] }
 0xf30   : > { %5183 = vmatpush.msra.mxu3 %v5167_v53  ;;  %v7938_v53 = vld [vmem:[%s11725_s4 + $0x120] sm:$0xff] }
 0xf32   : > { %5184 = vmatpush.msra.mxu3 %v5166_v35  ;;  %v7951_v35 = vld [vmem:[%s11725_s4 + $0x178] sm:$0xff] }
 0xf33   : > { %v4966_v17 = vpop.f32.mrf.mxu2 }
 0xf34   : > { %v5023_v3 = vrot.slane %v4966_v17, 7  ;;  %v5056_v39 = vrot.slane %v4966_v17, 6  ;;  %5185 = vmatpush.msra.mxu3 %v5165_v26  ;;  %v7929_v26 = vld [vmem:[%s11725_s4 + $0xe8] sm:$0xff] }
 0xf36   : > { %v5024_v19 = vsel %vm1489_vm7, %v5021_v20, %v5023_v3  ;;  %5186 = vmatpush.msra.mxu3 %v5164_v4 }
 0xf37   : > { %7890 = vmatmul.msk.f32.gmra.mxu3 %vm1107_vm3, %v5024_v19 }
 0xf3b   : > { %v4969_v38 = vpop.f32.mrf.mxu2 }
 0xf3c   : > { %v5057_v9 = vrot.slane %v4969_v38, 6  ;;  %v7915_v38 = vld [vmem:[%s11725_s4 + $0x90] sm:$0xff] }
 0xf3e   : > { %v5058_v24 = vsel %vm1157_vm4, %v5056_v39, %v5057_v9  ;;  %v7936_v39 = vld [vmem:[%s11725_s4 + $0x118] sm:$0xff] }
 0xf3f   : > { %7891 = vmatmul.msk.f32.vlgmr.msra.gmra.mxu1 %vm1107_vm3, %v5058_v24 }
 0xf40   : > { %5267 = vmatpush.msra.mxu1 %v7911_v41  ;;  %v7955_v41 = vld [vmem:[%s11725_s4 + $0x190] sm:$0xff] }
 0xf42   : > { %5268 = vmatpush.msra.mxu1 %v7910_v2  ;;  %v7946_v2 = vld [vmem:[%s11725_s4 + $0x158] sm:$0xff] }
 0xf43   : > { %v4972_v37 = vpop.f32.mrf.mxu2 }
 0xf44   : > { %v5059_v63 = vrot.slane %v4972_v37, 6  ;;  %v5092_v61 = vrot.slane %v4972_v37, 5  ;;  %5269 = vmatpush.msra.mxu1 %v7909_v40  ;;  %v7914_v37 = vld [vmem:[%s11725_s4 + $0x88] sm:$0xff]  ;;  %v7945_v40 = vld [vmem:[%s11725_s4 + $0x150] sm:$0xff] }
 0xf46   : > { %v5060_v56 = vsel %vm1157_vm4, %v5057_v9, %v5059_v63  ;;  %5270 = vmatpush.msra.mxu1 %v7908_v51  ;;  %v7941_v9 = vld [vmem:[%s11725_s4 + $0x138] sm:$0xff]  ;;  %v7935_v63 = vld [vmem:[%s11725_s4 + $0x110] sm:$0xff] }
 0xf47   : > { %7892 = vmatmul.msk.f32.gmra.mxu1 %vm1107_vm3, %v5060_v56  ;;  %v7966_v51 = vld [vmem:[%s11725_s4 + $0x1d8] sm:$0xff] }
 0xf4b   : > { %v4975_v6 = vpop.f32.mrf.mxu2 }
 0xf4c   : > { %v5093_v42 = vrot.slane %v4975_v6, 5  ;;  %v7940_v6 = vld [vmem:[%s11725_s4 + $0x130] sm:$0xff] }
 0xf4e   : > { %v5094_v59 = vsel %vm1562_vm8, %v5092_v61, %v5093_v42 }
 0xf4f   : > { %7893 = vmatmul.msk.f32.vlgmr.msrb.gmra.mxu3 %vm1107_vm3, %v5094_v59  ;;  %v7934_v59 = vld [vmem:[%s11725_s4 + $0x108] sm:$0xff] }
 0xf50   : > { %5211 = vmatpush.msrb.mxu3 %v7901_v58  ;;  %v7949_v58 = vld [vmem:[%s11725_s4 + $0x168] sm:$0xff] }
 0xf52   : > { %5212 = vmatpush.msrb.mxu3 %v7900_v30  ;;  %v7954_v30 = vld [vmem:[%s11725_s4 + $0x188] sm:$0xff] }
 0xf53   : > { %v4978_v14 = vpop.f32.mrf.mxu2 }
 0xf54   : > { %v5095_v57 = vrot.slane %v4978_v14, 5  ;;  %v5128_v21 = vrot.slane %v4978_v14, 4  ;;  %5213 = vmatpush.msrb.mxu3 %v7899_v8  ;;  %v7948_v8 = vld [vmem:[%s11725_s4 + $0x160] sm:$0xff] }
 0xf56   : > { %v5096_v45 = vsel %vm1562_vm8, %v5093_v42, %v5095_v57  ;;  %5214 = vmatpush.msrb.mxu3 %v7898_v55  ;;  %v7913_v42 = vld [vmem:[%s11725_s4 + $0x80] sm:$0xff]  ;;  %v7939_v57 = vld [vmem:[%s11725_s4 + $0x128] sm:$0xff] }
 0xf57   : > { %7894 = vmatmul.msk.f32.gmra.mxu3 %vm1107_vm3, %v5096_v45  ;;  %v7944_v55 = vld [vmem:[%s11725_s4 + $0x148] sm:$0xff] }
 0xf5b   : > { %v4981_v47 = vpop.f32.mrf.mxu2 }
 0xf5c   : > { %v5129_v32 = vrot.slane %v4981_v47, 4 }
 0xf5e   : > { %v5130_v29 = vsel %vm714_vm1, %v5128_v21, %v5129_v32  ;;  %v7931_v21 = vld [vmem:[%s11725_s4 + $0xf8] sm:$0xff] }
 0xf5f   : > { %7895 = vmatmul.msk.f32.vlgmr.msrb.gmra.mxu1 %vm1107_vm3, %v5130_v29 }
 0xf60   : > { %5351 = vmatpush.msrb.mxu1 %v7926_v7  ;;  %v7943_v7 = vld [vmem:[%s11725_s4 + $0x140] sm:$0xff] }
 0xf62   : > { %5352 = vmatpush.msrb.mxu1 %v7925_v28 }
 0xf63   : > { %v4984_v43 = vpop.f32.mrf.mxu2 }
 0xf64   : > { %v5131_v31 = vrot.slane %v4984_v43, 4  ;;  %5353 = vmatpush.msrb.mxu1 %v7924_v50  ;;  %v8273_v50 = vld [vmem:[%s11726_s5 + $0x10] sm:$0xff] }
 0xf66   : > { %v5132_v34 = vsel %vm714_vm1, %v5129_v32, %v5131_v31  ;;  %5354 = vmatpush.msrb.mxu1 %v7923_v60  ;;  %v7933_v32 = vld [vmem:[%s11725_s4 + $0x100] sm:$0xff] }
 0xf67   : > { %7896 = vmatmul.msk.f32.gmra.mxu1 %vm1107_vm3, %v5132_v34  ;;  %v7930_v34 = vld [vmem:[%s11725_s4 + $0xf0] sm:$0xff] }
 0xf9f   : > { %v5010_v33 = vpop.f32.mrf.mxu3 }
 0xfa0   : > { %v5016_v49 = vadd.f32 %v8271_v1, %v5010_v33  ;;  %v7956_v33 = vld [vmem:[%s11725_s4 + $0x198] sm:$0xff] }
 0xfa7   : > { %v5013_v5 = vpop.f32.mrf.mxu3 }
 0xfa8   : > { %v5017_v17 = vadd.f32 %v8271_v1, %v5013_v5  ;;  %v7928_v5 = vld [vmem:[%s11725_s4 + $0xe0] sm:$0xff]  ;;  %v7959_v1 = vld [vmem:[%s11725_s4 + $0x1a8] sm:$0xff] }
 0xfb2   : > { %v5046_v36 = vpop.f32.mrf.mxu3 }
 0xfb3   : > { %v5052_v62 = vadd.f32 %v5046_v36, %v5016_v49  ;;  %v7964_v36 = vld [vmem:[%s11725_s4 + $0x1c8] sm:$0xff]  ;;  %v7958_v49 = vld [vmem:[%s11725_s4 + $0x1a0] sm:$0xff] }
 0xfba   : > { %v5049_v48 = vpop.f32.mrf.mxu3 }
 0xfbb   : > { %v5053_v24 = vadd.f32 %v5049_v48, %v5017_v17  ;;  %v7963_v48 = vld [vmem:[%s11725_s4 + $0x1c0] sm:$0xff]  ;;  %v7981_v17 = vld [vmem:[%s8386_s26 + $0x1c8] sm:$0xff] }
 0xfbc   : > { %v5082_v18 = vpop.f32.mrf.mxu1 }
 0xfbd   : > { %v5088_v27 = vadd.f32 %v5082_v18, %v5052_v62  ;;  %v7960_v18 = vld [vmem:[%s11725_s4 + $0x1b0] sm:$0xff]  ;;  %v8275_v62 = vld [vmem:[%s11726_s5] sm:$0xff] }
 0xfc4   : > { %v5085_v52 = vpop.f32.mrf.mxu1 }
 0xfc5   : > { %v5089_v61 = vadd.f32 %v5085_v52, %v5053_v24  ;;  %v8274_v52 = vld [vmem:[%s11726_s5 + $0x8] sm:$0xff] }
 0xfc6   : > { %v7977_v24 = vld [vmem:[%s8386_s26 + $0x1a8] sm:$0xff] }
 0xfd2   : > { %v5118_v22 = vpop.f32.mrf.mxu3 }
 0xfd3   : > { %v5124_v12 = vadd.f32 %v5118_v22, %v5088_v27  ;;  %v8276_v22 = vld [vmem:[%s11723_s2 + $0x20] sm:$0xff] }
 0xfda   : > { %v5121_v56 = vpop.f32.mrf.mxu3 }
 0xfdb   : > { %v5125_v45 = vadd.f32 %v5121_v56, %v5089_v61  ;;  %v7974_v56 = vld [vmem:[%s8386_s26 + $0x190] sm:$0xff]  ;;  %v7972_v61 = vld [vmem:[%s8386_s26 + $0x180] sm:$0xff] }
 0xfdc   : > { %v5154_v13 = vpop.f32.mrf.mxu1 }
 0xfdd   : > { %v5160_v54 = vadd.f32 %v5154_v13, %v5124_v12  ;;  %v7983_v12 = vld [vmem:[%s8386_s26 + $0x1d8] sm:$0xff] }
 0xfde   : > { %v8277_v13 = vld [vmem:[%s11723_s2 + $0x18] sm:$0xff] }
 0xfdf   : > { %v10732_v20 = vmax.f32 %v5160_v54, 0.0 }
 0xfe1   : > { %7897 = vmatmul.msk.f32.vlgmr.msra.gmra.mxu3 %vm1107_vm3, %v10732_v20  ;;  %v5224_v3 = vrot.slane %v10732_v20, 2  ;;  %v5252_v19 = vrot.slane %v10732_v20, 3  ;;  %v5196_v47 = vrot.slane %v10732_v20, 1  ;;  %v5308_v43 = vrot.slane %v10732_v20, 5 }
 0xfe2   : > { %5295 = vmatpush.msra.mxu3 %v7916_v15  ;;  %v5336_v31 = vrot.slane %v10732_v20, 6  ;;  %v5280_v44 = vrot.slane %v10732_v20, 4  ;;  %v5364_v28 = vrot.slane %v10732_v20, 7  ;;  %v7982_v20 = vld [vmem:[%s8386_s26 + $0x1d0] sm:$0xff] }
 0xfe3   : > { %7907 = vmatmul.msk.f32.vlgmr.msra.gmra.mxu2 %vm1107_vm3, %v5224_v3  ;;  %7912 = vmatmul.msk.f32.vlgmr.msra.gmra.mxu1 %vm1107_vm3, %v5252_v19  ;;  %v8278_v15 = vld [vmem:[%s11723_s2 + $0x10] sm:$0xff]  ;;  %v8279_v3 = vld [vmem:[%s11723_s2 + $0x8] sm:$0xff]  ;;  %v7980_v19 = vld [vmem:[%s8386_s26 + $0x1c0] sm:$0xff] }
 0xfe4   : > { %5296 = vmatpush.msra.mxu3 %v7915_v38  ;;  %5407 = vmatpush.msra.mxu2 %v7936_v39  ;;  %v5157_v14 = vpop.f32.mrf.mxu1  ;;  %v7979_v39 = vld [vmem:[%s8386_s26 + $0x1b8] sm:$0xff] }
 0xfe5   : > { %5435 = vmatpush.msra.mxu1 %v7941_v9  ;;  %v5161_v29 = vadd.f32 %v5157_v14, %v5125_v45  ;;  %v7978_v9 = vld [vmem:[%s8386_s26 + $0x1b0] sm:$0xff]  ;;  %v7969_v14 = vld [vmem:[%s8386_s26 + $0x168] sm:$0xff] }
 0xfe6   : > { %5297 = vmatpush.msra.mxu3 %v7914_v37  ;;  %5408 = vmatpush.msra.mxu2 %v7935_v63  ;;  %v7976_v37 = vld [vmem:[%s8386_s26 + $0x1a0] sm:$0xff]  ;;  %v7975_v63 = vld [vmem:[%s8386_s26 + $0x198] sm:$0xff]  ;;  %v5626_v45 = vld [vmem:[%s11722_s1 + $0x8] sm:$0xff] }
 0xfe7   : > { %5436 = vmatpush.msra.mxu1 %v7940_v6  ;;  %v10803_v4 = vmax.f32 %v5161_v29, 0.0  ;;  %v7973_v6 = vld [vmem:[%s8386_s26 + $0x188] sm:$0xff] }
 0xfe8   : > { %5298 = vmatpush.msra.mxu3 %v7913_v42  ;;  %5409 = vmatpush.msra.mxu2 %v7934_v59  ;;  %v7971_v42 = vld [vmem:[%s8386_s26 + $0x178] sm:$0xff]  ;;  %v7970_v59 = vld [vmem:[%s8386_s26 + $0x170] sm:$0xff]  ;;  %v5630_v29 = vld [vmem:[%s11722_s1 + $0x28] sm:$0xff] }
 0xfe9   : > { %7902 = vmatmul.msk.f32.vlgmr.msrb.gmra.mxu3 %vm1107_vm3, %v5196_v47  ;;  %5437 = vmatpush.msra.mxu1 %v7939_v57  ;;  %v5420_v16 = vrot.slane %v10803_v4, 1  ;;  %v5476_v25 = vrot.slane %v10803_v4, 3  ;;  %v5504_v60 = vrot.slane %v10803_v4, 4  ;;  %v5448_v27 = vrot.slane %v10803_v4, 2  ;;  %v5625_v57 = vld [vmem:[%s11722_s1] sm:$0xff]  ;;  %v5627_v47 = vld [vmem:[%s11722_s1 + $0x10] sm:$0xff] }
 0xfea   : > { %5379 = vmatpush.msrb.mxu3 %v7931_v21  ;;  %5410 = vmatpush.msra.mxu2 %v7933_v32  ;;  %v5560_v54 = vrot.slane %v10803_v4, 6  ;;  %v5532_v38 = vrot.slane %v10803_v4, 5  ;;  %v5628_v21 = vld [vmem:[%s11722_s1 + $0x18] sm:$0xff]  ;;  %v5629_v32 = vld [vmem:[%s11722_s1 + $0x20] sm:$0xff] }
 0xfeb   : > { %7922 = vmatmul.msk.f32.vlgmr.msrb.gmra.mxu2 %vm1107_vm3, %v5308_v43  ;;  %7927 = vmatmul.msk.f32.vlgmr.msrb.gmra.mxu1 %vm1107_vm3, %v5336_v31  ;;  %v5631_v43 = vld [vmem:[%s11722_s1 + $0x30] sm:$0xff]  ;;  %v5632_v31 = vld [vmem:[%s11722_s1 + $0x38] sm:$0xff] }
 0xfec   : > { %5380 = vmatpush.msrb.mxu3 %v7930_v34  ;;  %5438 = vmatpush.msra.mxu1 %v7938_v53  ;;  %v5633_v34 = vld [vmem:[%s11722_s1 + $0x40] sm:$0xff] }
 0xfed   : > { %5491 = vmatpush.msrb.mxu2 %v7951_v35  ;;  %v5634_v35 = vld [vmem:[%s11722_s1 + $0x48] sm:$0xff] }
 0xfee   : > { %5519 = vmatpush.msrb.mxu1 %v7956_v33  ;;  %5381 = vmatpush.msrb.mxu3 %v7929_v26  ;;  %v8280_v26 = vld [vmem:[%s11724_s3 + $0x3] sm:$0x1] }
 0xfef   : > { %5492 = vmatpush.msrb.mxu2 %v7950_v0 }
 0xff0   : > { %5520 = vmatpush.msrb.mxu1 %v7955_v41  ;;  %5382 = vmatpush.msrb.mxu3 %v7928_v5  ;;  %v5635_v5 = vld [vmem:[%s11722_s1 + $0x50] sm:$0xff] }
 0xff1   : > { %7917 = vmatmul.msk.f32.vlgmr.msra.gmra.mxu3 %vm1107_vm3, %v5280_v44  ;;  %5493 = vmatpush.msrb.mxu2 %v7949_v58 }
 0xff2   : > { %5463 = vmatpush.msra.mxu3 %v7946_v2  ;;  %5521 = vmatpush.msrb.mxu1 %v7954_v30 }
 0xff3   : > { %7937 = vmatmul.msk.f32.vlgmr.msra.gmra.mxu2 %vm1107_vm3, %v10803_v4  ;;  %7942 = vmatmul.msk.f32.vlgmr.msra.gmra.mxu1 %vm1107_vm3, %v5420_v16 }
 0xff4   : > { %5464 = vmatpush.msra.mxu3 %v7945_v40  ;;  %5494 = vmatpush.msrb.mxu2 %v7948_v8  ;;  %v5636_v40 = vld [vmem:[%s11722_s1 + $0x58] sm:$0xff] }
 0xff5   : > { %5522 = vmatpush.msrb.mxu1 %v7953_v23 }
 0xff6   : > { %5575 = vmatpush.msra.mxu2 %v7966_v51  ;;  %5465 = vmatpush.msra.mxu3 %v7944_v55 }
 0xff7   : > { %5600 = vmatpush.msra.mxu1 %v8272_v46 }
 0xff8   : > { %5576 = vmatpush.msra.mxu2 %v7965_v11  ;;  %5466 = vmatpush.msra.mxu3 %v7943_v7 }
 0xff9   : > { %5601 = vmatpush.msra.mxu1 %v8273_v50  ;;  %7932 = vmatmul.msk.f32.vlgmr.msrb.gmra.mxu3 %vm1107_vm3, %v5364_v28 }
 0xffa   : > { %5577 = vmatpush.msra.mxu2 %v7964_v36  ;;  %5547 = vmatpush.msrb.mxu3 %v7961_v10  ;;  %v5637_v36 = vld [vmem:[%s11722_s1 + $0x60] sm:$0xff] }
 0xffb   : > { %5602 = vmatpush.msra.mxu1 %v8274_v52  ;;  %7952 = vmatmul.msk.f32.vlgmr.msrb.gmra.mxu2 %vm1107_vm3, %v5476_v25 }
 0xffc   : > { %7957 = vmatmul.msk.f32.vlgmr.msrb.gmra.mxu1 %vm1107_vm3, %v5504_v60  ;;  %5548 = vmatpush.msrb.mxu3 %v7960_v18  ;;  %v5638_v18 = vld [vmem:[%s11722_s1 + $0x68] sm:$0xff] }
 0xffd   : > { %5578 = vmatpush.msra.mxu2 %v7963_v48  ;;  %5603 = vmatpush.msra.mxu1 %v8275_v62 }
 0xffe   : > { %5549 = vmatpush.msrb.mxu3 %v7959_v1 }
 0xfff   : > { %6425 = vmatpush.msrb.mxu1 %v8276_v22  ;;  %v5639_v22 = vld [vmem:[%s11722_s1 + $0x70] sm:$0xff] }
0x1000   : > { %5550 = vmatpush.msrb.mxu3 %v7958_v49 }
0x1001   : > { %6426 = vmatpush.msrb.mxu1 %v8277_v13  ;;  %7947 = vmatmul.msk.f32.vlgmr.msra.gmra.mxu3 %vm1107_vm3, %v5448_v27 }
0x1002   : > { %5778 = vmatpush.msra.mxu3 %v7983_v12 }
0x1003   : > { %6427 = vmatpush.msrb.mxu1 %v8278_v15  ;;  %7967 = vmatmul.msk.f32.vlgmr.msra.gmra.mxu2 %vm1107_vm3, %v5560_v54  ;;  %v8281_v15 = vld [vmem:[%s11723_s2 + $0x68] sm:$0xff] }
0x1004   : > { %5779 = vmatpush.msra.mxu3 %v7982_v20  ;;  %v5640_v20 = vld [vmem:[%s11722_s1 + $0x78] sm:$0xff] }
0x1005   : > { %6428 = vmatpush.msrb.mxu1 %v8279_v3  ;;  %v8283_v3 = vld [vmem:[%s11723_s2 + $0x58] sm:$0xff] }
0x1006   : > { %5780 = vmatpush.msra.mxu3 %v7981_v17  ;;  %v8282_v17 = vld [vmem:[%s11723_s2 + $0x60] sm:$0xff] }
0x1008   : > { %5781 = vmatpush.msra.mxu3 %v7980_v19  ;;  %v8284_v19 = vld [vmem:[%s11723_s2 + $0x50] sm:$0xff] }
0x1009   : > { %7962 = vmatmul.msk.f32.vlgmr.msrb.gmra.mxu3 %vm1107_vm3, %v5532_v38  ;;  %v5641_v38 = vld [vmem:[%s11722_s1 + $0x80] sm:$0xff] }
0x100a   : > { %5782 = vmatpush.msra.mxu3 %v7979_v39 }
0x100c   : > { %5783 = vmatpush.msra.mxu3 %v7978_v9  ;;  %v5642_v9 = vld [vmem:[%s11722_s1 + $0x88] sm:$0xff] }
0x100e   : > { %5784 = vmatpush.msra.mxu3 %v7977_v24 }
0x1010   : > { %5785 = vmatpush.msra.mxu3 %v7976_v37  ;;  %v5643_v37 = vld [vmem:[%s11722_s1 + $0x90] sm:$0xff] }
0x1012   : > { %5786 = vmatpush.msra.mxu3 %v7975_v63 }
0x1014   : > { %5787 = vmatpush.msra.mxu3 %v7974_v56  ;;  %v5644_v56 = vld [vmem:[%s11722_s1 + $0x98] sm:$0xff] }
0x1016   : > { %5788 = vmatpush.msra.mxu3 %v7973_v6 }
0x1018   : > { %5789 = vmatpush.msra.mxu3 %v7972_v61  ;;  %v5645_v61 = vld [vmem:[%s11722_s1 + $0xa0] sm:$0xff] }
0x101a   : > { %5790 = vmatpush.msra.mxu3 %v7971_v42 }
0x101c   : > { %5791 = vmatpush.msra.mxu3 %v7970_v59  ;;  %v5646_v59 = vld [vmem:[%s11722_s1 + $0xa8] sm:$0xff] }
0x101e   : > { %5792 = vmatpush.msra.mxu3 %v7969_v14 }
0x101f   : > { %7984 = vmatmul.msk.f32.vlgmr.msra.gmra.mxu3 %vm357_vm0, %v5625_v57  ;;  %v5647_v57 = vld [vmem:[%s11722_s1 + $0xb0] sm:$0xff] }
0x1027   : > { %7985 = vmatmul.msk.f32.gmra.mxu3 %vm357_vm0, %v5626_v45 }
0x102f   : > { %7986 = vmatmul.msk.f32.gmra.mxu3 %vm357_vm0, %v5627_v47  ;;  %v5648_v47 = vld [vmem:[%s11722_s1 + $0xb8] sm:$0xff] }
0x1037   : > { %7987 = vmatmul.msk.f32.gmra.mxu3 %vm357_vm0, %v5628_v21 }
0x103f   : > { %7988 = vmatmul.msk.f32.gmra.mxu3 %vm357_vm0, %v5629_v32  ;;  %v5649_v32 = vld [vmem:[%s11722_s1 + $0xc0] sm:$0xff] }
0x1047   : > { %7989 = vmatmul.msk.f32.gmra.mxu3 %vm357_vm0, %v5630_v29 }
0x104f   : > { %7990 = vmatmul.msk.f32.gmra.mxu3 %vm357_vm0, %v5631_v43  ;;  %v5650_v43 = vld [vmem:[%s11722_s1 + $0xc8] sm:$0xff] }
0x1057   : > { %7991 = vmatmul.msk.f32.gmra.mxu3 %vm357_vm0, %v5632_v31 }
0x105f   : > { %7992 = vmatmul.msk.f32.gmra.mxu3 %vm357_vm0, %v5633_v34  ;;  %v5651_v34 = vld [vmem:[%s11722_s1 + $0xd0] sm:$0xff] }
0x1060   : > { %v5272_v41 = vpop.f32.mrf.mxu1 }
0x1064   : > { %v5188_v53 = vpop.f32.mrf.mxu3 }
0x1065   : > { %v5191_v0 = vadd.f32 %v8280_v26, %v5188_v53  ;;  %v5653_v26 = vld [vmem:[%s11722_s1 + $0xe0] sm:$0xff] }
0x1066   : > { %v5244_v33 = vpop.f32.mrf.mxu2 }
0x1067   : > { %7993 = vmatmul.msk.f32.gmra.mxu3 %vm357_vm0, %v5634_v35  ;;  %v5652_v35 = vld [vmem:[%s11722_s1 + $0xd8] sm:$0xff] }
0x1068   : > { %v5356_v23 = vpop.f32.mrf.mxu1 }
0x106c   : > { %v5216_v4 = vpop.f32.mrf.mxu3 }
0x106d   : > { %v5219_v58 = vadd.f32 %v5216_v4, %v5191_v0 }
0x106e   : > { %v5328_v2 = vpop.f32.mrf.mxu2 }
0x106f   : > { %v5247_v44 = vadd.f32 %v5244_v33, %v5219_v58  ;;  %7994 = vmatmul.msk.f32.gmra.mxu3 %vm357_vm0, %v5635_v5  ;;  %v5655_v5 = vld [vmem:[%s11722_s1 + $0xf0] sm:$0xff] }
0x1070   : > { %v5440_v10 = vpop.f32.mrf.mxu1 }
0x1071   : > { %v5275_v30 = vadd.f32 %v5272_v41, %v5247_v44  ;;  %v5654_v41 = vld [vmem:[%s11722_s1 + $0xe8] sm:$0xff]  ;;  %v8285_v44 = vld [vmem:[%s11724_s3 + $0x4] sm:$0x1] }
0x1074   : > { %v5300_v16 = vpop.f32.mrf.mxu3 }
0x1075   : > { %v5303_v8 = vadd.f32 %v5300_v16, %v5275_v30  ;;  %v5656_v16 = vld [vmem:[%s11722_s1 + $0xf8] sm:$0xff] }
0x1076   : > { %v5412_v55 = vpop.f32.mrf.mxu2 }
0x1077   : > { %v5331_v51 = vadd.f32 %v5328_v2, %v5303_v8  ;;  %7995 = vmatmul.msk.f32.gmra.mxu3 %vm357_vm0, %v5636_v40  ;;  %v5657_v8 = vld [vmem:[%s11722_s1 + $0x100] sm:$0xff] }
0x1079   : > { %v5359_v11 = vadd.f32 %v5356_v23, %v5331_v51  ;;  %v5524_v1 = vpop.f32.mrf.mxu1  ;;  %v5658_v51 = vld [vmem:[%s11722_s1 + $0x108] sm:$0xff] }
0x107c   : > { %v5384_v7 = vpop.f32.mrf.mxu3 }
0x107d   : > { %v5387_v46 = vadd.f32 %v5384_v7, %v5359_v11  ;;  %v5659_v11 = vld [vmem:[%s11722_s1 + $0x110] sm:$0xff] }
0x107e   : > { %v5496_v25 = vpop.f32.mrf.mxu2 }
0x107f   : > { %v5415_v28 = vadd.f32 %v5412_v55, %v5387_v46  ;;  %7996 = vmatmul.msk.f32.gmra.mxu3 %vm357_vm0, %v5637_v36  ;;  %v5660_v36 = vld [vmem:[%s11722_s1 + $0x118] sm:$0xff] }
0x1081   : > { %v5443_v50 = vadd.f32 %v5440_v10, %v5415_v28  ;;  %v5661_v28 = vld [vmem:[%s11722_s1 + $0x120] sm:$0xff] }
0x1084   : > { %v5468_v60 = vpop.f32.mrf.mxu3 }
0x1085   : > { %v5471_v48 = vadd.f32 %v5468_v60, %v5443_v50  ;;  %v5662_v60 = vld [vmem:[%s11722_s1 + $0x128] sm:$0xf] }
0x1086   : > { %v5580_v12 = vpop.f32.mrf.mxu2 }
0x1087   : > { %v5499_v52 = vadd.f32 %v5496_v25, %v5471_v48  ;;  %7997 = vmatmul.msk.f32.gmra.mxu3 %vm357_vm0, %v5638_v18 }
0x1089   : > { %v5527_v49 = vadd.f32 %v5524_v1, %v5499_v52 }
0x108c   : > { %v5552_v62 = vpop.f32.mrf.mxu3 }
0x108d   : > { %v5555_v27 = vadd.f32 %v5552_v62, %v5527_v49 }
0x108f   : > { %v5583_v13 = vadd.f32 %v5580_v12, %v5555_v27  ;;  %7998 = vmatmul.msk.f32.gmra.mxu3 %vm357_vm0, %v5639_v22  ;;  %v11101_v22 = vld [vmem:[%s11723_s2 + $0x48] ss:$0 sm:$0xff]  ;;  %v11108_v12 = vld [vmem:[%s11723_s2] ss:$0 sm:$0xff] }
0x1091   : > { %v5584_v54 = vmax.f32 %v5583_v13, 0.0 }
0x1093   : > { %7968 = vmatmul.msk.f32.vlgmr.msra.gmra.mxu1 %vm1107_vm3, %v5584_v54 }
0x1094   : > { %6479 = vmatpush.msra.mxu1 %v8281_v15 }
0x1096   : > { %6480 = vmatpush.msra.mxu1 %v8282_v17 }
0x1097   : > { %7999 = vmatmul.msk.f32.gmra.mxu3 %vm357_vm0, %v5640_v20 }
0x1098   : > { %6481 = vmatpush.msra.mxu1 %v8283_v3  ;;  %v11118_v3 = vld [vmem:[%s11724_s3] ss:$0 sm:$0xff] }
0x109a   : > { %6482 = vmatpush.msra.mxu1 %v8284_v19 }
0x109f   : > { %8000 = vmatmul.msk.f32.gmra.mxu3 %vm357_vm0, %v5641_v38 }
0x10a2   : > { %v5794_v39 = vpop.f32.mrf.mxu3 }
0x10a3   : > { %5910 = vperm.xlu1 %8171, %v5794_v39  }
0x10a7   : > { %8001 = vmatmul.msk.f32.gmra.mxu3 %vm357_vm0, %v5642_v9 }
0x10aa   : > { %v5797_v24 = vpop.f32.mrf.mxu3 }
0x10ab   : > { %5915 = vperm.xlu0 %8172, %v5797_v24  }
0x10af   : > { %8002 = vmatmul.msk.f32.gmra.mxu3 %vm357_vm0, %v5643_v37 }
0x10b2   : > { %v5800_v63 = vpop.f32.mrf.mxu3 }
0x10b3   : > { %5920 = vperm.xlu1 %8171, %v5800_v63  }
0x10b7   : > { %8003 = vmatmul.msk.f32.gmra.mxu3 %vm357_vm0, %v5644_v56 }
0x10ba   : > { %v5803_v6 = vpop.f32.mrf.mxu3 }
0x10bb   : > { %5925 = vperm.xlu2 %8173, %v5803_v6  }
0x10bf   : > { %8004 = vmatmul.msk.f32.gmra.mxu3 %vm357_vm0, %v5645_v61 }
0x10c2   : > { %v5806_v42 = vpop.f32.mrf.mxu3 }
0x10c3   : > { %5930 = vperm.xlu1 %8171, %v5806_v42  }
0x10c7   : > { %8005 = vmatmul.msk.f32.gmra.mxu3 %vm357_vm0, %v5646_v59 }
0x10ca   : > { %v5809_v14 = vpop.f32.mrf.mxu3 }
0x10cb   : > { %5935 = vperm.xlu2 %8173, %v5809_v14  }
0x10cf   : > { %8006 = vmatmul.msk.f32.gmra.mxu3 %vm357_vm0, %v5647_v57 }
0x10d2   : > { %v5812_v45 = vpop.f32.mrf.mxu3 }
0x10d3   : > { %5940 = vperm.xlu0 %8172, %v5812_v45  }
0x10d7   : > { %8007 = vmatmul.msk.f32.gmra.mxu3 %vm357_vm0, %v5648_v47 }
0x10da   : > { %v5815_v21 = vpop.f32.mrf.mxu3 }
0x10db   : > { %5945 = vperm.xlu0 %8172, %v5815_v21  }
0x10df   : > { %8008 = vmatmul.msk.f32.gmra.mxu3 %vm357_vm0, %v5649_v32 }
0x10e2   : > { %v5818_v29 = vpop.f32.mrf.mxu3 }
0x10e3   : > { %5966 = vperm.xlu1 %8171, %v5818_v29  }
0x10e7   : > { %8009 = vmatmul.msk.f32.gmra.mxu3 %vm357_vm0, %v5650_v43 }
0x10ea   : > { %v5821_v31 = vpop.f32.mrf.mxu3 }
0x10eb   : > { %5971 = vperm.xlu2 %8173, %v5821_v31  }
0x10ef   : > { %8010 = vmatmul.msk.f32.gmra.mxu3 %vm357_vm0, %v5651_v34 }
0x10f2   : > { %v5824_v53 = vpop.f32.mrf.mxu3 }
0x10f3   : > { %5976 = vperm.xlu0 %8172, %v5824_v53  }
0x10f7   : > { %8011 = vmatmul.msk.f32.gmra.mxu3 %vm357_vm0, %v5652_v35 }
0x10fa   : > { %v5827_v33 = vpop.f32.mrf.mxu3 }
0x10fb   : > { %5981 = vperm.xlu2 %8173, %v5827_v33  }
0x10ff   : > { %8012 = vmatmul.msk.f32.gmra.mxu3 %vm357_vm0, %v5653_v26 }
0x1102   : > { %v5830_v0 = vpop.f32.mrf.mxu3 }
0x1103   : > { %5986 = vperm.xlu1 %8171, %v5830_v0  }
0x1107   : > { %8013 = vmatmul.msk.f32.gmra.mxu3 %vm357_vm0, %v5654_v41 }
0x110a   : > { %v5833_v4 = vpop.f32.mrf.mxu3 }
0x110b   : > { %5991 = vperm.xlu2 %8173, %v5833_v4  }
0x110f   : > { %8014 = vmatmul.msk.f32.gmra.mxu3 %vm357_vm0, %v5655_v5 }
0x1110   : > { %v5605_v58 = vpop.f32.mrf.mxu1 }
0x1111   : > { %v5606_v2 = vadd.f32 %v8285_v44, %v5605_v58 }
0x1112   : > { %v5836_v30 = vpop.f32.mrf.mxu3 }
0x1113   : > { %5608 = vst.msk [vmem:[%s9399_s29 + $0x2] sm:$0x1] %vm2093_vm9, %v5606_v2  ;;  %5996 = vperm.xlu1 %8171, %v5836_v30  }
0x1115   : > { %v5911_v10 = vpop.permute.xlu1 %5910  ;;  %v5926_v29 = vpop.permute.xlu2 %5925 }
0x1116   : > { %v5948_v13 = vmul.f32 %v11108_v12, %v5911_v10 }
0x1117   : > { %8015 = vmatmul.msk.f32.gmra.mxu3 %vm357_vm0, %v5656_v16 }
0x1118   : > { %v5956_v19 = vadd.f32 %v11118_v3, %v5948_v13 }
0x111a   : > { %v11062_v40 = vpop.f32.mrf.mxu3 }
0x111d   : > { %v11083_v50 = vpop.permute.xlu0 %5915 }
0x111f   : > { %8016 = vmatmul.msk.f32.gmra.mxu3 %vm357_vm0, %v5657_v8 }
0x1122   : > { %v5842_v23 = vpop.f32.mrf.mxu3 }
0x1123   : > { %6053 = vperm.xlu2 %8173, %v5842_v23  }
0x1125   : > { %v11089_v18 = vpop.permute.xlu1 %5920  ;;  %v5936_v43 = vpop.permute.xlu2 %5935 }
0x1127   : > { %8017 = vmatmul.msk.f32.gmra.mxu3 %vm357_vm0, %v5658_v51 }
0x112a   : > { %v5845_v55 = vpop.f32.mrf.mxu3 }
0x112b   : > { %6058 = vperm.xlu2 %8173, %v5845_v55  }
0x112f   : > { %8018 = vmatmul.msk.f32.gmra.mxu3 %vm357_vm0, %v5659_v11 }
0x1132   : > { %v5848_v7 = vpop.f32.mrf.mxu3 }
0x1133   : > { %6063 = vperm.xlu1 %8171, %v5848_v7  }
0x1135   : > { %v11094_v1 = vpop.permute.xlu1 %5930 }
0x1137   : > { %8019 = vmatmul.msk.f32.gmra.mxu3 %vm357_vm0, %v5660_v36  ;;  %v5951_v36 = vmul.f32 %v11108_v12, %v5926_v29 }
0x113a   : > { %v5851_v46 = vpop.f32.mrf.mxu3 }
0x113b   : > { %6068 = vperm.xlu2 %8173, %v5851_v46  }
0x113f   : > { %8020 = vmatmul.msk.f32.gmra.mxu3 %vm357_vm0, %v5661_v28 }
0x1142   : > { %v5854_v25 = vpop.f32.mrf.mxu3 }
0x1143   : > { %6073 = vperm.xlu0 %8172, %v5854_v25  }
0x1145   : > { %v11091_v48 = vpop.permute.xlu0 %5940  ;;  %v5972_v31 = vpop.permute.xlu2 %5971 }
0x1146   : > { %v6001_v55 = vmul.f32 %v11101_v22, %v5972_v31 }
0x1147   : > { %8021 = vmatmul.msk.f32.gmra.mxu3 %vm357_vm0, %v5662_v60  ;;  %v5949_v60 = vmul.f32 %v11108_v12, %v11083_v50 }
0x114a   : > { %v5857_v52 = vpop.f32.mrf.mxu3 }
0x114b   : > { %6078 = vperm.xlu2 %8173, %v5857_v52   ;;  %v5950_v52 = vmul.f32 %v11108_v12, %v11089_v18 }
0x114d   : > { %v11096_v49 = vpop.permute.xlu0 %5945 }
0x114e   : > { %v5999_v27 = vmul.f32 %v11101_v22, %v11096_v49  ;;  %v5955_v50 = vmul.f32 %v11108_v12, %v11096_v49 }
0x1150   : > { %v6015_v15 = vrot.slane %v5999_v27, 4  ;;  %v5952_v27 = vmul.f32 %v11108_v12, %v11094_v1  ;;  %v11160_v1 = vld [vmem:[%s11723_s2 + $0xd8] ss:$0 sm:$0xff] }
0x1152   : > { %v5860_v62 = vpop.f32.mrf.mxu3  ;;  %v5960_v49 = vadd.f32 %v11118_v3, %v5952_v27 }
0x1153   : > { %6083 = vperm.xlu0 %8172, %v5860_v62   ;;  %v5953_v62 = vmul.f32 %v11108_v12, %v5936_v43 }
0x1155   : > { %v5967_v54 = vpop.permute.xlu1 %5966  ;;  %v5982_v34 = vpop.permute.xlu2 %5981 }
0x1156   : > { %v11112_v20 = vmul.f32 %v11101_v22, %v5967_v54  ;;  %v6003_v46 = vmul.f32 %v11101_v22, %v5982_v34  ;;  %v6018_v54 = vrot.slane %v6001_v55, 4 }
0x1158   : > { %v6016_v17 = vrot.slane %v11112_v20, 4 }
0x115a   : > { %v5863_v38 = vpop.f32.mrf.mxu3  ;;  %v6017_v39 = vsel %vm714_vm1, %v6015_v15, %v6016_v17 }
0x115b   : > { %6104 = vperm.xlu1 %8171, %v5863_v38   ;;  %v11124_v9 = vadd.f32 %v6017_v39, %v5956_v19  ;;  %v5959_v38 = vadd.f32 %v11118_v3, %v5951_v36  ;;  %v5954_v39 = vmul.f32 %v11108_v12, %v11091_v48  ;;  %v5961_v48 = vadd.f32 %v11118_v3, %v5953_v62 }
0x1162   : > { %v5866_v24 = vpop.f32.mrf.mxu3 }
0x1163   : > { %6109 = vperm.xlu0 %8172, %v5866_v24   ;;  %v6022_v24 = vrot.slane %v6003_v46, 4 }
0x1165   : > { %v5977_v53 = vpop.permute.xlu0 %5976  ;;  %v5992_v35 = vpop.permute.xlu2 %5991 }
0x1166   : > { %v6002_v51 = vmul.f32 %v11101_v22, %v5977_v53  ;;  %v6005_v15 = vmul.f32 %v11101_v22, %v5992_v35  ;;  %v11183_v35 = vld [vmem:[%s11723_s2 + $0x90] ss:$0 sm:$0xff] }
0x1168   : > { %v6020_v28 = vrot.slane %v6002_v51, 4  ;;  %v6026_v12 = vrot.slane %v6005_v15, 4 }
0x116a   : > { %v5869_v37 = vpop.f32.mrf.mxu3 }
0x116b   : > { %6114 = vperm.xlu2 %8173, %v5869_v37   ;;  %v6021_v37 = vsel %vm714_vm1, %v6018_v54, %v6020_v28 }
0x1172   : > { %v5872_v63 = vpop.f32.mrf.mxu3 }
0x1173   : > { %6119 = vperm.xlu0 %8172, %v5872_v63   ;;  %v11164_v63 = vadd.f32 %v11118_v3, %v5949_v60 }
0x1175   : > { %v5987_v26 = vpop.permute.xlu1 %5986 }
0x1176   : > { %v6004_v11 = vmul.f32 %v11101_v22, %v5987_v26 }
0x1178   : > { %v6024_v19 = vrot.slane %v6004_v11, 4 }
0x117a   : > { %v5875_v56 = vpop.f32.mrf.mxu3 }
0x117b   : > { %6124 = vperm.xlu1 %8171, %v5875_v56   ;;  %v5958_v56 = vadd.f32 %v11118_v3, %v5950_v52 }
0x117d   : > { %v11127_v0 = vpop.permute.xlu2 %6053 }
0x1182   : > { %v5878_v6 = vpop.f32.mrf.mxu3 }
0x1183   : > { %6129 = vperm.xlu0 %8172, %v5878_v6   ;;  %v6025_v6 = vsel %vm714_vm1, %v6022_v24, %v6024_v19 }
0x1184   : > { %v6042_v34 = vadd.f32 %v6025_v6, %v5960_v49 }
0x1185   : > { %v5997_v4 = vpop.permute.xlu1 %5996  ;;  %v6059_v58 = vpop.permute.xlu2 %6058 }
0x1186   : > { %v6006_v10 = vmul.f32 %v11101_v22, %v5997_v4  ;;  %v6088_v51 = vmul.f32 %v11183_v35, %v6059_v58 }
0x1188   : > { %v6028_v18 = vrot.slane %v6006_v10, 4 }
0x118a   : > { %v5881_v61 = vpop.f32.mrf.mxu3 }
0x118b   : > { %6134 = vperm.xlu1 %8171, %v5881_v61   ;;  %v6023_v61 = vsel %vm714_vm1, %v6020_v28, %v6022_v24 }
0x118c   : > { %v6041_v53 = vadd.f32 %v6023_v61, %v5959_v38 }
0x1192   : > { %v5884_v42 = vpop.f32.mrf.mxu3 }
0x1195   : > { %v6069_v30 = vpop.permute.xlu2 %6068 }
0x1196   : > { %v6090_v36 = vmul.f32 %v11183_v35, %v6069_v30 }
0x119a   : > { %v5887_v59 = vpop.f32.mrf.mxu3 }
0x11a2   : > { %v5890_v14 = vpop.f32.mrf.mxu3 }
0x11a5   : > { %v11131_v44 = vpop.permute.xlu1 %6063  ;;  %v6079_v8 = vpop.permute.xlu2 %6078 }
0x11a6   : > { %v6092_v20 = vmul.f32 %v11183_v35, %v6079_v8 }
0x11aa   : > { %v5893_v57 = vpop.f32.mrf.mxu3 }
0x11b2   : > { %v5896_v45 = vpop.f32.mrf.mxu3 }
0x11b3   : > { %6206 = vperm.xlu0 %8172, %v5896_v45   ;;  %v6019_v45 = vsel %vm714_vm1, %v6016_v17, %v6018_v54 }
0x11b5   : > { %v6074_v33 = vpop.permute.xlu0 %6073 }
0x11ba   : > { %v5899_v47 = vpop.f32.mrf.mxu3 }
0x11bb   : > { %6211 = vperm.xlu2 %8173, %v5899_v47   ;;  %v6040_v47 = vadd.f32 %v6021_v37, %v5958_v56  ;;  %v6087_v56 = vmul.f32 %v11183_v35, %v11127_v0 }
0x11c2   : > { %v5902_v21 = vpop.f32.mrf.mxu3 }
0x11c3   : > { %6196 = vperm.xlu2 %8173, %v5890_v14   ;;  %6216 = vperm.xlu0 %8172, %v5902_v21   ;;  %v5962_v14 = vadd.f32 %v11118_v3, %v5954_v39  ;;  %v6029_v21 = vsel %vm714_vm1, %v6026_v12, %v6028_v18 }
0x11c5   : > { %v11129_v41 = vpop.permute.xlu0 %6083  ;;  %v6115_v25 = vpop.permute.xlu2 %6114  ;;  %v6044_v55 = vadd.f32 %v6029_v21, %v5962_v14  ;;  %v6039_v14 = vadd.f32 %v6019_v45, %v11164_v63 }
0x11c6   : > { %v6093_v17 = vmul.f32 %v11183_v35, %v11129_v41  ;;  %v6140_v46 = vmul.f32 %v11160_v1, %v6115_v25  ;;  %v6137_v45 = vmul.f32 %v11160_v1, %v11129_v41 }
0x11c7   : > { %v6100_v10 = vadd.f32 %v6092_v20, %v6044_v55 }
0x11c8   : > { %v6158_v38 = vrot.slane %v6140_v46, 4 }
0x11ca   : > { %v5905_v32 = vpop.f32.mrf.mxu3 }
0x11cb   : > { %6201 = vperm.xlu0 %8172, %v5893_v57   ;;  %6221 = vperm.xlu1 %8171, %v5905_v32   ;;  %v5963_v57 = vadd.f32 %v11118_v3, %v5955_v50  ;;  %v6027_v32 = vsel %vm714_vm1, %v6024_v19, %v6026_v12  ;;  %v6091_v3 = vmul.f32 %v11183_v35, %v6074_v33 }
0x11cc   : > { %v6043_v11 = vadd.f32 %v6027_v32, %v5961_v48  ;;  %v6089_v33 = vmul.f32 %v11183_v35, %v11131_v44  ;;  %v6098_v19 = vadd.f32 %v6090_v36, %v6042_v34 }
0x11cd   : > { %v11133_v16 = vpop.permute.xlu1 %6104 }
0x11ce   : > { %v6099_v60 = vadd.f32 %v6091_v3, %v6043_v11  ;;  %v6138_v39 = vmul.f32 %v11160_v1, %v11133_v16  ;;  %v6097_v48 = vadd.f32 %v6089_v33, %v6041_v53  ;;  %v6153_v11 = vrot.slane %v6137_v45, 4 }
0x11d3   : > { %6191 = vperm.xlu0 %8172, %v5887_v59   ;;  %6048 = vperm.xlu1 %8171, %v11062_v40  }
0x11d5   : > { %v6110_v5 = vpop.permute.xlu0 %6109 }
0x11d6   : > { %v6139_v26 = vmul.f32 %v11160_v1, %v6110_v5 }
0x11d8   : > { %v6156_v52 = vrot.slane %v6139_v26, 4 }
0x11da   : > { %v6159_v49 = vsel %vm714_vm1, %v6156_v52, %v6158_v38 }
0x11db   : > { %6186 = vperm.xlu1 %8171, %v5884_v42  }
0x11e5   : > { %v6120_v2 = vpop.permute.xlu0 %6119 }
0x11e6   : > { %v6141_v4 = vmul.f32 %v11160_v1, %v6120_v2  ;;  %v11200_v2 = vld [vmem:[%s11723_s2 + $0x120] ss:$0 sm:$0xff] }
0x11e8   : > { %v6160_v30 = vrot.slane %v6141_v4, 4 }
0x11ea   : > { %v6161_v6 = vsel %vm714_vm1, %v6158_v38, %v6160_v30  ;;  %v6256_v38 = vld [vmem:[%s11722_s1 + $0x170] sm:$0xff] }
0x11eb   : > { %v6179_v0 = vadd.f32 %v6161_v6, %v6097_v48  ;;  %v6264_v48 = vld [vmem:[%s11722_s1 + $0x1b0] sm:$0xff] }
0x11ec   : > { %v8300_v6 = vld [vmem:[%s11723_s2 + $0xb0] sm:$0xff] }
0x11ed   : > { %v6125_v23 = vpop.permute.xlu1 %6124 }
0x11ee   : > { %v6142_v29 = vmul.f32 %v11160_v1, %v6125_v23  ;;  %v6045_v23 = vadd.f32 %v6028_v18, %v5963_v57  ;;  %v6096_v57 = vadd.f32 %v6088_v51, %v6040_v47 }
0x11f0   : > { %v6162_v8 = vrot.slane %v6142_v29, 4  ;;  %v6101_v5 = vadd.f32 %v6093_v17, %v6045_v23 }
0x11f2   : > { %v6163_v50 = vsel %vm714_vm1, %v6160_v30, %v6162_v8  ;;  %v8297_v30 = vld [vmem:[%s11723_s2 + $0x158] sm:$0xff] }
0x11f5   : > { %v6130_v40 = vpop.permute.xlu0 %6129 }
0x11f6   : > { %v6143_v42 = vmul.f32 %v11160_v1, %v6130_v40 }
0x11f8   : > { %v6164_v40 = vrot.slane %v6143_v42, 4  ;;  %v6180_v42 = vadd.f32 %v6163_v50, %v6098_v19  ;;  %v6255_v19 = vld [vmem:[%s11722_s1 + $0x168] sm:$0xff]  ;;  %v6258_v50 = vld [vmem:[%s11722_s1 + $0x180] sm:$0xff] }
0x11fa   : > { %v6165_v25 = vsel %vm714_vm1, %v6162_v8, %v6164_v40 }
0x11fb   : > { %v6181_v24 = vadd.f32 %v6165_v25, %v6099_v60  ;;  %v8295_v60 = vld [vmem:[%s11723_s2 + $0xb8] sm:$0xff]  ;;  %v6250_v25 = vld [vmem:[%s11722_s1 + $0x140] sm:$0xff] }
0x11fd   : > { %v6135_v13 = vpop.permute.xlu1 %6134 }
0x11fe   : > { %v6144_v22 = vmul.f32 %v11160_v1, %v6135_v13 }
0x1200   : > { %v6166_v43 = vrot.slane %v6144_v22, 4 }
0x1202   : > { %v6167_v28 = vsel %vm714_vm1, %v6164_v40, %v6166_v43  ;;  %v6183_v13 = vadd.f32 %v6166_v43, %v6101_v5  ;;  %v6095_v43 = vadd.f32 %v6087_v56, %v6039_v14  ;;  %v8293_v5 = vld [vmem:[%s11723_s2 + $0xc8] sm:$0xff]  ;;  %v6266_v14 = vld [vmem:[%s11722_s1 + $0x1c0] sm:$0x3f] }
0x1203   : > { %v6182_v44 = vadd.f32 %v6167_v28, %v6100_v10  ;;  %v6248_v10 = vld [vmem:[%s11722_s1 + $0x130] sm:$0xff]  ;;  %v6263_v56 = vld [vmem:[%s11722_s1 + $0x1a8] sm:$0xff] }
0x1215   : > { %v6212_v31 = vpop.permute.xlu2 %6211 }
0x1216   : > { %v6229_v54 = vmul.f32 %v11200_v2, %v6212_v31  ;;  %v6178_v31 = vadd.f32 %v6159_v49, %v6096_v57 }
0x1218   : > { %v6237_v61 = vadd.f32 %v6229_v54, %v6181_v24  ;;  %v6252_v54 = vld [vmem:[%s11722_s1 + $0x150] sm:$0xff]  ;;  %v6259_v24 = vld [vmem:[%s11722_s1 + $0x188] sm:$0xff] }
0x121a   : > { %v6245_v17 = vmax.f32 %v6237_v61, 0.0  ;;  %v8301_v61 = vld [vmem:[%s11723_s2 + $0xa8] sm:$0xff] }
0x121d   : > { %v6197_v12 = vpop.permute.xlu2 %6196 }
0x121e   : > { %v6226_v21 = vmul.f32 %v11200_v2, %v6197_v12  ;;  %v6265_v12 = vld [vmem:[%s11722_s1 + $0x1b8] sm:$0xff] }
0x1220   : > { %v6234_v47 = vadd.f32 %v6226_v21, %v6178_v31  ;;  %v8305_v31 = vld [vmem:[%s11723_s2 + $0x138] sm:$0xff] }
0x1222   : > { %v6242_v36 = vmax.f32 %v6234_v47, 0.0 }
0x1225   : > { %v11138_v7 = vpop.permute.xlu0 %6206 }
0x1226   : > { %v6228_v18 = vmul.f32 %v11200_v2, %v11138_v7  ;;  %v6154_v7 = vrot.slane %v6138_v39, 4  ;;  %v6257_v39 = vld [vmem:[%s11722_s1 + $0x178] sm:$0xff] }
0x1228   : > { %v6236_v32 = vadd.f32 %v6228_v18, %v6180_v42  ;;  %v6157_v34 = vsel %vm714_vm1, %v6154_v7, %v6156_v52  ;;  %v6155_v46 = vsel %vm714_vm1, %v6153_v11, %v6154_v7  ;;  %v8296_v52 = vld [vmem:[%s11723_s2 + $0x160] sm:$0xff]  ;;  %v6260_v18 = vld [vmem:[%s11722_s1 + $0x190] sm:$0xff] }
0x1229   : > { %v6177_v40 = vadd.f32 %v6157_v34, %v6095_v43  ;;  %v8302_v42 = vld [vmem:[%s11723_s2 + $0xa0] sm:$0xff] }
0x122a   : > { %v6244_v4 = vmax.f32 %v6236_v32, 0.0  ;;  %v8304_v43 = vld [vmem:[%s11723_s2 + $0x140] sm:$0xff] }
0x1235   : > { %v6217_v59 = vpop.permute.xlu0 %6216 }
0x1236   : > { %v6230_v58 = vmul.f32 %v11200_v2, %v6217_v59 }
0x1238   : > { %v6238_v37 = vadd.f32 %v6230_v58, %v6182_v44  ;;  %v8294_v58 = vld [vmem:[%s11723_s2 + $0xc0] sm:$0xff]  ;;  %v6253_v44 = vld [vmem:[%s11722_s1 + $0x158] sm:$0xff] }
0x123a   : > { %v6246_v29 = vmax.f32 %v6238_v37, 0.0  ;;  %v6261_v37 = vld [vmem:[%s11722_s1 + $0x198] sm:$0xff] }
0x123d   : > { %v6202_v62 = vpop.permute.xlu0 %6201  ;;  %v6222_v27 = vpop.permute.xlu1 %6221 }
0x123e   : > { %v6231_v15 = vmul.f32 %v11200_v2, %v6222_v27  ;;  %v6227_v16 = vmul.f32 %v11200_v2, %v6202_v62  ;;  %v8298_v62 = vld [vmem:[%s11723_s2 + $0x150] sm:$0xff]  ;;  %v8299_v27 = vld [vmem:[%s11723_s2 + $0x148] sm:$0xff] }
0x1240   : > { %v6239_v22 = vadd.f32 %v6231_v15, %v6183_v13  ;;  %v6235_v3 = vadd.f32 %v6227_v16, %v6179_v0  ;;  %v6251_v13 = vld [vmem:[%s11722_s1 + $0x148] sm:$0xff]  ;;  %v6254_v15 = vld [vmem:[%s11722_s1 + $0x160] sm:$0xff] }
0x1242   : > { %v6247_v59 = vmax.f32 %v6239_v22, 0.0  ;;  %v6243_v23 = vmax.f32 %v6235_v3, 0.0  ;;  %v6262_v22 = vld [vmem:[%s11722_s1 + $0x1a0] sm:$0xff]  ;;  %v8307_v3 = vld [vmem:[%s11723_s2 + $0x128] sm:$0xff] }
0x1244   : > { %8022 = vmatpush.msk.msrb.mxu2 %vm714_vm1, %v6247_v59  ;;  %v8303_v59 = vld [vmem:[%s11723_s2 + $0x98] sm:$0xff] }
0x1245   : > { %v6192_v53 = vpop.permute.xlu0 %6191  ;;  %v6049_v20 = vpop.permute.xlu1 %6048 }
0x1246   : > { %v6225_v26 = vmul.f32 %v11200_v2, %v6192_v53  ;;  %v6086_v63 = vmul.f32 %v11183_v35, %v6049_v20  ;;  %6336 = vmatpush.msrb.mxu2 %v6246_v29  ;;  %v8306_v20 = vld [vmem:[%s11723_s2 + $0x130] sm:$0xff] }
0x1248   : > { %6337 = vmatpush.msrb.mxu2 %v6245_v17  ;;  %v6233_v51 = vadd.f32 %v6225_v26, %v6177_v40  ;;  %v6094_v55 = vadd.f32 %v6086_v63, %v11124_v9  ;;  %v8292_v9 = vld [vmem:[%s11723_s2 + $0xd0] sm:$0xff] }
0x124a   : > { %6338 = vmatpush.msrb.mxu2 %v6244_v4  ;;  %v6241_v35 = vmax.f32 %v6233_v51, 0.0  ;;  %v6176_v28 = vadd.f32 %v6155_v46, %v6094_v55  ;;  %v8309_v46 = vld [vmem:[%s11723_s2 + $0x38] sm:$0xff] }
0x124c   : > { %6339 = vmatpush.msrb.mxu2 %v6243_v23 }
0x124d   : > { %v6187_v8 = vpop.permute.xlu1 %6186 }
0x124e   : > { %v6224_v33 = vmul.f32 %v11200_v2, %v6187_v8  ;;  %6340 = vmatpush.msrb.mxu2 %v6242_v36  ;;  %v6249_v2 = vld [vmem:[%s11722_s1 + $0x138] sm:$0xff]  ;;  %v8308_v36 = vld [vmem:[%s11723_s2 + $0x40] sm:$0xff] }
0x1250   : > { %v6232_v41 = vadd.f32 %v6224_v33, %v6176_v28  ;;  %6341 = vmatpush.msrb.mxu2 %v6241_v35  ;;  %v8310_v28 = vld [vmem:[%s11723_s2 + $0x30] sm:$0xff] }
0x1252   : > { %v6240_v1 = vmax.f32 %v6232_v41, 0.0  ;;  %v8311_v41 = vld [vmem:[%s11723_s2 + $0x28] sm:$0xff] }
0x1254   : > { %6342 = vmatpush.msrb.mxu2 %v6240_v1 }
0x1255   : > { %8023 = vmatmul.msk.f32.vlgmr.msrb.gmra.mxu2 %vm970_vm2, %v6248_v10 }
0x1256   : > { %6834 = vmatpush.msra.mxu2 %v8292_v9 }
0x1258   : > { %6835 = vmatpush.msra.mxu2 %v8293_v5 }
0x125a   : > { %6836 = vmatpush.msra.mxu2 %v8294_v58 }
0x125c   : > { %6837 = vmatpush.msra.mxu2 %v8295_v60 }
0x125d   : > { %8024 = vmatmul.msk.f32.gmra.mxu2 %vm970_vm2, %v6249_v2 }
0x125e   : > { %6906 = vmatpush.msrb.mxu2 %v8296_v52 }
0x1260   : > { %6907 = vmatpush.msrb.mxu2 %v8297_v30 }
0x1262   : > { %6908 = vmatpush.msrb.mxu2 %v8298_v62 }
0x1264   : > { %6909 = vmatpush.msrb.mxu2 %v8299_v27 }
0x1265   : > { %8025 = vmatmul.msk.f32.gmra.mxu2 %vm970_vm2, %v6250_v25 }
0x126d   : > { %8026 = vmatmul.msk.f32.gmra.mxu2 %vm970_vm2, %v6251_v13 }
0x1275   : > { %8027 = vmatmul.msk.f32.gmra.mxu2 %vm970_vm2, %v6252_v54 }
0x127d   : > { %8028 = vmatmul.msk.f32.gmra.mxu2 %vm970_vm2, %v6253_v44 }
0x1285   : > { %8029 = vmatmul.msk.f32.gmra.mxu2 %vm970_vm2, %v6254_v15 }
0x128d   : > { %8030 = vmatmul.msk.f32.gmra.mxu2 %vm970_vm2, %v6255_v19 }
0x1295   : > { %8031 = vmatmul.msk.f32.gmra.mxu2 %vm970_vm2, %v6256_v38  ;;  %v8312_v38 = vld [vmem:[%s11723_s2 + $0x88] sm:$0xff] }
0x129d   : > { %8032 = vmatmul.msk.f32.gmra.mxu2 %vm970_vm2, %v6257_v39  ;;  %v8313_v39 = vld [vmem:[%s11723_s2 + $0x80] sm:$0xff] }
0x12a5   : > { %8033 = vmatmul.msk.f32.gmra.mxu2 %vm970_vm2, %v6258_v50  ;;  %v8314_v50 = vld [vmem:[%s11723_s2 + $0x78] sm:$0xff] }
0x12ad   : > { %8034 = vmatmul.msk.f32.gmra.mxu2 %vm970_vm2, %v6259_v24 }
0x12b5   : > { %8035 = vmatmul.msk.f32.gmra.mxu2 %vm970_vm2, %v6260_v18  ;;  %v8315_v18 = vld [vmem:[%s11723_s2 + $0x70] sm:$0xff] }
0x12bd   : > { %8036 = vmatmul.msk.f32.gmra.mxu2 %vm970_vm2, %v6261_v37 }
0x12c5   : > { %8037 = vmatmul.msk.f32.gmra.mxu2 %vm970_vm2, %v6262_v22 }
0x12cd   : > { %8038 = vmatmul.msk.f32.gmra.mxu2 %vm970_vm2, %v6263_v56 }
0x12d5   : > { %8039 = vmatmul.msk.f32.gmra.mxu2 %vm970_vm2, %v6264_v48 }
0x12d8   : > { %v6344_v49 = vpop.f32.mrf.mxu2 }
0x12d9   : > { %8042 = vmatmul.msk.f32.vlgmr.msrb.gmra.mxu1 %vm1107_vm3, %v6344_v49 }
0x12da   : > { %6533 = vmatpush.msrb.mxu1 %v8300_v6 }
0x12dc   : > { %6534 = vmatpush.msrb.mxu1 %v8301_v61 }
0x12dd   : > { %8040 = vmatmul.msk.f32.gmra.mxu2 %vm970_vm2, %v6265_v12 }
0x12de   : > { %6535 = vmatpush.msrb.mxu1 %v8302_v42 }
0x12e0   : > { %v6347_v16 = vpop.f32.mrf.mxu2  ;;  %6536 = vmatpush.msrb.mxu1 %v8303_v59 }
0x12e1   : > { %8043 = vmatmul.msk.f32.gmra.mxu1 %vm1107_vm3, %v6347_v16 }
0x12e5   : > { %8041 = vmatmul.msk.f32.gmra.mxu2 %vm970_vm2, %v6266_v14 }
0x12e8   : > { %v6350_v57 = vpop.f32.mrf.mxu2 }
0x12e9   : > { %8044 = vmatmul.msk.f32.gmra.mxu1 %vm1107_vm3, %v6350_v57 }
0x12f0   : > { %v6353_v7 = vpop.f32.mrf.mxu2 }
0x12f1   : > { %8045 = vmatmul.msk.f32.gmra.mxu1 %vm1107_vm3, %v6353_v7  ;;  %v6450_v32 = vrot.slane %v6353_v7, 6 }
0x12f8   : > { %v6356_v21 = vpop.f32.mrf.mxu2 }
0x12f9   : > { %v6451_v29 = vrot.slane %v6356_v21, 6 }
0x12fb   : > { %v6452_v0 = vsel %vm1157_vm4, %v6450_v32, %v6451_v29 }
0x12fc   : > { %8046 = vmatmul.msk.f32.vlgmr.msra.gmra.mxu1 %vm1107_vm3, %v6452_v0 }
0x12fd   : > { %6629 = vmatpush.msra.mxu1 %v8304_v43 }
0x12ff   : > { %6630 = vmatpush.msra.mxu1 %v8305_v31 }
0x1300   : > { %v6359_v34 = vpop.f32.mrf.mxu2 }
0x1301   : > { %v6453_v53 = vrot.slane %v6359_v34, 6  ;;  %6631 = vmatpush.msra.mxu1 %v8306_v20  ;;  %v8316_v34 = vld [vmem:[%s11724_s3 + $0x1] ss:$0 sm:$0xff] }
0x1303   : > { %v6454_v17 = vsel %vm1157_vm4, %v6451_v29, %v6453_v53  ;;  %6632 = vmatpush.msra.mxu1 %v8307_v3 }
0x1304   : > { %8047 = vmatmul.msk.f32.gmra.mxu1 %vm1107_vm3, %v6454_v17 }
0x1308   : > { %v6362_v26 = vpop.f32.mrf.mxu2 }
0x1309   : > { %v6455_v63 = vrot.slane %v6362_v26, 6 }
0x130b   : > { %v6456_v45 = vsel %vm1157_vm4, %v6453_v53, %v6455_v63 }
0x130c   : > { %8048 = vmatmul.msk.f32.gmra.mxu1 %vm1107_vm3, %v6456_v45 }
0x1310   : > { %v6365_v47 = vpop.f32.mrf.mxu2 }
0x1311   : > { %v6457_v4 = vrot.slane %v6365_v47, 6  ;;  %v6504_v51 = vrot.slane %v6365_v47, 4 }
0x1313   : > { %v6458_v40 = vsel %vm1157_vm4, %v6455_v63, %v6457_v4 }
0x1314   : > { %8049 = vmatmul.msk.f32.gmra.mxu1 %vm1107_vm3, %v6458_v40 }
0x1318   : > { %v6368_v23 = vpop.f32.mrf.mxu2 }
0x1319   : > { %v6505_v55 = vrot.slane %v6368_v23, 4 }
0x131b   : > { %v6506_v11 = vsel %vm714_vm1, %v6504_v51, %v6505_v55 }
0x131c   : > { %8050 = vmatmul.msk.f32.vlgmr.msrb.gmra.mxu1 %vm1107_vm3, %v6506_v11 }
0x131d   : > { %6762 = vmatpush.msrb.mxu1 %v8308_v36 }
0x131f   : > { %6763 = vmatpush.msrb.mxu1 %v8309_v46 }
0x1320   : > { %v6371_v8 = vpop.f32.mrf.mxu2 }
0x1321   : > { %v6507_v35 = vrot.slane %v6371_v8, 4  ;;  %6764 = vmatpush.msrb.mxu1 %v8310_v28 }
0x1323   : > { %v6508_v33 = vsel %vm714_vm1, %v6505_v55, %v6507_v35  ;;  %6765 = vmatpush.msrb.mxu1 %v8311_v41 }
0x1324   : > { %8051 = vmatmul.msk.f32.gmra.mxu1 %vm1107_vm3, %v6508_v33 }
0x1328   : > { %v6374_v1 = vpop.f32.mrf.mxu2 }
0x1329   : > { %v6509_v10 = vrot.slane %v6374_v1, 4 }
0x132b   : > { %v6510_v9 = vsel %vm714_vm1, %v6507_v35, %v6509_v10 }
0x132c   : > { %8052 = vmatmul.msk.f32.gmra.mxu1 %vm1107_vm3, %v6510_v9 }
0x1330   : > { %v6377_v5 = vpop.f32.mrf.mxu2 }
0x1331   : > { %v6511_v2 = vrot.slane %v6377_v5, 4  ;;  %v6557_v52 = vrot.slane %v6377_v5, 2 }
0x1333   : > { %v6512_v58 = vsel %vm714_vm1, %v6509_v10, %v6511_v2 }
0x1334   : > { %8053 = vmatmul.msk.f32.gmra.mxu1 %vm1107_vm3, %v6512_v58  ;;  %v6654_v58 = vld [vmem:[%s11722_s1 + $0x1c8] sm:$0xff] }
0x1338   : > { %v6380_v60 = vpop.f32.mrf.mxu2 }
0x1339   : > { %v6558_v30 = vrot.slane %v6380_v60, 2  ;;  %v6655_v60 = vld [vmem:[%s11722_s1 + $0x1d0] sm:$0xff] }
0x133b   : > { %v6559_v25 = vsel %vm1265_vm5, %v6557_v52, %v6558_v30  ;;  %v6656_v52 = vld [vmem:[%s11722_s1 + $0x1d8] sm:$0xff] }
0x133c   : > { %8054 = vmatmul.msk.f32.vlgmr.msra.gmra.mxu0 %vm1107_vm3, %v6559_v25  ;;  %v6658_v25 = vld [vmem:[%s11722_s1 + $0x1e8] sm:$0xff] }
0x1340   : > { %v6383_v62 = vpop.f32.mrf.mxu2 }
0x1341   : > { %v6560_v27 = vrot.slane %v6383_v62, 2  ;;  %v6659_v62 = vld [vmem:[%s11722_s1 + $0x1f0] sm:$0xff] }
0x1343   : > { %v6561_v13 = vsel %vm1265_vm5, %v6558_v30, %v6560_v27  ;;  %v6657_v30 = vld [vmem:[%s11722_s1 + $0x1e0] sm:$0xff] }
0x1344   : > { %8055 = vmatmul.msk.f32.gmra.mxu0 %vm1107_vm3, %v6561_v13  ;;  %v6661_v13 = vld [vmem:[%s11722_s1 + $0x200] sm:$0xff] }
0x1348   : > { %v6386_v54 = vpop.f32.mrf.mxu2 }
0x1349   : > { %v6562_v44 = vrot.slane %v6386_v54, 2  ;;  %v6662_v54 = vld [vmem:[%s11722_s1 + $0x208] sm:$0xff] }
0x134b   : > { %v6563_v15 = vsel %vm1265_vm5, %v6560_v27, %v6562_v44  ;;  %v6660_v27 = vld [vmem:[%s11722_s1 + $0x1f8] sm:$0xff] }
0x134c   : > { %8056 = vmatmul.msk.f32.gmra.mxu0 %vm1107_vm3, %v6563_v15 }
0x1350   : > { %v6389_v19 = vpop.f32.mrf.mxu2 }
0x1351   : > { %8058 = vmatmul.msk.f32.vlgmr.msra.gmra.mxu1 %vm1107_vm3, %v6389_v19  ;;  %v8317_v19 = vld [vmem:[%s11723_s2 + $0x118] sm:$0xff] }
0x1352   : > { %6798 = vmatpush.msra.mxu1 %v8312_v38  ;;  %v8318_v38 = vld [vmem:[%s11723_s2 + $0x110] sm:$0xff] }
0x1354   : > { %8057 = vmatmul.msk.f32.gmra.mxu0 %vm1107_vm3, %v6562_v44  ;;  %6799 = vmatpush.msra.mxu1 %v8313_v39  ;;  %v6663_v44 = vld [vmem:[%s11722_s1 + $0x210] sm:$0x7]  ;;  %v8319_v39 = vld [vmem:[%s11723_s2 + $0x108] sm:$0xff] }
0x1356   : > { %6800 = vmatpush.msra.mxu1 %v8314_v50  ;;  %v6430_v37 = vpop.f32.mrf.mxu1 }
0x1357   : > { %v6442_v45 = vadd.f32 %v8316_v34, %v6430_v37 }
0x1358   : > { %v6392_v24 = vpop.f32.mrf.mxu2  ;;  %6801 = vmatpush.msra.mxu1 %v8315_v18 }
0x1359   : > { %8059 = vmatmul.msk.f32.gmra.mxu1 %vm1107_vm3, %v6392_v24  ;;  %v8320_v24 = vld [vmem:[%s11723_s2 + $0x100] sm:$0xff] }
0x135e   : > { %v6433_v56 = vpop.f32.mrf.mxu1 }
0x135f   : > { %v6443_v17 = vadd.f32 %v8316_v34, %v6433_v56 }
0x1360   : > { %v6395_v22 = vpop.f32.mrf.mxu2 }
0x1361   : > { %8060 = vmatmul.msk.f32.gmra.mxu1 %vm1107_vm3, %v6395_v22 }
0x1366   : > { %v6436_v49 = vpop.f32.mrf.mxu1 }
0x1367   : > { %v6444_v53 = vadd.f32 %v8316_v34, %v6436_v49 }
0x1368   : > { %v6398_v48 = vpop.f32.mrf.mxu2 }
0x1369   : > { %8061 = vmatmul.msk.f32.gmra.mxu1 %vm1107_vm3, %v6398_v48 }
0x136e   : > { %v6439_v12 = vpop.f32.mrf.mxu1 }
0x136f   : > { %v6445_v20 = vadd.f32 %v8316_v34, %v6439_v12 }
0x1379   : > { %v6484_v6 = vpop.f32.mrf.mxu1 }
0x137a   : > { %v6496_v23 = vadd.f32 %v6484_v6, %v6442_v45  ;;  %v8112_v45 = vld [vmem:[%s11725_s4 + $0xd8] sm:$0xff] }
0x1381   : > { %v6487_v61 = vpop.f32.mrf.mxu1 }
0x1382   : > { %v6497_v47 = vadd.f32 %v6487_v61, %v6443_v17 }
0x1389   : > { %v6490_v42 = vpop.f32.mrf.mxu1 }
0x138a   : > { %v6498_v3 = vadd.f32 %v6490_v42, %v6444_v53 }
0x1391   : > { %v6493_v16 = vpop.f32.mrf.mxu1 }
0x1392   : > { %v6499_v26 = vadd.f32 %v6493_v16, %v6445_v20 }
0x1399   : > { %v6538_v59 = vpop.f32.mrf.mxu1 }
0x139a   : > { %v6550_v46 = vadd.f32 %v6538_v59, %v6496_v23  ;;  %v6923_v23 = vld [vmem:[%s11725_s4 + $0x10] sm:$0xff] }
0x13a1   : > { %v6541_v14 = vpop.f32.mrf.mxu1 }
0x13a2   : > { %v6551_v51 = vadd.f32 %v6541_v14, %v6497_v47  ;;  %v6924_v47 = vld [vmem:[%s11725_s4 + $0x18] sm:$0xff] }
0x13a9   : > { %v6544_v57 = vpop.f32.mrf.mxu1 }
0x13aa   : > { %v6552_v4 = vadd.f32 %v6544_v57, %v6498_v3 }
0x13b1   : > { %v6547_v21 = vpop.f32.mrf.mxu1 }
0x13b2   : > { %v6553_v40 = vadd.f32 %v6547_v21, %v6499_v26 }
0x13b9   : > { %v6589_v7 = vpop.f32.mrf.mxu0 }
0x13ba   : > { %v6601_v33 = vadd.f32 %v6589_v7, %v6550_v46  ;;  %v6921_v46 = vld [vmem:[%s11725_s4] sm:$0xff] }
0x13c1   : > { %v6592_v32 = vpop.f32.mrf.mxu0 }
0x13c2   : > { %v6602_v8 = vadd.f32 %v6592_v32, %v6551_v51  ;;  %v8092_v51 = vld [vmem:[%s11725_s4 + $0x58] sm:$0xff] }
0x13c9   : > { %v6595_v43 = vpop.f32.mrf.mxu0 }
0x13ca   : > { %v6603_v55 = vadd.f32 %v6595_v43, %v6552_v4  ;;  %v8111_v4 = vld [vmem:[%s11725_s4 + $0xd0] sm:$0xff] }
0x13ce   : > { %v6634_v29 = vpop.f32.mrf.mxu1 }
0x13cf   : > { %v6646_v10 = vadd.f32 %v6634_v29, %v6601_v33  ;;  %v8089_v33 = vld [vmem:[%s11725_s4 + $0x40] sm:$0xff] }
0x13d1   : > { %v6598_v63 = vpop.f32.mrf.mxu0  ;;  %v6650_v2 = vmax.f32 %v6646_v10, 0.0  ;;  %v8102_v10 = vld [vmem:[%s11725_s4 + $0x98] sm:$0xff] }
0x13d2   : > { %v6604_v11 = vadd.f32 %v6598_v63, %v6553_v40 }
0x13d6   : > { %v6637_v0 = vpop.f32.mrf.mxu1 }
0x13d7   : > { %v6647_v41 = vadd.f32 %v6637_v0, %v6602_v8  ;;  %v8090_v8 = vld [vmem:[%s11725_s4 + $0x48] sm:$0xff] }
0x13d9   : > { %v6651_v5 = vmax.f32 %v6647_v41, 0.0  ;;  %v8109_v41 = vld [vmem:[%s11725_s4 + $0xc0] sm:$0xff] }
0x13de   : > { %v6640_v31 = vpop.f32.mrf.mxu1 }
0x13df   : > { %v6648_v35 = vadd.f32 %v6640_v31, %v6603_v55 }
0x13e1   : > { %v6652_v9 = vmax.f32 %v6648_v35, 0.0  ;;  %v8110_v35 = vld [vmem:[%s11725_s4 + $0xc8] sm:$0xff] }
0x13e6   : > { %v6643_v36 = vpop.f32.mrf.mxu1 }
0x13e7   : > { %v6649_v28 = vadd.f32 %v6643_v36, %v6604_v11  ;;  %v6922_v11 = vld [vmem:[%s11725_s4 + $0x8] sm:$0xff]  ;;  %v8091_v36 = vld [vmem:[%s11725_s4 + $0x50] sm:$0xff] }
0x13e9   : > { %v6653_v1 = vmax.f32 %v6649_v28, 0.0  ;;  %v8087_v28 = vld [vmem:[%s11725_s4 + $0x38] sm:$0xff] }
0x13eb   : > { %8062 = vmatpush.msk.msrb.mxu0 %vm1265_vm5, %v6653_v1  ;;  %v8086_v1 = vld [vmem:[%s11725_s4 + $0x30] sm:$0xff] }
0x13ed   : > { %6710 = vmatpush.msrb.mxu0 %v6652_v9  ;;  %v8127_v9 = vld [vmem:[%s11725_s4 + $0x138] sm:$0xff] }
0x13ef   : > { %6711 = vmatpush.msrb.mxu0 %v6651_v5 }
0x13f1   : > { %6712 = vmatpush.msrb.mxu0 %v6650_v2  ;;  %v8085_v2 = vld [vmem:[%s11725_s4 + $0x28] sm:$0xff] }
0x13f2   : > { %8063 = vmatmul.msk.f32.vlgmr.msrb.gmra.mxu0 %vm1373_vm6, %v6654_v58  ;;  %v8101_v58 = vld [vmem:[%s11725_s4 + $0x90] sm:$0xff] }
0x13f3   : > { %7108 = vmatpush.msra.mxu0 %v8112_v45  ;;  %v8139_v45 = vld [vmem:[%s11725_s4 + $0x180] sm:$0xff] }
0x13f5   : > { %7109 = vmatpush.msra.mxu0 %v8111_v4  ;;  %v8132_v4 = vld [vmem:[%s11725_s4 + $0x158] sm:$0xff] }
0x13f7   : > { %7110 = vmatpush.msra.mxu0 %v8110_v35 }
0x13f9   : > { %7111 = vmatpush.msra.mxu0 %v8109_v41  ;;  %v8121_v41 = vld [vmem:[%s11725_s4 + $0x110] sm:$0xff] }
0x13fa   : > { %8064 = vmatmul.msk.f32.gmra.mxu0 %vm1373_vm6, %v6655_v60  ;;  %v8126_v60 = vld [vmem:[%s11725_s4 + $0x130] sm:$0xff] }
0x13fb   : > { %7192 = vmatpush.msrb.mxu0 %v8127_v9  ;;  %v8120_v9 = vld [vmem:[%s11725_s4 + $0x108] sm:$0xff] }
0x13fd   : > { %7193 = vmatpush.msrb.mxu0 %v8126_v60  ;;  %v8145_v60 = vld [vmem:[%s11725_s4 + $0x1a8] sm:$0xff] }
0x1402   : > { %8065 = vmatmul.msk.f32.gmra.mxu0 %vm1373_vm6, %v6656_v52  ;;  %v8084_v52 = vld [vmem:[%s11725_s4 + $0x20] sm:$0xff] }
0x140a   : > { %8066 = vmatmul.msk.f32.gmra.mxu0 %vm1373_vm6, %v6657_v30  ;;  %v8100_v30 = vld [vmem:[%s11725_s4 + $0x88] sm:$0xff] }
0x1412   : > { %8067 = vmatmul.msk.f32.gmra.mxu0 %vm1373_vm6, %v6658_v25  ;;  %v8125_v25 = vld [vmem:[%s11725_s4 + $0x128] sm:$0xff] }
0x1413   : > { %7194 = vmatpush.msrb.mxu0 %v8125_v25 }
0x141a   : > { %8068 = vmatmul.msk.f32.gmra.mxu0 %vm1373_vm6, %v6659_v62  ;;  %v8099_v62 = vld [vmem:[%s11725_s4 + $0x80] sm:$0xff] }
0x1422   : > { %8069 = vmatmul.msk.f32.gmra.mxu0 %vm1373_vm6, %v6660_v27  ;;  %v8124_v27 = vld [vmem:[%s11725_s4 + $0x120] sm:$0xff] }
0x1423   : > { %7195 = vmatpush.msrb.mxu0 %v8124_v27  ;;  %v8136_v27 = vld [vmem:[%s11725_s4 + $0x170] sm:$0xff] }
0x142a   : > { %8070 = vmatmul.msk.f32.gmra.mxu0 %vm1373_vm6, %v6661_v13 }
0x1432   : > { %8071 = vmatmul.msk.f32.gmra.mxu0 %vm1373_vm6, %v6662_v54 }
0x143a   : > { %8072 = vmatmul.msk.f32.gmra.mxu0 %vm1373_vm6, %v6663_v44 }
0x146f   : > { %v6714_v15 = vpop.f32.mrf.mxu0 }
0x1470   : > { %8073 = vmatmul.msk.f32.vlgmr.msrb.gmra.mxu1 %vm1107_vm3, %v6714_v15  ;;  %v8321_v15 = vld [vmem:[%s11724_s3 + $0x2] ss:$0 sm:$0xff] }
0x1471   : > { %6870 = vmatpush.msrb.mxu1 %v8317_v19 }
0x1473   : > { %6871 = vmatpush.msrb.mxu1 %v8318_v38 }
0x1475   : > { %6872 = vmatpush.msrb.mxu1 %v8319_v39 }
0x1477   : > { %v6717_v50 = vpop.f32.mrf.mxu0  ;;  %6873 = vmatpush.msrb.mxu1 %v8320_v24 }
0x1478   : > { %8074 = vmatmul.msk.f32.gmra.mxu1 %vm1107_vm3, %v6717_v50  ;;  %v6777_v37 = vrot.slane %v6717_v50, 7 }
0x147f   : > { %v6720_v18 = vpop.f32.mrf.mxu0 }
0x1480   : > { %v6778_v22 = vrot.slane %v6720_v18, 7 }
0x1482   : > { %v6779_v56 = vsel %vm1489_vm7, %v6777_v37, %v6778_v22 }
0x1483   : > { %8075 = vmatmul.msk.f32.vlgmr.msra.gmra.mxu1 %vm1107_vm3, %v6779_v56 }
0x1484   : > { %6940 = vmatpush.msra.mxu1 %v6924_v47  ;;  %v8106_v47 = vld [vmem:[%s11725_s4 + $0xb0] sm:$0xff] }
0x1486   : > { %6941 = vmatpush.msra.mxu1 %v6923_v23  ;;  %v8131_v23 = vld [vmem:[%s11725_s4 + $0x150] sm:$0xff] }
0x1487   : > { %v6723_v48 = vpop.f32.mrf.mxu0 }
0x1488   : > { %v6780_v49 = vrot.slane %v6723_v48, 7  ;;  %v6813_v61 = vrot.slane %v6723_v48, 6  ;;  %6942 = vmatpush.msra.mxu1 %v6922_v11  ;;  %v8130_v11 = vld [vmem:[%s11725_s4 + $0x148] sm:$0xff] }
0x148a   : > { %v6781_v12 = vsel %vm1489_vm7, %v6778_v22, %v6780_v49  ;;  %6943 = vmatpush.msra.mxu1 %v6921_v46  ;;  %v8097_v49 = vld [vmem:[%s11725_s4 + $0x78] sm:$0xff] }
0x148b   : > { %8076 = vmatmul.msk.f32.gmra.mxu1 %vm1107_vm3, %v6781_v12  ;;  %v8122_v46 = vld [vmem:[%s11725_s4 + $0x118] sm:$0xff] }
0x148f   : > { %v6726_v6 = vpop.f32.mrf.mxu0 }
0x1490   : > { %v6814_v42 = vrot.slane %v6726_v6, 6 }
0x1492   : > { %v6815_v16 = vsel %vm1157_vm4, %v6813_v61, %v6814_v42 }
0x1493   : > { %8077 = vmatmul.msk.f32.vlgmr.msra.gmra.mxu2 %vm1107_vm3, %v6815_v16  ;;  %v8096_v16 = vld [vmem:[%s11725_s4 + $0x70] sm:$0xff] }
0x1494   : > { %6996 = vmatpush.msra.mxu2 %v8092_v51  ;;  %v8104_v51 = vld [vmem:[%s11725_s4 + $0xa0] sm:$0xff] }
0x1496   : > { %6997 = vmatpush.msra.mxu2 %v8091_v36 }
0x1497   : > { %v6729_v59 = vpop.f32.mrf.mxu0 }
0x1498   : > { %v6816_v14 = vrot.slane %v6729_v59, 6  ;;  %v6849_v21 = vrot.slane %v6729_v59, 5  ;;  %6998 = vmatpush.msra.mxu2 %v8090_v8  ;;  %v8117_v59 = vld [vmem:[%s11725_s4 + $0xf8] sm:$0xff]  ;;  %v8323_v8 = vld [vmem:[%s11726_s5 + $0x10] sm:$0xff] }
0x149a   : > { %v6817_v57 = vsel %vm1157_vm4, %v6814_v42, %v6816_v14  ;;  %6999 = vmatpush.msra.mxu2 %v8089_v33  ;;  %v8142_v14 = vld [vmem:[%s11725_s4 + $0x198] sm:$0xff]  ;;  %v8129_v33 = vld [vmem:[%s11725_s4 + $0x140] sm:$0xff] }
0x149b   : > { %8078 = vmatmul.msk.f32.gmra.mxu2 %vm1107_vm3, %v6817_v57 }
0x149f   : > { %v6732_v7 = vpop.f32.mrf.mxu0 }
0x14a0   : > { %v6850_v32 = vrot.slane %v6732_v7, 5  ;;  %v8095_v7 = vld [vmem:[%s11725_s4 + $0x68] sm:$0xff] }
0x14a2   : > { %v6851_v29 = vsel %vm1562_vm8, %v6849_v21, %v6850_v32  ;;  %v8116_v21 = vld [vmem:[%s11725_s4 + $0xf0] sm:$0xff] }
0x14a3   : > { %8079 = vmatmul.msk.f32.vlgmr.msrb.gmra.mxu1 %vm1107_vm3, %v6851_v29  ;;  %v8141_v29 = vld [vmem:[%s11725_s4 + $0x190] sm:$0xff] }
0x14a4   : > { %6968 = vmatpush.msrb.mxu1 %v8087_v28 }
0x14a6   : > { %6969 = vmatpush.msrb.mxu1 %v8086_v1  ;;  %v8147_v1 = vld [vmem:[%s11725_s4 + $0x1b8] sm:$0xff] }
0x14a7   : > { %v6735_v0 = vpop.f32.mrf.mxu0 }
0x14a8   : > { %v6852_v43 = vrot.slane %v6735_v0, 5  ;;  %v6885_v53 = vrot.slane %v6735_v0, 4  ;;  %6970 = vmatpush.msrb.mxu1 %v8085_v2  ;;  %v8119_v2 = vld [vmem:[%s11725_s4 + $0x100] sm:$0xff] }
0x14aa   : > { %v6853_v31 = vsel %vm1562_vm8, %v6850_v32, %v6852_v43  ;;  %6971 = vmatpush.msrb.mxu1 %v8084_v52  ;;  %v8094_v43 = vld [vmem:[%s11725_s4 + $0x60] sm:$0xff] }
0x14ab   : > { %8080 = vmatmul.msk.f32.gmra.mxu1 %vm1107_vm3, %v6853_v31  ;;  %v8115_v31 = vld [vmem:[%s11725_s4 + $0xe8] sm:$0xff] }
0x14af   : > { %v6738_v34 = vpop.f32.mrf.mxu0 }
0x14b0   : > { %v6886_v20 = vrot.slane %v6738_v34, 4  ;;  %v8140_v34 = vld [vmem:[%s11725_s4 + $0x188] sm:$0xff] }
0x14b2   : > { %v6887_v17 = vsel %vm714_vm1, %v6885_v53, %v6886_v20 }
0x14b3   : > { %8081 = vmatmul.msk.f32.vlgmr.msrb.gmra.mxu2 %vm1107_vm3, %v6887_v17  ;;  %v8107_v17 = vld [vmem:[%s11725_s4 + $0xb8] sm:$0xff] }
0x14b4   : > { %7052 = vmatpush.msrb.mxu2 %v8102_v10  ;;  %v8324_v10 = vld [vmem:[%s11726_s5 + $0x8] sm:$0xff] }
0x14b6   : > { %7053 = vmatpush.msrb.mxu2 %v8101_v58  ;;  %v8325_v58 = vld [vmem:[%s11726_s5] sm:$0xff] }
0x14b7   : > { %v6741_v3 = vpop.f32.mrf.mxu0 }
0x14b8   : > { %v6888_v26 = vrot.slane %v6741_v3, 4  ;;  %7054 = vmatpush.msrb.mxu2 %v8100_v30  ;;  %v8114_v3 = vld [vmem:[%s11725_s4 + $0xe0] sm:$0xff]  ;;  %v8137_v30 = vld [vmem:[%s11725_s4 + $0x178] sm:$0xff] }
0x14ba   : > { %v6889_v63 = vsel %vm714_vm1, %v6886_v20, %v6888_v26  ;;  %7055 = vmatpush.msrb.mxu2 %v8099_v62  ;;  %v8144_v62 = vld [vmem:[%s11725_s4 + $0x1a0] sm:$0xff] }
0x14bb   : > { %8082 = vmatmul.msk.f32.gmra.mxu2 %vm1107_vm3, %v6889_v63 }
0x14ed   : > { %v6767_v40 = vpop.f32.mrf.mxu1 }
0x14ee   : > { %v6773_v19 = vadd.f32 %v8321_v15, %v6767_v40  ;;  %v8105_v40 = vld [vmem:[%s11725_s4 + $0xa8] sm:$0xff] }
0x14f5   : > { %v6770_v55 = vpop.f32.mrf.mxu1 }
0x14f6   : > { %v6774_v37 = vadd.f32 %v8321_v15, %v6770_v55  ;;  %v8322_v55 = vld [vmem:[%s11726_s5 + $0x18] sm:$0xff] }
0x1500   : > { %v6803_v5 = vpop.f32.mrf.mxu1 }
0x1501   : > { %v6809_v39 = vadd.f32 %v6803_v5, %v6773_v19  ;;  %v8146_v5 = vld [vmem:[%s11725_s4 + $0x1b0] sm:$0xff] }
0x1502   : > { %v8151_v19 = vld [vmem:[%s11725_s4 + $0x1d0] sm:$0xff] }
0x1508   : > { %v6806_v54 = vpop.f32.mrf.mxu1 }
0x1509   : > { %v6810_v56 = vadd.f32 %v6806_v54, %v6774_v37  ;;  %v8134_v54 = vld [vmem:[%s11725_s4 + $0x160] sm:$0xff] }
0x1516   : > { %v6839_v13 = vpop.f32.mrf.mxu2 }
0x1517   : > { %v6845_v50 = vadd.f32 %v6839_v13, %v6809_v39  ;;  %v8135_v13 = vld [vmem:[%s11725_s4 + $0x168] sm:$0xff]  ;;  %v8149_v39 = vld [vmem:[%s11725_s4 + $0x1c0] sm:$0xff] }
0x151e   : > { %v6842_v44 = vpop.f32.mrf.mxu2 }
0x151f   : > { %v6846_v6 = vadd.f32 %v6842_v44, %v6810_v56  ;;  %v8152_v44 = vld [vmem:[%s11725_s4 + $0x1d8] sm:$0xff]  ;;  %v8326_v56 = vld [vmem:[%s11724_s3 + $0x3] sm:$0x1] }
0x1520   : > { %v6875_v38 = vpop.f32.mrf.mxu1 }
0x1521   : > { %v6881_v24 = vadd.f32 %v6875_v38, %v6845_v50  ;;  %v8150_v38 = vld [vmem:[%s11725_s4 + $0x1c8] sm:$0xff] }
0x1528   : > { %v6878_v12 = vpop.f32.mrf.mxu1 }
0x1529   : > { %v6882_v57 = vadd.f32 %v6878_v12, %v6846_v6 }
0x1536   : > { %v6911_v18 = vpop.f32.mrf.mxu2 }
0x1537   : > { %v6917_v22 = vadd.f32 %v6911_v18, %v6881_v24 }
0x1539   : > { %v11555_v48 = vmax.f32 %v6917_v22, 0.0 }
0x153b   : > { %8083 = vmatmul.msk.f32.vlgmr.msra.gmra.mxu1 %vm1107_vm3, %v11555_v48  ;;  %v6981_v61 = vrot.slane %v11555_v48, 2  ;;  %v7093_v42 = vrot.slane %v11555_v48, 6  ;;  %v6953_v20 = vrot.slane %v11555_v48, 1  ;;  %v7037_v26 = vrot.slane %v11555_v48, 4 }
0x153c   : > { %7024 = vmatpush.msra.mxu1 %v8097_v49  ;;  %v7009_v36 = vrot.slane %v11555_v48, 3  ;;  %v7121_v35 = vrot.slane %v11555_v48, 7  ;;  %v7065_v52 = vrot.slane %v11555_v48, 5 }
0x153d   : > { %8093 = vmatmul.msk.f32.vlgmr.msra.gmra.mxu2 %vm1107_vm3, %v6981_v61  ;;  %8113 = vmatmul.msk.f32.vlgmr.msra.gmra.mxu0 %vm1107_vm3, %v7093_v42 }
0x153e   : > { %v6914_v32 = vpop.f32.mrf.mxu2  ;;  %7025 = vmatpush.msra.mxu1 %v8096_v16  ;;  %7136 = vmatpush.msra.mxu2 %v8117_v59 }
0x153f   : > { %v6918_v0 = vadd.f32 %v6914_v32, %v6882_v57  ;;  %7276 = vmatpush.msra.mxu0 %v8142_v14 }
0x1540   : > { %7026 = vmatpush.msra.mxu1 %v8095_v7  ;;  %7137 = vmatpush.msra.mxu2 %v8116_v21 }
0x1541   : > { %v11593_v53 = vmax.f32 %v6918_v0, 0.0  ;;  %7277 = vmatpush.msra.mxu0 %v8141_v29 }
0x1542   : > { %7027 = vmatpush.msra.mxu1 %v8094_v43  ;;  %7138 = vmatpush.msra.mxu2 %v8115_v31 }
0x1543   : > { %8088 = vmatmul.msk.f32.vlgmr.msrb.gmra.mxu1 %vm1107_vm3, %v6953_v20  ;;  %v7177_v63 = vrot.slane %v11593_v53, 1  ;;  %7278 = vmatpush.msra.mxu0 %v8140_v34  ;;  %v7261_v28 = vrot.slane %v11593_v53, 4  ;;  %v7205_v25 = vrot.slane %v11593_v53, 2  ;;  %v7289_v15 = vrot.slane %v11593_v53, 5 }
0x1544   : > { %7080 = vmatpush.msrb.mxu1 %v8107_v17  ;;  %7139 = vmatpush.msra.mxu2 %v8114_v3  ;;  %v7233_v50 = vrot.slane %v11593_v53, 3  ;;  %v7317_v24 = vrot.slane %v11593_v53, 6 }
0x1545   : > { %8103 = vmatmul.msk.f32.vlgmr.msrb.gmra.mxu2 %vm1107_vm3, %v7037_v26  ;;  %8128 = vmatmul.msk.f32.vlgmr.msrb.gmra.mxu0 %vm1107_vm3, %v7177_v63 }
0x1546   : > { %7279 = vmatpush.msra.mxu0 %v8139_v45  ;;  %7081 = vmatpush.msrb.mxu1 %v8106_v47 }
0x1547   : > { %7220 = vmatpush.msrb.mxu2 %v8132_v4 }
0x1548   : > { %7357 = vmatpush.msrb.mxu0 %v8322_v55  ;;  %7082 = vmatpush.msrb.mxu1 %v8105_v40 }
0x1549   : > { %7221 = vmatpush.msrb.mxu2 %v8131_v23 }
0x154a   : > { %7358 = vmatpush.msrb.mxu0 %v8323_v8  ;;  %7083 = vmatpush.msrb.mxu1 %v8104_v51  ;;  %v8327_v51 = vld [vmem:[%s11724_s3 + $0x4] sm:$0x1] }
0x154b   : > { %8098 = vmatmul.msk.f32.vlgmr.msra.gmra.mxu1 %vm1107_vm3, %v7009_v36  ;;  %7222 = vmatpush.msrb.mxu2 %v8130_v11 }
0x154c   : > { %7164 = vmatpush.msra.mxu1 %v8122_v46  ;;  %7359 = vmatpush.msrb.mxu0 %v8324_v10 }
0x154d   : > { %8118 = vmatmul.msk.f32.vlgmr.msra.gmra.mxu2 %vm1107_vm3, %v7121_v35  ;;  %8143 = vmatmul.msk.f32.vlgmr.msra.gmra.mxu0 %vm1107_vm3, %v7261_v28 }
0x154e   : > { %7223 = vmatpush.msrb.mxu2 %v8129_v33  ;;  %7165 = vmatpush.msra.mxu1 %v8121_v41 }
0x154f   : > { %7360 = vmatpush.msrb.mxu0 %v8325_v58 }
0x1550   : > { %7304 = vmatpush.msra.mxu2 %v8147_v1  ;;  %7166 = vmatpush.msra.mxu1 %v8120_v9 }
0x1552   : > { %7305 = vmatpush.msra.mxu2 %v8146_v5  ;;  %7167 = vmatpush.msra.mxu1 %v8119_v2 }
0x1553   : > { %8108 = vmatmul.msk.f32.vlgmr.msrb.gmra.mxu1 %vm1107_vm3, %v7065_v52 }
0x1554   : > { %7306 = vmatpush.msra.mxu2 %v8145_v60  ;;  %7248 = vmatpush.msrb.mxu1 %v8137_v30 }
0x1555   : > { %8133 = vmatmul.msk.f32.vlgmr.msrb.gmra.mxu2 %vm1107_vm3, %v7205_v25 }
0x1556   : > { %7307 = vmatpush.msra.mxu2 %v8144_v62  ;;  %7249 = vmatpush.msrb.mxu1 %v8136_v27 }
0x1558   : > { %7250 = vmatpush.msrb.mxu1 %v8135_v13 }
0x155a   : > { %7251 = vmatpush.msrb.mxu1 %v8134_v54 }
0x155b   : > { %8123 = vmatmul.msk.f32.vlgmr.msra.gmra.mxu1 %vm1107_vm3, %v11593_v53 }
0x155c   : > { %7332 = vmatpush.msra.mxu1 %v8152_v44 }
0x155d   : > { %8148 = vmatmul.msk.f32.vlgmr.msra.gmra.mxu2 %vm1107_vm3, %v7289_v15 }
0x155e   : > { %7333 = vmatpush.msra.mxu1 %v8151_v19 }
0x1560   : > { %7334 = vmatpush.msra.mxu1 %v8150_v38 }
0x1562   : > { %7335 = vmatpush.msra.mxu1 %v8149_v39 }
0x1563   : > { %8138 = vmatmul.msk.f32.vlgmr.msrb.gmra.mxu1 %vm1107_vm3, %v7233_v50 }
0x156b   : > { %8153 = vmatmul.msk.f32.vlgmr.msra.gmra.mxu1 %vm1107_vm3, %v7317_v24 }
0x15b8   : > { %v6945_v18 = vpop.f32.mrf.mxu1 }
0x15b9   : > { %v6948_v48 = vadd.f32 %v8326_v56, %v6945_v18 }
0x15ba   : > { %v7113_v16 = vpop.f32.mrf.mxu0 }
0x15c0   : > { %v6973_v37 = vpop.f32.mrf.mxu1  ;;  %v7001_v22 = vpop.f32.mrf.mxu2 }
0x15c1   : > { %v6976_v49 = vadd.f32 %v6973_v37, %v6948_v48 }
0x15c2   : > { %v7197_v29 = vpop.f32.mrf.mxu0 }
0x15c3   : > { %v7004_v61 = vadd.f32 %v7001_v22, %v6976_v49 }
0x15c8   : > { %v7029_v12 = vpop.f32.mrf.mxu1  ;;  %v7057_v6 = vpop.f32.mrf.mxu2 }
0x15c9   : > { %v7032_v42 = vadd.f32 %v7029_v12, %v7004_v61 }
0x15ca   : > { %v7281_v3 = vpop.f32.mrf.mxu0 }
0x15cb   : > { %v7060_v59 = vadd.f32 %v7057_v6, %v7032_v42 }
0x15d0   : > { %v7085_v14 = vpop.f32.mrf.mxu1  ;;  %v7141_v7 = vpop.f32.mrf.mxu2 }
0x15d1   : > { %v7088_v57 = vadd.f32 %v7085_v14, %v7060_v59 }
0x15d3   : > { %v7116_v21 = vadd.f32 %v7113_v16, %v7088_v57 }
0x15d5   : > { %v7144_v32 = vadd.f32 %v7141_v7, %v7116_v21 }
0x15d8   : > { %v7169_v0 = vpop.f32.mrf.mxu1  ;;  %v7225_v34 = vpop.f32.mrf.mxu2 }
0x15d9   : > { %v7172_v43 = vadd.f32 %v7169_v0, %v7144_v32 }
0x15db   : > { %v7200_v31 = vadd.f32 %v7197_v29, %v7172_v43 }
0x15dd   : > { %v7228_v53 = vadd.f32 %v7225_v34, %v7200_v31 }
0x15e0   : > { %v7253_v20 = vpop.f32.mrf.mxu1  ;;  %v7309_v63 = vpop.f32.mrf.mxu2 }
0x15e1   : > { %v7256_v17 = vadd.f32 %v7253_v20, %v7228_v53 }
0x15e3   : > { %v7284_v26 = vadd.f32 %v7281_v3, %v7256_v17 }
0x15e5   : > { %v7312_v45 = vadd.f32 %v7309_v63, %v7284_v26 }
0x15e8   : > { %v7337_v47 = vpop.f32.mrf.mxu1 }
0x15e9   : > { %v7340_v4 = vadd.f32 %v7337_v47, %v7312_v45 }
0x15eb   : > { %v7341_v40 = vmax.f32 %v7340_v4, 0.0 }
0x15ed   : > { %8154 = vmatmul.msk.f32.vlgmr.msrb.gmra.mxu0 %vm1107_vm3, %v7341_v40 }
0x166a   : > { %v7362_v23 = vpop.f32.mrf.mxu0 }
0x166b   : > { %v7363_v55 = vadd.f32 %v8327_v51, %v7362_v23 }
0x166d   : > { %7365 = vst.msk [vmem:[%s9399_s29 + $0x3] sm:$0x1] %vm2093_vm9, %v7363_v55 }
0x166e PF: > { %s16_s21 = sadd.s32 1, %s8334_s21  }
0x166f   : > { %p13_p4 = scmp.ge.s32.totalorder %s16_s21, 4  }
0x1671   :  { %15 = sbr.rel (!%p13_p4) target bundleno = 1 (0x1), region = 91 }

</bundles_post_ra>
